<compile_context>
chip_gen: v5e
topology: v5e:2x2
jax: 0.10.0
libtpu: 0.0.40
codegen_flags: <defaults>
</compile_context>

<pallas_src>
import functools

import jax
import jax.numpy as jnp
import numpy as np
from jax import lax
from jax.experimental import pallas as pl
from jax.experimental.pallas import tpu as pltpu

EPS = 1e-5


# ---------------------------------------------------------------------------
# In-kernel 3x3 "same" convolution of one (NB, H, W, Cin) tile -> f32 value.
# ---------------------------------------------------------------------------
def _conv3x3(xc, w_ref, xm_ref, xp_ref):
    """Returns conv3x3(xc) as an f32 (NB, H, W, Cout) value (zero pad, stride 1).

    xc      : (NB, H, W, Cin)   f32 ref or value (tile to convolve)
    w_ref   : (3, 3, Cin, Cout) VMEM ref, weights[kh, kw]
    xm_ref  : (NB, H, W, Cin)   f32 VMEM scratch, receives x[w-1] (zero at w=0)
    xp_ref  : (NB, H, W, Cin)   f32 VMEM scratch, receives x[w+1] (zero at w=W-1)
    """
    NB, H, W, Cin = xc.shape
    Cout = w_ref.shape[3]

    # +/-1 column (W) taps, built once per conv via masked sub-sliced stores.
    zcol = jnp.zeros((NB, H, 1, Cin), jnp.float32)
    xm_ref[:, :, 1:, :] = xc[:, :, : W - 1, :]
    xm_ref[:, :, 0:1, :] = zcol
    xp_ref[:, :, : W - 1, :] = xc[:, :, 1:, :]
    xp_ref[:, :, W - 1:W, :] = zcol

    def kh_rows(kh, h0, h1):
        # Sum of the three kw taps for one kh, over input rows [h0, h1).
        rows = NB * (h1 - h0) * W
        lhs_m = xm_ref[:, h0:h1, :, :].reshape(rows, Cin)
        lhs_c = xc[:, h0:h1, :, :].reshape(rows, Cin)
        lhs_p = xp_ref[:, h0:h1, :, :].reshape(rows, Cin)
        acc = jnp.dot(lhs_m, w_ref[kh, 0], preferred_element_type=jnp.float32)
        acc += jnp.dot(lhs_c, w_ref[kh, 1], preferred_element_type=jnp.float32)
        acc += jnp.dot(lhs_p, w_ref[kh, 2], preferred_element_type=jnp.float32)
        return acc.reshape(NB, h1 - h0, W, Cout)

    # kh=1 covers every output row; the kh=0 / kh=2 contributions are padded
    # with a zero H-row block along the (untiled, major) H axis and added as
    # values, so the output ref is written exactly once (no RMW stores).
    zrow = jnp.zeros((NB, 1, W, Cout), jnp.float32)
    y = kh_rows(1, 0, H)
    y = y + jnp.concatenate([zrow, kh_rows(0, 0, H - 1)], axis=1)
    y = y + jnp.concatenate([kh_rows(2, 1, H), zrow], axis=1)
    return y


def _store_stats(y, st_ref):
    """Per-tile partial BN stats from the in-register f32 accumulator value."""
    nb, h, w, c = y.shape
    y2d = y.reshape(nb * h * w, c)
    st_ref[:, 0:1, :] = jnp.sum(y2d, axis=0, keepdims=True).reshape(1, 1, c)
    st_ref[:, 1:2, :] = jnp.sum(y2d * y2d, axis=0, keepdims=True).reshape(1, 1, c)


# ---------------------------------------------------------------------------
# Pass kernels
# ---------------------------------------------------------------------------
def _conv1_kernel(x_ref, w_ref, y_ref, st_ref, xm_ref, xp_ref):
    y = _conv3x3(x_ref, w_ref, xm_ref, xp_ref)
    _store_stats(y, st_ref)                 # stats from the pre-cast f32 value
    y_ref[...] = y.astype(y_ref.dtype)      # slab stored in the interm dtype


def _conv2_kernel(y1_ref, w_ref, sc_ref, sh_ref, y_ref, st_ref, xm_ref, xp_ref):
    # Fused bn1 (folded scale/shift) + ReLU, then conv2.
    a = jnp.maximum(
        y1_ref[...].astype(jnp.float32) * sc_ref[...] + sh_ref[...], 0.0)
    y = _conv3x3(a, w_ref, xm_ref, xp_ref)
    _store_stats(y, st_ref)
    y_ref[...] = y.astype(y_ref.dtype)


def _finalize_kernel(y2_ref, x_ref, sc_ref, sh_ref, o_ref):
    # bn2 (folded) + identity shortcut + ReLU on a lane-dense 3-D view.
    o_ref[...] = jnp.maximum(
        y2_ref[...].astype(jnp.float32) * sc_ref[...] + sh_ref[...] + x_ref[...],
        0.0)


# ---------------------------------------------------------------------------
# Wrapper helpers
# ---------------------------------------------------------------------------
def _pack_weight(w):
    # PyTorch (Cout, Cin, 3, 3) -> (kh, kw, Cin, Cout)
    return jnp.transpose(w, (2, 3, 1, 0)).astype(jnp.float32)


def _fold_bn(stats, gamma, beta, count):
    # stats: (n_blocks, 2, C) partial (sum, sumsq) -> per-channel scale / shift.
    s = jnp.sum(stats[:, 0, :], axis=0)
    ss = jnp.sum(stats[:, 1, :], axis=0)
    mean = s / count
    var = ss / count - mean * mean          # biased variance (training-mode BN)
    scale = gamma.astype(jnp.float32) * lax.rsqrt(var + EPS)
    shift = beta.astype(jnp.float32) - scale * mean
    return scale, shift


def _vmem_limit_bytes():
    """Scoped-VMEM limit from the actual chip (v7x: 48 MiB, v5e/v6e: 96 MiB)."""
    cap = 64 * 1024 * 1024                  # conservative fallback (v7x size)
    try:
        cap = int(pltpu.get_tpu_info().vmem_capacity_bytes)
    except Exception:
        pass
    return int(min(cap * 3 // 4, 96 * 1024 * 1024))


def _pick_block_n(n, h, w, c, interm_itemsize, block_n, vmem_limit):
    """Batch-tile size: biggest block whose real footprint fits ~half the limit.

    Per-sample footprint (worst pass = pass 2): double-buffered streamed in/out
    tiles in the intermediate dtype, two f32 shift scratches, and a few live
    f32 full-tile values (activations, per-kh partials, accumulator).
    """
    per_sample = h * w * max(c, 1) * (4 * interm_itemsize + 8 * 4)
    nb = max(1, (vmem_limit // 2) // max(per_sample, 1))
    nb = min(nb, max(1, n // 2))            # keep >=2 grid blocks (megacore/v7x)
    if block_n is not None:
        nb = min(nb, block_n)
    nb = max(1, min(nb, n))
    while n % nb:
        nb -= 1
    return nb


# ---------------------------------------------------------------------------
# Forward pass
# ---------------------------------------------------------------------------
@functools.partial(jax.jit, static_argnames=("block_n", "interm_dtype"))
def residual_forward(x_nchw, params, block_n=None, interm_dtype=jnp.bfloat16):
    """Residual(use_1x1conv=False, strides=1) forward, training-mode BN.

    x_nchw : (N, C, H, W) float32
    params : (w1, b1, g1, be1, w2, b2, g2, be2) in PyTorch layouts:
             conv weight (Cout, Cin, 3, 3), conv bias / BN gamma / BN beta (Cout,)
    """
    w1, b1, g1, be1, w2, b2, g2, be2 = params
    del b1, b2  # per-channel constants are exactly cancelled by train-mode BN
    # TODO(synk): restore conv biases for an eval-mode (running-stats) variant.

    N, Cin, H, W = x_nchw.shape
    Cout = w1.shape[0]
    assert Cout == Cin, "identity shortcut requires matching channel counts"
    # TODO(synk): optional use_1x1conv / strided projection shortcut is not
    # instantiated (default module config is the identity shortcut).

    x = jnp.transpose(x_nchw, (0, 2, 3, 1)).astype(jnp.float32)        # NHWC
    w1k = _pack_weight(w1)
    w2k = _pack_weight(w2)

    isz = np.dtype(interm_dtype).itemsize
    vmem_limit = _vmem_limit_bytes()
    nb = _pick_block_n(N, H, W, max(Cin, Cout), isz, block_n, vmem_limit)
    n_blocks = N // nb
    grid = (n_blocks,)
    count = N * H * W

    cparams = pltpu.CompilerParams(
        dimension_semantics=("parallel",),
        vmem_limit_bytes=vmem_limit,
    )

    def tile_spec(c):
        return pl.BlockSpec((nb, H, W, c), lambda i: (i, 0, 0, 0))

    def full_spec(shape):
        nd = len(shape)
        return pl.BlockSpec(shape, lambda i, _nd=nd: (0,) * _nd)

    st_spec = pl.BlockSpec((1, 2, Cout), lambda i: (i, 0, 0))
    st_shape = jax.ShapeDtypeStruct((n_blocks, 2, Cout), jnp.float32)
    slab_elems = N * H * W * Cout

    def conv_flops(ci, co):
        return 2 * N * H * W * 9 * ci * co

    # ---- pass 1: conv1 -> y1 slab (interm dtype) + per-tile (sum, sumsq) ----
    y1, st1 = pl.pallas_call(
        _conv1_kernel,
        grid=grid,
        in_specs=[tile_spec(Cin), full_spec((3, 3, Cin, Cout))],
        out_specs=(tile_spec(Cout), st_spec),
        out_shape=(jax.ShapeDtypeStruct((N, H, W, Cout), interm_dtype), st_shape),
        scratch_shapes=[pltpu.VMEM((nb, H, W, Cin), jnp.float32),
                        pltpu.VMEM((nb, H, W, Cin), jnp.float32)],
        compiler_params=cparams,
        cost_estimate=pl.CostEstimate(
            flops=conv_flops(Cin, Cout), transcendentals=0,
            bytes_accessed=N * H * W * Cin * 4 + slab_elems * isz),
    )(x, w1k)

    sc1, sh1 = _fold_bn(st1, g1, be1, count)

    # ---- pass 2: fused bn1-apply + relu, conv2 -> y2 slab + stats -----------
    y2, st2 = pl.pallas_call(
        _conv2_kernel,
        grid=grid,
        in_specs=[tile_spec(Cout), full_spec((3, 3, Cout, Cout)),
                  full_spec((1, 1, 1, Cout)), full_spec((1, 1, 1, Cout))],
        out_specs=(tile_spec(Cout), st_spec),
        out_shape=(jax.ShapeDtypeStruct((N, H, W, Cout), interm_dtype), st_shape),
        scratch_shapes=[pltpu.VMEM((nb, H, W, Cout), jnp.float32),
                        pltpu.VMEM((nb, H, W, Cout), jnp.float32)],
        compiler_params=cparams,
        cost_estimate=pl.CostEstimate(
            flops=conv_flops(Cout, Cout) + 4 * slab_elems, transcendentals=0,
            bytes_accessed=2 * slab_elems * isz),
    )(y1, w2k, sc1.reshape(1, 1, 1, Cout), sh1.reshape(1, 1, 1, Cout))

    sc2, sh2 = _fold_bn(st2, g2, be2, count)

    # ---- pass 3: bn2-apply + identity shortcut + relu (lane-dense view) -----
    L = H * W * Cout
    if L % 128 == 0 and 128 % Cout == 0:
        lane = 128                 # fully lane-dense, vreg-aligned stores
    else:
        lane = W * Cout            # fallback: still much denser than C alone
    rows3 = L // lane
    rep = lane // Cout

    y2v = y2.reshape(N, rows3, lane)
    xv = x.reshape(N, rows3, lane)
    sc2v = jnp.tile(sc2, rep).reshape(1, 1, lane)
    sh2v = jnp.tile(sh2, rep).reshape(1, 1, lane)

    tile3 = pl.BlockSpec((nb, rows3, lane), lambda i: (i, 0, 0))
    out3 = pl.pallas_call(
        _finalize_kernel,
        grid=grid,
        in_specs=[tile3, tile3, full_spec((1, 1, lane)), full_spec((1, 1, lane))],
        out_specs=tile3,
        out_shape=jax.ShapeDtypeStruct((N, rows3, lane), jnp.float32),
        compiler_params=cparams,
        cost_estimate=pl.CostEstimate(
            flops=3 * slab_elems, transcendentals=0,
            bytes_accessed=slab_elems * (isz + 8)),
    )(y2v, xv, sc2v, sh2v)
    # TODO(synk): when the whole problem fits in VMEM, fuse the 3 passes into
    # one kernel keeping y1/y2 in scratch, or alias pass-3's output onto y2
    # via input_output_aliases (needs matching dtypes).

    return jnp.transpose(out3.reshape(N, H, W, Cout), (0, 3, 1, 2))   # NCHW


# ---------------------------------------------------------------------------
# Pure-JAX reference (faithful to the PyTorch module: conv bias + train-mode BN)
# ---------------------------------------------------------------------------
def _conv3x3_ref(x_nhwc, w, b):
    w_hwio = jnp.transpose(w, (2, 3, 1, 0))
    y = lax.conv_general_dilated(
        x_nhwc, w_hwio, window_strides=(1, 1), padding="SAME",
        dimension_numbers=("NHWC", "HWIO", "NHWC"))
    return y + b.reshape(1, 1, 1, -1)


def _bn_train_ref(y, g, be):
    mean = jnp.mean(y, axis=(0, 1, 2), keepdims=True)
    var = jnp.mean((y - mean) ** 2, axis=(0, 1, 2), keepdims=True)
    return (g.reshape(1, 1, 1, -1) * (y - mean) * lax.rsqrt(var + EPS)
            + be.reshape(1, 1, 1, -1))


def residual_ref(x_nchw, params):
    w1, b1, g1, be1, w2, b2, g2, be2 = params
    x = jnp.transpose(x_nchw, (0, 2, 3, 1)).astype(jnp.float32)
    y = jnp.maximum(_bn_train_ref(_conv3x3_ref(x, w1, b1), g1, be1), 0.0)
    y = _bn_train_ref(_conv3x3_ref(y, w2, b2), g2, be2)
    y = jnp.maximum(y + x, 0.0)
    return jnp.transpose(y, (0, 3, 1, 2))


# ---------------------------------------------------------------------------
if __name__ == "__main__":
    key = jax.random.PRNGKey(0)
    N, C, H, W = 2, 4, 16, 16

    ks = jax.random.split(key, 9)
    x = jax.random.normal(ks[0], (N, C, H, W), jnp.float32)

    # PyTorch-layout parameters.
    w1 = 0.1 * jax.random.normal(ks[1], (C, C, 3, 3), jnp.float32)
    w2 = 0.1 * jax.random.normal(ks[2], (C, C, 3, 3), jnp.float32)
    b1 = 0.05 * jax.random.normal(ks[3], (C,), jnp.float32)
    b2 = 0.05 * jax.random.normal(ks[4], (C,), jnp.float32)
    g1 = 1.0 + 0.1 * jax.random.normal(ks[5], (C,), jnp.float32)
    be1 = 0.1 * jax.random.normal(ks[6], (C,), jnp.float32)
    g2 = 1.0 + 0.1 * jax.random.normal(ks[7], (C,), jnp.float32)
    be2 = 0.1 * jax.random.normal(ks[8], (C,), jnp.float32)
    params = (w1, b1, g1, be1, w2, b2, g2, be2)

    ref = jax.block_until_ready(residual_ref(x, params))

    # Exact-algorithm check: f32 intermediate slabs, tight tolerance.  The
    # auto-picked nb (capped at N//2) gives a grid of 2 batch tiles, which
    # exercises the pipelined grid and the cross-tile BN statistics reduction.
    out_f32 = jax.block_until_ready(
        residual_forward(x, params, interm_dtype=jnp.float32))
    assert out_f32.shape == (N, C, H, W), out_f32.shape
    err_f32 = float(jnp.max(jnp.abs(out_f32 - ref)))
    assert jnp.allclose(out_f32, ref, atol=5e-4, rtol=5e-4), err_f32

    # Default perf path: bf16 intermediate slabs (half the y1/y2 HBM traffic);
    # tolerance loosened for the bf16 rounding of the normalized activations.
    out = jax.block_until_ready(residual_forward(x, params))
    assert out.shape == (N, C, H, W), out.shape
    err_bf16 = float(jnp.max(jnp.abs(out - ref)))
    assert jnp.allclose(out, ref, atol=5e-2, rtol=5e-2), err_bf16

    print("KERNEL_OK")
</pallas_src>

<mosaic_0001>
module attributes {stable_mosaic.version = 11 : i64} {
  func.func @_conv1_kernel(%arg0: i32, %arg1: memref<1x16x16x4xf32, #tpu.memory_space<vmem>>, %arg2: memref<3x3x4x4xf32, #tpu.memory_space<vmem>>, %arg3: memref<1x16x16x4xf32, #tpu.memory_space<vmem>>, %arg4: memref<1x2x4xf32, #tpu.memory_space<vmem>>, %arg5: memref<1x16x16x4xf32, #tpu.memory_space<vmem>>, %arg6: memref<1x16x16x4xf32, #tpu.memory_space<vmem>>) attributes {dimension_semantics = [#tpu.dimension_semantics<parallel>], iteration_bounds = array<i64: 2>, scalar_prefetch = 0 : i64, scratch_operands = 2 : i64, tpu.core_type = #tpu.core_type<tc>, window_params = [{transform_indices = @transform_0, window_bounds = array<i64: 1, 16, 16, 4>}, {pipeline_mode = #tpu.pipeline_mode<synchronous>, transform_indices = @transform_1, window_bounds = array<i64: 3, 3, 4, 4>}, {transform_indices = @transform_2, window_bounds = array<i64: 1, 16, 16, 4>}, {transform_indices = @transform_3, window_bounds = array<i64: 1, 2, 4>}]} {
    %cst = arith.constant 0.000000e+00 : f32
    %0 = vector.broadcast %cst : f32 to vector<1x16x1x4xf32>
    %c0 = arith.constant 0 : index
    %c0_0 = arith.constant 0 : index
    %c0_1 = arith.constant 0 : index
    %c0_2 = arith.constant 0 : index
    %1 = vector.load %arg1[%c0, %c0_0, %c0_1, %c0_2] : memref<1x16x16x4xf32, #tpu.memory_space<vmem>>, vector<1x16x15x4xf32>
    %c0_3 = arith.constant 0 : index
    %c0_4 = arith.constant 0 : index
    %c1 = arith.constant 1 : index
    %c0_5 = arith.constant 0 : index
    %2 = vector.load %arg5[%c0_3, %c0_4, %c1, %c0_5] : memref<1x16x16x4xf32, #tpu.memory_space<vmem>>, vector<1x16x15x4xf32>
    tpu.vector_store %arg5[%c0_3, %c0_4, %c1, %c0_5], %1 {strides = array<i32>} : memref<1x16x16x4xf32, #tpu.memory_space<vmem>>, vector<1x16x15x4xf32>,
    %c0_6 = arith.constant 0 : index
    %c0_7 = arith.constant 0 : index
    %c0_8 = arith.constant 0 : index
    %c0_9 = arith.constant 0 : index
    %3 = vector.load %arg5[%c0_6, %c0_7, %c0_8, %c0_9] : memref<1x16x16x4xf32, #tpu.memory_space<vmem>>, vector<1x16x1x4xf32>
    tpu.vector_store %arg5[%c0_6, %c0_7, %c0_8, %c0_9], %0 {strides = array<i32>} : memref<1x16x16x4xf32, #tpu.memory_space<vmem>>, vector<1x16x1x4xf32>,
    %c0_10 = arith.constant 0 : index
    %c0_11 = arith.constant 0 : index
    %c1_12 = arith.constant 1 : index
    %c0_13 = arith.constant 0 : index
    %4 = vector.load %arg1[%c0_10, %c0_11, %c1_12, %c0_13] : memref<1x16x16x4xf32, #tpu.memory_space<vmem>>, vector<1x16x15x4xf32>
    %c0_14 = arith.constant 0 : index
    %c0_15 = arith.constant 0 : index
    %c0_16 = arith.constant 0 : index
    %c0_17 = arith.constant 0 : index
    %5 = vector.load %arg6[%c0_14, %c0_15, %c0_16, %c0_17] : memref<1x16x16x4xf32, #tpu.memory_space<vmem>>, vector<1x16x15x4xf32>
    tpu.vector_store %arg6[%c0_14, %c0_15, %c0_16, %c0_17], %4 {strides = array<i32>} : memref<1x16x16x4xf32, #tpu.memory_space<vmem>>, vector<1x16x15x4xf32>,
    %c0_18 = arith.constant 0 : index
    %c0_19 = arith.constant 0 : index
    %c15 = arith.constant 15 : index
    %c0_20 = arith.constant 0 : index
    %6 = vector.load %arg6[%c0_18, %c0_19, %c15, %c0_20] : memref<1x16x16x4xf32, #tpu.memory_space<vmem>>, vector<1x16x1x4xf32>
    tpu.vector_store %arg6[%c0_18, %c0_19, %c15, %c0_20], %0 {strides = array<i32>} : memref<1x16x16x4xf32, #tpu.memory_space<vmem>>, vector<1x16x1x4xf32>,
    %cst_21 = arith.constant 0.000000e+00 : f32
    %7 = vector.broadcast %cst_21 : f32 to vector<1x1x16x4xf32>
    %c0_22 = arith.constant 0 : index
    %c0_23 = arith.constant 0 : index
    %c0_24 = arith.constant 0 : index
    %c0_25 = arith.constant 0 : index
    %8 = vector.load %arg5[%c0_22, %c0_23, %c0_24, %c0_25] : memref<1x16x16x4xf32, #tpu.memory_space<vmem>>, vector<1x16x16x4xf32>
    %9 = vector.shape_cast %8 : vector<1x16x16x4xf32> to vector<256x4xf32>
    %c0_26 = arith.constant 0 : index
    %c0_27 = arith.constant 0 : index
    %c0_28 = arith.constant 0 : index
    %c0_29 = arith.constant 0 : index
    %10 = vector.load %arg1[%c0_26, %c0_27, %c0_28, %c0_29] : memref<1x16x16x4xf32, #tpu.memory_space<vmem>>, vector<1x16x16x4xf32>
    %11 = vector.shape_cast %10 : vector<1x16x16x4xf32> to vector<256x4xf32>
    %c0_30 = arith.constant 0 : index
    %c0_31 = arith.constant 0 : index
    %c0_32 = arith.constant 0 : index
    %c0_33 = arith.constant 0 : index
    %12 = vector.load %arg6[%c0_30, %c0_31, %c0_32, %c0_33] : memref<1x16x16x4xf32, #tpu.memory_space<vmem>>, vector<1x16x16x4xf32>
    %13 = vector.shape_cast %12 : vector<1x16x16x4xf32> to vector<256x4xf32>
    %c1_34 = arith.constant 1 : index
    %c0_35 = arith.constant 0 : index
    %c0_36 = arith.constant 0 : index
    %c0_37 = arith.constant 0 : index
    %14 = vector.load %arg2[%c1_34, %c0_35, %c0_36, %c0_37] : memref<3x3x4x4xf32, #tpu.memory_space<vmem>>, vector<1x1x4x4xf32>
    %15 = vector.shape_cast %14 : vector<1x1x4x4xf32> to vector<4x4xf32>
    %cst_38 = arith.constant dense<0.000000e+00> : vector<256x4xf32>
    %16 = tpu.matmul %9, %15, %cst_38 {dimension_numbers = #tpu.dot_dimension_numbers<[1], [0], [0], [1], [0, 0, 1, 1], [], []>} : vector<256x4xf32>, vector<4x4xf32>, vector<256x4xf32> -> vector<256x4xf32>
    %c1_39 = arith.constant 1 : index
    %c1_40 = arith.constant 1 : index
    %c0_41 = arith.constant 0 : index
    %c0_42 = arith.constant 0 : index
    %17 = vector.load %arg2[%c1_39, %c1_40, %c0_41, %c0_42] : memref<3x3x4x4xf32, #tpu.memory_space<vmem>>, vector<1x1x4x4xf32>
    %18 = vector.shape_cast %17 : vector<1x1x4x4xf32> to vector<4x4xf32>
    %cst_43 = arith.constant dense<0.000000e+00> : vector<256x4xf32>
    %19 = tpu.matmul %11, %18, %cst_43 {dimension_numbers = #tpu.dot_dimension_numbers<[1], [0], [0], [1], [0, 0, 1, 1], [], []>} : vector<256x4xf32>, vector<4x4xf32>, vector<256x4xf32> -> vector<256x4xf32>
    %20 = arith.addf %16, %19 : vector<256x4xf32>
    %c1_44 = arith.constant 1 : index
    %c2 = arith.constant 2 : index
    %c0_45 = arith.constant 0 : index
    %c0_46 = arith.constant 0 : index
    %21 = vector.load %arg2[%c1_44, %c2, %c0_45, %c0_46] : memref<3x3x4x4xf32, #tpu.memory_space<vmem>>, vector<1x1x4x4xf32>
    %22 = vector.shape_cast %21 : vector<1x1x4x4xf32> to vector<4x4xf32>
    %cst_47 = arith.constant dense<0.000000e+00> : vector<256x4xf32>
    %23 = tpu.matmul %13, %22, %cst_47 {dimension_numbers = #tpu.dot_dimension_numbers<[1], [0], [0], [1], [0, 0, 1, 1], [], []>} : vector<256x4xf32>, vector<4x4xf32>, vector<256x4xf32> -> vector<256x4xf32>
    %24 = arith.addf %20, %23 : vector<256x4xf32>
    %25 = vector.shape_cast %24 : vector<256x4xf32> to vector<1x16x16x4xf32>
    %c0_48 = arith.constant 0 : index
    %c0_49 = arith.constant 0 : index
    %c0_50 = arith.constant 0 : index
    %c0_51 = arith.constant 0 : index
    %26 = vector.load %arg5[%c0_48, %c0_49, %c0_50, %c0_51] : memref<1x16x16x4xf32, #tpu.memory_space<vmem>>, vector<1x15x16x4xf32>
    %27 = vector.shape_cast %26 : vector<1x15x16x4xf32> to vector<240x4xf32>
    %c0_52 = arith.constant 0 : index
    %c0_53 = arith.constant 0 : index
    %c0_54 = arith.constant 0 : index
    %c0_55 = arith.constant 0 : index
    %28 = vector.load %arg1[%c0_52, %c0_53, %c0_54, %c0_55] : memref<1x16x16x4xf32, #tpu.memory_space<vmem>>, vector<1x15x16x4xf32>
    %29 = vector.shape_cast %28 : vector<1x15x16x4xf32> to vector<240x4xf32>
    %c0_56 = arith.constant 0 : index
    %c0_57 = arith.constant 0 : index
    %c0_58 = arith.constant 0 : index
    %c0_59 = arith.constant 0 : index
    %30 = vector.load %arg6[%c0_56, %c0_57, %c0_58, %c0_59] : memref<1x16x16x4xf32, #tpu.memory_space<vmem>>, vector<1x15x16x4xf32>
    %31 = vector.shape_cast %30 : vector<1x15x16x4xf32> to vector<240x4xf32>
    %c0_60 = arith.constant 0 : index
    %c0_61 = arith.constant 0 : index
    %c0_62 = arith.constant 0 : index
    %c0_63 = arith.constant 0 : index
    %32 = vector.load %arg2[%c0_60, %c0_61, %c0_62, %c0_63] : memref<3x3x4x4xf32, #tpu.memory_space<vmem>>, vector<1x1x4x4xf32>
    %33 = vector.shape_cast %32 : vector<1x1x4x4xf32> to vector<4x4xf32>
    %cst_64 = arith.constant dense<0.000000e+00> : vector<240x4xf32>
    %34 = tpu.matmul %27, %33, %cst_64 {dimension_numbers = #tpu.dot_dimension_numbers<[1], [0], [0], [1], [0, 0, 1, 1], [], []>} : vector<240x4xf32>, vector<4x4xf32>, vector<240x4xf32> -> vector<240x4xf32>
    %c0_65 = arith.constant 0 : index
    %c1_66 = arith.constant 1 : index
    %c0_67 = arith.constant 0 : index
    %c0_68 = arith.constant 0 : index
    %35 = vector.load %arg2[%c0_65, %c1_66, %c0_67, %c0_68] : memref<3x3x4x4xf32, #tpu.memory_space<vmem>>, vector<1x1x4x4xf32>
    %36 = vector.shape_cast %35 : vector<1x1x4x4xf32> to vector<4x4xf32>
    %cst_69 = arith.constant dense<0.000000e+00> : vector<240x4xf32>
    %37 = tpu.matmul %29, %36, %cst_69 {dimension_numbers = #tpu.dot_dimension_numbers<[1], [0], [0], [1], [0, 0, 1, 1], [], []>} : vector<240x4xf32>, vector<4x4xf32>, vector<240x4xf32> -> vector<240x4xf32>
    %38 = arith.addf %34, %37 : vector<240x4xf32>
    %c0_70 = arith.constant 0 : index
    %c2_71 = arith.constant 2 : index
    %c0_72 = arith.constant 0 : index
    %c0_73 = arith.constant 0 : index
    %39 = vector.load %arg2[%c0_70, %c2_71, %c0_72, %c0_73] : memref<3x3x4x4xf32, #tpu.memory_space<vmem>>, vector<1x1x4x4xf32>
    %40 = vector.shape_cast %39 : vector<1x1x4x4xf32> to vector<4x4xf32>
    %cst_74 = arith.constant dense<0.000000e+00> : vector<240x4xf32>
    %41 = tpu.matmul %31, %40, %cst_74 {dimension_numbers = #tpu.dot_dimension_numbers<[1], [0], [0], [1], [0, 0, 1, 1], [], []>} : vector<240x4xf32>, vector<4x4xf32>, vector<240x4xf32> -> vector<240x4xf32>
    %42 = arith.addf %38, %41 : vector<240x4xf32>
    %43 = vector.shape_cast %42 : vector<240x4xf32> to vector<1x15x16x4xf32>
    %44 = tpu.concatenate %7, %43 in 1 : vector<1x1x16x4xf32>, vector<1x15x16x4xf32> -> vector<1x16x16x4xf32>
    %45 = arith.addf %25, %44 : vector<1x16x16x4xf32>
    %c0_75 = arith.constant 0 : index
    %c1_76 = arith.constant 1 : index
    %c0_77 = arith.constant 0 : index
    %c0_78 = arith.constant 0 : index
    %46 = vector.load %arg5[%c0_75, %c1_76, %c0_77, %c0_78] : memref<1x16x16x4xf32, #tpu.memory_space<vmem>>, vector<1x15x16x4xf32>
    %47 = vector.shape_cast %46 : vector<1x15x16x4xf32> to vector<240x4xf32>
    %c0_79 = arith.constant 0 : index
    %c1_80 = arith.constant 1 : index
    %c0_81 = arith.constant 0 : index
    %c0_82 = arith.constant 0 : index
    %48 = vector.load %arg1[%c0_79, %c1_80, %c0_81, %c0_82] : memref<1x16x16x4xf32, #tpu.memory_space<vmem>>, vector<1x15x16x4xf32>
    %49 = vector.shape_cast %48 : vector<1x15x16x4xf32> to vector<240x4xf32>
    %c0_83 = arith.constant 0 : index
    %c1_84 = arith.constant 1 : index
    %c0_85 = arith.constant 0 : index
    %c0_86 = arith.constant 0 : index
    %50 = vector.load %arg6[%c0_83, %c1_84, %c0_85, %c0_86] : memref<1x16x16x4xf32, #tpu.memory_space<vmem>>, vector<1x15x16x4xf32>
    %51 = vector.shape_cast %50 : vector<1x15x16x4xf32> to vector<240x4xf32>
    %c2_87 = arith.constant 2 : index
    %c0_88 = arith.constant 0 : index
    %c0_89 = arith.constant 0 : index
    %c0_90 = arith.constant 0 : index
    %52 = vector.load %arg2[%c2_87, %c0_88, %c0_89, %c0_90] : memref<3x3x4x4xf32, #tpu.memory_space<vmem>>, vector<1x1x4x4xf32>
    %53 = vector.shape_cast %52 : vector<1x1x4x4xf32> to vector<4x4xf32>
    %cst_91 = arith.constant dense<0.000000e+00> : vector<240x4xf32>
    %54 = tpu.matmul %47, %53, %cst_91 {dimension_numbers = #tpu.dot_dimension_numbers<[1], [0], [0], [1], [0, 0, 1, 1], [], []>} : vector<240x4xf32>, vector<4x4xf32>, vector<240x4xf32> -> vector<240x4xf32>
    %c2_92 = arith.constant 2 : index
    %c1_93 = arith.constant 1 : index
    %c0_94 = arith.constant 0 : index
    %c0_95 = arith.constant 0 : index
    %55 = vector.load %arg2[%c2_92, %c1_93, %c0_94, %c0_95] : memref<3x3x4x4xf32, #tpu.memory_space<vmem>>, vector<1x1x4x4xf32>
    %56 = vector.shape_cast %55 : vector<1x1x4x4xf32> to vector<4x4xf32>
    %cst_96 = arith.constant dense<0.000000e+00> : vector<240x4xf32>
    %57 = tpu.matmul %49, %56, %cst_96 {dimension_numbers = #tpu.dot_dimension_numbers<[1], [0], [0], [1], [0, 0, 1, 1], [], []>} : vector<240x4xf32>, vector<4x4xf32>, vector<240x4xf32> -> vector<240x4xf32>
    %58 = arith.addf %54, %57 : vector<240x4xf32>
    %c2_97 = arith.constant 2 : index
    %c2_98 = arith.constant 2 : index
    %c0_99 = arith.constant 0 : index
    %c0_100 = arith.constant 0 : index
    %59 = vector.load %arg2[%c2_97, %c2_98, %c0_99, %c0_100] : memref<3x3x4x4xf32, #tpu.memory_space<vmem>>, vector<1x1x4x4xf32>
    %60 = vector.shape_cast %59 : vector<1x1x4x4xf32> to vector<4x4xf32>
    %cst_101 = arith.constant dense<0.000000e+00> : vector<240x4xf32>
    %61 = tpu.matmul %51, %60, %cst_101 {dimension_numbers = #tpu.dot_dimension_numbers<[1], [0], [0], [1], [0, 0, 1, 1], [], []>} : vector<240x4xf32>, vector<4x4xf32>, vector<240x4xf32> -> vector<240x4xf32>
    %62 = arith.addf %58, %61 : vector<240x4xf32>
    %63 = vector.shape_cast %62 : vector<240x4xf32> to vector<1x15x16x4xf32>
    %64 = tpu.concatenate %63, %7 in 1 : vector<1x15x16x4xf32>, vector<1x1x16x4xf32> -> vector<1x16x16x4xf32>
    %65 = arith.addf %45, %64 : vector<1x16x16x4xf32>
    %66 = vector.shape_cast %65 : vector<1x16x16x4xf32> to vector<256x4xf32>
    %cst_102 = arith.constant dense<0.000000e+00> : vector<4xf32>
    %67 = vector.multi_reduction <add>, %66, %cst_102 [0] : vector<256x4xf32> to vector<4xf32>
    %68 = vector.shape_cast %67 : vector<4xf32> to vector<1x4xf32>
    %69 = vector.shape_cast %68 : vector<1x4xf32> to vector<1x1x4xf32>
    %c0_103 = arith.constant 0 : index
    %c0_104 = arith.constant 0 : index
    %c0_105 = arith.constant 0 : index
    %70 = vector.load %arg4[%c0_103, %c0_104, %c0_105] : memref<1x2x4xf32, #tpu.memory_space<vmem>>, vector<1x1x4xf32>
    tpu.vector_store %arg4[%c0_103, %c0_104, %c0_105], %69 {strides = array<i32>} : memref<1x2x4xf32, #tpu.memory_space<vmem>>, vector<1x1x4xf32>,
    %71 = arith.mulf %66, %66 : vector<256x4xf32>
    %cst_106 = arith.constant dense<0.000000e+00> : vector<4xf32>
    %72 = vector.multi_reduction <add>, %71, %cst_106 [0] : vector<256x4xf32> to vector<4xf32>
    %73 = vector.shape_cast %72 : vector<4xf32> to vector<1x4xf32>
    %74 = vector.shape_cast %73 : vector<1x4xf32> to vector<1x1x4xf32>
    %c0_107 = arith.constant 0 : index
    %c1_108 = arith.constant 1 : index
    %c0_109 = arith.constant 0 : index
    %75 = vector.load %arg4[%c0_107, %c1_108, %c0_109] : memref<1x2x4xf32, #tpu.memory_space<vmem>>, vector<1x1x4xf32>
    tpu.vector_store %arg4[%c0_107, %c1_108, %c0_109], %74 {strides = array<i32>} : memref<1x2x4xf32, #tpu.memory_space<vmem>>, vector<1x1x4xf32>,
    %c0_110 = arith.constant 0 : index
    %c0_111 = arith.constant 0 : index
    %c0_112 = arith.constant 0 : index
    %c0_113 = arith.constant 0 : index
    %76 = vector.load %arg3[%c0_110, %c0_111, %c0_112, %c0_113] : memref<1x16x16x4xf32, #tpu.memory_space<vmem>>, vector<1x16x16x4xf32>
    tpu.vector_store %arg3[%c0_110, %c0_111, %c0_112, %c0_113], %65 {strides = array<i32>} : memref<1x16x16x4xf32, #tpu.memory_space<vmem>>, vector<1x16x16x4xf32>,
    return
  }
  func.func @transform_0(%arg0: i32) -> (i32, i32, i32, i32) {
    %c0_i32 = arith.constant 0 : i32
    %c0_i32_0 = arith.constant 0 : i32
    %c0_i32_1 = arith.constant 0 : i32
    %c0_i32_2 = arith.constant 0 : i32
    return %arg0, %c0_i32, %c0_i32_0, %c0_i32_1 : i32, i32, i32, i32
  }
  func.func @transform_1(%arg0: i32) -> (i32, i32, i32, i32) {
    %c0_i32 = arith.constant 0 : i32
    %c0_i32_0 = arith.constant 0 : i32
    %c0_i32_1 = arith.constant 0 : i32
    %c0_i32_2 = arith.constant 0 : i32
    %c0_i32_3 = arith.constant 0 : i32
    return %c0_i32, %c0_i32_0, %c0_i32_1, %c0_i32_2 : i32, i32, i32, i32
  }
  func.func @transform_2(%arg0: i32) -> (i32, i32, i32, i32) {
    %c0_i32 = arith.constant 0 : i32
    %c0_i32_0 = arith.constant 0 : i32
    %c0_i32_1 = arith.constant 0 : i32
    %c0_i32_2 = arith.constant 0 : i32
    return %arg0, %c0_i32, %c0_i32_0, %c0_i32_1 : i32, i32, i32, i32
  }
  func.func @transform_3(%arg0: i32) -> (i32, i32, i32) {
    %c0_i32 = arith.constant 0 : i32
    %c0_i32_0 = arith.constant 0 : i32
    %c0_i32_1 = arith.constant 0 : i32
    return %arg0, %c0_i32, %c0_i32_0 : i32, i32, i32
  }
}

module attributes {stable_mosaic.version = 11 : i64} {
  func.func @_conv2_kernel(%arg0: i32, %arg1: memref<1x16x16x4xf32, #tpu.memory_space<vmem>>, %arg2: memref<3x3x4x4xf32, #tpu.memory_space<vmem>>, %arg3: memref<1x1x1x4xf32, #tpu.memory_space<vmem>>, %arg4: memref<1x1x1x4xf32, #tpu.memory_space<vmem>>, %arg5: memref<1x16x16x4xf32, #tpu.memory_space<vmem>>, %arg6: memref<1x2x4xf32, #tpu.memory_space<vmem>>, %arg7: memref<1x16x16x4xf32, #tpu.memory_space<vmem>>, %arg8: memref<1x16x16x4xf32, #tpu.memory_space<vmem>>) attributes {dimension_semantics = [#tpu.dimension_semantics<parallel>], iteration_bounds = array<i64: 2>, scalar_prefetch = 0 : i64, scratch_operands = 2 : i64, tpu.core_type = #tpu.core_type<tc>, window_params = [{transform_indices = @transform_0, window_bounds = array<i64: 1, 16, 16, 4>}, {pipeline_mode = #tpu.pipeline_mode<synchronous>, transform_indices = @transform_1, window_bounds = array<i64: 3, 3, 4, 4>}, {pipeline_mode = #tpu.pipeline_mode<synchronous>, transform_indices = @transform_2, window_bounds = array<i64: 1, 1, 1, 4>}, {pipeline_mode = #tpu.pipeline_mode<synchronous>, transform_indices = @transform_3, window_bounds = array<i64: 1, 1, 1, 4>}, {transform_indices = @transform_4, window_bounds = array<i64: 1, 16, 16, 4>}, {transform_indices = @transform_5, window_bounds = array<i64: 1, 2, 4>}]} {
    %c0 = arith.constant 0 : index
    %c0_0 = arith.constant 0 : index
    %c0_1 = arith.constant 0 : index
    %c0_2 = arith.constant 0 : index
    %0 = vector.load %arg1[%c0, %c0_0, %c0_1, %c0_2] : memref<1x16x16x4xf32, #tpu.memory_space<vmem>>, vector<1x16x16x4xf32>
    %c0_3 = arith.constant 0 : index
    %c0_4 = arith.constant 0 : index
    %c0_5 = arith.constant 0 : index
    %c0_6 = arith.constant 0 : index
    %1 = vector.load %arg3[%c0_3, %c0_4, %c0_5, %c0_6] : memref<1x1x1x4xf32, #tpu.memory_space<vmem>>, vector<1x1x1x4xf32>
    %2 = vector.broadcast %1 : vector<1x1x1x4xf32> to vector<1x16x16x4xf32>
    %3 = arith.mulf %0, %2 : vector<1x16x16x4xf32>
    %c0_7 = arith.constant 0 : index
    %c0_8 = arith.constant 0 : index
    %c0_9 = arith.constant 0 : index
    %c0_10 = arith.constant 0 : index
    %4 = vector.load %arg4[%c0_7, %c0_8, %c0_9, %c0_10] : memref<1x1x1x4xf32, #tpu.memory_space<vmem>>, vector<1x1x1x4xf32>
    %5 = vector.broadcast %4 : vector<1x1x1x4xf32> to vector<1x16x16x4xf32>
    %6 = arith.addf %3, %5 : vector<1x16x16x4xf32>
    %cst = arith.constant 0.000000e+00 : f32
    %7 = vector.broadcast %cst : f32 to vector<1x16x16x4xf32>
    %8 = arith.maximumf %6, %7 : vector<1x16x16x4xf32>
    %cst_11 = arith.constant 0.000000e+00 : f32
    %9 = vector.broadcast %cst_11 : f32 to vector<1x16x1x4xf32>
    %10 = vector.extract_strided_slice %8 {offsets = [0, 0, 0, 0], sizes = [1, 16, 15, 4], strides = [1, 1, 1, 1]} : vector<1x16x16x4xf32> to vector<1x16x15x4xf32>
    %c0_12 = arith.constant 0 : index
    %c0_13 = arith.constant 0 : index
    %c1 = arith.constant 1 : index
    %c0_14 = arith.constant 0 : index
    %11 = vector.load %arg7[%c0_12, %c0_13, %c1, %c0_14] : memref<1x16x16x4xf32, #tpu.memory_space<vmem>>, vector<1x16x15x4xf32>
    tpu.vector_store %arg7[%c0_12, %c0_13, %c1, %c0_14], %10 {strides = array<i32>} : memref<1x16x16x4xf32, #tpu.memory_space<vmem>>, vector<1x16x15x4xf32>,
    %c0_15 = arith.constant 0 : index
    %c0_16 = arith.constant 0 : index
    %c0_17 = arith.constant 0 : index
    %c0_18 = arith.constant 0 : index
    %12 = vector.load %arg7[%c0_15, %c0_16, %c0_17, %c0_18] : memref<1x16x16x4xf32, #tpu.memory_space<vmem>>, vector<1x16x1x4xf32>
    tpu.vector_store %arg7[%c0_15, %c0_16, %c0_17, %c0_18], %9 {strides = array<i32>} : memref<1x16x16x4xf32, #tpu.memory_space<vmem>>, vector<1x16x1x4xf32>,
    %13 = vector.extract_strided_slice %8 {offsets = [0, 0, 1, 0], sizes = [1, 16, 15, 4], strides = [1, 1, 1, 1]} : vector<1x16x16x4xf32> to vector<1x16x15x4xf32>
    %c0_19 = arith.constant 0 : index
    %c0_20 = arith.constant 0 : index
    %c0_21 = arith.constant 0 : index
    %c0_22 = arith.constant 0 : index
    %14 = vector.load %arg8[%c0_19, %c0_20, %c0_21, %c0_22] : memref<1x16x16x4xf32, #tpu.memory_space<vmem>>, vector<1x16x15x4xf32>
    tpu.vector_store %arg8[%c0_19, %c0_20, %c0_21, %c0_22], %13 {strides = array<i32>} : memref<1x16x16x4xf32, #tpu.memory_space<vmem>>, vector<1x16x15x4xf32>,
    %c0_23 = arith.constant 0 : index
    %c0_24 = arith.constant 0 : index
    %c15 = arith.constant 15 : index
    %c0_25 = arith.constant 0 : index
    %15 = vector.load %arg8[%c0_23, %c0_24, %c15, %c0_25] : memref<1x16x16x4xf32, #tpu.memory_space<vmem>>, vector<1x16x1x4xf32>
    tpu.vector_store %arg8[%c0_23, %c0_24, %c15, %c0_25], %9 {strides = array<i32>} : memref<1x16x16x4xf32, #tpu.memory_space<vmem>>, vector<1x16x1x4xf32>,
    %cst_26 = arith.constant 0.000000e+00 : f32
    %16 = vector.broadcast %cst_26 : f32 to vector<1x1x16x4xf32>
    %c0_27 = arith.constant 0 : index
    %c0_28 = arith.constant 0 : index
    %c0_29 = arith.constant 0 : index
    %c0_30 = arith.constant 0 : index
    %17 = vector.load %arg7[%c0_27, %c0_28, %c0_29, %c0_30] : memref<1x16x16x4xf32, #tpu.memory_space<vmem>>, vector<1x16x16x4xf32>
    %18 = vector.shape_cast %17 : vector<1x16x16x4xf32> to vector<256x4xf32>
    %19 = vector.shape_cast %8 : vector<1x16x16x4xf32> to vector<256x4xf32>
    %c0_31 = arith.constant 0 : index
    %c0_32 = arith.constant 0 : index
    %c0_33 = arith.constant 0 : index
    %c0_34 = arith.constant 0 : index
    %20 = vector.load %arg8[%c0_31, %c0_32, %c0_33, %c0_34] : memref<1x16x16x4xf32, #tpu.memory_space<vmem>>, vector<1x16x16x4xf32>
    %21 = vector.shape_cast %20 : vector<1x16x16x4xf32> to vector<256x4xf32>
    %c1_35 = arith.constant 1 : index
    %c0_36 = arith.constant 0 : index
    %c0_37 = arith.constant 0 : index
    %c0_38 = arith.constant 0 : index
    %22 = vector.load %arg2[%c1_35, %c0_36, %c0_37, %c0_38] : memref<3x3x4x4xf32, #tpu.memory_space<vmem>>, vector<1x1x4x4xf32>
    %23 = vector.shape_cast %22 : vector<1x1x4x4xf32> to vector<4x4xf32>
    %cst_39 = arith.constant dense<0.000000e+00> : vector<256x4xf32>
    %24 = tpu.matmul %18, %23, %cst_39 {dimension_numbers = #tpu.dot_dimension_numbers<[1], [0], [0], [1], [0, 0, 1, 1], [], []>} : vector<256x4xf32>, vector<4x4xf32>, vector<256x4xf32> -> vector<256x4xf32>
    %c1_40 = arith.constant 1 : index
    %c1_41 = arith.constant 1 : index
    %c0_42 = arith.constant 0 : index
    %c0_43 = arith.constant 0 : index
    %25 = vector.load %arg2[%c1_40, %c1_41, %c0_42, %c0_43] : memref<3x3x4x4xf32, #tpu.memory_space<vmem>>, vector<1x1x4x4xf32>
    %26 = vector.shape_cast %25 : vector<1x1x4x4xf32> to vector<4x4xf32>
    %cst_44 = arith.constant dense<0.000000e+00> : vector<256x4xf32>
    %27 = tpu.matmul %19, %26, %cst_44 {dimension_numbers = #tpu.dot_dimension_numbers<[1], [0], [0], [1], [0, 0, 1, 1], [], []>} : vector<256x4xf32>, vector<4x4xf32>, vector<256x4xf32> -> vector<256x4xf32>
    %28 = arith.addf %24, %27 : vector<256x4xf32>
    %c1_45 = arith.constant 1 : index
    %c2 = arith.constant 2 : index
    %c0_46 = arith.constant 0 : index
    %c0_47 = arith.constant 0 : index
    %29 = vector.load %arg2[%c1_45, %c2, %c0_46, %c0_47] : memref<3x3x4x4xf32, #tpu.memory_space<vmem>>, vector<1x1x4x4xf32>
    %30 = vector.shape_cast %29 : vector<1x1x4x4xf32> to vector<4x4xf32>
    %cst_48 = arith.constant dense<0.000000e+00> : vector<256x4xf32>
    %31 = tpu.matmul %21, %30, %cst_48 {dimension_numbers = #tpu.dot_dimension_numbers<[1], [0], [0], [1], [0, 0, 1, 1], [], []>} : vector<256x4xf32>, vector<4x4xf32>, vector<256x4xf32> -> vector<256x4xf32>
    %32 = arith.addf %28, %31 : vector<256x4xf32>
    %33 = vector.shape_cast %32 : vector<256x4xf32> to vector<1x16x16x4xf32>
    %c0_49 = arith.constant 0 : index
    %c0_50 = arith.constant 0 : index
    %c0_51 = arith.constant 0 : index
    %c0_52 = arith.constant 0 : index
    %34 = vector.load %arg7[%c0_49, %c0_50, %c0_51, %c0_52] : memref<1x16x16x4xf32, #tpu.memory_space<vmem>>, vector<1x15x16x4xf32>
    %35 = vector.shape_cast %34 : vector<1x15x16x4xf32> to vector<240x4xf32>
    %36 = vector.extract_strided_slice %8 {offsets = [0, 0, 0, 0], sizes = [1, 15, 16, 4], strides = [1, 1, 1, 1]} : vector<1x16x16x4xf32> to vector<1x15x16x4xf32>
    %37 = vector.shape_cast %36 : vector<1x15x16x4xf32> to vector<240x4xf32>
    %c0_53 = arith.constant 0 : index
    %c0_54 = arith.constant 0 : index
    %c0_55 = arith.constant 0 : index
    %c0_56 = arith.constant 0 : index
    %38 = vector.load %arg8[%c0_53, %c0_54, %c0_55, %c0_56] : memref<1x16x16x4xf32, #tpu.memory_space<vmem>>, vector<1x15x16x4xf32>
    %39 = vector.shape_cast %38 : vector<1x15x16x4xf32> to vector<240x4xf32>
    %c0_57 = arith.constant 0 : index
    %c0_58 = arith.constant 0 : index
    %c0_59 = arith.constant 0 : index
    %c0_60 = arith.constant 0 : index
    %40 = vector.load %arg2[%c0_57, %c0_58, %c0_59, %c0_60] : memref<3x3x4x4xf32, #tpu.memory_space<vmem>>, vector<1x1x4x4xf32>
    %41 = vector.shape_cast %40 : vector<1x1x4x4xf32> to vector<4x4xf32>
    %cst_61 = arith.constant dense<0.000000e+00> : vector<240x4xf32>
    %42 = tpu.matmul %35, %41, %cst_61 {dimension_numbers = #tpu.dot_dimension_numbers<[1], [0], [0], [1], [0, 0, 1, 1], [], []>} : vector<240x4xf32>, vector<4x4xf32>, vector<240x4xf32> -> vector<240x4xf32>
    %c0_62 = arith.constant 0 : index
    %c1_63 = arith.constant 1 : index
    %c0_64 = arith.constant 0 : index
    %c0_65 = arith.constant 0 : index
    %43 = vector.load %arg2[%c0_62, %c1_63, %c0_64, %c0_65] : memref<3x3x4x4xf32, #tpu.memory_space<vmem>>, vector<1x1x4x4xf32>
    %44 = vector.shape_cast %43 : vector<1x1x4x4xf32> to vector<4x4xf32>
    %cst_66 = arith.constant dense<0.000000e+00> : vector<240x4xf32>
    %45 = tpu.matmul %37, %44, %cst_66 {dimension_numbers = #tpu.dot_dimension_numbers<[1], [0], [0], [1], [0, 0, 1, 1], [], []>} : vector<240x4xf32>, vector<4x4xf32>, vector<240x4xf32> -> vector<240x4xf32>
    %46 = arith.addf %42, %45 : vector<240x4xf32>
    %c0_67 = arith.constant 0 : index
    %c2_68 = arith.constant 2 : index
    %c0_69 = arith.constant 0 : index
    %c0_70 = arith.constant 0 : index
    %47 = vector.load %arg2[%c0_67, %c2_68, %c0_69, %c0_70] : memref<3x3x4x4xf32, #tpu.memory_space<vmem>>, vector<1x1x4x4xf32>
    %48 = vector.shape_cast %47 : vector<1x1x4x4xf32> to vector<4x4xf32>
    %cst_71 = arith.constant dense<0.000000e+00> : vector<240x4xf32>
    %49 = tpu.matmul %39, %48, %cst_71 {dimension_numbers = #tpu.dot_dimension_numbers<[1], [0], [0], [1], [0, 0, 1, 1], [], []>} : vector<240x4xf32>, vector<4x4xf32>, vector<240x4xf32> -> vector<240x4xf32>
    %50 = arith.addf %46, %49 : vector<240x4xf32>
    %51 = vector.shape_cast %50 : vector<240x4xf32> to vector<1x15x16x4xf32>
    %52 = tpu.concatenate %16, %51 in 1 : vector<1x1x16x4xf32>, vector<1x15x16x4xf32> -> vector<1x16x16x4xf32>
    %53 = arith.addf %33, %52 : vector<1x16x16x4xf32>
    %c0_72 = arith.constant 0 : index
    %c1_73 = arith.constant 1 : index
    %c0_74 = arith.constant 0 : index
    %c0_75 = arith.constant 0 : index
    %54 = vector.load %arg7[%c0_72, %c1_73, %c0_74, %c0_75] : memref<1x16x16x4xf32, #tpu.memory_space<vmem>>, vector<1x15x16x4xf32>
    %55 = vector.shape_cast %54 : vector<1x15x16x4xf32> to vector<240x4xf32>
    %56 = vector.extract_strided_slice %8 {offsets = [0, 1, 0, 0], sizes = [1, 15, 16, 4], strides = [1, 1, 1, 1]} : vector<1x16x16x4xf32> to vector<1x15x16x4xf32>
    %57 = vector.shape_cast %56 : vector<1x15x16x4xf32> to vector<240x4xf32>
    %c0_76 = arith.constant 0 : index
    %c1_77 = arith.constant 1 : index
    %c0_78 = arith.constant 0 : index
    %c0_79 = arith.constant 0 : index
    %58 = vector.load %arg8[%c0_76, %c1_77, %c0_78, %c0_79] : memref<1x16x16x4xf32, #tpu.memory_space<vmem>>, vector<1x15x16x4xf32>
    %59 = vector.shape_cast %58 : vector<1x15x16x4xf32> to vector<240x4xf32>
    %c2_80 = arith.constant 2 : index
    %c0_81 = arith.constant 0 : index
    %c0_82 = arith.constant 0 : index
    %c0_83 = arith.constant 0 : index
    %60 = vector.load %arg2[%c2_80, %c0_81, %c0_82, %c0_83] : memref<3x3x4x4xf32, #tpu.memory_space<vmem>>, vector<1x1x4x4xf32>
    %61 = vector.shape_cast %60 : vector<1x1x4x4xf32> to vector<4x4xf32>
    %cst_84 = arith.constant dense<0.000000e+00> : vector<240x4xf32>
    %62 = tpu.matmul %55, %61, %cst_84 {dimension_numbers = #tpu.dot_dimension_numbers<[1], [0], [0], [1], [0, 0, 1, 1], [], []>} : vector<240x4xf32>, vector<4x4xf32>, vector<240x4xf32> -> vector<240x4xf32>
    %c2_85 = arith.constant 2 : index
    %c1_86 = arith.constant 1 : index
    %c0_87 = arith.constant 0 : index
    %c0_88 = arith.constant 0 : index
    %63 = vector.load %arg2[%c2_85, %c1_86, %c0_87, %c0_88] : memref<3x3x4x4xf32, #tpu.memory_space<vmem>>, vector<1x1x4x4xf32>
    %64 = vector.shape_cast %63 : vector<1x1x4x4xf32> to vector<4x4xf32>
    %cst_89 = arith.constant dense<0.000000e+00> : vector<240x4xf32>
    %65 = tpu.matmul %57, %64, %cst_89 {dimension_numbers = #tpu.dot_dimension_numbers<[1], [0], [0], [1], [0, 0, 1, 1], [], []>} : vector<240x4xf32>, vector<4x4xf32>, vector<240x4xf32> -> vector<240x4xf32>
    %66 = arith.addf %62, %65 : vector<240x4xf32>
    %c2_90 = arith.constant 2 : index
    %c2_91 = arith.constant 2 : index
    %c0_92 = arith.constant 0 : index
    %c0_93 = arith.constant 0 : index
    %67 = vector.load %arg2[%c2_90, %c2_91, %c0_92, %c0_93] : memref<3x3x4x4xf32, #tpu.memory_space<vmem>>, vector<1x1x4x4xf32>
    %68 = vector.shape_cast %67 : vector<1x1x4x4xf32> to vector<4x4xf32>
    %cst_94 = arith.constant dense<0.000000e+00> : vector<240x4xf32>
    %69 = tpu.matmul %59, %68, %cst_94 {dimension_numbers = #tpu.dot_dimension_numbers<[1], [0], [0], [1], [0, 0, 1, 1], [], []>} : vector<240x4xf32>, vector<4x4xf32>, vector<240x4xf32> -> vector<240x4xf32>
    %70 = arith.addf %66, %69 : vector<240x4xf32>
    %71 = vector.shape_cast %70 : vector<240x4xf32> to vector<1x15x16x4xf32>
    %72 = tpu.concatenate %71, %16 in 1 : vector<1x15x16x4xf32>, vector<1x1x16x4xf32> -> vector<1x16x16x4xf32>
    %73 = arith.addf %53, %72 : vector<1x16x16x4xf32>
    %74 = vector.shape_cast %73 : vector<1x16x16x4xf32> to vector<256x4xf32>
    %cst_95 = arith.constant dense<0.000000e+00> : vector<4xf32>
    %75 = vector.multi_reduction <add>, %74, %cst_95 [0] : vector<256x4xf32> to vector<4xf32>
    %76 = vector.shape_cast %75 : vector<4xf32> to vector<1x4xf32>
    %77 = vector.shape_cast %76 : vector<1x4xf32> to vector<1x1x4xf32>
    %c0_96 = arith.constant 0 : index
    %c0_97 = arith.constant 0 : index
    %c0_98 = arith.constant 0 : index
    %78 = vector.load %arg6[%c0_96, %c0_97, %c0_98] : memref<1x2x4xf32, #tpu.memory_space<vmem>>, vector<1x1x4xf32>
    tpu.vector_store %arg6[%c0_96, %c0_97, %c0_98], %77 {strides = array<i32>} : memref<1x2x4xf32, #tpu.memory_space<vmem>>, vector<1x1x4xf32>,
    %79 = arith.mulf %74, %74 : vector<256x4xf32>
    %cst_99 = arith.constant dense<0.000000e+00> : vector<4xf32>
    %80 = vector.multi_reduction <add>, %79, %cst_99 [0] : vector<256x4xf32> to vector<4xf32>
    %81 = vector.shape_cast %80 : vector<4xf32> to vector<1x4xf32>
    %82 = vector.shape_cast %81 : vector<1x4xf32> to vector<1x1x4xf32>
    %c0_100 = arith.constant 0 : index
    %c1_101 = arith.constant 1 : index
    %c0_102 = arith.constant 0 : index
    %83 = vector.load %arg6[%c0_100, %c1_101, %c0_102] : memref<1x2x4xf32, #tpu.memory_space<vmem>>, vector<1x1x4xf32>
    tpu.vector_store %arg6[%c0_100, %c1_101, %c0_102], %82 {strides = array<i32>} : memref<1x2x4xf32, #tpu.memory_space<vmem>>, vector<1x1x4xf32>,
    %c0_103 = arith.constant 0 : index
    %c0_104 = arith.constant 0 : index
    %c0_105 = arith.constant 0 : index
    %c0_106 = arith.constant 0 : index
    %84 = vector.load %arg5[%c0_103, %c0_104, %c0_105, %c0_106] : memref<1x16x16x4xf32, #tpu.memory_space<vmem>>, vector<1x16x16x4xf32>
    tpu.vector_store %arg5[%c0_103, %c0_104, %c0_105, %c0_106], %73 {strides = array<i32>} : memref<1x16x16x4xf32, #tpu.memory_space<vmem>>, vector<1x16x16x4xf32>,
    return
  }
  func.func @transform_0(%arg0: i32) -> (i32, i32, i32, i32) {
    %c0_i32 = arith.constant 0 : i32
    %c0_i32_0 = arith.constant 0 : i32
    %c0_i32_1 = arith.constant 0 : i32
    %c0_i32_2 = arith.constant 0 : i32
    return %arg0, %c0_i32, %c0_i32_0, %c0_i32_1 : i32, i32, i32, i32
  }
  func.func @transform_1(%arg0: i32) -> (i32, i32, i32, i32) {
    %c0_i32 = arith.constant 0 : i32
    %c0_i32_0 = arith.constant 0 : i32
    %c0_i32_1 = arith.constant 0 : i32
    %c0_i32_2 = arith.constant 0 : i32
    %c0_i32_3 = arith.constant 0 : i32
    return %c0_i32, %c0_i32_0, %c0_i32_1, %c0_i32_2 : i32, i32, i32, i32
  }
  func.func @transform_2(%arg0: i32) -> (i32, i32, i32, i32) {
    %c0_i32 = arith.constant 0 : i32
    %c0_i32_0 = arith.constant 0 : i32
    %c0_i32_1 = arith.constant 0 : i32
    %c0_i32_2 = arith.constant 0 : i32
    %c0_i32_3 = arith.constant 0 : i32
    return %c0_i32, %c0_i32_0, %c0_i32_1, %c0_i32_2 : i32, i32, i32, i32
  }
  func.func @transform_3(%arg0: i32) -> (i32, i32, i32, i32) {
    %c0_i32 = arith.constant 0 : i32
    %c0_i32_0 = arith.constant 0 : i32
    %c0_i32_1 = arith.constant 0 : i32
    %c0_i32_2 = arith.constant 0 : i32
    %c0_i32_3 = arith.constant 0 : i32
    return %c0_i32, %c0_i32_0, %c0_i32_1, %c0_i32_2 : i32, i32, i32, i32
  }
  func.func @transform_4(%arg0: i32) -> (i32, i32, i32, i32) {
    %c0_i32 = arith.constant 0 : i32
    %c0_i32_0 = arith.constant 0 : i32
    %c0_i32_1 = arith.constant 0 : i32
    %c0_i32_2 = arith.constant 0 : i32
    return %arg0, %c0_i32, %c0_i32_0, %c0_i32_1 : i32, i32, i32, i32
  }
  func.func @transform_5(%arg0: i32) -> (i32, i32, i32) {
    %c0_i32 = arith.constant 0 : i32
    %c0_i32_0 = arith.constant 0 : i32
    %c0_i32_1 = arith.constant 0 : i32
    return %arg0, %c0_i32, %c0_i32_0 : i32, i32, i32
  }
}

module attributes {stable_mosaic.version = 11 : i64} {
  func.func @_finalize_kernel(%arg0: i32, %arg1: memref<1x8x128xf32, #tpu.memory_space<vmem>>, %arg2: memref<1x8x128xf32, #tpu.memory_space<vmem>>, %arg3: memref<1x1x128xf32, #tpu.memory_space<vmem>>, %arg4: memref<1x1x128xf32, #tpu.memory_space<vmem>>, %arg5: memref<1x8x128xf32, #tpu.memory_space<vmem>>) attributes {dimension_semantics = [#tpu.dimension_semantics<parallel>], iteration_bounds = array<i64: 2>, scalar_prefetch = 0 : i64, scratch_operands = 0 : i64, tpu.core_type = #tpu.core_type<tc>, window_params = [{transform_indices = @transform_0, window_bounds = array<i64: 1, 8, 128>}, {transform_indices = @transform_1, window_bounds = array<i64: 1, 8, 128>}, {pipeline_mode = #tpu.pipeline_mode<synchronous>, transform_indices = @transform_2, window_bounds = array<i64: 1, 1, 128>}, {pipeline_mode = #tpu.pipeline_mode<synchronous>, transform_indices = @transform_3, window_bounds = array<i64: 1, 1, 128>}, {transform_indices = @transform_4, window_bounds = array<i64: 1, 8, 128>}]} {
    %c0 = arith.constant 0 : index
    %c0_0 = arith.constant 0 : index
    %c0_1 = arith.constant 0 : index
    %0 = vector.load %arg1[%c0, %c0_0, %c0_1] : memref<1x8x128xf32, #tpu.memory_space<vmem>>, vector<1x8x128xf32>
    %c0_2 = arith.constant 0 : index
    %c0_3 = arith.constant 0 : index
    %c0_4 = arith.constant 0 : index
    %1 = vector.load %arg3[%c0_2, %c0_3, %c0_4] : memref<1x1x128xf32, #tpu.memory_space<vmem>>, vector<1x1x128xf32>
    %2 = vector.broadcast %1 : vector<1x1x128xf32> to vector<1x8x128xf32>
    %3 = arith.mulf %0, %2 : vector<1x8x128xf32>
    %c0_5 = arith.constant 0 : index
    %c0_6 = arith.constant 0 : index
    %c0_7 = arith.constant 0 : index
    %4 = vector.load %arg4[%c0_5, %c0_6, %c0_7] : memref<1x1x128xf32, #tpu.memory_space<vmem>>, vector<1x1x128xf32>
    %5 = vector.broadcast %4 : vector<1x1x128xf32> to vector<1x8x128xf32>
    %6 = arith.addf %3, %5 : vector<1x8x128xf32>
    %c0_8 = arith.constant 0 : index
    %c0_9 = arith.constant 0 : index
    %c0_10 = arith.constant 0 : index
    %7 = vector.load %arg2[%c0_8, %c0_9, %c0_10] : memref<1x8x128xf32, #tpu.memory_space<vmem>>, vector<1x8x128xf32>
    %8 = arith.addf %6, %7 : vector<1x8x128xf32>
    %cst = arith.constant 0.000000e+00 : f32
    %9 = vector.broadcast %cst : f32 to vector<1x8x128xf32>
    %10 = arith.maximumf %8, %9 : vector<1x8x128xf32>
    %c0_11 = arith.constant 0 : index
    %c0_12 = arith.constant 0 : index
    %c0_13 = arith.constant 0 : index
    %11 = vector.load %arg5[%c0_11, %c0_12, %c0_13] : memref<1x8x128xf32, #tpu.memory_space<vmem>>, vector<1x8x128xf32>
    tpu.vector_store %arg5[%c0_11, %c0_12, %c0_13], %10 {strides = array<i32>} : memref<1x8x128xf32, #tpu.memory_space<vmem>>, vector<1x8x128xf32>,
    return
  }
  func.func @transform_0(%arg0: i32) -> (i32, i32, i32) {
    %c0_i32 = arith.constant 0 : i32
    %c0_i32_0 = arith.constant 0 : i32
    %c0_i32_1 = arith.constant 0 : i32
    return %arg0, %c0_i32, %c0_i32_0 : i32, i32, i32
  }
  func.func @transform_1(%arg0: i32) -> (i32, i32, i32) {
    %c0_i32 = arith.constant 0 : i32
    %c0_i32_0 = arith.constant 0 : i32
    %c0_i32_1 = arith.constant 0 : i32
    return %arg0, %c0_i32, %c0_i32_0 : i32, i32, i32
  }
  func.func @transform_2(%arg0: i32) -> (i32, i32, i32) {
    %c0_i32 = arith.constant 0 : i32
    %c0_i32_0 = arith.constant 0 : i32
    %c0_i32_1 = arith.constant 0 : i32
    %c0_i32_2 = arith.constant 0 : i32
    return %c0_i32, %c0_i32_0, %c0_i32_1 : i32, i32, i32
  }
  func.func @transform_3(%arg0: i32) -> (i32, i32, i32) {
    %c0_i32 = arith.constant 0 : i32
    %c0_i32_0 = arith.constant 0 : i32
    %c0_i32_1 = arith.constant 0 : i32
    %c0_i32_2 = arith.constant 0 : i32
    return %c0_i32, %c0_i32_0, %c0_i32_1 : i32, i32, i32
  }
  func.func @transform_4(%arg0: i32) -> (i32, i32, i32) {
    %c0_i32 = arith.constant 0 : i32
    %c0_i32_0 = arith.constant 0 : i32
    %c0_i32_1 = arith.constant 0 : i32
    return %arg0, %c0_i32, %c0_i32_0 : i32, i32, i32
  }
}

</mosaic_0001>

<bundles_post_ra>
// kernel: tile.18
= control target key start
LH: loop header
LB: loop body
LE: loop exit
PB: predicated region body
PF: predicated region fallthrough
CT: control target
= control target key end

     0   :  { %s40_s0 = inlined_call_operand.vmem [shape: f32[4], index: 0, kind: input, shape index: {}]   ;;  %s41_s1 = inlined_call_operand.vmem [shape: f32[32,4], index: 1, kind: output, shape index: {}]  }
   0x1   :  { %v4_v0 = vld [vmem:[%s40_s0] ss:$0 sm:$0xff] }
   0x2   :  { %5 = vst [vmem:[%s41_s1] sm:$0xff] %v4_v0 }
   0x3   :  { %12 = vst [vmem:[%s41_s1 + $0x8] sm:$0xff] %v4_v0 }
   0x4   :  { %13 = vst [vmem:[%s41_s1 + $0x10] sm:$0xff] %v4_v0 }
   0x5   :  { %14 = vst [vmem:[%s41_s1 + $0x18] sm:$0xff] %v4_v0 }

// kernel: tile.19
= control target key start
LH: loop header
LB: loop body
LE: loop exit
PB: predicated region body
PF: predicated region fallthrough
CT: control target
= control target key end

     0   :  { %s259_s10 = smov 124   ;;  %s260_s11 = smov 116   ;;  %vm3_vm0 = vcmask 31744   ;;  %vm9_vm1 = vcmask 1048544   ;;  %vm15_vm2 = vcmask 1015744   ;;  %vm21_vm3 = vcmask 982944   ;;  %s399_s0 = inlined_call_operand.vmem [shape: f32[32,4], index: 0, kind: input, shape index: {}]   ;;  %s400_s1 = inlined_call_operand.vmem [shape: f32[1,1,128], index: 1, kind: output, shape index: {}]  }
   0x1   :  { %v197_v0 = vld [vmem:[%s399_s0 + $0x1f] sm:$0x1]   ;;  %v199_v1 = vld [vmem:[%s399_s0 + $0x1d] sm:$0x1]   ;;  %v201_v2 = vld [vmem:[%s399_s0 + $0x1b] sm:$0x1]  }
   0x2   :  { %7 = vrot.lane.b32.xlu0 %v197_v0, %s259_s10  ;;  %19 = vrot.lane.b32.xlu1 %v199_v1, %s260_s11  ;;  %s261_s14 = smov 108   ;;  %v198_v3 = vld [vmem:[%s399_s0 + $0x1e] sm:$0x1]   ;;  %v200_v4 = vld [vmem:[%s399_s0 + $0x1c] sm:$0x1]   ;;  %s262_s19 = smov 120  }
   0x3   :  { %31 = vrot.lane.b32.xlu2 %v201_v2, %s261_s14  ;;  %s263_s20 = smov 112   ;;  %v202_v5 = vld [vmem:[%s399_s0 + $0x1a] sm:$0x1]   ;;  %s264_s23 = smov 104   ;;  %v203_v6 = vld [vmem:[%s399_s0 + $0x19] sm:$0x1]  }
   0x4   :  { %v204_v7 = vld [vmem:[%s399_s0 + $0x18] sm:$0x1]   ;;  %s265_s28 = smov 100   ;;  %s266_s29 = smov 96   ;;  %v205_v8 = vld [vmem:[%s399_s0 + $0x17] sm:$0x1]  }
   0x5   :  { %s267_s3 = smov 92   ;;  %v206_v9 = vld [vmem:[%s399_s0 + $0x16] sm:$0x1]   ;;  %v207_v10 = vld [vmem:[%s399_s0 + $0x15] sm:$0x1]   ;;  %s268_s8 = smov 88  }
   0x6   :  { %s269_s9 = smov 84   ;;  %v208_v11 = vld [vmem:[%s399_s0 + $0x14] sm:$0x1]   ;;  %s270_s12 = smov 80   ;;  %v209_v12 = vld [vmem:[%s399_s0 + $0x13] sm:$0x1]  }
   0x7   :  { %v210_v13 = vld [vmem:[%s399_s0 + $0x12] sm:$0x1]   ;;  %s271_s17 = smov 76   ;;  %s272_s18 = smov 72   ;;  %v211_v14 = vld [vmem:[%s399_s0 + $0x11] sm:$0x1]  }
   0x8   :  { %s273_s21 = smov 68   ;;  %v212_v15 = vld [vmem:[%s399_s0 + $0x10] sm:$0x1]   ;;  %v213_v16 = vld [vmem:[%s399_s0 + $0xf] sm:$0x1]   ;;  %s274_s26 = smov 64  }
   0x9   :  { %s275_s27 = smov 60   ;;  %v214_v17 = vld [vmem:[%s399_s0 + $0xe] sm:$0x1]   ;;  %s276_s30 = smov 56   ;;  %v215_v18 = vld [vmem:[%s399_s0 + $0xd] sm:$0x1]  }
   0xa   :  { %13 = vrot.lane.b32.xlu0 %v198_v3, %s262_s19  ;;  %25 = vrot.lane.b32.xlu1 %v200_v4, %s263_s20  ;;  %v216_v19 = vld [vmem:[%s399_s0 + $0xc] sm:$0x1]   ;;  %s277_s6 = smov 52   ;;  %s278_s7 = smov 48   ;;  %v217_v20 = vld [vmem:[%s399_s0 + $0xb] sm:$0x1]  }
   0xb   :  { %37 = vrot.lane.b32.xlu2 %v202_v5, %s264_s23  ;;  %s279_s10 = smov 44   ;;  %v218_v21 = vld [vmem:[%s399_s0 + $0xa] sm:$0x1]   ;;  %v219_v22 = vld [vmem:[%s399_s0 + $0x9] sm:$0x1]   ;;  %s280_s15 = smov 40  }
   0xc   :  { %s281_s16 = smov 36   ;;  %v220_v23 = vld [vmem:[%s399_s0 + $0x8] sm:$0x1]   ;;  %s282_s19 = smov 32   ;;  %v221_v24 = vld [vmem:[%s399_s0 + $0x7] sm:$0x1]  }
   0xd   :  { %v222_v25 = vld [vmem:[%s399_s0 + $0x6] sm:$0x1]   ;;  %s283_s24 = smov 28   ;;  %s284_s25 = smov 24   ;;  %v223_v26 = vld [vmem:[%s399_s0 + $0x5] sm:$0x1]  }
   0xe   :  { %v224_v27 = vld [vmem:[%s399_s0 + $0x4] sm:$0x1]   ;;  %v225_v28 = vld [vmem:[%s399_s0 + $0x3] sm:$0x1]   ;;  %s286_s4 = smov 16   ;;  %s287_s5 = smov 12  }
   0xf   :  { %v226_v29 = vld [vmem:[%s399_s0 + $0x2] sm:$0x1]   ;;  %v227_v30 = vld [vmem:[%s399_s0 + $0x1] sm:$0x1]   ;;  %s289_s11 = smov 4   ;;  %vm27_vm4 = vcmask 950144  }
  0x10   :  { %v2_v31 = vld [vmem:[%s399_s0] sm:$0x1]   ;;  %vm33_vm5 = vcmask 917344   ;;  %vm39_vm6 = vcmask 884544   ;;  %vm45_vm7 = vcmask 851744   ;;  %vm51_vm8 = vcmask 818944  }
  0x11   :  { %4 = vst.msk [vmem:[#allocation0] sm:$0x1] %vm3_vm0, %v2_v31   ;;  %vm57_vm9 = vcmask 786144   ;;  %vm63_vm10 = vcmask 753344   ;;  %vm69_vm11 = vcmask 720544   ;;  %vm75_vm12 = vcmask 687744  }
  0x12   :  { %43 = vrot.lane.b32.xlu0 %v203_v6, %s265_s28  ;;  %49 = vrot.lane.b32.xlu1 %v204_v7, %s266_s29  ;;  %s285_s28 = smov 20   ;;  %vm81_vm13 = vcmask 654944   ;;  %vm87_vm14 = vcmask 622144   ;;  %vm93_vm15 = vcmask 589344   ;;  %vm99_vm0 = vcmask 556544  }
  0x13   :  { %55 = vrot.lane.b32.xlu2 %v205_v8, %s267_s3 }
  0x1a   :  { %61 = vrot.lane.b32.xlu0 %v206_v9, %s268_s8  ;;  %67 = vrot.lane.b32.xlu1 %v207_v10, %s269_s9  ;;  %s288_s8 = smov 8  }
  0x1b   :  { %73 = vrot.lane.b32.xlu2 %v208_v11, %s270_s12 }
  0x22   :  { %79 = vrot.lane.b32.xlu0 %v209_v12, %s271_s17  ;;  %85 = vrot.lane.b32.xlu1 %v210_v13, %s272_s18 }
  0x23   :  { %91 = vrot.lane.b32.xlu2 %v211_v14, %s273_s21 }
  0x2a   :  { %97 = vrot.lane.b32.xlu0 %v212_v15, %s274_s26  ;;  %103 = vrot.lane.b32.xlu1 %v213_v16, %s275_s27 }
  0x2b   :  { %109 = vrot.lane.b32.xlu2 %v214_v17, %s276_s30 }
  0x32   :  { %115 = vrot.lane.b32.xlu0 %v215_v18, %s277_s6  ;;  %121 = vrot.lane.b32.xlu1 %v216_v19, %s278_s7 }
  0x33   :  { %127 = vrot.lane.b32.xlu2 %v217_v20, %s279_s10 }
  0x3a   :  { %133 = vrot.lane.b32.xlu0 %v218_v21, %s280_s15  ;;  %139 = vrot.lane.b32.xlu1 %v219_v22, %s281_s16 }
  0x3b   :  { %145 = vrot.lane.b32.xlu2 %v220_v23, %s282_s19 }
  0x42   :  { %151 = vrot.lane.b32.xlu0 %v221_v24, %s283_s24  ;;  %157 = vrot.lane.b32.xlu1 %v222_v25, %s284_s25 }
  0x43   :  { %163 = vrot.lane.b32.xlu2 %v223_v26, %s285_s28 }
  0x4a   :  { %169 = vrot.lane.b32.xlu0 %v224_v27, %s286_s4  ;;  %175 = vrot.lane.b32.xlu1 %v225_v28, %s287_s5 }
  0x4b   :  { %181 = vrot.lane.b32.xlu2 %v226_v29, %s288_s8 }
  0x52   :  { %187 = vrot.lane.b32.xlu0 %v227_v30, %s289_s11 }
  0x5d   :  { %v32_v32 = vpop.permute.xlu2 %31  }
  0x65   :  { %v38_v33 = vpop.permute.xlu2 %37  }
  0x6d   :  { %v56_v34 = vpop.permute.xlu2 %55  }
  0x74   :  { %v8_v35 = vpop.permute.xlu0 %7   ;;  %v20_v36 = vpop.permute.xlu1 %19  }
  0x75   :  { %10 = vst.msk [vmem:[#allocation0] sm:$0x1] %vm9_vm1, %v8_v35   ;;  %v74_v37 = vpop.permute.xlu2 %73   ;;  %vm105_vm1 = vcmask 523744  }
  0x7c   :  { %v14_v38 = vpop.permute.xlu0 %13   ;;  %v26_v39 = vpop.permute.xlu1 %25  }
  0x7d   :  { %16 = vst.msk [vmem:[#allocation0] sm:$0x1] %vm15_vm2, %v14_v38   ;;  %v92_v40 = vpop.permute.xlu2 %91   ;;  %vm111_vm2 = vcmask 490944  }
  0x7e   :  { %22 = vst.msk [vmem:[#allocation0] sm:$0x1] %vm21_vm3, %v20_v36   ;;  %vm117_vm3 = vcmask 458144  }
  0x7f   :  { %28 = vst.msk [vmem:[#allocation0] sm:$0x1] %vm27_vm4, %v26_v39   ;;  %vm123_vm4 = vcmask 425344  }
  0x80   :  { %34 = vst.msk [vmem:[#allocation0] sm:$0x1] %vm33_vm5, %v32_v32   ;;  %vm129_vm5 = vcmask 392544  }
  0x81   :  { %40 = vst.msk [vmem:[#allocation0] sm:$0x1] %vm39_vm6, %v38_v33   ;;  %vm135_vm6 = vcmask 359744  }
  0x84   :  { %v44_v41 = vpop.permute.xlu0 %43   ;;  %v50_v42 = vpop.permute.xlu1 %49  }
  0x85   :  { %46 = vst.msk [vmem:[#allocation0] sm:$0x1] %vm45_vm7, %v44_v41   ;;  %v110_v43 = vpop.permute.xlu2 %109   ;;  %vm141_vm7 = vcmask 326944  }
  0x86   :  { %52 = vst.msk [vmem:[#allocation0] sm:$0x1] %vm51_vm8, %v50_v42   ;;  %vm147_vm8 = vcmask 294144  }
  0x87   :  { %58 = vst.msk [vmem:[#allocation0] sm:$0x1] %vm57_vm9, %v56_v34   ;;  %vm153_vm9 = vcmask 261344  }
  0x8c   :  { %v62_v44 = vpop.permute.xlu0 %61   ;;  %v68_v45 = vpop.permute.xlu1 %67  }
  0x8d   :  { %64 = vst.msk [vmem:[#allocation0] sm:$0x1] %vm63_vm10, %v62_v44   ;;  %v128_v46 = vpop.permute.xlu2 %127   ;;  %vm159_vm10 = vcmask 228544  }
  0x8e   :  { %70 = vst.msk [vmem:[#allocation0] sm:$0x1] %vm69_vm11, %v68_v45   ;;  %vm165_vm11 = vcmask 195744  }
  0x8f   :  { %76 = vst.msk [vmem:[#allocation0] sm:$0x1] %vm75_vm12, %v74_v37   ;;  %vm171_vm12 = vcmask 162944  }
  0x94   :  { %v80_v47 = vpop.permute.xlu0 %79   ;;  %v86_v48 = vpop.permute.xlu1 %85  }
  0x95   :  { %82 = vst.msk [vmem:[#allocation0] sm:$0x1] %vm81_vm13, %v80_v47   ;;  %v146_v49 = vpop.permute.xlu2 %145   ;;  %vm177_vm13 = vcmask 130144  }
  0x96   :  { %88 = vst.msk [vmem:[#allocation0] sm:$0x1] %vm87_vm14, %v86_v48   ;;  %vm183_vm14 = vcmask 97344  }
  0x97   :  { %94 = vst.msk [vmem:[#allocation0] sm:$0x1] %vm93_vm15, %v92_v40   ;;  %vm189_vm15 = vcmask 64544  }
  0x9c   :  { %v98_v50 = vpop.permute.xlu0 %97   ;;  %v104_v51 = vpop.permute.xlu1 %103  }
  0x9d   :  { %100 = vst.msk [vmem:[#allocation0] sm:$0x1] %vm99_vm0, %v98_v50   ;;  %v164_v52 = vpop.permute.xlu2 %163  }
  0x9e   :  { %106 = vst.msk [vmem:[#allocation0] sm:$0x1] %vm105_vm1, %v104_v51  }
  0x9f   :  { %112 = vst.msk [vmem:[#allocation0] sm:$0x1] %vm111_vm2, %v110_v43  }
  0xa4   :  { %v116_v53 = vpop.permute.xlu0 %115   ;;  %v122_v54 = vpop.permute.xlu1 %121  }
  0xa5   :  { %118 = vst.msk [vmem:[#allocation0] sm:$0x1] %vm117_vm3, %v116_v53   ;;  %v182_v55 = vpop.permute.xlu2 %181  }
  0xa6   :  { %124 = vst.msk [vmem:[#allocation0] sm:$0x1] %vm123_vm4, %v122_v54  }
  0xa7   :  { %130 = vst.msk [vmem:[#allocation0] sm:$0x1] %vm129_vm5, %v128_v46  }
  0xac   :  { %v134_v56 = vpop.permute.xlu0 %133   ;;  %v140_v57 = vpop.permute.xlu1 %139  }
  0xad   :  { %136 = vst.msk [vmem:[#allocation0] sm:$0x1] %vm135_vm6, %v134_v56  }
  0xae   :  { %142 = vst.msk [vmem:[#allocation0] sm:$0x1] %vm141_vm7, %v140_v57  }
  0xaf   :  { %148 = vst.msk [vmem:[#allocation0] sm:$0x1] %vm147_vm8, %v146_v49  }
  0xb4   :  { %v152_v58 = vpop.permute.xlu0 %151   ;;  %v158_v59 = vpop.permute.xlu1 %157  }
  0xb5   :  { %154 = vst.msk [vmem:[#allocation0] sm:$0x1] %vm153_vm9, %v152_v58  }
  0xb6   :  { %160 = vst.msk [vmem:[#allocation0] sm:$0x1] %vm159_vm10, %v158_v59  }
  0xb7   :  { %166 = vst.msk [vmem:[#allocation0] sm:$0x1] %vm165_vm11, %v164_v52  }
  0xbc   :  { %v170_v60 = vpop.permute.xlu0 %169   ;;  %v176_v61 = vpop.permute.xlu1 %175  }
  0xbd   :  { %172 = vst.msk [vmem:[#allocation0] sm:$0x1] %vm171_vm12, %v170_v60  }
  0xbe   :  { %178 = vst.msk [vmem:[#allocation0] sm:$0x1] %vm177_vm13, %v176_v61  }
  0xbf   :  { %184 = vst.msk [vmem:[#allocation0] sm:$0x1] %vm183_vm14, %v182_v55  }
  0xc4   :  { %v188_v62 = vpop.permute.xlu0 %187  }
  0xc5   :  { %190 = vst.msk [vmem:[#allocation0] sm:$0x1] %vm189_vm15, %v188_v62  }
  0xcc   :  { %v193_v63 = vld [vmem:[#allocation0] sm:$0x1] }
  0xcd   :  { %196 = vst [vmem:[%s400_s1] sm:$0x1] %v193_v63 }

// kernel: residual_forward.5
= control target key start
LH: loop header
LB: loop body
LE: loop exit
PB: predicated region body
PF: predicated region fallthrough
CT: control target
= control target key end

     0   :  { %s314_s15 = smov 0   ;;  %s358_s0 = inlined_call_operand.vmem [shape: f32[2,8,128], index: 0, kind: input, shape index: {}]   ;;  %s359_s1 = inlined_call_operand.vmem [shape: f32[2,8,128], index: 1, kind: input, shape index: {}]   ;;  %s360_s2 = inlined_call_operand.vmem [shape: f32[1,1,128], index: 2, kind: input, shape index: {}]   ;;  %s361_s3 = inlined_call_operand.vmem [shape: f32[1,1,128], index: 3, kind: input, shape index: {}]   ;;  %s362_s4 = inlined_call_operand.vmem [shape: f32[2,8,128], index: 4, kind: output, shape index: {}]  }
   0x1 LB: > { %s290_s16 = sadd.s32 4294967295, %s316_s15   ;;  %p294_p0 = scmp.ge.s32.totalorder %s316_s15, 1  ;;  %s316_s15 = sphi %s314_s15, %s14_s15  }
   0x2   : > { %p170_p1 = scmp.lt.s32.totalorder %s316_s15, 3 }
   0x4   : > { %p171_p2 = pnand %p294_p0, %p170_p1 }
   0x5   : > { %p198_p3 = scmp.lt.s32.totalorder (!%p171_p2), %s290_s16, 1 }
   0x6   : > { %174 = sbr.rel (%p171_p2) target bundleno = 24 (0x18), region = 36 }
   0xb   : > { %s364_s16 = smov (!%p198_p3, %s290_s16), 1  ;;  %v308_v0 = vld [vmem:[%s360_s2] ss:$0 sm:$0xff] }
   0xc   : > { %s295_s19 = sshll.u32 %s364_s16, 3  ;;  %v309_v1 = vld [vmem:[%s361_s3] ss:$0 sm:$0xff] }
   0xd   : > { %s201_s22 = scalar_lea.vmem %s358_s0, %s295_s19  ;;  %s205_s25 = scalar_lea.vmem %s359_s1, %s295_s19 }
   0xe   : > { %v210_v2 = vld [vmem:[%s201_s22] sm:$0xff]  ;;  %s209_s30 = scalar_lea.vmem %s362_s4, %s295_s19 }
   0xf   : > { %v215_v3 = vmul.f32 %v308_v0, %v210_v2  ;;  %v221_v4 = vld [vmem:[%s205_s25] sm:$0xff] }
  0x11   : > { %v220_v5 = vadd.f32 %v309_v1, %v215_v3 }
  0x13   : > { %v222_v6 = vadd.f32 %v221_v4, %v220_v5 }
  0x15   : > { %v223_v7 = vmax.f32 %v222_v6, 0.0 }
  0x17   : > { %224 = vst [vmem:[%s209_s30] sm:$0xff] %v223_v7 }
  0x18 PF: > { %s14_s15 = sadd.s32 1, %s316_s15  }
  0x19   : > { %p11_p4 = scmp.ge.s32.totalorder %s14_s15, 4  }
  0x1b   :  { %13 = sbr.rel (!%p11_p4) target bundleno = 1 (0x1), region = 69 }

// kernel: residual_forward.3
= control target key start
LH: loop header
LB: loop body
LE: loop exit
PB: predicated region body
PF: predicated region fallthrough
CT: control target
= control target key end

     0   :  { %s3302_s12 = smov 0   ;;  %s4703_s0 = inlined_call_operand.vmem [shape: f32[2,16,16,4], index: 0, kind: input, shape index: {}]   ;;  %s4704_s1 = inlined_call_operand.vmem [shape: f32[3,3,4,4], index: 1, kind: input, shape index: {}]   ;;  %s4705_s2 = inlined_call_operand.vmem [shape: f32[2,16,16,4], index: 2, kind: output, shape index: {0}]   ;;  %s4706_s3 = inlined_call_operand.vmem [shape: f32[2,2,4], index: 3, kind: output, shape index: {1}]  }
   0x1 LB: > { %s2924_s13 = sadd.s32 4294967295, %s3279_s12   ;;  %p2928_p0 = scmp.ge.s32.totalorder %s3279_s12, 1  ;;  %s3279_s12 = sphi %s3302_s12, %s14_s12  }
   0x2   : > { %p140_p1 = scmp.lt.s32.totalorder %s3279_s12, 3 }
   0x4   : > { %p141_p2 = pnand %p2928_p0, %p140_p1 }
   0x6   : > { %144 = sbr.rel (%p141_p2) target bundleno = 722 (0x2d2), region = 28 }
   0xb   : > { %v2935_v0 = vld [vmem:[%s4704_s1 + $0x10] sm:$0xf]  ;;  %vm541_vm0 = vcmask 1043456   ;;  %v3036_v1 = vld [vmem:[%s4704_s1 + $0x4] sm:$0xf]  ;;  %p168_p3 = scmp.lt.s32.totalorder %s2924_s13, 1 }
   0xc   : > { %2936 = vmatpush.msk.msra.mxu0 %vm541_vm0, %v2935_v0  ;;  %3261 = vmatpush.msk.msra.mxu1 %vm541_vm0, %v2935_v0  ;;  %v3002_v2 = vld [vmem:[%s4704_s1 + $0x14] sm:$0xf]  ;;  %v1206_v3 = vld [vmem:[%s4704_s1] sm:$0xf]  ;;  %v2934_v4 = vld [vmem:[%s4704_s1 + $0xc] sm:$0xf] }
   0xd   : > { %3262 = vmatpush.msk.msra.mxu2 %vm541_vm0, %v2935_v0  ;;  %3263 = vmatpush.msk.msra.mxu3 %vm541_vm0, %v3036_v1  ;;  %s4867_s13 = smov (!%p168_p3, %s2924_s13), 1  ;;  %vm214_vm1 = vcmask 31744   ;;  %vm248_vm2 = vcmask 24576   ;;  %v3281_v21 = vmov 0.0   ;;  %v3161_v23 = vld [vmem:[%s4704_s1 + $0x18] sm:$0xf] }
   0xe   : > { %s3259_s24 = sshll.u32 %s4867_s13, 8  ;;  %2969 = vmatpush.msk.msrb.mxu1 %vm541_vm0, %v2934_v4  ;;  %3037 = vmatpush.msk.msrb.mxu0 %vm541_vm0, %v3036_v1  ;;  %249 = vst.msk [vmem:[#allocation2] sm:$0x1] %vm248_vm2, %v3281_v21  ;;  %v3162_v24 = vld [vmem:[%s4704_s1 + $0x1c] sm:$0xf]  ;;  %vm216_vm3 = vcmask 30720  }
   0xf   : > { %3003 = vmatpush.msk.msrb.mxu2 %vm541_vm0, %v3002_v2  ;;  %3068 = vmatpush.msk.msrb.mxu3 %vm541_vm0, %v1206_v3  ;;  %s3341_s27 = scalar_lea.vmem %s4703_s0, %s3259_s24  ;;  %250 = vst.msk [vmem:[#allocation2 + $0x10] sm:$0x1] %vm248_vm2, %v3281_v21  ;;  %v3225_v28 = vld [vmem:[%s4704_s1 + $0x20] sm:$0xf]  ;;  %s4351_s11 = scalar_lea.vmem %s4705_s2, %s3259_s24 }
  0x10   : > { %v3344_v5 = vld [vmem:[%s3341_s27] sm:$0xff]  ;;  %v395_v6 = vld [vmem:[%s3341_s27 + $0x90] sm:$0xff]  ;;  %v3348_v7 = vld [vmem:[%s3341_s27 + $0xc8] sm:$0xff]  ;;  %251 = vst.msk [vmem:[#allocation2 + $0x20] sm:$0x1] %vm248_vm2, %v3281_v21  ;;  %s2933_s14 = sshll.u32 %s4867_s13, 1 }
  0x11   : > { %2937 = vmatmul.msk.f32.vlgmr.msra.gmra.mxu0 %vm214_vm1, %v3344_v5  ;;  %2955 = vmatmul.msk.f32.vlgmr.msra.gmra.mxu1 %vm214_vm1, %v395_v6  ;;  %v1167_v8 = vld [vmem:[%s3341_s27 + $0xa8] sm:$0xff]  ;;  %215 = vst.msk [vmem:[#allocation2 + $0x1] sm:$0xff] %vm214_vm1, %v3344_v5  ;;  %v3360_v9 = vld [vmem:[%s3341_s27 + $0x10] sm:$0xff]  ;;  %v397_v10 = vld [vmem:[%s3341_s27 + $0xa0] sm:$0xff]  ;;  %s181_s17 = scalar_lea.vmem %s4706_s3, %s2933_s14 }
  0x12   : > { %2962 = vmatmul.msk.f32.vlgmr.msra.gmra.mxu2 %vm214_vm1, %v3348_v7  ;;  %3059 = vmatmul.msk.f32.vlgmr.msra.gmra.mxu3 %vm214_vm1, %v1167_v8  ;;  %234 = vst.msk [vmem:[#allocation2 + $0x91] sm:$0xff] %vm214_vm1, %v395_v6  ;;  %v1168_v11 = vld [vmem:[%s3341_s27 + $0xb0] sm:$0xff]  ;;  %v3369_v12 = vld [vmem:[%s3341_s27 + $0x20] sm:$0xff]  ;;  %v3373_v13 = vld [vmem:[%s3341_s27 + $0x8] sm:$0xff] }
  0x13   : > { %218 = vst.msk [vmem:[#allocation2 + $0x11] sm:$0xff] %vm214_vm1, %v3360_v9  ;;  %v396_v14 = vld [vmem:[%s3341_s27 + $0x98] sm:$0xff]  ;;  %v3377_v15 = vld [vmem:[%s3341_s27 + $0xc0] sm:$0xff]  ;;  %v403_v16 = vld [vmem:[%s3341_s27 + $0xd0] sm:$0xff]  ;;  %3194 = vmatpush.msk.msra.mxu2 %vm541_vm0, %v3161_v23  ;;  %3163 = vmatpush.msk.msra.mxu1 %vm541_vm0, %v3162_v24 }
  0x14   : > { %236 = vst.msk [vmem:[#allocation2 + $0xa1] sm:$0xff] %vm214_vm1, %v397_v10  ;;  %v3385_v17 = vld [vmem:[%s3341_s27 + $0xe0] sm:$0xff]  ;;  %v3396_v18 = vld [vmem:[%s3341_s27 + $0x30] sm:$0xff]  ;;  %v3401_v19 = vld [vmem:[%s3341_s27 + $0xd8] sm:$0xff]  ;;  %3226 = vmatpush.msk.msra.mxu3 %vm541_vm0, %v3225_v28 }
  0x15   : > { %238 = vst.msk [vmem:[#allocation2 + $0xb1] sm:$0xff] %vm214_vm1, %v1168_v11  ;;  %v1169_v20 = vld [vmem:[%s3341_s27 + $0xb8] sm:$0xff]  ;;  %v3442_v25 = vld [vmem:[%s3341_s27 + $0xe8] sm:$0xff]  ;;  %v407_v27 = vld [vmem:[%s3341_s27 + $0xf0] sm:$0xff] }
  0x16   : > { %220 = vst.msk [vmem:[#allocation2 + $0x21] sm:$0xff] %vm214_vm1, %v3369_v12  ;;  %v3415_v22 = vld [vmem:[%s3341_s27 + $0x18] sm:$0xff]  ;;  %v3459_v26 = vld [vmem:[%s3341_s27 + $0x28] sm:$0xff]  ;;  %v3508_v39 = vld [vmem:[%s3341_s27 + $0x40] sm:$0xff] }
  0x17   : > { %240 = vst.msk [vmem:[#allocation2 + $0xc1] sm:$0xff] %vm214_vm1, %v3377_v15  ;;  %v408_v29 = vld [vmem:[%s3341_s27 + $0xf8] sm:$0xff]  ;;  %v265_v30 = vld [vmem:[%s3341_s27 + $0x1] sm:$0xff]  ;;  %v266_v32 = vld [vmem:[%s3341_s27 + $0x9] sm:$0x7f] }
  0x18   : > { %242 = vst.msk [vmem:[#allocation2 + $0xd1] sm:$0xff] %vm214_vm1, %v403_v16  ;;  %v183_v31 = vld [vmem:[%s3341_s27 + $0x8] sm:$0x7f]  ;;  %v267_v33 = vld [vmem:[%s3341_s27 + $0x11] sm:$0xff]  ;;  %v268_v35 = vld [vmem:[%s3341_s27 + $0x19] sm:$0x7f] }
  0x19   : > { %2938 = vmatmul.msk.f32.gmra.mxu0 %vm214_vm1, %v3373_v13  ;;  %2956 = vmatmul.msk.f32.gmra.mxu1 %vm214_vm1, %v396_v14  ;;  %244 = vst.msk [vmem:[#allocation2 + $0xe1] sm:$0xff] %vm214_vm1, %v3385_v17  ;;  %v185_v34 = vld [vmem:[%s3341_s27 + $0x18] sm:$0x7f]  ;;  %v269_v36 = vld [vmem:[%s3341_s27 + $0x21] sm:$0xff]  ;;  %v270_v42 = vld [vmem:[%s3341_s27 + $0x29] sm:$0x7f] }
  0x1a   : > { %2963 = vmatmul.msk.f32.gmra.mxu2 %vm214_vm1, %v403_v16  ;;  %3060 = vmatmul.msk.f32.gmra.mxu3 %vm214_vm1, %v1168_v11  ;;  %222 = vst.msk [vmem:[#allocation2 + $0x31] sm:$0xff] %vm214_vm1, %v3396_v18  ;;  %v3503_v37 = vld [vmem:[%s3341_s27 + $0x38] sm:$0xff]  ;;  %v345_v38 = vld [vmem:[#allocation2] sm:$0xff]  ;;  %v187_v41 = vld [vmem:[%s3341_s27 + $0x28] sm:$0x7f] }
  0x1b   : > { %252 = vst.msk [vmem:[#allocation2 + $0x30] sm:$0x1] %vm248_vm2, %v3281_v21  ;;  %v3523_v43 = vld [vmem:[%s3341_s27 + $0x50] sm:$0xff]  ;;  %v3527_v44 = vld [vmem:[%s3341_s27 + $0x60] sm:$0xff]  ;;  %v3542_v48 = vld [vmem:[%s3341_s27 + $0x48] sm:$0xff] }
  0x1c   : > { %253 = vst.msk [vmem:[#allocation2 + $0x40] sm:$0x1] %vm248_vm2, %v3281_v21  ;;  %v271_v47 = vld [vmem:[%s3341_s27 + $0x31] sm:$0xff]  ;;  %v272_v52 = vld [vmem:[%s3341_s27 + $0x39] sm:$0x7f]  ;;  %v273_v56 = vld [vmem:[%s3341_s27 + $0x41] sm:$0xff] }
  0x1d   : > { %254 = vst.msk [vmem:[#allocation2 + $0x50] sm:$0x1] %vm248_vm2, %v3281_v21  ;;  %v3544_v49 = vld [vmem:[#allocation2 + $0x10] sm:$0xff]  ;;  %v189_v51 = vld [vmem:[%s3341_s27 + $0x38] sm:$0x7f]  ;;  %v3580_v58 = vld [vmem:[#allocation2 + $0x20] sm:$0xff] }
  0x1e   : > { %255 = vst.msk [vmem:[#allocation2 + $0x60] sm:$0x1] %vm248_vm2, %v3281_v21  ;;  %v3559_v53 = vld [vmem:[%s3341_s27 + $0x70] sm:$0xff]  ;;  %v3578_v57 = vld [vmem:[%s3341_s27 + $0x58] sm:$0xff]  ;;  %v191_v60 = vld [vmem:[%s3341_s27 + $0x48] sm:$0x7f] }
  0x1f   : > { %256 = vst.msk [vmem:[#allocation2 + $0x70] sm:$0x1] %vm248_vm2, %v3281_v21  ;;  %v274_v61 = vld [vmem:[%s3341_s27 + $0x49] sm:$0x7f]  ;;  %v3599_v63 = vld [vmem:[%s3341_s27 + $0x80] sm:$0xff]  ;;  %v275_v1 = vld [vmem:[%s3341_s27 + $0x51] sm:$0xff] }
  0x20   : > { %257 = vst.msk [vmem:[#allocation2 + $0x80] sm:$0x1] %vm248_vm2, %v3281_v21  ;;  %v3616_v2 = vld [vmem:[%s3341_s27 + $0x68] sm:$0xff]  ;;  %v193_v6 = vld [vmem:[%s3341_s27 + $0x58] sm:$0x7f] }
  0x21   : > { %2939 = vmatmul.msk.f32.gmra.mxu0 %vm214_vm1, %v3360_v9  ;;  %2957 = vmatmul.msk.f32.gmra.mxu1 %vm214_vm1, %v397_v10  ;;  %258 = vst.msk [vmem:[#allocation2 + $0x90] sm:$0x1] %vm248_vm2, %v3281_v21  ;;  %v3649_v14 = vld [vmem:[%s3341_s27 + $0x78] sm:$0xff] }
  0x22   : > { %2964 = vmatmul.msk.f32.gmra.mxu2 %vm214_vm1, %v3401_v19  ;;  %3061 = vmatmul.msk.f32.gmra.mxu3 %vm214_vm1, %v1169_v20  ;;  %259 = vst.msk [vmem:[#allocation2 + $0xa0] sm:$0x1] %vm248_vm2, %v3281_v21  ;;  %v3618_v3 = vld [vmem:[#allocation2 + $0x30] sm:$0xff] }
  0x23   : > { %260 = vst.msk [vmem:[#allocation2 + $0xb0] sm:$0x1] %vm248_vm2, %v3281_v21 }
  0x24   : > { %261 = vst.msk [vmem:[#allocation2 + $0xc0] sm:$0x1] %vm248_vm2, %v3281_v21 }
  0x25   : > { %262 = vst.msk [vmem:[#allocation2 + $0xd0] sm:$0x1] %vm248_vm2, %v3281_v21 }
  0x26   : > { %263 = vst.msk [vmem:[#allocation2 + $0xe0] sm:$0x1] %vm248_vm2, %v3281_v21 }
  0x27   : > { %264 = vst.msk [vmem:[#allocation2 + $0xf0] sm:$0x1] %vm248_vm2, %v3281_v21 }
  0x28   : > { %329 = vst.msk [vmem:[#allocation3 + $0xf] sm:$0x1] %vm248_vm2, %v3281_v21 }
  0x29   : > { %2940 = vmatmul.msk.f32.gmra.mxu0 %vm214_vm1, %v3415_v22  ;;  %2958 = vmatmul.msk.f32.gmra.mxu1 %vm214_vm1, %v1167_v8  ;;  %330 = vst.msk [vmem:[#allocation3 + $0x1f] sm:$0x1] %vm248_vm2, %v3281_v21 }
  0x2a   : > { %2965 = vmatmul.msk.f32.gmra.mxu2 %vm214_vm1, %v3385_v17  ;;  %3062 = vmatmul.msk.f32.gmra.mxu3 %vm214_vm1, %v3377_v15  ;;  %331 = vst.msk [vmem:[#allocation3 + $0x2f] sm:$0x1] %vm248_vm2, %v3281_v21 }
  0x2b   : > { %332 = vst.msk [vmem:[#allocation3 + $0x3f] sm:$0x1] %vm248_vm2, %v3281_v21 }
  0x2c   : > { %333 = vst.msk [vmem:[#allocation3 + $0x4f] sm:$0x1] %vm248_vm2, %v3281_v21 }
  0x2d   : > { %334 = vst.msk [vmem:[#allocation3 + $0x5f] sm:$0x1] %vm248_vm2, %v3281_v21 }
  0x2e   : > { %335 = vst.msk [vmem:[#allocation3 + $0x6f] sm:$0x1] %vm248_vm2, %v3281_v21 }
  0x2f   : > { %336 = vst.msk [vmem:[#allocation3 + $0x7f] sm:$0x1] %vm248_vm2, %v3281_v21 }
  0x30   : > { %337 = vst.msk [vmem:[#allocation3 + $0x8f] sm:$0x1] %vm248_vm2, %v3281_v21 }
  0x31   : > { %2941 = vmatmul.msk.f32.gmra.mxu0 %vm214_vm1, %v3369_v12  ;;  %2959 = vmatmul.msk.f32.gmra.mxu1 %vm214_vm1, %v1168_v11  ;;  %338 = vst.msk [vmem:[#allocation3 + $0x9f] sm:$0x1] %vm248_vm2, %v3281_v21  ;;  %v277_v11 = vld [vmem:[%s3341_s27 + $0x61] sm:$0xff] }
  0x32   : > { %2966 = vmatmul.msk.f32.gmra.mxu2 %vm214_vm1, %v3442_v25  ;;  %3063 = vmatmul.msk.f32.gmra.mxu3 %vm214_vm1, %v3348_v7  ;;  %339 = vst.msk [vmem:[#allocation3 + $0xaf] sm:$0x1] %vm248_vm2, %v3281_v21  ;;  %v276_v7 = vld [vmem:[%s3341_s27 + $0x59] sm:$0x7f] }
  0x33   : > { %340 = vst.msk [vmem:[#allocation3 + $0xbf] sm:$0x1] %vm248_vm2, %v3281_v21 }
  0x34   : > { %341 = vst.msk [vmem:[#allocation3 + $0xcf] sm:$0x1] %vm248_vm2, %v3281_v21 }
  0x35   : > { %342 = vst.msk [vmem:[#allocation3 + $0xdf] sm:$0x1] %vm248_vm2, %v3281_v21 }
  0x36   : > { %343 = vst.msk [vmem:[#allocation3 + $0xef] sm:$0x1] %vm248_vm2, %v3281_v21 }
  0x37   : > { %344 = vst.msk [vmem:[#allocation3 + $0xff] sm:$0x1] %vm248_vm2, %v3281_v21 }
  0x38   : > { %297 = vst.msk [vmem:[#allocation3] sm:$0xff] %vm214_vm1, %v265_v30 }
  0x39   : > { %2942 = vmatmul.msk.f32.gmra.mxu0 %vm214_vm1, %v3459_v26  ;;  %2960 = vmatmul.msk.f32.gmra.mxu1 %vm214_vm1, %v1169_v20  ;;  %217 = vst.msk [vmem:[#allocation2 + $0x9] sm:$0x7f] %vm216_vm3, %v183_v31  ;;  %v3099_v20 = vld [vmem:[%s4704_s1 + $0x8] sm:$0xf] }
  0x3a   : > { %2967 = vmatmul.msk.f32.gmra.mxu2 %vm214_vm1, %v407_v27  ;;  %3064 = vmatmul.msk.f32.gmra.mxu3 %vm214_vm1, %v403_v16  ;;  %298 = vst.msk [vmem:[#allocation3 + $0x8] sm:$0x7f] %vm216_vm3, %v266_v32  ;;  %v279_v27 = vld [vmem:[%s3341_s27 + $0x71] sm:$0xff]  ;;  %v3698_v32 = vld [vmem:[%s3341_s27 + $0x88] sm:$0xff] }
  0x3b   : > { %299 = vst.msk [vmem:[#allocation3 + $0x10] sm:$0xff] %vm214_vm1, %v267_v33  ;;  %3100 = vmatpush.msk.msra.mxu0 %vm541_vm0, %v3099_v20 }
  0x3c   : > { %219 = vst.msk [vmem:[#allocation2 + $0x19] sm:$0x7f] %vm216_vm3, %v185_v34 }
  0x3d   : > { %300 = vst.msk [vmem:[#allocation3 + $0x18] sm:$0x7f] %vm216_vm3, %v268_v35  ;;  %v197_v35 = vld [vmem:[%s3341_s27 + $0x78] sm:$0x7f] }
  0x3e   : > { %301 = vst.msk [vmem:[#allocation3 + $0x20] sm:$0xff] %vm214_vm1, %v269_v36  ;;  %v280_v36 = vld [vmem:[%s3341_s27 + $0x79] sm:$0x7f] }
  0x3f   : > { %v409_v40 = vld [vmem:[#allocation3] sm:$0xff]  ;;  %224 = vst.msk [vmem:[#allocation2 + $0x41] sm:$0xff] %vm214_vm1, %v3508_v39 }
  0x40   : > { %221 = vst.msk [vmem:[#allocation2 + $0x29] sm:$0x7f] %vm216_vm3, %v187_v41  ;;  %v346_v45 = vld [vmem:[#allocation2 + $0x8] sm:$0xff] }
  0x41   : > { %2943 = vmatmul.msk.f32.gmra.mxu0 %vm214_vm1, %v3396_v18  ;;  %2961 = vmatmul.msk.f32.gmra.mxu1 %vm214_vm1, %v3377_v15  ;;  %302 = vst.msk [vmem:[#allocation3 + $0x28] sm:$0x7f] %vm216_vm3, %v270_v42  ;;  %v410_v46 = vld [vmem:[#allocation3 + $0x8] sm:$0xff] }
  0x42   : > { %2968 = vmatmul.msk.f32.gmra.mxu2 %vm214_vm1, %v408_v29  ;;  %3065 = vmatmul.msk.f32.gmra.mxu3 %vm214_vm1, %v3401_v19  ;;  %226 = vst.msk [vmem:[#allocation2 + $0x51] sm:$0xff] %vm214_vm1, %v3523_v43  ;;  %v3546_v50 = vld [vmem:[#allocation3 + $0x10] sm:$0xff]  ;;  %v278_v19 = vld [vmem:[%s3341_s27 + $0x69] sm:$0x7f] }
  0x43   : > { %228 = vst.msk [vmem:[#allocation2 + $0x61] sm:$0xff] %vm214_vm1, %v3527_v44  ;;  %v3564_v54 = vld [vmem:[#allocation2 + $0x18] sm:$0xff] }
  0x44   : > { %303 = vst.msk [vmem:[#allocation3 + $0x30] sm:$0xff] %vm214_vm1, %v271_v47  ;;  %v3566_v55 = vld [vmem:[#allocation3 + $0x18] sm:$0xff]  ;;  %v281_v47 = vld [vmem:[%s3341_s27 + $0x81] sm:$0xff] }
  0x45   : > { %223 = vst.msk [vmem:[#allocation2 + $0x39] sm:$0x7f] %vm216_vm3, %v189_v51  ;;  %v3582_v59 = vld [vmem:[#allocation3 + $0x20] sm:$0xff] }
  0x46   : > { %304 = vst.msk [vmem:[#allocation3 + $0x38] sm:$0x7f] %vm216_vm3, %v272_v52  ;;  %v3651_v15 = vld [vmem:[#allocation2 + $0x40] sm:$0xff] }
  0x47   : > { %230 = vst.msk [vmem:[#allocation2 + $0x71] sm:$0xff] %vm214_vm1, %v3559_v53  ;;  %v3596_v62 = vld [vmem:[#allocation2 + $0x28] sm:$0xff] }
  0x48   : > { %305 = vst.msk [vmem:[#allocation3 + $0x40] sm:$0xff] %vm214_vm1, %v273_v56  ;;  %v3601_v0 = vld [vmem:[#allocation3 + $0x28] sm:$0xff] }
  0x49   : > { %2944 = vmatmul.msk.f32.gmra.mxu0 %vm214_vm1, %v3503_v37  ;;  %2970 = vmatmul.msk.f32.vlgmr.msrb.gmra.mxu1 %vm214_vm1, %v345_v38  ;;  %225 = vst.msk [vmem:[#allocation2 + $0x49] sm:$0x7f] %vm216_vm3, %v191_v60  ;;  %v3700_v33 = vld [vmem:[#allocation2 + $0x50] sm:$0xff] }
  0x4a   : > { %3004 = vmatmul.msk.f32.vlgmr.msrb.gmra.mxu2 %vm214_vm1, %v409_v40  ;;  %3066 = vmatmul.msk.f32.gmra.mxu3 %vm214_vm1, %v3385_v17  ;;  %306 = vst.msk [vmem:[#allocation3 + $0x48] sm:$0x7f] %vm216_vm3, %v274_v61  ;;  %v195_v17 = vld [vmem:[%s3341_s27 + $0x68] sm:$0x7f]  ;;  %v357_v61 = vld [vmem:[#allocation2 + $0x60] sm:$0xff] }
  0x4b   : > { %232 = vst.msk [vmem:[#allocation2 + $0x81] sm:$0xff] %vm214_vm1, %v3599_v63  ;;  %v3620_v4 = vld [vmem:[#allocation3 + $0x30] sm:$0xff] }
  0x4c   : > { %307 = vst.msk [vmem:[#allocation3 + $0x50] sm:$0xff] %vm214_vm1, %v275_v1  ;;  %v3634_v8 = vld [vmem:[#allocation2 + $0x38] sm:$0xff] }
  0x4d   : > { %227 = vst.msk [vmem:[#allocation2 + $0x59] sm:$0x7f] %vm216_vm3, %v193_v6  ;;  %v3636_v10 = vld [vmem:[#allocation3 + $0x38] sm:$0xff]  ;;  %v282_v6 = vld [vmem:[%s3341_s27 + $0x89] sm:$0x7f] }
  0x4e   : > { %308 = vst.msk [vmem:[#allocation3 + $0x58] sm:$0x7f] %vm216_vm3, %v276_v7 }
  0x4f   : > { %309 = vst.msk [vmem:[#allocation3 + $0x60] sm:$0xff] %vm214_vm1, %v277_v11  ;;  %v3653_v16 = vld [vmem:[#allocation3 + $0x40] sm:$0xff] }
  0x50   : > { %229 = vst.msk [vmem:[#allocation2 + $0x69] sm:$0x7f] %vm216_vm3, %v195_v17  ;;  %v3674_v24 = vld [vmem:[#allocation2 + $0x48] sm:$0xff] }
  0x51   : > { %2945 = vmatmul.msk.f32.gmra.mxu0 %vm214_vm1, %v3508_v39  ;;  %2971 = vmatmul.msk.f32.gmra.mxu1 %vm214_vm1, %v346_v45  ;;  %310 = vst.msk [vmem:[#allocation3 + $0x68] sm:$0x7f] %vm216_vm3, %v278_v19 }
  0x52   : > { %3005 = vmatmul.msk.f32.gmra.mxu2 %vm214_vm1, %v410_v46  ;;  %3067 = vmatmul.msk.f32.gmra.mxu3 %vm214_vm1, %v3442_v25  ;;  %v3677_v25 = vld [vmem:[#allocation3 + $0x48] sm:$0xff]  ;;  %311 = vst.msk [vmem:[#allocation3 + $0x70] sm:$0xff] %vm214_vm1, %v279_v27  ;;  %v283_v27 = vld [vmem:[%s3341_s27 + $0x91] sm:$0xff] }
  0x53   : > { %v3702_v34 = vld [vmem:[#allocation3 + $0x50] sm:$0xff]  ;;  %231 = vst.msk [vmem:[#allocation2 + $0x79] sm:$0x7f] %vm216_vm3, %v197_v35 }
  0x54   : > { %312 = vst.msk [vmem:[#allocation3 + $0x78] sm:$0x7f] %vm216_vm3, %v280_v36 }
  0x55   : > { %v3724_v46 = vld [vmem:[#allocation3 + $0x58] sm:$0xff]  ;;  %313 = vst.msk [vmem:[#allocation3 + $0x80] sm:$0xff] %vm214_vm1, %v281_v47 }
  0x56   : > { %v3743_v1 = vld [vmem:[#allocation3 + $0x60] sm:$0xff]  ;;  %314 = vst.msk [vmem:[#allocation3 + $0x88] sm:$0x7f] %vm216_vm3, %v282_v6  ;;  %v3785_v6 = vld [vmem:[#allocation2 + $0x70] sm:$0xff] }
  0x57   : > { %315 = vst.msk [vmem:[#allocation3 + $0x90] sm:$0xff] %vm214_vm1, %v283_v27 }
  0x58   : > { %v3766_v20 = vld [vmem:[#allocation3 + $0x68] sm:$0xff] }
  0x59   : > { %2946 = vmatmul.msk.f32.gmra.mxu0 %vm214_vm1, %v3542_v48  ;;  %2972 = vmatmul.msk.f32.gmra.mxu1 %vm214_vm1, %v3544_v49 }
  0x5a   : > { %3006 = vmatmul.msk.f32.gmra.mxu2 %vm214_vm1, %v3546_v50  ;;  %3069 = vmatmul.msk.f32.vlgmr.msrb.gmra.mxu3 %vm214_vm1, %v345_v38 }
  0x61   : > { %2947 = vmatmul.msk.f32.gmra.mxu0 %vm214_vm1, %v3523_v43  ;;  %2973 = vmatmul.msk.f32.gmra.mxu1 %vm214_vm1, %v3564_v54 }
  0x62   : > { %3007 = vmatmul.msk.f32.gmra.mxu2 %vm214_vm1, %v3566_v55  ;;  %3070 = vmatmul.msk.f32.gmra.mxu3 %vm214_vm1, %v346_v45  ;;  %v356_v45 = vld [vmem:[#allocation2 + $0x58] sm:$0xff] }
  0x69   : > { %2948 = vmatmul.msk.f32.gmra.mxu0 %vm214_vm1, %v3578_v57  ;;  %2974 = vmatmul.msk.f32.gmra.mxu1 %vm214_vm1, %v3580_v58 }
  0x6a   : > { %3008 = vmatmul.msk.f32.gmra.mxu2 %vm214_vm1, %v3582_v59  ;;  %3071 = vmatmul.msk.f32.gmra.mxu3 %vm214_vm1, %v3544_v49 }
  0x71   : > { %2949 = vmatmul.msk.f32.gmra.mxu0 %vm214_vm1, %v3527_v44  ;;  %2975 = vmatmul.msk.f32.gmra.mxu1 %vm214_vm1, %v3596_v62 }
  0x72   : > { %3009 = vmatmul.msk.f32.gmra.mxu2 %vm214_vm1, %v3601_v0  ;;  %3072 = vmatmul.msk.f32.gmra.mxu3 %vm214_vm1, %v3564_v54 }
  0x79   : > { %2950 = vmatmul.msk.f32.gmra.mxu0 %vm214_vm1, %v3616_v2  ;;  %2976 = vmatmul.msk.f32.gmra.mxu1 %vm214_vm1, %v3618_v3 }
  0x7a   : > { %3010 = vmatmul.msk.f32.gmra.mxu2 %vm214_vm1, %v3620_v4  ;;  %3073 = vmatmul.msk.f32.gmra.mxu3 %vm214_vm1, %v3580_v58 }
  0x81   : > { %2951 = vmatmul.msk.f32.gmra.mxu0 %vm214_vm1, %v3559_v53  ;;  %2977 = vmatmul.msk.f32.gmra.mxu1 %vm214_vm1, %v3634_v8 }
  0x82   : > { %3011 = vmatmul.msk.f32.gmra.mxu2 %vm214_vm1, %v3636_v10  ;;  %3074 = vmatmul.msk.f32.gmra.mxu3 %vm214_vm1, %v3596_v62 }
  0x89   : > { %2952 = vmatmul.msk.f32.gmra.mxu0 %vm214_vm1, %v3649_v14  ;;  %2978 = vmatmul.msk.f32.gmra.mxu1 %vm214_vm1, %v3651_v15 }
  0x8a   : > { %3012 = vmatmul.msk.f32.gmra.mxu2 %vm214_vm1, %v3653_v16  ;;  %3075 = vmatmul.msk.f32.gmra.mxu3 %vm214_vm1, %v3618_v3 }
  0x8e   : > { %v3670_v21 = vpop.f32.mrf.mxu0  ;;  %v3672_v23 = vpop.f32.mrf.mxu1 }
  0x8f   : > { %4708 = vst [vmem:[#allocation4_spill] sm:$0xff] %v3672_v23  ;;  %v365_v23 = vld [vmem:[#allocation2 + $0xa0] sm:$0xff] }
  0x91   : > { %2953 = vmatmul.msk.f32.gmra.mxu0 %vm214_vm1, %v3599_v63  ;;  %2979 = vmatmul.msk.f32.gmra.mxu1 %vm214_vm1, %v3674_v24 }
  0x92   : > { %3013 = vmatmul.msk.f32.gmra.mxu2 %vm214_vm1, %v3677_v25  ;;  %3076 = vmatmul.msk.f32.gmra.mxu3 %vm214_vm1, %v3634_v8 }
  0x95   : > { %v3689_v28 = vpop.f32.mrf.mxu2  ;;  %v3691_v29 = vpop.f32.mrf.mxu3 }
  0x96   : > { %4709 = vst [vmem:[#allocation5_spill] sm:$0xff] %v3689_v28  ;;  %v3693_v30 = vpop.f32.mrf.mxu0  ;;  %v3695_v31 = vpop.f32.mrf.mxu1 }
  0x97   : > { %4710 = vst [vmem:[#allocation6_spill] sm:$0xff] %v3691_v29 }
  0x98   : > { %4711 = vst [vmem:[#allocation7_spill] sm:$0xff] %v3695_v31 }
  0x99   : > { %2954 = vmatmul.msk.f32.gmra.mxu0 %vm214_vm1, %v3698_v32  ;;  %2980 = vmatmul.msk.f32.gmra.mxu1 %vm214_vm1, %v3700_v33 }
  0x9a   : > { %3014 = vmatmul.msk.f32.gmra.mxu2 %vm214_vm1, %v3702_v34  ;;  %3077 = vmatmul.msk.f32.gmra.mxu3 %vm214_vm1, %v3651_v15 }
  0x9d   : > { %v3716_v38 = vpop.f32.mrf.mxu2  ;;  %v3718_v40 = vpop.f32.mrf.mxu3 }
  0x9e   : > { %4712 = vst [vmem:[#allocation8_spill] sm:$0xff] %v3716_v38  ;;  %v3720_v41 = vpop.f32.mrf.mxu0  ;;  %v3722_v42 = vpop.f32.mrf.mxu1  ;;  %v3828_v38 = vld [vmem:[#allocation2 + $0x80] sm:$0xff] }
  0x9f   : > { %4713 = vst [vmem:[#allocation9_spill] sm:$0xff] %v3718_v40 }
  0xa0   : > { %4714 = vst [vmem:[#allocation10_spill] sm:$0xff] %v3722_v42 }
  0xa1   : > { %2981 = vmatmul.msk.f32.gmra.mxu1 %vm214_vm1, %v356_v45  ;;  %3038 = vmatmul.msk.f32.vlgmr.msrb.gmra.mxu0 %vm214_vm1, %v3344_v5  ;;  %v199_v5 = vld [vmem:[%s3341_s27 + $0x88] sm:$0x7f] }
  0xa2   : > { %3015 = vmatmul.msk.f32.gmra.mxu2 %vm214_vm1, %v3724_v46  ;;  %3078 = vmatmul.msk.f32.gmra.mxu3 %vm214_vm1, %v3674_v24  ;;  %233 = vst.msk [vmem:[#allocation2 + $0x89] sm:$0x7f] %vm216_vm3, %v199_v5 }
  0xa5   : > { %v3735_v51 = vpop.f32.mrf.mxu2  ;;  %v3737_v52 = vpop.f32.mrf.mxu3 }
  0xa6   : > { %4715 = vst [vmem:[#allocation11_spill] sm:$0xff] %v3735_v51  ;;  %v3739_v56 = vpop.f32.mrf.mxu0  ;;  %v3741_v60 = vpop.f32.mrf.mxu1 }
  0xa7   : > { %4716 = vst [vmem:[#allocation12_spill] sm:$0xff] %v3737_v52  ;;  %v3830_v52 = vld [vmem:[#allocation3 + $0x80] sm:$0xff] }
  0xa8   : > { %4717 = vst [vmem:[#allocation13_spill] sm:$0xff] %v3741_v60 }
  0xa9   : > { %2982 = vmatmul.msk.f32.gmra.mxu1 %vm214_vm1, %v357_v61  ;;  %3039 = vmatmul.msk.f32.gmra.mxu0 %vm214_vm1, %v3373_v13  ;;  %v3764_v13 = vld [vmem:[#allocation2 + $0x68] sm:$0xff] }
  0xaa   : > { %3016 = vmatmul.msk.f32.gmra.mxu2 %vm214_vm1, %v3743_v1  ;;  %3079 = vmatmul.msk.f32.gmra.mxu3 %vm214_vm1, %v3700_v33  ;;  %v3851_v29 = vld [vmem:[#allocation2 + $0x88] sm:$0xff] }
  0xad   : > { %v3756_v7 = vpop.f32.mrf.mxu2  ;;  %v3758_v11 = vpop.f32.mrf.mxu3 }
  0xae   : > { %4718 = vst [vmem:[#allocation14_spill] sm:$0xff] %v3756_v7  ;;  %v3760_v17 = vpop.f32.mrf.mxu0  ;;  %v3762_v19 = vpop.f32.mrf.mxu1  ;;  %v3787_v7 = vld [vmem:[#allocation3 + $0x70] sm:$0xff] }
  0xaf   : > { %4719 = vst [vmem:[#allocation15_spill] sm:$0xff] %v3758_v11  ;;  %v3810_v11 = vld [vmem:[#allocation3 + $0x78] sm:$0xff] }
  0xb0   : > { %4720 = vst [vmem:[#allocation16_spill] sm:$0xff] %v3762_v19  ;;  %v3874_v19 = vld [vmem:[#allocation3 + $0x90] sm:$0xff] }
  0xb1   : > { %2983 = vmatmul.msk.f32.gmra.mxu1 %vm214_vm1, %v3764_v13  ;;  %3040 = vmatmul.msk.f32.gmra.mxu0 %vm214_vm1, %v3360_v9  ;;  %v201_v9 = vld [vmem:[%s3341_s27 + $0x98] sm:$0x7f] }
  0xb2   : > { %3017 = vmatmul.msk.f32.gmra.mxu2 %vm214_vm1, %v3766_v20  ;;  %3080 = vmatmul.msk.f32.gmra.mxu3 %vm214_vm1, %v356_v45  ;;  %v284_v45 = vld [vmem:[%s3341_s27 + $0x99] sm:$0x7f]  ;;  %235 = vst.msk [vmem:[#allocation2 + $0x99] sm:$0x7f] %vm216_vm3, %v201_v9 }
  0xb3   : > { %316 = vst.msk [vmem:[#allocation3 + $0x98] sm:$0x7f] %vm216_vm3, %v284_v45 }
  0xb5   : > { %v3777_v35 = vpop.f32.mrf.mxu2  ;;  %v3779_v36 = vpop.f32.mrf.mxu3 }
  0xb6   : > { %4721 = vst [vmem:[#allocation17_spill] sm:$0xff] %v3777_v35  ;;  %v3781_v47 = vpop.f32.mrf.mxu0  ;;  %v3783_v5 = vpop.f32.mrf.mxu1 }
  0xb7   : > { %4722 = vst [vmem:[#allocation18_spill] sm:$0xff] %v3779_v36 }
  0xb8   : > { %4723 = vst [vmem:[#allocation19_spill] sm:$0xff] %v3783_v5  ;;  %v3853_v5 = vld [vmem:[#allocation3 + $0x88] sm:$0xff] }
  0xb9   : > { %2984 = vmatmul.msk.f32.gmra.mxu1 %vm214_vm1, %v3785_v6  ;;  %3041 = vmatmul.msk.f32.gmra.mxu0 %vm214_vm1, %v3415_v22  ;;  %v3808_v22 = vld [vmem:[#allocation2 + $0x78] sm:$0xff] }
  0xba   : > { %3018 = vmatmul.msk.f32.gmra.mxu2 %vm214_vm1, %v3787_v7  ;;  %3081 = vmatmul.msk.f32.gmra.mxu3 %vm214_vm1, %v357_v61  ;;  %v285_v61 = vld [vmem:[%s3341_s27 + $0xa1] sm:$0xff]  ;;  %v3895_v42 = vld [vmem:[#allocation2 + $0x98] sm:$0xff] }
  0xbb   : > { %317 = vst.msk [vmem:[#allocation3 + $0xa0] sm:$0xff] %vm214_vm1, %v285_v61  ;;  %v286_v61 = vld [vmem:[%s3341_s27 + $0xa9] sm:$0x7f]  ;;  %v3897_v31 = vld [vmem:[#allocation3 + $0x98] sm:$0xff] }
  0xbc   : > { %318 = vst.msk [vmem:[#allocation3 + $0xa8] sm:$0x7f] %vm216_vm3, %v286_v61 }
  0xbd   : > { %v3800_v27 = vpop.f32.mrf.mxu2  ;;  %v3802_v35 = vpop.f32.mrf.mxu3  ;;  %4733 = vst [vmem:[#allocation29_spill] sm:$0xff] %v3897_v31 }
  0xbe   : > { %4724 = vst [vmem:[#allocation20_spill] sm:$0xff] %v3800_v27  ;;  %v3804_v36 = vpop.f32.mrf.mxu0  ;;  %v3806_v51 = vpop.f32.mrf.mxu1 }
  0xbf   : > { %4725 = vst [vmem:[#allocation21_spill] sm:$0xff] %v3802_v35 }
  0xc0   : > { %4726 = vst [vmem:[#allocation22_spill] sm:$0xff] %v3806_v51 }
  0xc1   : > { %2985 = vmatmul.msk.f32.gmra.mxu1 %vm214_vm1, %v3808_v22  ;;  %3042 = vmatmul.msk.f32.gmra.mxu0 %vm214_vm1, %v3369_v12  ;;  %v203_v12 = vld [vmem:[%s3341_s27 + $0xa8] sm:$0x7f] }
  0xc2   : > { %3019 = vmatmul.msk.f32.gmra.mxu2 %vm214_vm1, %v3810_v11  ;;  %3082 = vmatmul.msk.f32.gmra.mxu3 %vm214_vm1, %v3764_v13  ;;  %237 = vst.msk [vmem:[#allocation2 + $0xa9] sm:$0x7f] %vm216_vm3, %v203_v12 }
  0xc5   : > { %v3822_v9 = vpop.f32.mrf.mxu2  ;;  %v3824_v45 = vpop.f32.mrf.mxu3 }
  0xc6   : > { %4727 = vst [vmem:[#allocation23_spill] sm:$0xff] %v3822_v9  ;;  %v3826_v27 = vpop.f32.mrf.mxu0  ;;  %v774_v35 = vpop.f32.mrf.mxu1 }
  0xc7   : > { %4728 = vst [vmem:[#allocation24_spill] sm:$0xff] %v3824_v45  ;;  %v775_v9 = vadd.f32 %v774_v35, %v3670_v21  ;;  %v287_v21 = vld [vmem:[%s3341_s27 + $0xb1] sm:$0xff] }
  0xc8   : > { %319 = vst.msk [vmem:[#allocation3 + $0xb0] sm:$0xff] %vm214_vm1, %v287_v21  ;;  %v205_v21 = vld [vmem:[%s3341_s27 + $0xb8] sm:$0x7f] }
  0xc9   : > { %2986 = vmatmul.msk.f32.gmra.mxu1 %vm214_vm1, %v3828_v38  ;;  %3043 = vmatmul.msk.f32.gmra.mxu0 %vm214_vm1, %v3459_v26  ;;  %239 = vst.msk [vmem:[#allocation2 + $0xb9] sm:$0x7f] %vm216_vm3, %v205_v21 }
  0xca   : > { %3020 = vmatmul.msk.f32.gmra.mxu2 %vm214_vm1, %v3830_v52  ;;  %3083 = vmatmul.msk.f32.gmra.mxu3 %vm214_vm1, %v3785_v6 }
  0xcd   : > { %v988_v45 = vpop.f32.mrf.mxu2  ;;  %v3845_v28 = vpop.f32.mrf.mxu3 }
  0xce   : > { %4729 = vst [vmem:[#allocation25_spill] sm:$0xff] %v3845_v28  ;;  %v3847_v40 = vadd.f32 %v988_v45, %v775_v9  ;;  %v3849_v26 = vpop.f32.mrf.mxu0  ;;  %v777_v51 = vpop.f32.mrf.mxu1  ;;  %v3872_v28 = vld [vmem:[#allocation2 + $0x90] sm:$0xff] }
  0xcf   : > { %v778_v35 = vadd.f32 %v777_v51, %v3693_v30  ;;  %v288_v30 = vld [vmem:[%s3341_s27 + $0xb9] sm:$0x7f] }
  0xd0   : > { %4730 = vst [vmem:[#allocation26_spill] sm:$0xff] %v3847_v40 }
  0xd1   : > { %2987 = vmatmul.msk.f32.gmra.mxu1 %vm214_vm1, %v3851_v29  ;;  %3044 = vmatmul.msk.f32.gmra.mxu0 %vm214_vm1, %v3396_v18  ;;  %320 = vst.msk [vmem:[#allocation3 + $0xb8] sm:$0x7f] %vm216_vm3, %v288_v30 }
  0xd2   : > { %3021 = vmatmul.msk.f32.gmra.mxu2 %vm214_vm1, %v3853_v5  ;;  %3084 = vmatmul.msk.f32.gmra.mxu3 %vm214_vm1, %v3808_v22 }
  0xd5   : > { %v991_v9 = vpop.f32.mrf.mxu2  ;;  %v3866_v45 = vpop.f32.mrf.mxu3 }
  0xd6   : > { %4731 = vst [vmem:[#allocation27_spill] sm:$0xff] %v3866_v45  ;;  %v3868_v12 = vadd.f32 %v991_v9, %v778_v35  ;;  %v3870_v61 = vpop.f32.mrf.mxu0  ;;  %v780_v18 = vpop.f32.mrf.mxu1 }
  0xd7   : > { %v781_v51 = vadd.f32 %v780_v18, %v3720_v41  ;;  %v289_v41 = vld [vmem:[%s3341_s27 + $0xc1] sm:$0xff] }
  0xd8   : > { %4732 = vst [vmem:[#allocation28_spill] sm:$0xff] %v3868_v12  ;;  %v429_v12 = vld [vmem:[#allocation3 + $0xa0] sm:$0xff] }
  0xd9   : > { %2988 = vmatmul.msk.f32.gmra.mxu1 %vm214_vm1, %v3872_v28  ;;  %3045 = vmatmul.msk.f32.gmra.mxu0 %vm214_vm1, %v3503_v37  ;;  %321 = vst.msk [vmem:[#allocation3 + $0xc0] sm:$0xff] %vm214_vm1, %v289_v41  ;;  %v290_v41 = vld [vmem:[%s3341_s27 + $0xc9] sm:$0x7f] }
  0xda   : > { %3022 = vmatmul.msk.f32.gmra.mxu2 %vm214_vm1, %v3874_v19  ;;  %3085 = vmatmul.msk.f32.gmra.mxu3 %vm214_vm1, %v3828_v38  ;;  %322 = vst.msk [vmem:[#allocation3 + $0xc8] sm:$0x7f] %vm216_vm3, %v290_v41 }
  0xdd   : > { %v994_v35 = vpop.f32.mrf.mxu2  ;;  %v3889_v9 = vpop.f32.mrf.mxu3 }
  0xde   : > { %v3891_v45 = vadd.f32 %v994_v35, %v781_v51  ;;  %v3893_v37 = vpop.f32.mrf.mxu0  ;;  %v783_v60 = vpop.f32.mrf.mxu1 }
  0xdf   : > { %v784_v18 = vadd.f32 %v783_v60, %v3739_v56 }
  0xe1   : > { %2989 = vmatmul.msk.f32.gmra.mxu1 %vm214_vm1, %v3895_v42  ;;  %3046 = vmatmul.msk.f32.gmra.mxu0 %vm214_vm1, %v3508_v39 }
  0xe2   : > { %3023 = vmatmul.msk.f32.gmra.mxu2 %vm214_vm1, %v3897_v31  ;;  %3086 = vmatmul.msk.f32.gmra.mxu3 %vm214_vm1, %v3851_v29  ;;  %v207_v31 = vld [vmem:[%s3341_s27 + $0xc8] sm:$0x7f] }
  0xe3   : > { %241 = vst.msk [vmem:[#allocation2 + $0xc9] sm:$0x7f] %vm216_vm3, %v207_v31  ;;  %v291_v31 = vld [vmem:[%s3341_s27 + $0xd1] sm:$0xff] }
  0xe4   : > { %323 = vst.msk [vmem:[#allocation3 + $0xd0] sm:$0xff] %vm214_vm1, %v291_v31  ;;  %v292_v31 = vld [vmem:[%s3341_s27 + $0xd9] sm:$0x7f] }
  0xe5   : > { %v997_v21 = vpop.f32.mrf.mxu2  ;;  %v3910_v30 = vpop.f32.mrf.mxu3  ;;  %324 = vst.msk [vmem:[#allocation3 + $0xd8] sm:$0x7f] %vm216_vm3, %v292_v31 }
  0xe6   : > { %4734 = vst [vmem:[#allocation30_spill] sm:$0xff] %v3910_v30  ;;  %v3912_v51 = vadd.f32 %v997_v21, %v784_v18  ;;  %v3914_v35 = vpop.f32.mrf.mxu0  ;;  %v786_v39 = vpop.f32.mrf.mxu1  ;;  %v430_v30 = vld [vmem:[#allocation3 + $0xa8] sm:$0xff] }
  0xe7   : > { %v787_v56 = vadd.f32 %v786_v39, %v3760_v17 }
  0xe8   : > { %4735 = vst [vmem:[#allocation31_spill] sm:$0xff] %v3912_v51  ;;  %v366_v51 = vld [vmem:[#allocation2 + $0xa8] sm:$0xff] }
  0xe9   : > { %2990 = vmatmul.msk.f32.gmra.mxu1 %vm214_vm1, %v365_v23  ;;  %3047 = vmatmul.msk.f32.gmra.mxu0 %vm214_vm1, %v3542_v48 }
  0xea   : > { %3024 = vmatmul.msk.f32.gmra.mxu2 %vm214_vm1, %v429_v12  ;;  %3087 = vmatmul.msk.f32.gmra.mxu3 %vm214_vm1, %v3872_v28 }
  0xed   : > { %v1000_v60 = vpop.f32.mrf.mxu2  ;;  %v3927_v18 = vpop.f32.mrf.mxu3 }
  0xee   : > { %4736 = vst [vmem:[#allocation32_spill] sm:$0xff] %v3927_v18  ;;  %v3929_v21 = vadd.f32 %v1000_v60, %v787_v56  ;;  %v3931_v48 = vpop.f32.mrf.mxu0  ;;  %v789_v40 = vpop.f32.mrf.mxu1  ;;  %v432_v18 = vld [vmem:[#allocation3 + $0xb8] sm:$0xff] }
  0xef   : > { %v790_v17 = vadd.f32 %v789_v40, %v3781_v47 }
  0xf0   : > { %4737 = vst [vmem:[#allocation33_spill] sm:$0xff] %v3929_v21  ;;  %v431_v21 = vld [vmem:[#allocation3 + $0xb0] sm:$0xff] }
  0xf1   : > { %2991 = vmatmul.msk.f32.gmra.mxu1 %vm214_vm1, %v366_v51  ;;  %3048 = vmatmul.msk.f32.gmra.mxu0 %vm214_vm1, %v3523_v43  ;;  %v367_v43 = vld [vmem:[#allocation2 + $0xb0] sm:$0xff] }
  0xf2   : > { %3025 = vmatmul.msk.f32.gmra.mxu2 %vm214_vm1, %v430_v30  ;;  %3088 = vmatmul.msk.f32.gmra.mxu3 %vm214_vm1, %v3895_v42  ;;  %v209_v30 = vld [vmem:[%s3341_s27 + $0xd8] sm:$0x7f] }
  0xf3   : > { %243 = vst.msk [vmem:[#allocation2 + $0xd9] sm:$0x7f] %vm216_vm3, %v209_v30 }
  0xf5   : > { %v1003_v12 = vpop.f32.mrf.mxu2  ;;  %v3942_v39 = vpop.f32.mrf.mxu3 }
  0xf6   : > { %4738 = vst [vmem:[#allocation34_spill] sm:$0xff] %v3942_v39  ;;  %v3944_v41 = vadd.f32 %v1003_v12, %v790_v17  ;;  %v3946_v56 = vpop.f32.mrf.mxu0  ;;  %v792_v60 = vpop.f32.mrf.mxu1  ;;  %v368_v39 = vld [vmem:[#allocation2 + $0xb8] sm:$0xff] }
  0xf7   : > { %v793_v40 = vadd.f32 %v792_v60, %v3804_v36 }
  0xf8   : > { %4739 = vst [vmem:[#allocation35_spill] sm:$0xff] %v3944_v41 }
  0xf9   : > { %2992 = vmatmul.msk.f32.gmra.mxu1 %vm214_vm1, %v367_v43  ;;  %3049 = vmatmul.msk.f32.gmra.mxu0 %vm214_vm1, %v3578_v57 }
  0xfa   : > { %3026 = vmatmul.msk.f32.gmra.mxu2 %vm214_vm1, %v431_v21  ;;  %3089 = vmatmul.msk.f32.gmra.mxu3 %vm214_vm1, %v365_v23  ;;  %v293_v23 = vld [vmem:[%s3341_s27 + $0xe1] sm:$0xff] }
  0xfb   : > { %325 = vst.msk [vmem:[#allocation3 + $0xe0] sm:$0xff] %vm214_vm1, %v293_v23 }
  0xfd   : > { %v1006_v47 = vpop.f32.mrf.mxu2  ;;  %v3958_v17 = vpop.f32.mrf.mxu3 }
  0xfe   : > { %v3960_v12 = vadd.f32 %v1006_v47, %v793_v40  ;;  %v3962_v41 = vpop.f32.mrf.mxu0  ;;  %v795_v57 = vpop.f32.mrf.mxu1  ;;  %v369_v47 = vld [vmem:[#allocation2 + $0xc0] sm:$0xff] }
  0xff   : > { %v796_v36 = vadd.f32 %v795_v57, %v3826_v27 }
 0x101   : > { %2993 = vmatmul.msk.f32.gmra.mxu1 %vm214_vm1, %v368_v39  ;;  %3050 = vmatmul.msk.f32.gmra.mxu0 %vm214_vm1, %v3527_v44  ;;  %v433_v44 = vld [vmem:[#allocation3 + $0xc0] sm:$0xff] }
 0x102   : > { %3027 = vmatmul.msk.f32.gmra.mxu2 %vm214_vm1, %v432_v18  ;;  %3090 = vmatmul.msk.f32.gmra.mxu3 %vm214_vm1, %v366_v51  ;;  %v211_v51 = vld [vmem:[%s3341_s27 + $0xe8] sm:$0x7f] }
 0x103   : > { %v294_v18 = vld [vmem:[%s3341_s27 + $0xe9] sm:$0x7f]  ;;  %245 = vst.msk [vmem:[#allocation2 + $0xe9] sm:$0x7f] %vm216_vm3, %v211_v51 }
 0x104   : > { %326 = vst.msk [vmem:[#allocation3 + $0xe8] sm:$0x7f] %vm216_vm3, %v294_v18 }
 0x105   : > { %v1009_v21 = vpop.f32.mrf.mxu2  ;;  %v3972_v60 = vpop.f32.mrf.mxu3 }
 0x106   : > { %4740 = vst [vmem:[#allocation36_spill] sm:$0xff] %v3972_v60  ;;  %v3974_v30 = vadd.f32 %v1009_v21, %v796_v36  ;;  %v3976_v31 = vpop.f32.mrf.mxu0  ;;  %v798_v40 = vpop.f32.mrf.mxu1  ;;  %v434_v60 = vld [vmem:[#allocation3 + $0xc8] sm:$0xff] }
 0x107   : > { %v799_v27 = vadd.f32 %v798_v40, %v3849_v26  ;;  %v295_v26 = vld [vmem:[%s3341_s27 + $0xf1] sm:$0xff] }
 0x108   : > { %4741 = vst [vmem:[#allocation37_spill] sm:$0xff] %v3974_v30  ;;  %v370_v30 = vld [vmem:[#allocation2 + $0xc8] sm:$0xff] }
 0x109   : > { %2994 = vmatmul.msk.f32.gmra.mxu1 %vm214_vm1, %v369_v47  ;;  %3051 = vmatmul.msk.f32.gmra.mxu0 %vm214_vm1, %v3616_v2  ;;  %327 = vst.msk [vmem:[#allocation3 + $0xf0] sm:$0xff] %vm214_vm1, %v295_v26 }
 0x10a   : > { %3028 = vmatmul.msk.f32.gmra.mxu2 %vm214_vm1, %v433_v44  ;;  %3091 = vmatmul.msk.f32.gmra.mxu3 %vm214_vm1, %v367_v43  ;;  %v212_v43 = vld [vmem:[%s3341_s27 + $0xf0] sm:$0xff] }
 0x10b   : > { %246 = vst.msk [vmem:[#allocation2 + $0xf1] sm:$0xff] %vm214_vm1, %v212_v43 }
 0x10d   : > { %v1012_v57 = vpop.f32.mrf.mxu2  ;;  %v3988_v23 = vpop.f32.mrf.mxu3 }
 0x10e   : > { %v3990_v36 = vadd.f32 %v1012_v57, %v799_v27  ;;  %v3992_v2 = vpop.f32.mrf.mxu0  ;;  %v801_v21 = vpop.f32.mrf.mxu1  ;;  %v371_v57 = vld [vmem:[#allocation2 + $0xd0] sm:$0xff] }
 0x10f   : > { %v802_v40 = vadd.f32 %v801_v21, %v3870_v61  ;;  %v296_v61 = vld [vmem:[%s3341_s27 + $0xf9] sm:$0x7f] }
 0x110   : > { %328 = vst.msk [vmem:[#allocation3 + $0xf8] sm:$0x7f] %vm216_vm3, %v296_v61 }
 0x111   : > { %2995 = vmatmul.msk.f32.gmra.mxu1 %vm214_vm1, %v370_v30  ;;  %3052 = vmatmul.msk.f32.gmra.mxu0 %vm214_vm1, %v3559_v53 }
 0x112   : > { %3029 = vmatmul.msk.f32.gmra.mxu2 %vm214_vm1, %v434_v60  ;;  %3092 = vmatmul.msk.f32.gmra.mxu3 %vm214_vm1, %v368_v39  ;;  %v435_v60 = vld [vmem:[#allocation3 + $0xd0] sm:$0xff]  ;;  %v213_v39 = vld [vmem:[%s3341_s27 + $0xf8] sm:$0x7f] }
 0x113   : > { %247 = vst.msk [vmem:[#allocation2 + $0xf9] sm:$0x7f] %vm216_vm3, %v213_v39 }
 0x115   : > { %v1015_v44 = vpop.f32.mrf.mxu2  ;;  %v4004_v51 = vpop.f32.mrf.mxu3 }
 0x116   : > { %4742 = vst [vmem:[#allocation38_spill] sm:$0xff] %v4004_v51  ;;  %v4006_v18 = vadd.f32 %v1015_v44, %v802_v40  ;;  %v4008_v53 = vpop.f32.mrf.mxu0  ;;  %v804_v27 = vpop.f32.mrf.mxu1  ;;  %v436_v51 = vld [vmem:[#allocation3 + $0xd8] sm:$0xff] }
 0x117   : > { %v805_v21 = vadd.f32 %v804_v27, %v3893_v37 }
 0x118   : > { %4743 = vst [vmem:[#allocation39_spill] sm:$0xff] %v4006_v18 }
 0x119   : > { %2996 = vmatmul.msk.f32.gmra.mxu1 %vm214_vm1, %v371_v57  ;;  %3053 = vmatmul.msk.f32.gmra.mxu0 %vm214_vm1, %v3649_v14  ;;  %v372_v14 = vld [vmem:[#allocation2 + $0xd8] sm:$0xff] }
 0x11a   : > { %3030 = vmatmul.msk.f32.gmra.mxu2 %vm214_vm1, %v435_v60  ;;  %3093 = vmatmul.msk.f32.gmra.mxu3 %vm214_vm1, %v369_v47 }
 0x11d   : > { %v1018_v43 = vpop.f32.mrf.mxu2  ;;  %v4020_v26 = vpop.f32.mrf.mxu3 }
 0x11e   : > { %v4022_v40 = vadd.f32 %v1018_v43, %v805_v21  ;;  %v807_v44 = vpop.f32.mrf.mxu1  ;;  %v4024_v18 = vpop.f32.mrf.mxu0  ;;  %v373_v21 = vld [vmem:[#allocation2 + $0xe0] sm:$0xff] }
 0x11f   : > { %v808_v37 = vadd.f32 %v807_v44, %v3914_v35  ;;  %v437_v43 = vld [vmem:[#allocation3 + $0xe0] sm:$0xff] }
 0x121   : > { %2997 = vmatmul.msk.f32.gmra.mxu1 %vm214_vm1, %v372_v14  ;;  %3054 = vmatmul.msk.f32.gmra.mxu0 %vm214_vm1, %v3599_v63 }
 0x122   : > { %3031 = vmatmul.msk.f32.gmra.mxu2 %vm214_vm1, %v436_v51  ;;  %3094 = vmatmul.msk.f32.gmra.mxu3 %vm214_vm1, %v370_v30 }
 0x125   : > { %v1021_v47 = vpop.f32.mrf.mxu2  ;;  %v4032_v27 = vpop.f32.mrf.mxu3 }
 0x126   : > { %4744 = vst [vmem:[#allocation40_spill] sm:$0xff] %v4032_v27  ;;  %v4034_v60 = vadd.f32 %v1021_v47, %v808_v37  ;;  %v810_v39 = vpop.f32.mrf.mxu1  ;;  %v4036_v61 = vpop.f32.mrf.mxu0  ;;  %v374_v47 = vld [vmem:[#allocation2 + $0xe8] sm:$0xff] }
 0x127   : > { %v811_v63 = vadd.f32 %v810_v39, %v3931_v48  ;;  %v438_v27 = vld [vmem:[#allocation3 + $0xe8] sm:$0xff] }
 0x128   : > { %4745 = vst [vmem:[#allocation41_spill] sm:$0xff] %v4034_v60  ;;  %v4051_v60 = vld [vmem:[%s3341_s27 + $0x90] sm:$0xff] }
 0x129   : > { %2998 = vmatmul.msk.f32.gmra.mxu1 %vm214_vm1, %v373_v21  ;;  %3055 = vmatmul.msk.f32.gmra.mxu0 %vm214_vm1, %v3698_v32 }
 0x12a   : > { %3032 = vmatmul.msk.f32.gmra.mxu2 %vm214_vm1, %v437_v43  ;;  %3095 = vmatmul.msk.f32.gmra.mxu3 %vm214_vm1, %v371_v57 }
 0x12d   : > { %v1024_v35 = vpop.f32.mrf.mxu2  ;;  %v4044_v30 = vpop.f32.mrf.mxu3 }
 0x12e   : > { %4746 = vst [vmem:[#allocation42_spill] sm:$0xff] %v4044_v30  ;;  %v4046_v51 = vadd.f32 %v1024_v35, %v811_v63  ;;  %v813_v44 = vpop.f32.mrf.mxu1  ;;  %v4048_v37 = vpop.f32.mrf.mxu0  ;;  %v375_v35 = vld [vmem:[#allocation2 + $0xf0] sm:$0xff] }
 0x12f   : > { %v814_v32 = vadd.f32 %v813_v44, %v3946_v56  ;;  %v439_v30 = vld [vmem:[#allocation3 + $0xf0] sm:$0xff] }
 0x130   : > { %4747 = vst [vmem:[#allocation43_spill] sm:$0xff] %v4046_v51  ;;  %v4066_v51 = vld [vmem:[%s3341_s27 + $0x98] sm:$0xff] }
 0x131   : > { %2999 = vmatmul.msk.f32.gmra.mxu1 %vm214_vm1, %v374_v47  ;;  %3056 = vmatmul.msk.f32.gmra.mxu0 %vm214_vm1, %v4051_v60 }
 0x132   : > { %3033 = vmatmul.msk.f32.gmra.mxu2 %vm214_vm1, %v438_v27  ;;  %3096 = vmatmul.msk.f32.gmra.mxu3 %vm214_vm1, %v372_v14 }
 0x135   : > { %v1027_v48 = vpop.f32.mrf.mxu2  ;;  %v4059_v57 = vpop.f32.mrf.mxu3 }
 0x136   : > { %4748 = vst [vmem:[#allocation44_spill] sm:$0xff] %v4059_v57  ;;  %v4061_v39 = vadd.f32 %v1027_v48, %v814_v32  ;;  %v816_v43 = vpop.f32.mrf.mxu1  ;;  %v4063_v63 = vpop.f32.mrf.mxu0  ;;  %v440_v57 = vld [vmem:[#allocation3 + $0xf8] sm:$0xff] }
 0x137   : > { %v817_v56 = vadd.f32 %v816_v43, %v3962_v41 }
 0x138   : > { %4749 = vst [vmem:[#allocation45_spill] sm:$0xff] %v4061_v39  ;;  %v376_v39 = vld [vmem:[#allocation2 + $0xf8] sm:$0xff] }
 0x139   : > { %3000 = vmatmul.msk.f32.gmra.mxu1 %vm214_vm1, %v375_v35  ;;  %3057 = vmatmul.msk.f32.gmra.mxu0 %vm214_vm1, %v4066_v51  ;;  %v4081_v35 = vld [vmem:[%s3341_s27 + $0xa0] sm:$0xff] }
 0x13a   : > { %3034 = vmatmul.msk.f32.gmra.mxu2 %vm214_vm1, %v439_v30  ;;  %3097 = vmatmul.msk.f32.gmra.mxu3 %vm214_vm1, %v373_v21 }
 0x13d   : > { %v1030_v14 = vpop.f32.mrf.mxu2  ;;  %v4074_v27 = vpop.f32.mrf.mxu3 }
 0x13e   : > { %v4076_v44 = vadd.f32 %v1030_v14, %v817_v56  ;;  %v819_v32 = vpop.f32.mrf.mxu1  ;;  %v4078_v48 = vpop.f32.mrf.mxu0 }
 0x13f   : > { %v820_v41 = vadd.f32 %v819_v32, %v3976_v31 }
 0x140   : > { %4750 = vst [vmem:[#allocation46_spill] sm:$0xff] %v4076_v44  ;;  %v1176_v44 = vld [vmem:[#allocation3] sm:$0xff] }
 0x141   : > { %3001 = vmatmul.msk.f32.gmra.mxu1 %vm214_vm1, %v376_v39  ;;  %3058 = vmatmul.msk.f32.gmra.mxu0 %vm214_vm1, %v4081_v35  ;;  %v3131_v39 = vld [vmem:[%s3341_s27 + $0x10] sm:$0xff] }
 0x142   : > { %3035 = vmatmul.msk.f32.gmra.mxu2 %vm214_vm1, %v440_v57  ;;  %3098 = vmatmul.msk.f32.gmra.mxu3 %vm214_vm1, %v374_v47 }
 0x145   : > { %v1033_v21 = vpop.f32.mrf.mxu2  ;;  %v4089_v30 = vpop.f32.mrf.mxu3 }
 0x146   : > { %v4091_v43 = vadd.f32 %v1033_v21, %v820_v41  ;;  %v822_v56 = vpop.f32.mrf.mxu1  ;;  %v4093_v14 = vpop.f32.mrf.mxu0 }
 0x147   : > { %v823_v31 = vadd.f32 %v822_v56, %v3992_v2 }
 0x148   : > { %4751 = vst [vmem:[#allocation47_spill] sm:$0xff] %v4091_v43  ;;  %v3132_v43 = vld [vmem:[%s3341_s27 + $0x18] sm:$0xff] }
 0x149   : > { %3101 = vmatmul.msk.f32.vlgmr.msra.gmra.mxu0 %vm214_vm1, %v1176_v44  ;;  %3164 = vmatmul.msk.f32.vlgmr.msra.gmra.mxu1 %vm214_vm1, %v3131_v39  ;;  %v1177_v44 = vld [vmem:[#allocation3 + $0x8] sm:$0xff] }
 0x14a   : > { %3195 = vmatmul.msk.f32.vlgmr.msra.gmra.mxu2 %vm214_vm1, %v3544_v49  ;;  %3227 = vmatmul.msk.f32.vlgmr.msra.gmra.mxu3 %vm214_vm1, %v3546_v50 }
 0x14d   : > { %v1036_v47 = vpop.f32.mrf.mxu2  ;;  %v4103_v57 = vpop.f32.mrf.mxu3 }
 0x14e   : > { %v4105_v32 = vadd.f32 %v1036_v47, %v823_v31  ;;  %v825_v41 = vpop.f32.mrf.mxu1  ;;  %v4107_v21 = vpop.f32.mrf.mxu0  ;;  %v1178_v47 = vld [vmem:[#allocation3 + $0x10] sm:$0xff] }
 0x14f   : > { %v826_v49 = vadd.f32 %v825_v41, %v4008_v53 }
 0x151   : > { %3102 = vmatmul.msk.f32.gmra.mxu0 %vm214_vm1, %v1177_v44  ;;  %3165 = vmatmul.msk.f32.gmra.mxu1 %vm214_vm1, %v3132_v43  ;;  %v3133_v43 = vld [vmem:[%s3341_s27 + $0x20] sm:$0xff]  ;;  %v1179_v44 = vld [vmem:[#allocation3 + $0x18] sm:$0xff] }
 0x152   : > { %3196 = vmatmul.msk.f32.gmra.mxu2 %vm214_vm1, %v3564_v54  ;;  %3228 = vmatmul.msk.f32.gmra.mxu3 %vm214_vm1, %v3566_v55 }
 0x155   : > { %v1039_v50 = vpop.f32.mrf.mxu2  ;;  %v4117_v2 = vpop.f32.mrf.mxu3 }
 0x156   : > { %v4119_v56 = vadd.f32 %v1039_v50, %v826_v49  ;;  %v4121_v39 = vpop.f32.mrf.mxu1  ;;  %v4123_v31 = vpop.f32.mrf.mxu0  ;;  %v3134_v49 = vld [vmem:[%s3341_s27 + $0x28] sm:$0xff] }
 0x159   : > { %3103 = vmatmul.msk.f32.gmra.mxu0 %vm214_vm1, %v1178_v47  ;;  %3166 = vmatmul.msk.f32.gmra.mxu1 %vm214_vm1, %v3133_v43  ;;  %v1180_v43 = vld [vmem:[#allocation3 + $0x20] sm:$0xff] }
 0x15a   : > { %3197 = vmatmul.msk.f32.gmra.mxu2 %vm214_vm1, %v3580_v58  ;;  %3229 = vmatmul.msk.f32.gmra.mxu3 %vm214_vm1, %v3582_v59 }
 0x15d   : > { %v4132_v54 = vpop.f32.mrf.mxu2  ;;  %v4134_v55 = vpop.f32.mrf.mxu3 }
 0x15e   : > { %v4136_v53 = vpop.f32.mrf.mxu1  ;;  %v4138_v41 = vpop.f32.mrf.mxu0 }
 0x15f   : > { %4752 = vst [vmem:[#allocation48_spill] sm:$0xff] %v4136_v53  ;;  %v3135_v53 = vld [vmem:[%s3341_s27 + $0x30] sm:$0xff] }
 0x161   : > { %3104 = vmatmul.msk.f32.gmra.mxu0 %vm214_vm1, %v1179_v44  ;;  %3167 = vmatmul.msk.f32.gmra.mxu1 %vm214_vm1, %v3134_v49 }
 0x162   : > { %3198 = vmatmul.msk.f32.gmra.mxu2 %vm214_vm1, %v3596_v62  ;;  %3230 = vmatmul.msk.f32.gmra.mxu3 %vm214_vm1, %v3601_v0 }
 0x165   : > { %v4147_v58 = vpop.f32.mrf.mxu2  ;;  %v4149_v59 = vpop.f32.mrf.mxu3 }
 0x166   : > { %4753 = vst [vmem:[#allocation49_spill] sm:$0xff] %v4147_v58  ;;  %v4151_v50 = vpop.f32.mrf.mxu1  ;;  %v4153_v47 = vpop.f32.mrf.mxu0  ;;  %v3136_v58 = vld [vmem:[%s3341_s27 + $0x38] sm:$0xff] }
 0x167   : > { %4754 = vst [vmem:[#allocation50_spill] sm:$0xff] %v4151_v50  ;;  %v1181_v50 = vld [vmem:[#allocation3 + $0x28] sm:$0xff] }
 0x169   : > { %3105 = vmatmul.msk.f32.gmra.mxu0 %vm214_vm1, %v1180_v43  ;;  %3168 = vmatmul.msk.f32.gmra.mxu1 %vm214_vm1, %v3135_v53 }
 0x16a   : > { %3199 = vmatmul.msk.f32.gmra.mxu2 %vm214_vm1, %v3618_v3  ;;  %3231 = vmatmul.msk.f32.gmra.mxu3 %vm214_vm1, %v3620_v4 }
 0x16d   : > { %v4162_v62 = vpop.f32.mrf.mxu2  ;;  %v4164_v0 = vpop.f32.mrf.mxu3 }
 0x16e   : > { %4755 = vst [vmem:[#allocation51_spill] sm:$0xff] %v4162_v62  ;;  %v4166_v44 = vpop.f32.mrf.mxu1  ;;  %v4168_v49 = vpop.f32.mrf.mxu0  ;;  %v3137_v62 = vld [vmem:[%s3341_s27 + $0x40] sm:$0xff] }
 0x16f   : > { %4756 = vst [vmem:[#allocation52_spill] sm:$0xff] %v4166_v44  ;;  %v1182_v44 = vld [vmem:[#allocation3 + $0x30] sm:$0xff] }
 0x171   : > { %3106 = vmatmul.msk.f32.gmra.mxu0 %vm214_vm1, %v1181_v50  ;;  %3169 = vmatmul.msk.f32.gmra.mxu1 %vm214_vm1, %v3136_v58 }
 0x172   : > { %3200 = vmatmul.msk.f32.gmra.mxu2 %vm214_vm1, %v3634_v8  ;;  %3232 = vmatmul.msk.f32.gmra.mxu3 %vm214_vm1, %v3636_v10 }
 0x175   : > { %v4177_v3 = vpop.f32.mrf.mxu2  ;;  %v4179_v4 = vpop.f32.mrf.mxu3 }
 0x176   : > { %4757 = vst [vmem:[#allocation53_spill] sm:$0xff] %v4177_v3  ;;  %v4181_v53 = vpop.f32.mrf.mxu1  ;;  %v4183_v43 = vpop.f32.mrf.mxu0  ;;  %v3138_v3 = vld [vmem:[%s3341_s27 + $0x48] sm:$0xff] }
 0x177   : > { %4758 = vst [vmem:[#allocation54_spill] sm:$0xff] %v4181_v53  ;;  %v1183_v53 = vld [vmem:[#allocation3 + $0x38] sm:$0xff] }
 0x179   : > { %3107 = vmatmul.msk.f32.gmra.mxu0 %vm214_vm1, %v1182_v44  ;;  %3170 = vmatmul.msk.f32.gmra.mxu1 %vm214_vm1, %v3137_v62 }
 0x17a   : > { %3201 = vmatmul.msk.f32.gmra.mxu2 %vm214_vm1, %v3651_v15  ;;  %3233 = vmatmul.msk.f32.gmra.mxu3 %vm214_vm1, %v3653_v16 }
 0x17d   : > { %v4192_v8 = vpop.f32.mrf.mxu2  ;;  %v4194_v10 = vpop.f32.mrf.mxu3 }
 0x17e   : > { %4759 = vst [vmem:[#allocation55_spill] sm:$0xff] %v4192_v8  ;;  %v4196_v58 = vpop.f32.mrf.mxu1  ;;  %v4198_v50 = vpop.f32.mrf.mxu0  ;;  %v3139_v8 = vld [vmem:[%s3341_s27 + $0x50] sm:$0xff] }
 0x17f   : > { %4760 = vst [vmem:[#allocation56_spill] sm:$0xff] %v4196_v58  ;;  %v1184_v58 = vld [vmem:[#allocation3 + $0x40] sm:$0xff] }
 0x181   : > { %3108 = vmatmul.msk.f32.gmra.mxu0 %vm214_vm1, %v1183_v53  ;;  %3171 = vmatmul.msk.f32.gmra.mxu1 %vm214_vm1, %v3138_v3 }
 0x182   : > { %3202 = vmatmul.msk.f32.gmra.mxu2 %vm214_vm1, %v3674_v24  ;;  %3234 = vmatmul.msk.f32.gmra.mxu3 %vm214_vm1, %v3677_v25 }
 0x185   : > { %v4207_v15 = vpop.f32.mrf.mxu2  ;;  %v4209_v16 = vpop.f32.mrf.mxu3 }
 0x186   : > { %4761 = vst [vmem:[#allocation57_spill] sm:$0xff] %v4207_v15  ;;  %v4211_v62 = vpop.f32.mrf.mxu1  ;;  %v4213_v44 = vpop.f32.mrf.mxu0  ;;  %v3140_v15 = vld [vmem:[%s3341_s27 + $0x58] sm:$0xff] }
 0x187   : > { %4762 = vst [vmem:[#allocation58_spill] sm:$0xff] %v4209_v16  ;;  %v1884_v16 = vld [vmem:[#allocation2 + $0x60] sm:$0xff] }
 0x188   : > { %4763 = vst [vmem:[#allocation59_spill] sm:$0xff] %v4211_v62  ;;  %v1185_v62 = vld [vmem:[#allocation3 + $0x48] sm:$0xff] }
 0x189   : > { %3109 = vmatmul.msk.f32.gmra.mxu0 %vm214_vm1, %v1184_v58  ;;  %3172 = vmatmul.msk.f32.gmra.mxu1 %vm214_vm1, %v3139_v8  ;;  %v1883_v58 = vld [vmem:[#allocation2 + $0x58] sm:$0xff] }
 0x18a   : > { %3203 = vmatmul.msk.f32.gmra.mxu2 %vm214_vm1, %v3700_v33  ;;  %3235 = vmatmul.msk.f32.gmra.mxu3 %vm214_vm1, %v3702_v34 }
 0x18d   : > { %v4222_v24 = vpop.f32.mrf.mxu2  ;;  %v4224_v25 = vpop.f32.mrf.mxu3 }
 0x18e   : > { %4764 = vst [vmem:[#allocation60_spill] sm:$0xff] %v4222_v24  ;;  %v4226_v3 = vpop.f32.mrf.mxu1  ;;  %v4228_v53 = vpop.f32.mrf.mxu0  ;;  %v1186_v24 = vld [vmem:[#allocation3 + $0x50] sm:$0xff] }
 0x18f   : > { %4765 = vst [vmem:[#allocation61_spill] sm:$0xff] %v4224_v25  ;;  %v3141_v25 = vld [vmem:[%s3341_s27 + $0x60] sm:$0xff] }
 0x190   : > { %4766 = vst [vmem:[#allocation62_spill] sm:$0xff] %v4226_v3 }
 0x191   : > { %3110 = vmatmul.msk.f32.gmra.mxu0 %vm214_vm1, %v1185_v62  ;;  %3173 = vmatmul.msk.f32.gmra.mxu1 %vm214_vm1, %v3140_v15 }
 0x192   : > { %3204 = vmatmul.msk.f32.gmra.mxu2 %vm214_vm1, %v1883_v58  ;;  %3236 = vmatmul.msk.f32.gmra.mxu3 %vm214_vm1, %v3724_v46 }
 0x195   : > { %v4236_v33 = vpop.f32.mrf.mxu2  ;;  %v4238_v34 = vpop.f32.mrf.mxu3 }
 0x196   : > { %4767 = vst [vmem:[#allocation63_spill] sm:$0xff] %v4236_v33  ;;  %v4240_v8 = vpop.f32.mrf.mxu1  ;;  %v4242_v3 = vpop.f32.mrf.mxu0  ;;  %v3142_v33 = vld [vmem:[%s3341_s27 + $0x68] sm:$0xff] }
 0x197   : > { %4768 = vst [vmem:[#allocation64_spill] sm:$0xff] %v4238_v34  ;;  %v4795_v34 = vld [vmem:[#allocation35_spill] sm:$0xff] }
 0x198   : > { %4769 = vst [vmem:[#allocation65_spill] sm:$0xff] %v4240_v8  ;;  %v1187_v8 = vld [vmem:[#allocation3 + $0x58] sm:$0xff] }
 0x199   : > { %3111 = vmatmul.msk.f32.gmra.mxu0 %vm214_vm1, %v1186_v24  ;;  %3174 = vmatmul.msk.f32.gmra.mxu1 %vm214_vm1, %v3141_v25 }
 0x19a   : > { %3205 = vmatmul.msk.f32.gmra.mxu2 %vm214_vm1, %v1884_v16  ;;  %3237 = vmatmul.msk.f32.gmra.mxu3 %vm214_vm1, %v3743_v1 }
 0x19d   : > { %v4250_v46 = vpop.f32.mrf.mxu2  ;;  %v4252_v15 = vpop.f32.mrf.mxu3 }
 0x19e   : > { %4770 = vst [vmem:[#allocation66_spill] sm:$0xff] %v4250_v46  ;;  %v4254_v62 = vpop.f32.mrf.mxu1  ;;  %v4256_v58 = vpop.f32.mrf.mxu0  ;;  %v3143_v46 = vld [vmem:[%s3341_s27 + $0x70] sm:$0xff] }
 0x19f   : > { %4771 = vst [vmem:[#allocation67_spill] sm:$0xff] %v4252_v15 }
 0x1a0   : > { %4772 = vst [vmem:[#allocation68_spill] sm:$0xff] %v4254_v62  ;;  %v1188_v62 = vld [vmem:[#allocation3 + $0x60] sm:$0xff] }
 0x1a1   : > { %3112 = vmatmul.msk.f32.gmra.mxu0 %vm214_vm1, %v1187_v8  ;;  %3175 = vmatmul.msk.f32.gmra.mxu1 %vm214_vm1, %v3142_v33 }
 0x1a2   : > { %3206 = vmatmul.msk.f32.gmra.mxu2 %vm214_vm1, %v3764_v13  ;;  %3238 = vmatmul.msk.f32.gmra.mxu3 %vm214_vm1, %v3766_v20 }
 0x1a5   : > { %v4265_v1 = vpop.f32.mrf.mxu2  ;;  %v4267_v16 = vpop.f32.mrf.mxu3 }
 0x1a6   : > { %4773 = vst [vmem:[#allocation69_spill] sm:$0xff] %v4265_v1  ;;  %v4269_v24 = vpop.f32.mrf.mxu1  ;;  %v4271_v25 = vpop.f32.mrf.mxu0  ;;  %v3144_v1 = vld [vmem:[%s3341_s27 + $0x78] sm:$0xff] }
 0x1a7   : > { %4774 = vst [vmem:[#allocation70_spill] sm:$0xff] %v4267_v16  ;;  %v1893_v16 = vld [vmem:[#allocation2 + $0xa8] sm:$0xff] }
 0x1a8   : > { %4775 = vst [vmem:[#allocation71_spill] sm:$0xff] %v4269_v24  ;;  %v1189_v24 = vld [vmem:[#allocation3 + $0x68] sm:$0xff] }
 0x1a9   : > { %3113 = vmatmul.msk.f32.gmra.mxu0 %vm214_vm1, %v1188_v62  ;;  %3176 = vmatmul.msk.f32.gmra.mxu1 %vm214_vm1, %v3143_v46 }
 0x1aa   : > { %3207 = vmatmul.msk.f32.gmra.mxu2 %vm214_vm1, %v3785_v6  ;;  %3239 = vmatmul.msk.f32.gmra.mxu3 %vm214_vm1, %v3787_v7 }
 0x1ad   : > { %v4280_v13 = vpop.f32.mrf.mxu2  ;;  %v4282_v20 = vpop.f32.mrf.mxu3 }
 0x1ae   : > { %4776 = vst [vmem:[#allocation72_spill] sm:$0xff] %v4280_v13  ;;  %v4284_v33 = vpop.f32.mrf.mxu1  ;;  %v4286_v8 = vpop.f32.mrf.mxu0  ;;  %v3145_v13 = vld [vmem:[%s3341_s27 + $0x80] sm:$0xff] }
 0x1af   : > { %4777 = vst [vmem:[#allocation73_spill] sm:$0xff] %v4282_v20 }
 0x1b0   : > { %4778 = vst [vmem:[#allocation74_spill] sm:$0xff] %v4284_v33  ;;  %v1190_v33 = vld [vmem:[#allocation3 + $0x70] sm:$0xff] }
 0x1b1   : > { %3114 = vmatmul.msk.f32.gmra.mxu0 %vm214_vm1, %v1189_v24  ;;  %3177 = vmatmul.msk.f32.gmra.mxu1 %vm214_vm1, %v3144_v1 }
 0x1b2   : > { %3208 = vmatmul.msk.f32.gmra.mxu2 %vm214_vm1, %v3808_v22  ;;  %3240 = vmatmul.msk.f32.gmra.mxu3 %vm214_vm1, %v3810_v11 }
 0x1b5   : > { %v4295_v7 = vpop.f32.mrf.mxu2  ;;  %v4297_v6 = vpop.f32.mrf.mxu3 }
 0x1b6   : > { %4779 = vst [vmem:[#allocation75_spill] sm:$0xff] %v4295_v7  ;;  %v4299_v46 = vpop.f32.mrf.mxu1  ;;  %v4301_v62 = vpop.f32.mrf.mxu0  ;;  %v3146_v7 = vld [vmem:[%s3341_s27 + $0x88] sm:$0xff] }
 0x1b7   : > { %4780 = vst [vmem:[#allocation76_spill] sm:$0xff] %v4297_v6 }
 0x1b8   : > { %4781 = vst [vmem:[#allocation77_spill] sm:$0xff] %v4299_v46  ;;  %v1191_v46 = vld [vmem:[#allocation3 + $0x78] sm:$0xff] }
 0x1b9   : > { %3115 = vmatmul.msk.f32.gmra.mxu0 %vm214_vm1, %v1190_v33  ;;  %3178 = vmatmul.msk.f32.gmra.mxu1 %vm214_vm1, %v3145_v13 }
 0x1ba   : > { %3209 = vmatmul.msk.f32.gmra.mxu2 %vm214_vm1, %v3828_v38  ;;  %3241 = vmatmul.msk.f32.gmra.mxu3 %vm214_vm1, %v3830_v52  ;;  %v1520_v38 = vadd.f32 %v3889_v9, %v4024_v18 }
 0x1bd   : > { %v4310_v11 = vpop.f32.mrf.mxu2  ;;  %v4312_v22 = vpop.f32.mrf.mxu3 }
 0x1be   : > { %4782 = vst [vmem:[#allocation78_spill] sm:$0xff] %v4310_v11  ;;  %v4314_v1 = vpop.f32.mrf.mxu1  ;;  %v4316_v24 = vpop.f32.mrf.mxu0 }
 0x1bf   : > { %4783 = vst [vmem:[#allocation79_spill] sm:$0xff] %v4312_v22 }
 0x1c0   : > { %4784 = vst [vmem:[#allocation80_spill] sm:$0xff] %v4314_v1  ;;  %v1192_v1 = vld [vmem:[#allocation3 + $0x80] sm:$0xff] }
 0x1c1   : > { %3116 = vmatmul.msk.f32.gmra.mxu0 %vm214_vm1, %v1191_v46  ;;  %3179 = vmatmul.msk.f32.gmra.mxu1 %vm214_vm1, %v3146_v7 }
 0x1c2   : > { %3210 = vmatmul.msk.f32.gmra.mxu2 %vm214_vm1, %v3851_v29  ;;  %3242 = vmatmul.msk.f32.gmra.mxu3 %vm214_vm1, %v3853_v5  ;;  %v4787_v29 = vld [vmem:[#allocation30_spill] sm:$0xff] }
 0x1c3   : > { %v1523_v5 = vadd.f32 %v4787_v29, %v4036_v61  ;;  %v4791_v61 = vld [vmem:[#allocation32_spill] sm:$0xff] }
 0x1c5   : > { %v4327_v52 = vpop.f32.mrf.mxu2  ;;  %v4329_v13 = vpop.f32.mrf.mxu3 }
 0x1c6   : > { %4785 = vst [vmem:[#allocation81_spill] sm:$0xff] %v4327_v52  ;;  %v1721_v33 = vpop.f32.mrf.mxu0  ;;  %v2080_v11 = vpop.f32.mrf.mxu1  ;;  %v4788_v52 = vld [vmem:[#allocation31_spill] sm:$0xff] }
 0x1c7   : > { %4786 = vst [vmem:[#allocation82_spill] sm:$0xff] %v4329_v13  ;;  %v1811_v22 = vadd.f32 %v1721_v33, %v1520_v38 }
 0x1c9   : > { %v4332_v7 = vadd.f32 %v1811_v22, %v3891_v45  ;;  %3117 = vmatmul.msk.f32.gmra.mxu0 %vm214_vm1, %v1192_v1  ;;  %3180 = vmatmul.msk.f32.gmra.mxu1 %vm214_vm1, %v4051_v60  ;;  %v1193_v45 = vld [vmem:[#allocation3 + $0x88] sm:$0xff] }
 0x1ca   : > { %3211 = vmatmul.msk.f32.gmra.mxu2 %vm214_vm1, %v3872_v28  ;;  %3243 = vmatmul.msk.f32.gmra.mxu3 %vm214_vm1, %v3874_v19  ;;  %v4789_v28 = vld [vmem:[#allocation26_spill] sm:$0xff]  ;;  %v4790_v60 = vld [vmem:[#allocation29_spill] sm:$0xff] }
 0x1cd   : > { %v2280_v9 = vpop.f32.mrf.mxu2  ;;  %v2482_v18 = vpop.f32.mrf.mxu3 }
 0x1ce   : > { %v2281_v46 = vadd.f32 %v2280_v9, %v2080_v11  ;;  %v1724_v38 = vpop.f32.mrf.mxu0  ;;  %v2083_v22 = vpop.f32.mrf.mxu1  ;;  %v1526_v11 = vadd.f32 %v4791_v61, %v4048_v37 }
 0x1cf   : > { %v1812_v33 = vadd.f32 %v1724_v38, %v1523_v5  ;;  %v1892_v38 = vld [vmem:[#allocation2 + $0xa0] sm:$0xff] }
 0x1d0   : > { %v2572_v1 = vadd.f32 %v2482_v18, %v2281_v46  ;;  %v1194_v18 = vld [vmem:[#allocation3 + $0x90] sm:$0xff] }
 0x1d1   : > { %v4344_v13 = vadd.f32 %v1812_v33, %v4788_v52  ;;  %3118 = vmatmul.msk.f32.gmra.mxu0 %vm214_vm1, %v1193_v45  ;;  %3181 = vmatmul.msk.f32.gmra.mxu1 %vm214_vm1, %v4066_v51  ;;  %v1954_v45 = vld [vmem:[#allocation3 + $0xa0] sm:$0xff] }
 0x1d2   : > { %v2602_v19 = vadd.f32 %v2572_v1, %v4789_v28  ;;  %3212 = vmatmul.msk.f32.gmra.mxu2 %vm214_vm1, %v3895_v42  ;;  %3244 = vmatmul.msk.f32.gmra.mxu3 %vm214_vm1, %v4790_v60  ;;  %v4792_v42 = vld [vmem:[#allocation33_spill] sm:$0xff]  ;;  %v4793_v28 = vld [vmem:[#allocation28_spill] sm:$0xff] }
 0x1d4   : > { %2806 = vst.msk [vmem:[%s4351_s11] sm:$0xff] %vm214_vm1, %v2602_v19  ;;  %v2704_v37 = vmul.f32 %v2602_v19, %v2602_v19 }
 0x1d5   : > { %v2283_v52 = vpop.f32.mrf.mxu2  ;;  %v2485_v29 = vpop.f32.mrf.mxu3 }
 0x1d6   : > { %v2284_v5 = vadd.f32 %v2283_v52, %v2083_v22  ;;  %v1727_v9 = vpop.f32.mrf.mxu0  ;;  %v2086_v51 = vpop.f32.mrf.mxu1  ;;  %v2634_v22 = vsel %vm214_vm1, %v2602_v19, 0.0  ;;  %v4794_v52 = vld [vmem:[#allocation34_spill] sm:$0xff] }
 0x1d7   : > { %v1813_v46 = vadd.f32 %v1727_v9, %v1526_v11 }
 0x1d8   : > { %v2573_v33 = vadd.f32 %v2485_v29, %v2284_v5  ;;  %v1529_v29 = vadd.f32 %v4794_v52, %v4063_v63 }
 0x1d9   : > { %v4366_v1 = vadd.f32 %v1813_v46, %v4792_v42  ;;  %3119 = vmatmul.msk.f32.gmra.mxu0 %vm214_vm1, %v1194_v18  ;;  %3182 = vmatmul.msk.f32.gmra.mxu1 %vm214_vm1, %v4081_v35  ;;  %v2736_v18 = vsel %vm214_vm1, %v2704_v37, 0.0  ;;  %v1195_v42 = vld [vmem:[#allocation3 + $0x98] sm:$0xff] }
 0x1da   : > { %v2603_v60 = vadd.f32 %v2573_v33, %v4793_v28  ;;  %3213 = vmatmul.msk.f32.gmra.mxu2 %vm214_vm1, %v1892_v38  ;;  %3245 = vmatmul.msk.f32.gmra.mxu3 %vm214_vm1, %v1954_v45  ;;  %v3150_v28 = vld [vmem:[%s3341_s27 + $0xa8] sm:$0xff] }
 0x1dc   : > { %v2635_v61 = vsel %vm214_vm1, %v2603_v60, 0.0  ;;  %v2705_v11 = vmul.f32 %v2603_v60, %v2603_v60  ;;  %2807 = vst.msk [vmem:[%s4351_s11 + $0x8] sm:$0xff] %vm214_vm1, %v2603_v60  ;;  %v1955_v60 = vld [vmem:[#allocation3 + $0xa8] sm:$0xff] }
 0x1dd   : > { %v2636_v5 = vadd.f32 %v2635_v61, %v2634_v22  ;;  %v2286_v35 = vpop.f32.mrf.mxu2  ;;  %v2488_v9 = vpop.f32.mrf.mxu3 }
 0x1de   : > { %v2737_v46 = vsel %vm214_vm1, %v2705_v11, 0.0  ;;  %v2287_v38 = vadd.f32 %v2286_v35, %v2086_v51  ;;  %v1730_v33 = vpop.f32.mrf.mxu0  ;;  %v2089_v19 = vpop.f32.mrf.mxu1 }
 0x1df   : > { %v2738_v6 = vadd.f32 %v2737_v46, %v2736_v18  ;;  %v1814_v20 = vadd.f32 %v1730_v33, %v1529_v29  ;;  %v1894_v18 = vld [vmem:[#allocation2 + $0xb0] sm:$0xff] }
 0x1e0   : > { %v2574_v15 = vadd.f32 %v2488_v9, %v2287_v38  ;;  %v1956_v46 = vld [vmem:[#allocation3 + $0xb0] sm:$0xff] }
 0x1e1   : > { %v4384_v63 = vadd.f32 %v1814_v20, %v4795_v34  ;;  %3120 = vmatmul.msk.f32.gmra.mxu0 %vm214_vm1, %v1195_v42  ;;  %3183 = vmatmul.msk.f32.gmra.mxu1 %vm214_vm1, %v3150_v28  ;;  %v1532_v34 = vadd.f32 %v3958_v17, %v4078_v48 }
 0x1e2   : > { %v2604_v51 = vadd.f32 %v2574_v15, %v4332_v7  ;;  %3214 = vmatmul.msk.f32.gmra.mxu2 %vm214_vm1, %v1893_v16  ;;  %3246 = vmatmul.msk.f32.gmra.mxu3 %vm214_vm1, %v1955_v60  ;;  %v3151_v16 = vld [vmem:[%s3341_s27 + $0xb0] sm:$0xff] }
 0x1e4   : > { %v2637_v37 = vsel %vm214_vm1, %v2604_v51, 0.0  ;;  %v2706_v22 = vmul.f32 %v2604_v51, %v2604_v51  ;;  %2808 = vst.msk [vmem:[%s4351_s11 + $0x10] sm:$0xff] %vm214_vm1, %v2604_v51 }
 0x1e5   : > { %v2638_v20 = vadd.f32 %v2637_v37, %v2636_v5  ;;  %v2289_v61 = vpop.f32.mrf.mxu2  ;;  %v2491_v11 = vpop.f32.mrf.mxu3  ;;  %v4796_v5 = vld [vmem:[#allocation36_spill] sm:$0xff] }
 0x1e6   : > { %v2739_v52 = vsel %vm214_vm1, %v2706_v22, 0.0  ;;  %v2290_v29 = vadd.f32 %v2289_v61, %v2089_v19  ;;  %v1733_v35 = vpop.f32.mrf.mxu0  ;;  %v2092_v15 = vpop.f32.mrf.mxu1  ;;  %v3152_v22 = vld [vmem:[%s3341_s27 + $0xb8] sm:$0xff] }
 0x1e7   : > { %v2740_v7 = vadd.f32 %v2739_v52, %v2738_v6  ;;  %v1815_v9 = vadd.f32 %v1733_v35, %v1532_v34  ;;  %v1957_v52 = vld [vmem:[#allocation3 + $0xb8] sm:$0xff]  ;;  %v4797_v35 = vld [vmem:[#allocation37_spill] sm:$0xff] }
 0x1e8   : > { %v2575_v38 = vadd.f32 %v2491_v11, %v2290_v29  ;;  %v1895_v11 = vld [vmem:[#allocation2 + $0xb8] sm:$0xff] }
 0x1e9   : > { %v4399_v33 = vadd.f32 %v1815_v9, %v3960_v12  ;;  %3121 = vmatmul.msk.f32.gmra.mxu0 %vm214_vm1, %v1954_v45  ;;  %3184 = vmatmul.msk.f32.gmra.mxu1 %vm214_vm1, %v3151_v16  ;;  %v1535_v12 = vadd.f32 %v4796_v5, %v4093_v14 }
 0x1ea   : > { %v2605_v17 = vadd.f32 %v2575_v38, %v4344_v13  ;;  %3215 = vmatmul.msk.f32.gmra.mxu2 %vm214_vm1, %v1894_v18  ;;  %3247 = vmatmul.msk.f32.gmra.mxu3 %vm214_vm1, %v1956_v46 }
 0x1ec   : > { %v2639_v48 = vsel %vm214_vm1, %v2605_v17, 0.0  ;;  %v2707_v6 = vmul.f32 %v2605_v17, %v2605_v17  ;;  %2809 = vst.msk [vmem:[%s4351_s11 + $0x18] sm:$0xff] %vm214_vm1, %v2605_v17 }
 0x1ed   : > { %v2640_v42 = vadd.f32 %v2639_v48, %v2638_v20  ;;  %v2292_v19 = vpop.f32.mrf.mxu2  ;;  %v2494_v45 = vpop.f32.mrf.mxu3 }
 0x1ee   : > { %v2741_v28 = vsel %vm214_vm1, %v2707_v6, 0.0  ;;  %v2293_v51 = vadd.f32 %v2292_v19, %v2092_v15  ;;  %v1736_v37 = vpop.f32.mrf.mxu0  ;;  %v2095_v13 = vpop.f32.mrf.mxu1  ;;  %v3153_v6 = vld [vmem:[%s3341_s27 + $0xc0] sm:$0xff] }
 0x1ef   : > { %v2742_v34 = vadd.f32 %v2741_v28, %v2740_v7  ;;  %v1816_v61 = vadd.f32 %v1736_v37, %v1535_v12  ;;  %v1538_v7 = vadd.f32 %v3988_v23, %v4107_v21  ;;  %v1896_v19 = vld [vmem:[#allocation2 + $0xc0] sm:$0xff]  ;;  %v4798_v37 = vld [vmem:[#allocation38_spill] sm:$0xff] }
 0x1f0   : > { %v2576_v29 = vadd.f32 %v2494_v45, %v2293_v51  ;;  %v1958_v45 = vld [vmem:[#allocation3 + $0xc0] sm:$0xff] }
 0x1f1   : > { %v4414_v16 = vadd.f32 %v1816_v61, %v4797_v35  ;;  %3122 = vmatmul.msk.f32.gmra.mxu0 %vm214_vm1, %v1955_v60  ;;  %3185 = vmatmul.msk.f32.gmra.mxu1 %vm214_vm1, %v3152_v22 }
 0x1f2   : > { %v2606_v14 = vadd.f32 %v2576_v29, %v4366_v1  ;;  %3216 = vmatmul.msk.f32.gmra.mxu2 %vm214_vm1, %v1895_v11  ;;  %3248 = vmatmul.msk.f32.gmra.mxu3 %vm214_vm1, %v1957_v52  ;;  %v3154_v29 = vld [vmem:[%s3341_s27 + $0xc8] sm:$0xff] }
 0x1f4   : > { %v2641_v20 = vsel %vm214_vm1, %v2606_v14, 0.0  ;;  %v2708_v15 = vmul.f32 %v2606_v14, %v2606_v14  ;;  %2810 = vst.msk [vmem:[%s4351_s11 + $0x20] sm:$0xff] %vm214_vm1, %v2606_v14 }
 0x1f5   : > { %v2642_v9 = vadd.f32 %v2641_v20, %v2640_v42  ;;  %v2295_v18 = vpop.f32.mrf.mxu2  ;;  %v2497_v60 = vpop.f32.mrf.mxu3  ;;  %v1897_v20 = vld [vmem:[#allocation2 + $0xc8] sm:$0xff] }
 0x1f6   : > { %v2743_v38 = vsel %vm214_vm1, %v2708_v15, 0.0  ;;  %v2296_v17 = vadd.f32 %v2295_v18, %v2095_v13  ;;  %v1739_v48 = vpop.f32.mrf.mxu0  ;;  %v2098_v1 = vpop.f32.mrf.mxu1  ;;  %v1959_v15 = vld [vmem:[#allocation3 + $0xc8] sm:$0xff]  ;;  %v4799_v18 = vld [vmem:[#allocation39_spill] sm:$0xff] }
 0x1f7   : > { %v2744_v5 = vadd.f32 %v2743_v38, %v2742_v34  ;;  %v1817_v12 = vadd.f32 %v1739_v48, %v1538_v7 }
 0x1f8   : > { %v2577_v28 = vadd.f32 %v2497_v60, %v2296_v17  ;;  %v1544_v17 = vadd.f32 %v4020_v26, %v4138_v41 }
 0x1f9   : > { %v4429_v51 = vadd.f32 %v1817_v12, %v3990_v36  ;;  %3123 = vmatmul.msk.f32.gmra.mxu0 %vm214_vm1, %v1956_v46  ;;  %3186 = vmatmul.msk.f32.gmra.mxu1 %vm214_vm1, %v3153_v6  ;;  %v1541_v36 = vadd.f32 %v4798_v37, %v4123_v31 }
 0x1fa   : > { %v2607_v23 = vadd.f32 %v2577_v28, %v4384_v63  ;;  %3217 = vmatmul.msk.f32.gmra.mxu2 %vm214_vm1, %v1896_v19  ;;  %3249 = vmatmul.msk.f32.gmra.mxu3 %vm214_vm1, %v1958_v45  ;;  %v3155_v19 = vld [vmem:[%s3341_s27 + $0xd0] sm:$0xff] }
 0x1fc   : > { %v2643_v21 = vsel %vm214_vm1, %v2607_v23, 0.0  ;;  %v2709_v42 = vmul.f32 %v2607_v23, %v2607_v23  ;;  %2811 = vst.msk [vmem:[%s4351_s11 + $0x28] sm:$0xff] %vm214_vm1, %v2607_v23 }
 0x1fd   : > { %v2644_v13 = vadd.f32 %v2643_v21, %v2642_v9  ;;  %v2298_v22 = vpop.f32.mrf.mxu2  ;;  %v2500_v46 = vpop.f32.mrf.mxu3  ;;  %v1898_v21 = vld [vmem:[#allocation2 + $0xd0] sm:$0xff] }
 0x1fe   : > { %v2745_v34 = vsel %vm214_vm1, %v2709_v42, 0.0  ;;  %v2299_v61 = vadd.f32 %v2298_v22, %v2098_v1  ;;  %v1742_v11 = vpop.f32.mrf.mxu0  ;;  %v2101_v63 = vpop.f32.mrf.mxu1  ;;  %v1960_v42 = vld [vmem:[#allocation3 + $0xd0] sm:$0xff]  ;;  %v4800_v22 = vld [vmem:[#allocation40_spill] sm:$0xff] }
 0x1ff   : > { %v2746_v35 = vadd.f32 %v2745_v34, %v2744_v5  ;;  %v1818_v14 = vadd.f32 %v1742_v11, %v1541_v36 }
 0x200   : > { %v2578_v7 = vadd.f32 %v2500_v46, %v2299_v61 }
 0x201   : > { %v4444_v60 = vadd.f32 %v1818_v14, %v4799_v18  ;;  %3124 = vmatmul.msk.f32.gmra.mxu0 %vm214_vm1, %v1957_v52  ;;  %3187 = vmatmul.msk.f32.gmra.mxu1 %vm214_vm1, %v3154_v29  ;;  %v3156_v29 = vld [vmem:[%s3341_s27 + $0xd8] sm:$0xff] }
 0x202   : > { %v2608_v31 = vadd.f32 %v2578_v7, %v4399_v33  ;;  %3218 = vmatmul.msk.f32.gmra.mxu2 %vm214_vm1, %v1897_v20  ;;  %3250 = vmatmul.msk.f32.gmra.mxu3 %vm214_vm1, %v1959_v15  ;;  %v1899_v20 = vld [vmem:[#allocation2 + $0xd8] sm:$0xff] }
 0x203   : > { %v1961_v7 = vld [vmem:[#allocation3 + $0xd8] sm:$0xff] }
 0x204   : > { %v2645_v9 = vsel %vm214_vm1, %v2608_v31, 0.0  ;;  %v2710_v38 = vmul.f32 %v2608_v31, %v2608_v31  ;;  %2812 = vst.msk [vmem:[%s4351_s11 + $0x30] sm:$0xff] %vm214_vm1, %v2608_v31  ;;  %v4801_v31 = vld [vmem:[#allocation41_spill] sm:$0xff] }
 0x205   : > { %v2646_v48 = vadd.f32 %v2645_v9, %v2644_v13  ;;  %v2301_v1 = vpop.f32.mrf.mxu2  ;;  %v2503_v52 = vpop.f32.mrf.mxu3 }
 0x206   : > { %v2747_v6 = vsel %vm214_vm1, %v2710_v38, 0.0  ;;  %v2302_v5 = vadd.f32 %v2301_v1, %v2101_v63  ;;  %v1745_v12 = vpop.f32.mrf.mxu0  ;;  %v2104_v33 = vpop.f32.mrf.mxu1 }
 0x207   : > { %v2748_v28 = vadd.f32 %v2747_v6, %v2746_v35  ;;  %v1819_v23 = vadd.f32 %v1745_v12, %v1544_v17 }
 0x208   : > { %v2579_v37 = vadd.f32 %v2503_v52, %v2302_v5 }
 0x209   : > { %v4459_v36 = vadd.f32 %v1819_v23, %v4022_v40  ;;  %3125 = vmatmul.msk.f32.gmra.mxu0 %vm214_vm1, %v1958_v45  ;;  %3188 = vmatmul.msk.f32.gmra.mxu1 %vm214_vm1, %v3155_v19  ;;  %v1547_v40 = vadd.f32 %v4800_v22, %v4153_v47  ;;  %v3157_v19 = vld [vmem:[%s3341_s27 + $0xe0] sm:$0xff] }
 0x20a   : > { %v2609_v26 = vadd.f32 %v2579_v37, %v4414_v16  ;;  %3219 = vmatmul.msk.f32.gmra.mxu2 %vm214_vm1, %v1898_v21  ;;  %3251 = vmatmul.msk.f32.gmra.mxu3 %vm214_vm1, %v1960_v42  ;;  %v1900_v21 = vld [vmem:[#allocation2 + $0xe0] sm:$0xff] }
 0x20b   : > { %v1962_v37 = vld [vmem:[#allocation3 + $0xe0] sm:$0xff] }
 0x20c   : > { %v2647_v41 = vsel %vm214_vm1, %v2609_v26, 0.0  ;;  %v2711_v13 = vmul.f32 %v2609_v26, %v2609_v26  ;;  %2813 = vst.msk [vmem:[%s4351_s11 + $0x38] sm:$0xff] %vm214_vm1, %v2609_v26 }
 0x20d   : > { %v2648_v46 = vadd.f32 %v2647_v41, %v2646_v48  ;;  %v2304_v34 = vpop.f32.mrf.mxu2  ;;  %v2506_v45 = vpop.f32.mrf.mxu3  ;;  %v4802_v48 = vld [vmem:[#allocation42_spill] sm:$0xff]  ;;  %v4803_v41 = vld [vmem:[#allocation43_spill] sm:$0xff] }
 0x20e   : > { %v2749_v61 = vsel %vm214_vm1, %v2711_v13, 0.0  ;;  %v2305_v11 = vadd.f32 %v2304_v34, %v2104_v33  ;;  %v1748_v63 = vpop.f32.mrf.mxu0  ;;  %v2107_v16 = vpop.f32.mrf.mxu1  ;;  %v1550_v1 = vadd.f32 %v4802_v48, %v4168_v49 }
 0x20f   : > { %v2750_v35 = vadd.f32 %v2749_v61, %v2748_v28  ;;  %v1820_v14 = vadd.f32 %v1748_v63, %v1547_v40 }
 0x210   : > { %v2580_v18 = vadd.f32 %v2506_v45, %v2305_v11 }
 0x211   : > { %v4474_v9 = vadd.f32 %v1820_v14, %v4801_v31  ;;  %3126 = vmatmul.msk.f32.gmra.mxu0 %vm214_vm1, %v1959_v15  ;;  %3189 = vmatmul.msk.f32.gmra.mxu1 %vm214_vm1, %v3156_v29  ;;  %v3158_v29 = vld [vmem:[%s3341_s27 + $0xe8] sm:$0xff] }
 0x212   : > { %v2610_v47 = vadd.f32 %v2580_v18, %v4429_v51  ;;  %3220 = vmatmul.msk.f32.gmra.mxu2 %vm214_vm1, %v1899_v20  ;;  %3252 = vmatmul.msk.f32.gmra.mxu3 %vm214_vm1, %v1961_v7  ;;  %v1901_v20 = vld [vmem:[#allocation2 + $0xe8] sm:$0xff] }
 0x213   : > { %v1963_v18 = vld [vmem:[#allocation3 + $0xe8] sm:$0xff] }
 0x214   : > { %v2649_v38 = vsel %vm214_vm1, %v2610_v47, 0.0  ;;  %v2712_v17 = vmul.f32 %v2610_v47, %v2610_v47  ;;  %2814 = vst.msk [vmem:[%s4351_s11 + $0x40] sm:$0xff] %vm214_vm1, %v2610_v47  ;;  %v4805_v47 = vld [vmem:[#allocation45_spill] sm:$0xff] }
 0x215   : > { %v2650_v52 = vadd.f32 %v2649_v38, %v2648_v46  ;;  %v2307_v6 = vpop.f32.mrf.mxu2  ;;  %v2509_v15 = vpop.f32.mrf.mxu3  ;;  %v4804_v46 = vld [vmem:[#allocation44_spill] sm:$0xff] }
 0x216   : > { %v2751_v5 = vsel %vm214_vm1, %v2712_v17, 0.0  ;;  %v2308_v12 = vadd.f32 %v2307_v6, %v2107_v16  ;;  %v1751_v33 = vpop.f32.mrf.mxu0  ;;  %v2110_v51 = vpop.f32.mrf.mxu1  ;;  %v1553_v34 = vadd.f32 %v4804_v46, %v4183_v43 }
 0x217   : > { %v2752_v28 = vadd.f32 %v2751_v5, %v2750_v35  ;;  %v1821_v23 = vadd.f32 %v1751_v33, %v1550_v1  ;;  %v1556_v1 = vadd.f32 %v4074_v27, %v4198_v50  ;;  %v3159_v33 = vld [vmem:[%s3341_s27 + $0xf0] sm:$0xff] }
 0x218   : > { %v2581_v26 = vadd.f32 %v2509_v15, %v2308_v12 }
 0x219   : > { %v4489_v13 = vadd.f32 %v1821_v23, %v4803_v41  ;;  %3127 = vmatmul.msk.f32.gmra.mxu0 %vm214_vm1, %v1960_v42  ;;  %3190 = vmatmul.msk.f32.gmra.mxu1 %vm214_vm1, %v3157_v19  ;;  %v1964_v23 = vld [vmem:[#allocation3 + $0xf0] sm:$0xff] }
 0x21a   : > { %v2611_v49 = vadd.f32 %v2581_v26, %v4444_v60  ;;  %3221 = vmatmul.msk.f32.gmra.mxu2 %vm214_vm1, %v1900_v21  ;;  %3253 = vmatmul.msk.f32.gmra.mxu3 %vm214_vm1, %v1962_v37  ;;  %v4806_v26 = vld [vmem:[#allocation46_spill] sm:$0xff] }
 0x21c   : > { %v2651_v22 = vsel %vm214_vm1, %v2611_v49, 0.0  ;;  %v2713_v40 = vmul.f32 %v2611_v49, %v2611_v49  ;;  %2815 = vst.msk [vmem:[%s4351_s11 + $0x48] sm:$0xff] %vm214_vm1, %v2611_v49 }
 0x21d   : > { %v2652_v45 = vadd.f32 %v2651_v22, %v2650_v52  ;;  %v2310_v61 = vpop.f32.mrf.mxu2  ;;  %v2512_v42 = vpop.f32.mrf.mxu3  ;;  %v1559_v22 = vadd.f32 %v4089_v30, %v4213_v44 }
 0x21e   : > { %v2753_v11 = vsel %vm214_vm1, %v2713_v40, 0.0  ;;  %v2311_v63 = vadd.f32 %v2310_v61, %v2110_v51  ;;  %v1754_v16 = vpop.f32.mrf.mxu0  ;;  %v2113_v60 = vpop.f32.mrf.mxu1 }
 0x21f   : > { %v2754_v35 = vadd.f32 %v2753_v11, %v2752_v28  ;;  %v1822_v14 = vadd.f32 %v1754_v16, %v1553_v34  ;;  %v1902_v28 = vld [vmem:[#allocation2 + $0xf0] sm:$0xff]  ;;  %v1903_v16 = vld [vmem:[#allocation2 + $0xf8] sm:$0xff] }
 0x220   : > { %v2582_v31 = vadd.f32 %v2512_v42, %v2311_v63  ;;  %v3160_v42 = vld [vmem:[%s3341_s27 + $0xf8] sm:$0xff] }
 0x221   : > { %v4504_v38 = vadd.f32 %v1822_v14, %v4805_v47  ;;  %3128 = vmatmul.msk.f32.gmra.mxu0 %vm214_vm1, %v1961_v7  ;;  %3191 = vmatmul.msk.f32.gmra.mxu1 %vm214_vm1, %v3158_v29 }
 0x222   : > { %v2612_v43 = vadd.f32 %v2582_v31, %v4459_v36  ;;  %3222 = vmatmul.msk.f32.gmra.mxu2 %vm214_vm1, %v1901_v20  ;;  %3254 = vmatmul.msk.f32.gmra.mxu3 %vm214_vm1, %v1963_v18  ;;  %v1562_v31 = vadd.f32 %v4103_v57, %v4228_v53  ;;  %v1565_v57 = vadd.f32 %v4117_v2, %v4242_v3  ;;  %v4808_v2 = vld [vmem:[#allocation4_spill] sm:$0xff] }
 0x223   : > { %v829_v3 = vadd.f32 %v4121_v39, %v4808_v2 }
 0x224   : > { %v2653_v17 = vsel %vm214_vm1, %v2612_v43, 0.0  ;;  %v2714_v48 = vmul.f32 %v2612_v43, %v2612_v43  ;;  %2816 = vst.msk [vmem:[%s4351_s11 + $0x50] sm:$0xff] %vm214_vm1, %v2612_v43 }
 0x225   : > { %v2654_v52 = vadd.f32 %v2653_v17, %v2652_v45  ;;  %v2313_v6 = vpop.f32.mrf.mxu2  ;;  %v2515_v7 = vpop.f32.mrf.mxu3 }
 0x226   : > { %v2755_v15 = vsel %vm214_vm1, %v2714_v48, 0.0  ;;  %v2314_v5 = vadd.f32 %v2313_v6, %v2113_v60  ;;  %v1757_v12 = vpop.f32.mrf.mxu0  ;;  %v2116_v36 = vpop.f32.mrf.mxu1  ;;  %v1965_v60 = vld [vmem:[#allocation3 + $0xf8] sm:$0xff] }
 0x227   : > { %v2756_v51 = vadd.f32 %v2755_v15, %v2754_v35  ;;  %v1823_v19 = vadd.f32 %v1757_v12, %v1556_v1  ;;  %v4807_v35 = vld [vmem:[#allocation47_spill] sm:$0xff] }
 0x228   : > { %v2583_v21 = vadd.f32 %v2515_v7, %v2314_v5 }
 0x229   : > { %v1855_v41 = vadd.f32 %v1823_v19, %v4806_v26  ;;  %3129 = vmatmul.msk.f32.gmra.mxu0 %vm214_vm1, %v1962_v37  ;;  %3192 = vmatmul.msk.f32.gmra.mxu1 %vm214_vm1, %v3159_v33 }
 0x22a   : > { %v2613_v27 = vadd.f32 %v2583_v21, %v4474_v9  ;;  %3223 = vmatmul.msk.f32.gmra.mxu2 %vm214_vm1, %v1902_v28  ;;  %3255 = vmatmul.msk.f32.gmra.mxu3 %vm214_vm1, %v1964_v23 }
 0x22c   : > { %v2655_v50 = vsel %vm214_vm1, %v2613_v27, 0.0  ;;  %v2715_v49 = vmul.f32 %v2613_v27, %v2613_v27  ;;  %2817 = vst.msk [vmem:[%s4351_s11 + $0x58] sm:$0xff] %vm214_vm1, %v2613_v27 }
 0x22d   : > { %v2656_v40 = vadd.f32 %v2655_v50, %v2654_v52  ;;  %v2316_v46 = vpop.f32.mrf.mxu2  ;;  %v2518_v37 = vpop.f32.mrf.mxu3 }
 0x22e   : > { %v2757_v34 = vsel %vm214_vm1, %v2715_v49, 0.0  ;;  %v2317_v45 = vadd.f32 %v2316_v46, %v2116_v36  ;;  %v1760_v61 = vpop.f32.mrf.mxu0  ;;  %v2119_v9 = vpop.f32.mrf.mxu1 }
 0x22f   : > { %v2758_v11 = vadd.f32 %v2757_v34, %v2756_v51  ;;  %v1824_v63 = vadd.f32 %v1760_v61, %v1559_v22 }
 0x230   : > { %v2584_v29 = vadd.f32 %v2518_v37, %v2317_v45 }
 0x231   : > { %v1856_v14 = vadd.f32 %v1824_v63, %v4807_v35  ;;  %3130 = vmatmul.msk.f32.gmra.mxu0 %vm214_vm1, %v1963_v18  ;;  %3193 = vmatmul.msk.f32.gmra.mxu1 %vm214_vm1, %v3160_v42 }
 0x232   : > { %v2614_v30 = vadd.f32 %v2584_v29, %v4489_v13  ;;  %3224 = vmatmul.msk.f32.gmra.mxu2 %vm214_vm1, %v1903_v16  ;;  %3256 = vmatmul.msk.f32.gmra.mxu3 %vm214_vm1, %v1965_v60 }
 0x234   : > { %v2657_v44 = vsel %vm214_vm1, %v2614_v30, 0.0  ;;  %v2716_v20 = vmul.f32 %v2614_v30, %v2614_v30  ;;  %2818 = vst.msk [vmem:[%s4351_s11 + $0x60] sm:$0xff] %vm214_vm1, %v2614_v30  ;;  %v1571_v30 = vadd.f32 %v4149_v59, %v4271_v25  ;;  %v4812_v59 = vld [vmem:[#allocation10_spill] sm:$0xff] }
 0x235   : > { %v2658_v47 = vadd.f32 %v2657_v44, %v2656_v40  ;;  %v2319_v43 = vpop.f32.mrf.mxu2  ;;  %v2521_v18 = vpop.f32.mrf.mxu3  ;;  %v1568_v40 = vadd.f32 %v4134_v55, %v4256_v58  ;;  %v4809_v55 = vld [vmem:[#allocation7_spill] sm:$0xff]  ;;  %v4810_v58 = vld [vmem:[#allocation48_spill] sm:$0xff]  ;;  %v4813_v25 = vld [vmem:[#allocation50_spill] sm:$0xff] }
 0x236   : > { %v2759_v17 = vsel %vm214_vm1, %v2716_v20, 0.0  ;;  %v2320_v48 = vadd.f32 %v2319_v43, %v2119_v9  ;;  %v1763_v13 = vpop.f32.mrf.mxu0  ;;  %v2122_v1 = vpop.f32.mrf.mxu1  ;;  %v1102_v9 = vadd.f32 %v4132_v54, %v829_v3  ;;  %v832_v35 = vadd.f32 %v4810_v58, %v4809_v55 }
 0x237   : > { %v2760_v52 = vadd.f32 %v2759_v17, %v2758_v11  ;;  %v1825_v6 = vadd.f32 %v1763_v13, %v1562_v31 }
 0x238   : > { %v2585_v7 = vadd.f32 %v2521_v18, %v2320_v48  ;;  %v4811_v18 = vld [vmem:[#allocation49_spill] sm:$0xff] }
 0x239   : > { %v1857_v15 = vadd.f32 %v1825_v6, %v4105_v32  ;;  %v1103_v17 = vadd.f32 %v4811_v18, %v832_v35  ;;  %v1580_v35 = vadd.f32 %v4194_v10, %v4316_v24  ;;  %v4821_v10 = vld [vmem:[#allocation19_spill] sm:$0xff]  ;;  %v4822_v24 = vld [vmem:[#allocation56_spill] sm:$0xff] }
 0x23a   : > { %v2615_v5 = vadd.f32 %v2585_v7, %v4504_v38 }
 0x23c   : > { %v2659_v12 = vsel %vm214_vm1, %v2615_v5, 0.0  ;;  %v2717_v36 = vmul.f32 %v2615_v5, %v2615_v5  ;;  %2819 = vst.msk [vmem:[%s4351_s11 + $0x68] sm:$0xff] %vm214_vm1, %v2615_v5 }
 0x23d   : > { %v2660_v53 = vadd.f32 %v2659_v12, %v2658_v47  ;;  %v2322_v33 = vpop.f32.mrf.mxu2  ;;  %v2524_v51 = vpop.f32.mrf.mxu3  ;;  %v835_v12 = vadd.f32 %v4813_v25, %v4812_v59  ;;  %v4823_v59 = vld [vmem:[#allocation6_spill] sm:$0xff] }
 0x23e   : > { %v2761_v19 = vsel %vm214_vm1, %v2717_v36, 0.0  ;;  %v2323_v28 = vadd.f32 %v2322_v33, %v2122_v1  ;;  %v1766_v23 = vpop.f32.mrf.mxu0  ;;  %v2125_v21 = vpop.f32.mrf.mxu1  ;;  %v1574_v36 = vadd.f32 %v4164_v0, %v4286_v8  ;;  %v4815_v0 = vld [vmem:[#allocation13_spill] sm:$0xff]  ;;  %v4816_v8 = vld [vmem:[#allocation52_spill] sm:$0xff]  ;;  %v4824_v25 = vld [vmem:[#allocation58_spill] sm:$0xff] }
 0x23f   : > { %v2762_v32 = vadd.f32 %v2761_v19, %v2760_v52  ;;  %v1826_v26 = vadd.f32 %v1766_v23, %v1565_v57  ;;  %v4814_v23 = vld [vmem:[#allocation51_spill] sm:$0xff]  ;;  %v838_v3 = vadd.f32 %v4816_v8, %v4815_v0 }
 0x240   : > { %v2586_v38 = vadd.f32 %v2524_v51, %v2323_v28  ;;  %v4827_v0 = vld [vmem:[#allocation59_spill] sm:$0xff] }
 0x241   : > { %v1858_v27 = vadd.f32 %v1826_v26, %v4119_v56 }
 0x242   : > { %v2616_v50 = vadd.f32 %v2586_v38, %v1855_v41 }
 0x244   : > { %v2661_v49 = vsel %vm214_vm1, %v2616_v50, 0.0  ;;  %v2718_v22 = vmul.f32 %v2616_v50, %v2616_v50  ;;  %2820 = vst.msk [vmem:[%s4351_s11 + $0x70] sm:$0xff] %vm214_vm1, %v2616_v50 }
 0x245   : > { %v2662_v46 = vadd.f32 %v2661_v49, %v2660_v53  ;;  %v2325_v37 = vpop.f32.mrf.mxu2  ;;  %v2527_v34 = vpop.f32.mrf.mxu3 }
 0x246   : > { %v2763_v45 = vsel %vm214_vm1, %v2718_v22, 0.0  ;;  %v2326_v61 = vadd.f32 %v2325_v37, %v2125_v21  ;;  %v1769_v56 = vpop.f32.mrf.mxu0  ;;  %v2128_v41 = vpop.f32.mrf.mxu1  ;;  %v1104_v21 = vadd.f32 %v4814_v23, %v835_v12  ;;  %v1583_v12 = vadd.f32 %v4824_v25, %v4823_v59  ;;  %v4836_v59 = vld [vmem:[#allocation8_spill] sm:$0xff]  ;;  %v4837_v25 = vld [vmem:[#allocation65_spill] sm:$0xff] }
 0x247   : > { %v2764_v42 = vadd.f32 %v2763_v45, %v2762_v32  ;;  %v1827_v11 = vadd.f32 %v1769_v56, %v1568_v40  ;;  %v1577_v40 = vadd.f32 %v4179_v4, %v4301_v62  ;;  %v4818_v4 = vld [vmem:[#allocation16_spill] sm:$0xff]  ;;  %v4819_v62 = vld [vmem:[#allocation54_spill] sm:$0xff] }
 0x248   : > { %v2587_v63 = vadd.f32 %v2527_v34, %v2326_v61  ;;  %v841_v58 = vadd.f32 %v4819_v62, %v4818_v4  ;;  %v4831_v62 = vld [vmem:[#allocation5_spill] sm:$0xff] }
 0x249   : > { %v1859_v16 = vadd.f32 %v1827_v11, %v1102_v9 }
 0x24a   : > { %v2617_v60 = vadd.f32 %v2587_v63, %v1856_v14 }
 0x24c   : > { %v2663_v39 = vsel %vm214_vm1, %v2617_v60, 0.0  ;;  %v2719_v29 = vmul.f32 %v2617_v60, %v2617_v60  ;;  %2821 = vst.msk [vmem:[%s4351_s11 + $0x78] sm:$0xff] %vm214_vm1, %v2617_v60 }
 0x24d   : > { %v2664_v44 = vadd.f32 %v2663_v39, %v2662_v46  ;;  %v2328_v20 = vpop.f32.mrf.mxu2  ;;  %v2530_v54 = vpop.f32.mrf.mxu3 }
 0x24e   : > { %v2765_v31 = vsel %vm214_vm1, %v2719_v29, 0.0  ;;  %v2329_v47 = vadd.f32 %v2328_v20, %v2128_v41  ;;  %v1772_v43 = vpop.f32.mrf.mxu0  ;;  %v2131_v14 = vpop.f32.mrf.mxu1  ;;  %v4817_v41 = vld [vmem:[#allocation53_spill] sm:$0xff] }
 0x24f   : > { %v2766_v48 = vadd.f32 %v2765_v31, %v2764_v42  ;;  %v1828_v13 = vadd.f32 %v1772_v43, %v1571_v30  ;;  %v1105_v9 = vadd.f32 %v4817_v41, %v838_v3  ;;  %v4820_v43 = vld [vmem:[#allocation55_spill] sm:$0xff]  ;;  %v4828_v3 = vld [vmem:[#allocation9_spill] sm:$0xff]  ;;  %v4830_v41 = vld [vmem:[#allocation60_spill] sm:$0xff] }
 0x250   : > { %v2588_v1 = vadd.f32 %v2530_v54, %v2329_v47 }
 0x251   : > { %v1860_v52 = vadd.f32 %v1828_v13, %v1103_v17 }
 0x252   : > { %v2618_v6 = vadd.f32 %v2588_v1, %v1857_v15 }
 0x254   : > { %v2665_v7 = vsel %vm214_vm1, %v2618_v6, 0.0  ;;  %v2720_v5 = vmul.f32 %v2618_v6, %v2618_v6  ;;  %2822 = vst.msk [vmem:[%s4351_s11 + $0x80] sm:$0xff] %vm214_vm1, %v2618_v6 }
 0x255   : > { %v2666_v57 = vadd.f32 %v2665_v7, %v2664_v44  ;;  %v2331_v53 = vpop.f32.mrf.mxu2  ;;  %v2533_v33 = vpop.f32.mrf.mxu3 }
 0x256   : > { %v2767_v51 = vsel %vm214_vm1, %v2720_v5, 0.0  ;;  %v2332_v19 = vadd.f32 %v2331_v53, %v2131_v14  ;;  %v1775_v28 = vpop.f32.mrf.mxu0  ;;  %v2134_v15 = vpop.f32.mrf.mxu1  ;;  %v1106_v14 = vadd.f32 %v4820_v43, %v841_v58  ;;  %v844_v5 = vadd.f32 %v4822_v24, %v4821_v10  ;;  %v4832_v58 = vld [vmem:[#allocation62_spill] sm:$0xff] }
 0x257   : > { %v2768_v32 = vadd.f32 %v2767_v51, %v2766_v48  ;;  %v1829_v26 = vadd.f32 %v1775_v28, %v1574_v36  ;;  %v4825_v28 = vld [vmem:[#allocation57_spill] sm:$0xff] }
 0x258   : > { %v2589_v38 = vadd.f32 %v2533_v33, %v2332_v19 }
 0x259   : > { %v1861_v50 = vadd.f32 %v1829_v26, %v1104_v21 }
 0x25a   : > { %v2619_v49 = vadd.f32 %v2589_v38, %v1858_v27 }
 0x25c   : > { %v2667_v22 = vsel %vm214_vm1, %v2619_v49, 0.0  ;;  %v2721_v2 = vmul.f32 %v2619_v49, %v2619_v49  ;;  %2823 = vst.msk [vmem:[%s4351_s11 + $0x88] sm:$0xff] %vm214_vm1, %v2619_v49 }
 0x25d   : > { %v2668_v46 = vadd.f32 %v2667_v22, %v2666_v57  ;;  %v2334_v37 = vpop.f32.mrf.mxu2  ;;  %v2536_v34 = vpop.f32.mrf.mxu3 }
 0x25e   : > { %v2769_v45 = vsel %vm214_vm1, %v2721_v2, 0.0  ;;  %v2335_v61 = vadd.f32 %v2334_v37, %v2134_v15  ;;  %v1778_v56 = vpop.f32.mrf.mxu0  ;;  %v2137_v27 = vpop.f32.mrf.mxu1  ;;  %v1107_v15 = vadd.f32 %v4825_v28, %v844_v5  ;;  %v4826_v2 = vld [vmem:[#allocation22_spill] sm:$0xff] }
 0x25f   : > { %v2770_v42 = vadd.f32 %v2769_v45, %v2768_v32  ;;  %v1830_v11 = vadd.f32 %v1778_v56, %v1577_v40  ;;  %v847_v8 = vadd.f32 %v4827_v0, %v4826_v2  ;;  %v4829_v40 = vld [vmem:[#allocation61_spill] sm:$0xff] }
 0x260   : > { %v2590_v63 = vadd.f32 %v2536_v34, %v2335_v61 }
 0x261   : > { %v1862_v60 = vadd.f32 %v1830_v11, %v1105_v9  ;;  %v1108_v9 = vadd.f32 %v4830_v41, %v847_v8 }
 0x262   : > { %v2620_v39 = vadd.f32 %v2590_v63, %v1859_v16 }
 0x264   : > { %v2669_v29 = vsel %vm214_vm1, %v2620_v39, 0.0  ;;  %v2722_v55 = vmul.f32 %v2620_v39, %v2620_v39  ;;  %2824 = vst.msk [vmem:[%s4351_s11 + $0x90] sm:$0xff] %vm214_vm1, %v2620_v39 }
 0x265   : > { %v2670_v30 = vadd.f32 %v2669_v29, %v2668_v46  ;;  %v2337_v44 = vpop.f32.mrf.mxu2  ;;  %v2539_v20 = vpop.f32.mrf.mxu3  ;;  %v1586_v46 = vadd.f32 %v4829_v40, %v4828_v3  ;;  %v4841_v3 = vld [vmem:[#allocation11_spill] sm:$0xff]  ;;  %v4842_v40 = vld [vmem:[#allocation68_spill] sm:$0xff] }
 0x266   : > { %v2771_v54 = vsel %vm214_vm1, %v2722_v55, 0.0  ;;  %v2338_v31 = vadd.f32 %v2337_v44, %v2137_v27  ;;  %v1781_v47 = vpop.f32.mrf.mxu0  ;;  %v2140_v16 = vpop.f32.mrf.mxu1  ;;  %v4834_v44 = vld [vmem:[#allocation64_spill] sm:$0xff] }
 0x267   : > { %v2772_v18 = vadd.f32 %v2771_v54, %v2770_v42  ;;  %v1831_v17 = vadd.f32 %v1781_v47, %v1580_v35  ;;  %v850_v35 = vadd.f32 %v4832_v58, %v4831_v62 }
 0x268   : > { %v2591_v48 = vadd.f32 %v2539_v20, %v2338_v31 }
 0x269   : > { %v1863_v13 = vadd.f32 %v1831_v17, %v1106_v14 }
 0x26a   : > { %v2621_v1 = vadd.f32 %v2591_v48, %v1860_v52 }
 0x26c   : > { %v2671_v6 = vsel %vm214_vm1, %v2621_v1, 0.0  ;;  %v2723_v7 = vmul.f32 %v2621_v1, %v2621_v1  ;;  %2825 = vst.msk [vmem:[%s4351_s11 + $0x98] sm:$0xff] %vm214_vm1, %v2621_v1 }
 0x26d   : > { %v2672_v36 = vadd.f32 %v2671_v6, %v2670_v30  ;;  %v2340_v57 = vpop.f32.mrf.mxu2  ;;  %v2542_v53 = vpop.f32.mrf.mxu3  ;;  %v4833_v30 = vld [vmem:[#allocation12_spill] sm:$0xff] }
 0x26e   : > { %v2773_v33 = vsel %vm214_vm1, %v2723_v7, 0.0  ;;  %v2341_v51 = vadd.f32 %v2340_v57, %v2140_v16  ;;  %v1784_v19 = vpop.f32.mrf.mxu0  ;;  %v2143_v52 = vpop.f32.mrf.mxu1  ;;  %v1589_v20 = vadd.f32 %v4834_v44, %v4833_v30  ;;  %v4839_v57 = vld [vmem:[#allocation67_spill] sm:$0xff]  ;;  %v4846_v30 = vld [vmem:[#allocation14_spill] sm:$0xff] }
 0x26f   : > { %v2774_v23 = vadd.f32 %v2773_v33, %v2772_v18  ;;  %v1832_v21 = vadd.f32 %v1784_v19, %v1583_v12  ;;  %v4835_v18 = vld [vmem:[#allocation63_spill] sm:$0xff]  ;;  %v853_v12 = vadd.f32 %v4837_v25, %v4836_v59 }
 0x270   : > { %v2592_v32 = vadd.f32 %v2542_v53, %v2341_v51  ;;  %v1109_v17 = vadd.f32 %v4835_v18, %v850_v35  ;;  %v4847_v44 = vld [vmem:[#allocation71_spill] sm:$0xff] }
 0x271   : > { %v1864_v26 = vadd.f32 %v1832_v21, %v1107_v15 }
 0x272   : > { %v2622_v38 = vadd.f32 %v2592_v32, %v1861_v50 }
 0x274   : > { %v2673_v49 = vsel %vm214_vm1, %v2622_v38, 0.0  ;;  %v2724_v22 = vmul.f32 %v2622_v38, %v2622_v38  ;;  %2826 = vst.msk [vmem:[%s4351_s11 + $0xa0] sm:$0xff] %vm214_vm1, %v2622_v38 }
 0x275   : > { %v2674_v37 = vadd.f32 %v2673_v49, %v2672_v36  ;;  %v2343_v34 = vpop.f32.mrf.mxu2  ;;  %v2545_v45 = vpop.f32.mrf.mxu3  ;;  %v4838_v36 = vld [vmem:[#allocation15_spill] sm:$0xff] }
 0x276   : > { %v2775_v61 = vsel %vm214_vm1, %v2724_v22, 0.0  ;;  %v2344_v56 = vadd.f32 %v2343_v34, %v2143_v52  ;;  %v1787_v27 = vpop.f32.mrf.mxu0  ;;  %v2146_v50 = vpop.f32.mrf.mxu1  ;;  %v1592_v53 = vadd.f32 %v4839_v57, %v4838_v36  ;;  %v4844_v34 = vld [vmem:[#allocation70_spill] sm:$0xff]  ;;  %v4851_v36 = vld [vmem:[#allocation17_spill] sm:$0xff] }
 0x277   : > { %v2776_v42 = vadd.f32 %v2775_v61, %v2774_v23  ;;  %v1833_v11 = vadd.f32 %v1787_v27, %v1586_v46  ;;  %v4840_v23 = vld [vmem:[#allocation66_spill] sm:$0xff]  ;;  %v856_v46 = vadd.f32 %v4842_v40, %v4841_v3 }
 0x278   : > { %v2593_v63 = vadd.f32 %v2545_v45, %v2344_v56  ;;  %v1110_v21 = vadd.f32 %v4840_v23, %v853_v12  ;;  %v4852_v57 = vld [vmem:[#allocation74_spill] sm:$0xff] }
 0x279   : > { %v1865_v39 = vadd.f32 %v1833_v11, %v1108_v9 }
 0x27a   : > { %v2623_v29 = vadd.f32 %v2593_v63, %v1862_v60 }
 0x27c   : > { %v2675_v55 = vsel %vm214_vm1, %v2623_v29, 0.0  ;;  %v2725_v4 = vmul.f32 %v2623_v29, %v2623_v29  ;;  %2827 = vst.msk [vmem:[%s4351_s11 + $0xa8] sm:$0xff] %vm214_vm1, %v2623_v29 }
 0x27d   : > { %v2676_v54 = vadd.f32 %v2675_v55, %v2674_v37  ;;  %v2346_v31 = vpop.f32.mrf.mxu2  ;;  %v2548_v47 = vpop.f32.mrf.mxu3  ;;  %v4843_v37 = vld [vmem:[#allocation18_spill] sm:$0xff] }
 0x27e   : > { %v2777_v16 = vsel %vm214_vm1, %v2725_v4, 0.0  ;;  %v2347_v43 = vadd.f32 %v2346_v31, %v2146_v50  ;;  %v1790_v14 = vpop.f32.mrf.mxu0  ;;  %v2149_v60 = vpop.f32.mrf.mxu1  ;;  %v1595_v45 = vadd.f32 %v4844_v34, %v4843_v37  ;;  %v4849_v31 = vld [vmem:[#allocation73_spill] sm:$0xff]  ;;  %v4856_v37 = vld [vmem:[#allocation20_spill] sm:$0xff] }
 0x27f   : > { %v2778_v48 = vadd.f32 %v2777_v16, %v2776_v42  ;;  %v1834_v1 = vadd.f32 %v1790_v14, %v1589_v20  ;;  %v4845_v42 = vld [vmem:[#allocation69_spill] sm:$0xff]  ;;  %v859_v20 = vadd.f32 %v4847_v44, %v4846_v30 }
 0x280   : > { %v2594_v6 = vadd.f32 %v2548_v47, %v2347_v43  ;;  %v1111_v11 = vadd.f32 %v4845_v42, %v856_v46  ;;  %v4857_v34 = vld [vmem:[#allocation77_spill] sm:$0xff] }
 0x281   : > { %v1866_v7 = vadd.f32 %v1834_v1, %v1109_v17 }
 0x282   : > { %v2624_v10 = vadd.f32 %v2594_v6, %v1863_v13 }
 0x284   : > { %v2677_v24 = vsel %vm214_vm1, %v2624_v10, 0.0  ;;  %v2726_v5 = vmul.f32 %v2624_v10, %v2624_v10  ;;  %2828 = vst.msk [vmem:[%s4351_s11 + $0xb0] sm:$0xff] %vm214_vm1, %v2624_v10 }
 0x285   : > { %v2678_v33 = vadd.f32 %v2677_v24, %v2676_v54  ;;  %v2349_v51 = vpop.f32.mrf.mxu2  ;;  %v2551_v19 = vpop.f32.mrf.mxu3  ;;  %v4848_v54 = vld [vmem:[#allocation21_spill] sm:$0xff] }
 0x286   : > { %v2779_v52 = vsel %vm214_vm1, %v2726_v5, 0.0  ;;  %v2350_v28 = vadd.f32 %v2349_v51, %v2149_v60  ;;  %v1793_v15 = vpop.f32.mrf.mxu0  ;;  %v2152_v13 = vpop.f32.mrf.mxu1  ;;  %v1598_v47 = vadd.f32 %v4849_v31, %v4848_v54  ;;  %v4854_v51 = vld [vmem:[#allocation76_spill] sm:$0xff]  ;;  %v4861_v54 = vld [vmem:[#allocation23_spill] sm:$0xff] }
 0x287   : > { %v2780_v32 = vadd.f32 %v2779_v52, %v2778_v48  ;;  %v1835_v38 = vadd.f32 %v1793_v15, %v1592_v53  ;;  %v4850_v48 = vld [vmem:[#allocation72_spill] sm:$0xff]  ;;  %v862_v53 = vadd.f32 %v4852_v57, %v4851_v36 }
 0x288   : > { %v2595_v49 = vadd.f32 %v2551_v19, %v2350_v28  ;;  %v1112_v1 = vadd.f32 %v4850_v48, %v859_v20  ;;  %v4862_v31 = vld [vmem:[#allocation80_spill] sm:$0xff] }
 0x289   : > { %v1867_v22 = vadd.f32 %v1835_v38, %v1110_v21 }
 0x28a   : > { %v2625_v2 = vadd.f32 %v2595_v49, %v1864_v26 }
 0x28c   : > { %v2679_v0 = vsel %vm214_vm1, %v2625_v2, 0.0  ;;  %v2727_v8 = vmul.f32 %v2625_v2, %v2625_v2  ;;  %2829 = vst.msk [vmem:[%s4351_s11 + $0xb8] sm:$0xff] %vm214_vm1, %v2625_v2 }
 0x28d   : > { %v2680_v61 = vadd.f32 %v2679_v0, %v2678_v33  ;;  %v2352_v56 = vpop.f32.mrf.mxu2  ;;  %v2554_v27 = vpop.f32.mrf.mxu3  ;;  %v4853_v33 = vld [vmem:[#allocation24_spill] sm:$0xff] }
 0x28e   : > { %v2781_v50 = vsel %vm214_vm1, %v2727_v8, 0.0  ;;  %v2353_v41 = vadd.f32 %v2352_v56, %v2152_v13  ;;  %v1796_v9 = vpop.f32.mrf.mxu0  ;;  %v2155_v26 = vpop.f32.mrf.mxu1  ;;  %v1601_v19 = vadd.f32 %v4854_v51, %v4853_v33  ;;  %v4859_v56 = vld [vmem:[#allocation79_spill] sm:$0xff] }
 0x28f   : > { %v2782_v63 = vadd.f32 %v2781_v50, %v2780_v32  ;;  %v1836_v29 = vadd.f32 %v1796_v9, %v1595_v45  ;;  %v865_v45 = vadd.f32 %v4857_v34, %v4856_v37 }
 0x290   : > { %v2596_v55 = vadd.f32 %v2554_v27, %v2353_v41 }
 0x291   : > { %v1868_v4 = vadd.f32 %v1836_v29, %v1111_v11  ;;  %v4860_v11 = vld [vmem:[#allocation78_spill] sm:$0xff] }
 0x292   : > { %v2626_v62 = vadd.f32 %v2596_v55, %v1865_v39 }
 0x294   : > { %v2681_v58 = vsel %vm214_vm1, %v2626_v62, 0.0  ;;  %v2728_v35 = vmul.f32 %v2626_v62, %v2626_v62  ;;  %2830 = vst.msk [vmem:[%s4351_s11 + $0xc0] sm:$0xff] %vm214_vm1, %v2626_v62 }
 0x295   : > { %v2682_v16 = vadd.f32 %v2681_v58, %v2680_v61  ;;  %v2355_v43 = vpop.f32.mrf.mxu2  ;;  %v2557_v14 = vpop.f32.mrf.mxu3  ;;  %v4858_v61 = vld [vmem:[#allocation25_spill] sm:$0xff] }
 0x296   : > { %v2783_v60 = vsel %vm214_vm1, %v2728_v35, 0.0  ;;  %v2356_v18 = vadd.f32 %v2355_v43, %v2155_v26  ;;  %v1799_v17 = vpop.f32.mrf.mxu0  ;;  %v2158_v39 = vpop.f32.mrf.mxu1  ;;  %v1604_v27 = vadd.f32 %v4859_v56, %v4858_v61  ;;  %v4864_v43 = vld [vmem:[#allocation82_spill] sm:$0xff] }
 0x297   : > { %v2784_v6 = vadd.f32 %v2783_v60, %v2782_v63  ;;  %v1837_v10 = vadd.f32 %v1799_v17, %v1598_v47  ;;  %v1114_v63 = vadd.f32 %v4860_v11, %v865_v45  ;;  %v868_v47 = vadd.f32 %v4862_v31, %v4861_v54 }
 0x298   : > { %v2597_v24 = vadd.f32 %v2557_v14, %v2356_v18 }
 0x299   : > { %v1869_v5 = vadd.f32 %v1837_v10, %v1112_v1  ;;  %v4865_v1 = vld [vmem:[#allocation81_spill] sm:$0xff] }
 0x29a   : > { %v2627_v59 = vadd.f32 %v2597_v24, %v1866_v7  ;;  %v4855_v7 = vld [vmem:[#allocation75_spill] sm:$0xff] }
 0x29b   : > { %v1113_v32 = vadd.f32 %v4855_v7, %v862_v53 }
 0x29c   : > { %v2683_v25 = vsel %vm214_vm1, %v2627_v59, 0.0  ;;  %v2729_v12 = vmul.f32 %v2627_v59, %v2627_v59  ;;  %2831 = vst.msk [vmem:[%s4351_s11 + $0xc8] sm:$0xff] %vm214_vm1, %v2627_v59 }
 0x29d   : > { %v2684_v52 = vadd.f32 %v2683_v25, %v2682_v16  ;;  %v2358_v28 = vpop.f32.mrf.mxu2  ;;  %v2560_v15 = vpop.f32.mrf.mxu3  ;;  %v4863_v16 = vld [vmem:[#allocation27_spill] sm:$0xff] }
 0x29e   : > { %v2785_v13 = vsel %vm214_vm1, %v2729_v12, 0.0  ;;  %v2359_v23 = vadd.f32 %v2358_v28, %v2158_v39  ;;  %v1802_v21 = vpop.f32.mrf.mxu0  ;;  %v2161_v2 = vpop.f32.mrf.mxu1  ;;  %v1607_v14 = vadd.f32 %v4864_v43, %v4863_v16 }
 0x29f   : > { %v2786_v38 = vadd.f32 %v2785_v13, %v2784_v6  ;;  %v1838_v49 = vadd.f32 %v1802_v21, %v1601_v19  ;;  %v1115_v6 = vadd.f32 %v4865_v1, %v868_v47 }
 0x2a0   : > { %v2598_v0 = vadd.f32 %v2560_v15, %v2359_v23 }
 0x2a1   : > { %v1870_v8 = vadd.f32 %v1838_v49, %v1113_v32 }
 0x2a2   : > { %v2628_v3 = vadd.f32 %v2598_v0, %v1867_v22 }
 0x2a4   : > { %v2685_v40 = vsel %vm214_vm1, %v2628_v3, 0.0  ;;  %v2730_v46 = vmul.f32 %v2628_v3, %v2628_v3  ;;  %2832 = vst.msk [vmem:[%s4351_s11 + $0xd0] sm:$0xff] %vm214_vm1, %v2628_v3 }
 0x2a5   : > { %v2686_v50 = vadd.f32 %v2685_v40, %v2684_v52  ;;  %v2361_v41 = vpop.f32.mrf.mxu2  ;;  %v2563_v9 = vpop.f32.mrf.mxu3 }
 0x2a6   : > { %v2787_v26 = vsel %vm214_vm1, %v2730_v46, 0.0  ;;  %v2362_v42 = vadd.f32 %v2361_v41, %v2161_v2  ;;  %v1805_v22 = vpop.f32.mrf.mxu0  ;;  %v2164_v35 = vpop.f32.mrf.mxu1 }
 0x2a7   : > { %v2788_v29 = vadd.f32 %v2787_v26, %v2786_v38  ;;  %v1839_v55 = vadd.f32 %v1805_v22, %v1604_v27 }
 0x2a8   : > { %v2599_v62 = vadd.f32 %v2563_v9, %v2362_v42 }
 0x2a9   : > { %v1871_v58 = vadd.f32 %v1839_v55, %v1114_v63 }
 0x2aa   : > { %v2629_v30 = vadd.f32 %v2599_v62, %v1868_v4 }
 0x2ab   : > { %2836 = vst.msk [vmem:[%s4351_s11 + $0xf0] sm:$0xff] %vm214_vm1, %v1871_v58  ;;  %v2734_v21 = vmul.f32 %v1871_v58, %v1871_v58  ;;  %v2693_v38 = vsel %vm214_vm1, %v1871_v58, 0.0 }
 0x2ac   : > { %v2687_v44 = vsel %vm214_vm1, %v2629_v30, 0.0  ;;  %v2731_v20 = vmul.f32 %v2629_v30, %v2629_v30  ;;  %2833 = vst.msk [vmem:[%s4351_s11 + $0xd8] sm:$0xff] %vm214_vm1, %v2629_v30 }
 0x2ad   : > { %v2688_v60 = vadd.f32 %v2687_v44, %v2686_v50  ;;  %v2364_v18 = vpop.f32.mrf.mxu2  ;;  %v2566_v17 = vpop.f32.mrf.mxu3  ;;  %v2795_v40 = vsel %vm214_vm1, %v2734_v21, 0.0 }
 0x2ae   : > { %v2789_v4 = vsel %vm214_vm1, %v2731_v20, 0.0  ;;  %v2365_v39 = vadd.f32 %v2364_v18, %v2164_v35  ;;  %v1808_v48 = vpop.f32.mrf.mxu0  ;;  %v2167_v36 = vpop.f32.mrf.mxu1 }
 0x2af   : > { %v2790_v10 = vadd.f32 %v2789_v4, %v2788_v29  ;;  %v1840_v24 = vadd.f32 %v1808_v48, %v1607_v14 }
 0x2b0   : > { %v2600_v59 = vadd.f32 %v2566_v17, %v2365_v39 }
 0x2b1   : > { %v1872_v25 = vadd.f32 %v1840_v24, %v1115_v6 }
 0x2b2   : > { %v2630_v12 = vadd.f32 %v2600_v59, %v1869_v5 }
 0x2b3   : > { %2837 = vst.msk [vmem:[%s4351_s11 + $0xf8] sm:$0xff] %vm214_vm1, %v1872_v25  ;;  %v2735_v49 = vmul.f32 %v1872_v25, %v1872_v25  ;;  %v2695_v46 = vsel %vm214_vm1, %v1872_v25, 0.0 }
 0x2b4   : > { %v2689_v57 = vsel %vm214_vm1, %v2630_v12, 0.0  ;;  %v2732_v53 = vmul.f32 %v2630_v12, %v2630_v12  ;;  %2834 = vst.msk [vmem:[%s4351_s11 + $0xe0] sm:$0xff] %vm214_vm1, %v2630_v12 }
 0x2b5   : > { %v2690_v33 = vadd.f32 %v2689_v57, %v2688_v60  ;;  %v2367_v51 = vpop.f32.mrf.mxu2  ;;  %v2569_v19 = vpop.f32.mrf.mxu3  ;;  %v2797_v34 = vsel %vm214_vm1, %v2735_v49, 0.0 }
 0x2b6   : > { %v2791_v52 = vsel %vm214_vm1, %v2732_v53, 0.0  ;;  %v2368_v28 = vadd.f32 %v2367_v51, %v2167_v36 }
 0x2b7   : > { %v2792_v15 = vadd.f32 %v2791_v52, %v2790_v10 }
 0x2b8   : > { %v2601_v13 = vadd.f32 %v2569_v19, %v2368_v28 }
 0x2ba   : > { %v2631_v23 = vadd.f32 %v2601_v13, %v1870_v8 }
 0x2bc   : > { %v2691_v5 = vsel %vm214_vm1, %v2631_v23, 0.0  ;;  %v2733_v7 = vmul.f32 %v2631_v23, %v2631_v23  ;;  %2835 = vst.msk [vmem:[%s4351_s11 + $0xe8] sm:$0xff] %vm214_vm1, %v2631_v23 }
 0x2bd   : > { %v2692_v32 = vadd.f32 %v2691_v5, %v2690_v33 }
 0x2be   : > { %v2793_v2 = vsel %vm214_vm1, %v2733_v7, 0.0 }
 0x2bf   : > { %v2694_v0 = vadd.f32 %v2693_v38, %v2692_v32  ;;  %v2794_v3 = vadd.f32 %v2793_v2, %v2792_v15 }
 0x2c1   : > { %v2696_v8 = vadd.f32 %v2695_v46, %v2694_v0  ;;  %v2796_v37 = vadd.f32 %v2795_v40, %v2794_v3 }
 0x2c3   : > { %v2697_v45 = vrot.slane %v2696_v8, 4  ;;  %v2798_v61 = vadd.f32 %v2797_v34, %v2796_v37 }
 0x2c5   : > { %v2698_v56 = vadd.f32 %v2697_v45, %v2696_v8  ;;  %v2799_v27 = vrot.slane %v2798_v61, 4 }
 0x2c7   : > { %v2699_v50 = vrot.slane %v2698_v56, 2  ;;  %v2800_v41 = vadd.f32 %v2799_v27, %v2798_v61 }
 0x2c9   : > { %v2700_v9 = vadd.f32 %v2699_v50, %v2698_v56  ;;  %v2801_v26 = vrot.slane %v2800_v41, 2 }
 0x2cb   : > { %v2701_v42 = vrot.slane %v2700_v9, 1  ;;  %v2802_v22 = vadd.f32 %v2801_v26, %v2800_v41 }
 0x2cd   : > { %v2702_v11 = vadd.f32 %v2701_v42, %v2700_v9  ;;  %v2803_v63 = vrot.slane %v2802_v22, 1 }
 0x2cf   : > { %2703 = vst.msk [vmem:[%s181_s17] sm:$0x1] %vm248_vm2, %v2702_v11  ;;  %v2804_v29 = vadd.f32 %v2803_v63, %v2802_v22 }
 0x2d1   : > { %2805 = vst.msk [vmem:[%s181_s17 + $0x1] sm:$0x1] %vm248_vm2, %v2804_v29 }
 0x2d2 PF: > { %s14_s12 = sadd.s32 1, %s3279_s12  }
 0x2d3   : > { %p11_p4 = scmp.ge.s32.totalorder %s14_s12, 4  }
 0x2d5   :  { %13 = sbr.rel (!%p11_p4) target bundleno = 1 (0x1), region = 81 }

// kernel: residual_forward.4
= control target key start
LH: loop header
LB: loop body
LE: loop exit
PB: predicated region body
PF: predicated region fallthrough
CT: control target
= control target key end

     0   :  { %s3138_s18 = smov 0   ;;  %s4792_s0 = inlined_call_operand.vmem [shape: f32[2,16,16,4], index: 0, kind: input, shape index: {}]   ;;  %s4793_s1 = inlined_call_operand.vmem [shape: f32[3,3,4,4], index: 1, kind: input, shape index: {}]   ;;  %s4794_s2 = inlined_call_operand.vmem [shape: f32[1,1,1,4], index: 2, kind: input, shape index: {}]   ;;  %s4795_s3 = inlined_call_operand.vmem [shape: f32[1,1,1,4], index: 3, kind: input, shape index: {}]   ;;  %s4796_s4 = inlined_call_operand.vmem [shape: f32[2,16,16,4], index: 4, kind: output, shape index: {0}]   ;;  %s4797_s5 = inlined_call_operand.vmem [shape: f32[2,2,4], index: 5, kind: output, shape index: {1}]  }
   0x1 LB: > { %s2778_s19 = sadd.s32 4294967295, %s3105_s18   ;;  %p2782_p0 = scmp.ge.s32.totalorder %s3105_s18, 1  ;;  %s3105_s18 = sphi %s3138_s18, %s16_s18  }
   0x2   : > { %p190_p1 = scmp.lt.s32.totalorder %s3105_s18, 3 }
   0x4   : > { %p191_p2 = pnand %p2782_p0, %p190_p1 }
   0x6   : > { %194 = sbr.rel (%p191_p2) target bundleno = 742 (0x2e6), region = 36 }
   0xb   : > { %v2789_v0 = vld [vmem:[%s4793_s1 + $0x10] sm:$0xf]  ;;  %vm636_vm0 = vcmask 1043456   ;;  %v2890_v1 = vld [vmem:[%s4793_s1 + $0x4] sm:$0xf]  ;;  %p222_p3 = scmp.lt.s32.totalorder %s2778_s19, 1 }
   0xc   : > { %2790 = vmatpush.msk.msra.mxu0 %vm636_vm0, %v2789_v0  ;;  %3085 = vmatpush.msk.msra.mxu1 %vm636_vm0, %v2789_v0  ;;  %v3161_v2 = vld [vmem:[%s4794_s2] ss:$0 sm:$0xff]  ;;  %v2856_v3 = vld [vmem:[%s4793_s1 + $0x14] sm:$0xf]  ;;  %v2788_v5 = vld [vmem:[%s4793_s1 + $0xc] sm:$0xf] }
   0xd   : > { %3086 = vmatpush.msk.msra.mxu2 %vm636_vm0, %v2789_v0  ;;  %3087 = vmatpush.msk.msra.mxu3 %vm636_vm0, %v2890_v1  ;;  %s5090_s19 = smov (!%p222_p3, %s2778_s19), 1  ;;  %v1271_v4 = vld [vmem:[%s4793_s1] sm:$0xf]  ;;  %vm372_vm1 = vcmask 31744   ;;  %vm423_vm2 = vcmask 31745   ;;  %vm374_vm3 = vcmask 30720  }
   0xe   : > { %2891 = vmatpush.msk.msrb.mxu0 %vm636_vm0, %v2890_v1  ;;  %s3083_s7 = sshll.u32 %s5090_s19, 8  ;;  %v3186_v6 = vld [vmem:[%s4795_s3] ss:$0 sm:$0xff]  ;;  %2823 = vmatpush.msk.msrb.mxu1 %vm636_vm0, %v2788_v5  ;;  %vm406_vm4 = vcmask 24576   ;;  %s2787_s26 = sshll.u32 %s5090_s19, 1 }
   0xf   : > { %2857 = vmatpush.msk.msrb.mxu2 %vm636_vm0, %v2856_v3  ;;  %2922 = vmatpush.msk.msrb.mxu3 %vm636_vm0, %v1271_v4  ;;  %s3181_s10 = scalar_lea.vmem %s4792_s0, %s3083_s7  ;;  %s4419_s25 = scalar_lea.vmem %s4796_s4, %s3083_s7 }
  0x10   : > { %v236_v7 = vld [vmem:[%s3181_s10] sm:$0xff]  ;;  %v254_v8 = vld [vmem:[%s3181_s10 + $0x90] sm:$0xff]  ;;  %v261_v9 = vld [vmem:[%s3181_s10 + $0xc8] sm:$0xff]  ;;  %s235_s29 = scalar_lea.vmem %s4797_s5, %s2787_s26 }
  0x11   : > { %v272_v10 = vmul.f32 %v3161_v2, %v236_v7  ;;  %v290_v11 = vmul.f32 %v3161_v2, %v254_v8  ;;  %v297_v12 = vmul.f32 %v3161_v2, %v261_v9  ;;  %v257_v13 = vld [vmem:[%s3181_s10 + $0xa8] sm:$0xff]  ;;  %v255_v15 = vld [vmem:[%s3181_s10 + $0x98] sm:$0xff]  ;;  %v262_v18 = vld [vmem:[%s3181_s10 + $0xd0] sm:$0xff] }
  0x12   : > { %v237_v14 = vld [vmem:[%s3181_s10 + $0x8] sm:$0xff]  ;;  %v293_v16 = vmul.f32 %v3161_v2, %v257_v13  ;;  %v258_v19 = vld [vmem:[%s3181_s10 + $0xb0] sm:$0xff]  ;;  %v291_v23 = vmul.f32 %v3161_v2, %v255_v15  ;;  %v298_v25 = vmul.f32 %v3161_v2, %v262_v18  ;;  %v256_v36 = vld [vmem:[%s3181_s10 + $0xa0] sm:$0xff] }
  0x13   : > { %v273_v17 = vmul.f32 %v3161_v2, %v237_v14  ;;  %v308_v20 = vadd.f32 %v3186_v6, %v272_v10  ;;  %v326_v21 = vadd.f32 %v3186_v6, %v290_v11  ;;  %v333_v22 = vadd.f32 %v3186_v6, %v297_v12  ;;  %v238_v35 = vld [vmem:[%s3181_s10 + $0x10] sm:$0xff]  ;;  %v263_v37 = vld [vmem:[%s3181_s10 + $0xd8] sm:$0xff]  ;;  %v264_v52 = vld [vmem:[%s3181_s10 + $0xe0] sm:$0xff] }
  0x14   : > { %v329_v24 = vadd.f32 %v3186_v6, %v293_v16  ;;  %v294_v26 = vmul.f32 %v3161_v2, %v258_v19  ;;  %v327_v32 = vadd.f32 %v3186_v6, %v291_v23  ;;  %v334_v33 = vadd.f32 %v3186_v6, %v298_v25  ;;  %v259_v38 = vld [vmem:[%s3181_s10 + $0xb8] sm:$0xff]  ;;  %v260_v53 = vld [vmem:[%s3181_s10 + $0xc0] sm:$0xff]  ;;  %v265_v1 = vld [vmem:[%s3181_s10 + $0xe8] sm:$0xff] }
  0x15   : > { %v3209_v27 = vmax.f32 %v308_v20, 0.0  ;;  %v3211_v28 = vmax.f32 %v326_v21, 0.0  ;;  %v3213_v29 = vmax.f32 %v333_v22, 0.0  ;;  %v309_v31 = vadd.f32 %v3186_v6, %v273_v17  ;;  %v239_v51 = vld [vmem:[%s3181_s10 + $0x18] sm:$0xff]  ;;  %v240_v0 = vld [vmem:[%s3181_s10 + $0x20] sm:$0xff]  ;;  %v241_v9 = vld [vmem:[%s3181_s10 + $0x28] sm:$0xff] }
  0x16   : > { %v3215_v30 = vmax.f32 %v329_v24, 0.0  ;;  %v330_v34 = vadd.f32 %v3186_v6, %v294_v26  ;;  %v3245_v40 = vmax.f32 %v327_v32, 0.0  ;;  %v274_v41 = vmul.f32 %v3161_v2, %v238_v35  ;;  %v266_v10 = vld [vmem:[%s3181_s10 + $0xf0] sm:$0xff]  ;;  %v267_v16 = vld [vmem:[%s3181_s10 + $0xf8] sm:$0xff] }
  0x17   : > { %4849 = vst [vmem:[#allocation4_spill] sm:$0xff] %v3213_v29  ;;  %2791 = vmatmul.msk.f32.vlgmr.msra.gmra.mxu0 %vm372_vm1, %v3209_v27  ;;  %2809 = vmatmul.msk.f32.vlgmr.msra.gmra.mxu1 %vm372_vm1, %v3211_v28  ;;  %v3243_v39 = vmax.f32 %v309_v31, 0.0  ;;  %v292_v42 = vmul.f32 %v3161_v2, %v256_v36  ;;  %v3251_v43 = vmax.f32 %v334_v33, 0.0  ;;  %v299_v45 = vmul.f32 %v3161_v2, %v263_v37  ;;  %v242_v14 = vld [vmem:[%s3181_s10 + $0x30] sm:$0xff]  ;;  %v243_v21 = vld [vmem:[%s3181_s10 + $0x38] sm:$0xff] }
  0x18   : > { %4850 = vst [vmem:[#allocation5_spill] sm:$0xff] %v3215_v30  ;;  %2816 = vmatmul.msk.f32.vlgmr.msra.gmra.mxu2 %vm372_vm1, %v3213_v29  ;;  %2913 = vmatmul.msk.f32.vlgmr.msra.gmra.mxu3 %vm372_vm1, %v3215_v30  ;;  %v3253_v44 = vmax.f32 %v330_v34, 0.0  ;;  %v295_v46 = vmul.f32 %v3161_v2, %v259_v38  ;;  %v310_v47 = vadd.f32 %v3186_v6, %v274_v41  ;;  %v2985_v37 = vld [vmem:[%s4793_s1 + $0x18] sm:$0xf]  ;;  %v2986_v38 = vld [vmem:[%s4793_s1 + $0x1c] sm:$0xf] }
  0x19   : > { %373 = vst.msk [vmem:[#allocation2 + $0x1] sm:$0xff] %vm372_vm1, %v3209_v27  ;;  %v328_v48 = vadd.f32 %v3186_v6, %v292_v42  ;;  %v335_v49 = vadd.f32 %v3186_v6, %v299_v45  ;;  %v275_v56 = vmul.f32 %v3161_v2, %v239_v51  ;;  %v300_v59 = vmul.f32 %v3161_v2, %v264_v52  ;;  %v3049_v42 = vld [vmem:[%s4793_s1 + $0x20] sm:$0xf] }
  0x1a   : > { %424 = vst.msk [vmem:[#allocation3 - $0x1] sm:$0xfe] %vm423_vm2, %v3209_v27  ;;  %v331_v50 = vadd.f32 %v3186_v6, %v295_v46  ;;  %v3286_v54 = vmax.f32 %v310_v47, 0.0  ;;  %v296_v60 = vmul.f32 %v3161_v2, %v260_v53  ;;  %v276_v4 = vmul.f32 %v3161_v2, %v240_v0  ;;  %3018 = vmatpush.msk.msra.mxu2 %vm636_vm0, %v2985_v37  ;;  %v244_v45 = vld [vmem:[%s3181_s10 + $0x40] sm:$0xff]  ;;  %v247_v0 = vld [vmem:[%s3181_s10 + $0x58] sm:$0xff] }
  0x1b   : > { %392 = vst.msk [vmem:[#allocation2 + $0x91] sm:$0xff] %vm372_vm1, %v3211_v28  ;;  %v3288_v55 = vmax.f32 %v328_v48, 0.0  ;;  %v3293_v57 = vmax.f32 %v335_v49, 0.0  ;;  %v311_v61 = vadd.f32 %v3186_v6, %v275_v56  ;;  %v336_v62 = vadd.f32 %v3186_v6, %v300_v59  ;;  %2987 = vmatpush.msk.msra.mxu1 %vm636_vm0, %v2986_v38  ;;  %3050 = vmatpush.msk.msra.mxu3 %vm636_vm0, %v3049_v42  ;;  %v246_v59 = vld [vmem:[%s3181_s10 + $0x50] sm:$0xff] }
  0x1c   : > { %442 = vst.msk [vmem:[#allocation3 + $0x8f] sm:$0xfe] %vm423_vm2, %v3211_v28  ;;  %v3295_v58 = vmax.f32 %v331_v50, 0.0  ;;  %v332_v63 = vadd.f32 %v3186_v6, %v296_v60  ;;  %v301_v8 = vmul.f32 %v3161_v2, %v265_v1  ;;  %v312_v11 = vadd.f32 %v3186_v6, %v276_v4  ;;  %v245_v50 = vld [vmem:[%s3181_s10 + $0x48] sm:$0xff]  ;;  %v248_v1 = vld [vmem:[%s3181_s10 + $0x60] sm:$0xff] }
  0x1d   : > { %399 = vst.msk [vmem:[#allocation2 + $0xc9] sm:$0x7f] %vm374_vm3, %v3213_v29  ;;  %v3326_v3 = vmax.f32 %v311_v61, 0.0  ;;  %v3331_v5 = vmax.f32 %v336_v62, 0.0  ;;  %v277_v12 = vmul.f32 %v3161_v2, %v241_v9  ;;  %v302_v15 = vmul.f32 %v3161_v2, %v266_v10  ;;  %v249_v10 = vld [vmem:[%s3181_s10 + $0x68] sm:$0xff] }
  0x1e   : > { %449 = vst.msk [vmem:[#allocation3 + $0xc7] sm:$0xff] %vm372_vm1, %v3213_v29  ;;  %v3333_v7 = vmax.f32 %v332_v63, 0.0  ;;  %v337_v13 = vadd.f32 %v3186_v6, %v301_v8  ;;  %v3366_v17 = vmax.f32 %v312_v11, 0.0  ;;  %v278_v19 = vmul.f32 %v3161_v2, %v242_v14 }
  0x1f   : > { %4851 = vst [vmem:[#allocation6_spill] sm:$0xff] %v3251_v43  ;;  %2792 = vmatmul.msk.f32.gmra.mxu0 %vm372_vm1, %v3243_v39  ;;  %2810 = vmatmul.msk.f32.gmra.mxu1 %vm372_vm1, %v3245_v40  ;;  %v313_v18 = vadd.f32 %v3186_v6, %v277_v12  ;;  %v338_v22 = vadd.f32 %v3186_v6, %v302_v15  ;;  %v3107_v41 = vmov 0.0   ;;  %v250_v15 = vld [vmem:[%s3181_s10 + $0x70] sm:$0xff] }
  0x20   : > { %4852 = vst [vmem:[#allocation7_spill] sm:$0xff] %v3253_v44  ;;  %2817 = vmatmul.msk.f32.gmra.mxu2 %vm372_vm1, %v3251_v43  ;;  %2914 = vmatmul.msk.f32.gmra.mxu3 %vm372_vm1, %v3253_v44  ;;  %v3372_v20 = vmax.f32 %v337_v13, 0.0  ;;  %v303_v23 = vmul.f32 %v3161_v2, %v267_v16  ;;  %v314_v25 = vadd.f32 %v3186_v6, %v278_v19 }
  0x21   : > { %395 = vst.msk [vmem:[#allocation2 + $0xa9] sm:$0x7f] %vm374_vm3, %v3215_v30  ;;  %v3387_v24 = vmax.f32 %v313_v18, 0.0  ;;  %v279_v26 = vmul.f32 %v3161_v2, %v243_v21  ;;  %v3399_v31 = vmax.f32 %v338_v22, 0.0  ;;  %v280_v46 = vmul.f32 %v3161_v2, %v244_v45 }
  0x22   : > { %445 = vst.msk [vmem:[#allocation3 + $0xa7] sm:$0xff] %vm372_vm1, %v3215_v30  ;;  %v339_v32 = vadd.f32 %v3186_v6, %v303_v23  ;;  %v3406_v33 = vmax.f32 %v314_v25, 0.0  ;;  %v281_v52 = vmul.f32 %v3161_v2, %v245_v50  ;;  %v282_v62 = vmul.f32 %v3161_v2, %v246_v59 }
  0x23   : > { %375 = vst.msk [vmem:[#allocation2 + $0x9] sm:$0x7f] %vm374_vm3, %v3243_v39  ;;  %v315_v34 = vadd.f32 %v3186_v6, %v279_v26  ;;  %v316_v49 = vadd.f32 %v3186_v6, %v280_v46  ;;  %v283_v8 = vmul.f32 %v3161_v2, %v247_v0  ;;  %v284_v11 = vmul.f32 %v3161_v2, %v248_v1 }
  0x24   : > { %425 = vst.msk [vmem:[#allocation3 + $0x7] sm:$0xff] %vm372_vm1, %v3243_v39  ;;  %v3413_v35 = vmax.f32 %v339_v32, 0.0  ;;  %v317_v56 = vadd.f32 %v3186_v6, %v281_v52  ;;  %v318_v4 = vadd.f32 %v3186_v6, %v282_v62  ;;  %v285_v14 = vmul.f32 %v3161_v2, %v249_v10  ;;  %v253_v62 = vld [vmem:[%s3181_s10 + $0x88] sm:$0xff] }
  0x25   : > { %393 = vst.msk [vmem:[#allocation2 + $0x99] sm:$0x7f] %vm374_vm3, %v3245_v40  ;;  %v3423_v36 = vmax.f32 %v315_v34, 0.0  ;;  %v3502_v51 = vmax.f32 %v316_v49, 0.0  ;;  %v319_v13 = vadd.f32 %v3186_v6, %v283_v8  ;;  %v320_v18 = vadd.f32 %v3186_v6, %v284_v11  ;;  %v251_v34 = vld [vmem:[%s3181_s10 + $0x78] sm:$0xff]  ;;  %v252_v49 = vld [vmem:[%s3181_s10 + $0x80] sm:$0xff] }
  0x26   : > { %443 = vst.msk [vmem:[#allocation3 + $0x97] sm:$0xff] %vm372_vm1, %v3245_v40  ;;  %v3532_v61 = vmax.f32 %v317_v56, 0.0  ;;  %v3568_v12 = vmax.f32 %v318_v4, 0.0  ;;  %v286_v19 = vmul.f32 %v3161_v2, %v250_v15  ;;  %v321_v22 = vadd.f32 %v3186_v6, %v285_v14 }
  0x27   : > { %400 = vst.msk [vmem:[#allocation2 + $0xd1] sm:$0xff] %vm372_vm1, %v3251_v43  ;;  %2793 = vmatmul.msk.f32.gmra.mxu0 %vm372_vm1, %v3286_v54  ;;  %2811 = vmatmul.msk.f32.gmra.mxu1 %vm372_vm1, %v3288_v55  ;;  %v3589_v21 = vmax.f32 %v319_v13, 0.0  ;;  %v3599_v25 = vmax.f32 %v320_v18, 0.0  ;;  %v287_v38 = vmul.f32 %v3161_v2, %v251_v34  ;;  %v288_v50 = vmul.f32 %v3161_v2, %v252_v49  ;;  %v2953_v13 = vld [vmem:[%s4793_s1 + $0x8] sm:$0xf] }
  0x28   : > { %450 = vst.msk [vmem:[#allocation3 + $0xcf] sm:$0xfe] %vm423_vm2, %v3251_v43  ;;  %2818 = vmatmul.msk.f32.gmra.mxu2 %vm372_vm1, %v3293_v57  ;;  %2915 = vmatmul.msk.f32.gmra.mxu3 %vm372_vm1, %v3295_v58  ;;  %v322_v26 = vadd.f32 %v3186_v6, %v286_v19  ;;  %v3608_v32 = vmax.f32 %v321_v22, 0.0  ;;  %v289_v0 = vmul.f32 %v3161_v2, %v253_v62 }
  0x29   : > { %4853 = vst [vmem:[#allocation8_spill] sm:$0xff] %v3293_v57  ;;  %v323_v42 = vadd.f32 %v3186_v6, %v287_v38  ;;  %v324_v52 = vadd.f32 %v3186_v6, %v288_v50  ;;  %2954 = vmatpush.msk.msra.mxu0 %vm636_vm0, %v2953_v13 }
  0x2a   : > { %4854 = vst [vmem:[#allocation9_spill] sm:$0xff] %v3295_v58  ;;  %v473_v53 = vld [vmem:[#allocation2 + $0x8] sm:$0xff]  ;;  %v325_v1 = vadd.f32 %v3186_v6, %v289_v0 }
  0x2b   : > { %396 = vst.msk [vmem:[#allocation2 + $0xb1] sm:$0xff] %vm372_vm1, %v3253_v44  ;;  %v3479_v48 = vld [vmem:[#allocation3] sm:$0xff]  ;;  %v3635_v46 = vmax.f32 %v323_v42, 0.0  ;;  %v3656_v56 = vmax.f32 %v324_v52, 0.0 }
  0x2c   : > { %446 = vst.msk [vmem:[#allocation3 + $0xaf] sm:$0xfe] %vm423_vm2, %v3253_v44  ;;  %v3677_v8 = vmax.f32 %v325_v1, 0.0 }
  0x2d   : > { %376 = vst.msk [vmem:[#allocation2 + $0x11] sm:$0xff] %vm372_vm1, %v3286_v54 }
  0x2e   : > { %426 = vst.msk [vmem:[#allocation3 + $0xf] sm:$0xfe] %vm423_vm2, %v3286_v54 }
  0x2f   : > { %394 = vst.msk [vmem:[#allocation2 + $0xa1] sm:$0xff] %vm372_vm1, %v3288_v55  ;;  %2794 = vmatmul.msk.f32.gmra.mxu0 %vm372_vm1, %v3326_v3  ;;  %2812 = vmatmul.msk.f32.gmra.mxu1 %vm372_vm1, %v3215_v30 }
  0x30   : > { %444 = vst.msk [vmem:[#allocation3 + $0x9f] sm:$0xfe] %vm423_vm2, %v3288_v55  ;;  %2819 = vmatmul.msk.f32.gmra.mxu2 %vm372_vm1, %v3331_v5  ;;  %2916 = vmatmul.msk.f32.gmra.mxu3 %vm372_vm1, %v3333_v7 }
  0x31   : > { %401 = vst.msk [vmem:[#allocation2 + $0xd9] sm:$0x7f] %vm374_vm3, %v3293_v57 }
  0x32   : > { %451 = vst.msk [vmem:[#allocation3 + $0xd7] sm:$0xff] %vm372_vm1, %v3293_v57 }
  0x33   : > { %4855 = vst [vmem:[#allocation10_spill] sm:$0xff] %v3331_v5 }
  0x34   : > { %4856 = vst [vmem:[#allocation11_spill] sm:$0xff] %v3333_v7 }
  0x35   : > { %397 = vst.msk [vmem:[#allocation2 + $0xb9] sm:$0x7f] %vm374_vm3, %v3295_v58 }
  0x36   : > { %447 = vst.msk [vmem:[#allocation3 + $0xb7] sm:$0xff] %vm372_vm1, %v3295_v58 }
  0x37   : > { %377 = vst.msk [vmem:[#allocation2 + $0x19] sm:$0x7f] %vm374_vm3, %v3326_v3  ;;  %2795 = vmatmul.msk.f32.gmra.mxu0 %vm372_vm1, %v3366_v17  ;;  %2813 = vmatmul.msk.f32.gmra.mxu1 %vm372_vm1, %v3253_v44 }
  0x38   : > { %427 = vst.msk [vmem:[#allocation3 + $0x17] sm:$0xff] %vm372_vm1, %v3326_v3  ;;  %2820 = vmatmul.msk.f32.gmra.mxu2 %vm372_vm1, %v3372_v20  ;;  %2917 = vmatmul.msk.f32.gmra.mxu3 %vm372_vm1, %v3213_v29 }
  0x39   : > { %402 = vst.msk [vmem:[#allocation2 + $0xe1] sm:$0xff] %vm372_vm1, %v3331_v5 }
  0x3a   : > { %452 = vst.msk [vmem:[#allocation3 + $0xdf] sm:$0xfe] %vm423_vm2, %v3331_v5 }
  0x3b   : > { %398 = vst.msk [vmem:[#allocation2 + $0xc1] sm:$0xff] %vm372_vm1, %v3333_v7 }
  0x3c   : > { %448 = vst.msk [vmem:[#allocation3 + $0xbf] sm:$0xfe] %vm423_vm2, %v3333_v7 }
  0x3d   : > { %4857 = vst [vmem:[#allocation12_spill] sm:$0xff] %v3372_v20 }
  0x3e   : > { %378 = vst.msk [vmem:[#allocation2 + $0x21] sm:$0xff] %vm372_vm1, %v3366_v17  ;;  %v3575_v16 = vld [vmem:[#allocation2 + $0x18] sm:$0xff] }
  0x3f   : > { %428 = vst.msk [vmem:[#allocation3 + $0x1f] sm:$0xfe] %vm423_vm2, %v3366_v17  ;;  %2796 = vmatmul.msk.f32.gmra.mxu0 %vm372_vm1, %v3387_v24  ;;  %2814 = vmatmul.msk.f32.gmra.mxu1 %vm372_vm1, %v3295_v58  ;;  %v3555_v9 = vld [vmem:[#allocation3 + $0x10] sm:$0xff] }
  0x40   : > { %403 = vst.msk [vmem:[#allocation2 + $0xe9] sm:$0x7f] %vm374_vm3, %v3372_v20  ;;  %2821 = vmatmul.msk.f32.gmra.mxu2 %vm372_vm1, %v3399_v31  ;;  %2918 = vmatmul.msk.f32.gmra.mxu3 %vm372_vm1, %v3251_v43 }
  0x41   : > { %453 = vst.msk [vmem:[#allocation3 + $0xe7] sm:$0xff] %vm372_vm1, %v3372_v20 }
  0x42   : > { %379 = vst.msk [vmem:[#allocation2 + $0x29] sm:$0x7f] %vm374_vm3, %v3387_v24 }
  0x43   : > { %4858 = vst [vmem:[#allocation13_spill] sm:$0xff] %v3399_v31 }
  0x44   : > { %429 = vst.msk [vmem:[#allocation3 + $0x27] sm:$0xff] %vm372_vm1, %v3387_v24 }
  0x45   : > { %404 = vst.msk [vmem:[#allocation2 + $0xf1] sm:$0xff] %vm372_vm1, %v3399_v31 }
  0x46   : > { %454 = vst.msk [vmem:[#allocation3 + $0xef] sm:$0xfe] %vm423_vm2, %v3399_v31 }
  0x47   : > { %380 = vst.msk [vmem:[#allocation2 + $0x31] sm:$0xff] %vm372_vm1, %v3406_v33  ;;  %2797 = vmatmul.msk.f32.gmra.mxu0 %vm372_vm1, %v3406_v33  ;;  %2815 = vmatmul.msk.f32.gmra.mxu1 %vm372_vm1, %v3333_v7 }
  0x48   : > { %4859 = vst [vmem:[#allocation14_spill] sm:$0xff] %v3413_v35  ;;  %2822 = vmatmul.msk.f32.gmra.mxu2 %vm372_vm1, %v3413_v35  ;;  %2919 = vmatmul.msk.f32.gmra.mxu3 %vm372_vm1, %v3293_v57 }
  0x49   : > { %430 = vst.msk [vmem:[#allocation3 + $0x2f] sm:$0xfe] %vm423_vm2, %v3406_v33 }
  0x4a   : > { %405 = vst.msk [vmem:[#allocation2 + $0xf9] sm:$0x7f] %vm374_vm3, %v3413_v35 }
  0x4b   : > { %455 = vst.msk [vmem:[#allocation3 + $0xf7] sm:$0xff] %vm372_vm1, %v3413_v35  ;;  %v3629_v45 = vld [vmem:[#allocation3 + $0x20] sm:$0xff] }
  0x4c   : > { %381 = vst.msk [vmem:[#allocation2 + $0x39] sm:$0x7f] %vm374_vm3, %v3423_v36 }
  0x4d   : > { %431 = vst.msk [vmem:[#allocation3 + $0x37] sm:$0xff] %vm372_vm1, %v3423_v36 }
  0x4e   : > { %407 = vst.msk [vmem:[#allocation2] sm:$0x1] %vm406_vm4, %v3107_v41 }
  0x4f   : > { %408 = vst.msk [vmem:[#allocation2 + $0x10] sm:$0x1] %vm406_vm4, %v3107_v41  ;;  %2798 = vmatmul.msk.f32.gmra.mxu0 %vm372_vm1, %v3423_v36 }
  0x50   : > { %409 = vst.msk [vmem:[#allocation2 + $0x20] sm:$0x1] %vm406_vm4, %v3107_v41  ;;  %2858 = vmatmul.msk.f32.vlgmr.msrb.gmra.mxu2 %vm372_vm1, %v3479_v48  ;;  %2920 = vmatmul.msk.f32.gmra.mxu3 %vm372_vm1, %v3331_v5 }
  0x51   : > { %410 = vst.msk [vmem:[#allocation2 + $0x30] sm:$0x1] %vm406_vm4, %v3107_v41 }
  0x52   : > { %411 = vst.msk [vmem:[#allocation2 + $0x40] sm:$0x1] %vm406_vm4, %v3107_v41 }
  0x53   : > { %412 = vst.msk [vmem:[#allocation2 + $0x50] sm:$0x1] %vm406_vm4, %v3107_v41  ;;  %v3683_v2 = vld [vmem:[#allocation2 + $0x38] sm:$0xff] }
  0x54   : > { %413 = vst.msk [vmem:[#allocation2 + $0x60] sm:$0x1] %vm406_vm4, %v3107_v41  ;;  %v3673_v4 = vld [vmem:[#allocation3 + $0x30] sm:$0xff] }
  0x55   : > { %414 = vst.msk [vmem:[#allocation2 + $0x70] sm:$0x1] %vm406_vm4, %v3107_v41  ;;  %v472_v47 = vld [vmem:[#allocation2] sm:$0xff] }
  0x56   : > { %415 = vst.msk [vmem:[#allocation2 + $0x80] sm:$0x1] %vm406_vm4, %v3107_v41  ;;  %2824 = vmatmul.msk.f32.vlgmr.msrb.gmra.mxu1 %vm372_vm1, %v472_v47  ;;  %v3537_v63 = vld [vmem:[#allocation2 + $0x10] sm:$0xff] }
  0x57   : > { %416 = vst.msk [vmem:[#allocation2 + $0x90] sm:$0x1] %vm406_vm4, %v3107_v41  ;;  %2799 = vmatmul.msk.f32.gmra.mxu0 %vm372_vm1, %v3502_v51  ;;  %v3611_v37 = vld [vmem:[#allocation2 + $0x20] sm:$0xff] }
  0x58   : > { %417 = vst.msk [vmem:[#allocation2 + $0xa0] sm:$0x1] %vm406_vm4, %v3107_v41  ;;  %2921 = vmatmul.msk.f32.gmra.mxu3 %vm372_vm1, %v3372_v20  ;;  %v3662_v59 = vld [vmem:[#allocation2 + $0x30] sm:$0xff] }
  0x59   : > { %418 = vst.msk [vmem:[#allocation2 + $0xb0] sm:$0x1] %vm406_vm4, %v3107_v41 }
  0x5a   : > { %419 = vst.msk [vmem:[#allocation2 + $0xc0] sm:$0x1] %vm406_vm4, %v3107_v41 }
  0x5b   : > { %420 = vst.msk [vmem:[#allocation2 + $0xd0] sm:$0x1] %vm406_vm4, %v3107_v41 }
  0x5c   : > { %421 = vst.msk [vmem:[#allocation2 + $0xe0] sm:$0x1] %vm406_vm4, %v3107_v41 }
  0x5d   : > { %422 = vst.msk [vmem:[#allocation2 + $0xf0] sm:$0x1] %vm406_vm4, %v3107_v41 }
  0x5e   : > { %456 = vst.msk [vmem:[#allocation3 + $0xf] sm:$0x1] %vm406_vm4, %v3107_v41  ;;  %2825 = vmatmul.msk.f32.gmra.mxu1 %vm372_vm1, %v473_v53 }
  0x5f   : > { %457 = vst.msk [vmem:[#allocation3 + $0x1f] sm:$0x1] %vm406_vm4, %v3107_v41  ;;  %2800 = vmatmul.msk.f32.gmra.mxu0 %vm372_vm1, %v3532_v61 }
  0x60   : > { %458 = vst.msk [vmem:[#allocation3 + $0x2f] sm:$0x1] %vm406_vm4, %v3107_v41  ;;  %2923 = vmatmul.msk.f32.vlgmr.msrb.gmra.mxu3 %vm372_vm1, %v472_v47  ;;  %v3643_v47 = vld [vmem:[#allocation2 + $0x28] sm:$0xff] }
  0x61   : > { %459 = vst.msk [vmem:[#allocation3 + $0x3f] sm:$0x1] %vm406_vm4, %v3107_v41 }
  0x62   : > { %460 = vst.msk [vmem:[#allocation3 + $0x4f] sm:$0x1] %vm406_vm4, %v3107_v41 }
  0x63   : > { %461 = vst.msk [vmem:[#allocation3 + $0x5f] sm:$0x1] %vm406_vm4, %v3107_v41 }
  0x64   : > { %462 = vst.msk [vmem:[#allocation3 + $0x6f] sm:$0x1] %vm406_vm4, %v3107_v41 }
  0x65   : > { %463 = vst.msk [vmem:[#allocation3 + $0x7f] sm:$0x1] %vm406_vm4, %v3107_v41  ;;  %v3526_v60 = vld [vmem:[#allocation3 + $0x8] sm:$0xff] }
  0x66   : > { %464 = vst.msk [vmem:[#allocation3 + $0x8f] sm:$0x1] %vm406_vm4, %v3107_v41  ;;  %2859 = vmatmul.msk.f32.gmra.mxu2 %vm372_vm1, %v3526_v60  ;;  %2826 = vmatmul.msk.f32.gmra.mxu1 %vm372_vm1, %v3537_v63  ;;  %v3594_v23 = vld [vmem:[#allocation3 + $0x18] sm:$0xff] }
  0x67   : > { %465 = vst.msk [vmem:[#allocation3 + $0x9f] sm:$0x1] %vm406_vm4, %v3107_v41  ;;  %2801 = vmatmul.msk.f32.gmra.mxu0 %vm372_vm1, %v3568_v12 }
  0x68   : > { %466 = vst.msk [vmem:[#allocation3 + $0xaf] sm:$0x1] %vm406_vm4, %v3107_v41  ;;  %2924 = vmatmul.msk.f32.gmra.mxu3 %vm372_vm1, %v473_v53  ;;  %v3652_v53 = vld [vmem:[#allocation3 + $0x28] sm:$0xff]  ;;  %v3691_v6 = vld [vmem:[#allocation3 + $0x38] sm:$0xff] }
  0x69   : > { %467 = vst.msk [vmem:[#allocation3 + $0xbf] sm:$0x1] %vm406_vm4, %v3107_v41 }
  0x6a   : > { %468 = vst.msk [vmem:[#allocation3 + $0xcf] sm:$0x1] %vm406_vm4, %v3107_v41 }
  0x6b   : > { %469 = vst.msk [vmem:[#allocation3 + $0xdf] sm:$0x1] %vm406_vm4, %v3107_v41 }
  0x6c   : > { %470 = vst.msk [vmem:[#allocation3 + $0xef] sm:$0x1] %vm406_vm4, %v3107_v41 }
  0x6d   : > { %471 = vst.msk [vmem:[#allocation3 + $0xff] sm:$0x1] %vm406_vm4, %v3107_v41  ;;  %v3618_v41 = vmax.f32 %v322_v26, 0.0 }
  0x6e   : > { %382 = vst.msk [vmem:[#allocation2 + $0x41] sm:$0xff] %vm372_vm1, %v3502_v51  ;;  %2860 = vmatmul.msk.f32.gmra.mxu2 %vm372_vm1, %v3555_v9  ;;  %2827 = vmatmul.msk.f32.gmra.mxu1 %vm372_vm1, %v3575_v16 }
  0x6f   : > { %432 = vst.msk [vmem:[#allocation3 + $0x3f] sm:$0xfe] %vm423_vm2, %v3502_v51  ;;  %2802 = vmatmul.msk.f32.gmra.mxu0 %vm372_vm1, %v3589_v21 }
  0x70   : > { %383 = vst.msk [vmem:[#allocation2 + $0x49] sm:$0x7f] %vm374_vm3, %v3532_v61  ;;  %2925 = vmatmul.msk.f32.gmra.mxu3 %vm372_vm1, %v3537_v63 }
  0x71   : > { %433 = vst.msk [vmem:[#allocation3 + $0x47] sm:$0xff] %vm372_vm1, %v3532_v61 }
  0x72   : > { %384 = vst.msk [vmem:[#allocation2 + $0x51] sm:$0xff] %vm372_vm1, %v3568_v12 }
  0x73   : > { %434 = vst.msk [vmem:[#allocation3 + $0x4f] sm:$0xfe] %vm423_vm2, %v3568_v12 }
  0x74   : > { %385 = vst.msk [vmem:[#allocation2 + $0x59] sm:$0x7f] %vm374_vm3, %v3589_v21 }
  0x75   : > { %435 = vst.msk [vmem:[#allocation3 + $0x57] sm:$0xff] %vm372_vm1, %v3589_v21  ;;  %v3697_v10 = vld [vmem:[#allocation2 + $0x40] sm:$0xff] }
  0x76   : > { %2861 = vmatmul.msk.f32.gmra.mxu2 %vm372_vm1, %v3594_v23  ;;  %386 = vst.msk [vmem:[#allocation2 + $0x61] sm:$0xff] %vm372_vm1, %v3599_v25  ;;  %2828 = vmatmul.msk.f32.gmra.mxu1 %vm372_vm1, %v3611_v37 }
  0x77   : > { %436 = vst.msk [vmem:[#allocation3 + $0x5f] sm:$0xfe] %vm423_vm2, %v3599_v25  ;;  %2803 = vmatmul.msk.f32.gmra.mxu0 %vm372_vm1, %v3599_v25  ;;  %v3716_v18 = vld [vmem:[#allocation2 + $0x48] sm:$0xff] }
  0x78   : > { %387 = vst.msk [vmem:[#allocation2 + $0x69] sm:$0x7f] %vm374_vm3, %v3608_v32  ;;  %2926 = vmatmul.msk.f32.gmra.mxu3 %vm372_vm1, %v3575_v16  ;;  %v3703_v11 = vld [vmem:[#allocation3 + $0x40] sm:$0xff]  ;;  %v3723_v19 = vld [vmem:[#allocation3 + $0x48] sm:$0xff] }
  0x79   : > { %437 = vst.msk [vmem:[#allocation3 + $0x67] sm:$0xff] %vm372_vm1, %v3608_v32  ;;  %v3737_v42 = vld [vmem:[#allocation2 + $0x50] sm:$0xff] }
  0x7a   : > { %388 = vst.msk [vmem:[#allocation2 + $0x71] sm:$0xff] %vm372_vm1, %v3618_v41 }
  0x7b   : > { %438 = vst.msk [vmem:[#allocation3 + $0x6f] sm:$0xfe] %vm423_vm2, %v3618_v41  ;;  %v3757_v1 = vld [vmem:[#allocation2 + $0x58] sm:$0xff] }
  0x7c   : > { %389 = vst.msk [vmem:[#allocation2 + $0x79] sm:$0x7f] %vm374_vm3, %v3635_v46  ;;  %v3743_v49 = vld [vmem:[#allocation3 + $0x50] sm:$0xff]  ;;  %v3763_v13 = vld [vmem:[#allocation3 + $0x58] sm:$0xff] }
  0x7d   : > { %439 = vst.msk [vmem:[#allocation3 + $0x77] sm:$0xff] %vm372_vm1, %v3635_v46 }
  0x7e   : > { %2862 = vmatmul.msk.f32.gmra.mxu2 %vm372_vm1, %v3629_v45  ;;  %2829 = vmatmul.msk.f32.gmra.mxu1 %vm372_vm1, %v3643_v47  ;;  %390 = vst.msk [vmem:[#allocation2 + $0x81] sm:$0xff] %vm372_vm1, %v3656_v56 }
  0x7f   : > { %440 = vst.msk [vmem:[#allocation3 + $0x7f] sm:$0xfe] %vm423_vm2, %v3656_v56  ;;  %2804 = vmatmul.msk.f32.gmra.mxu0 %vm372_vm1, %v3608_v32 }
  0x80   : > { %2927 = vmatmul.msk.f32.gmra.mxu3 %vm372_vm1, %v3611_v37  ;;  %391 = vst.msk [vmem:[#allocation2 + $0x89] sm:$0x7f] %vm374_vm3, %v3677_v8 }
  0x81   : > { %441 = vst.msk [vmem:[#allocation3 + $0x87] sm:$0xff] %vm372_vm1, %v3677_v8  ;;  %v3817_v31 = vld [vmem:[#allocation2 + $0x70] sm:$0xff] }
  0x82   : > { %4877 = vst [vmem:[#allocation32_spill] sm:$0xff] %v3817_v31 }
  0x83   : > { %v3837_v57 = vld [vmem:[#allocation2 + $0x78] sm:$0xff] }
  0x84   : > { %v3823_v20 = vld [vmem:[#allocation3 + $0x70] sm:$0xff]  ;;  %4882 = vst [vmem:[#allocation37_spill] sm:$0xff] %v3837_v57  ;;  %v3843_v43 = vld [vmem:[#allocation3 + $0x78] sm:$0xff] }
  0x85   : > { %4878 = vst [vmem:[#allocation33_spill] sm:$0xff] %v3823_v20  ;;  %v3855_v7 = vld [vmem:[#allocation2 + $0x80] sm:$0xff] }
  0x86   : > { %2863 = vmatmul.msk.f32.gmra.mxu2 %vm372_vm1, %v3652_v53  ;;  %2830 = vmatmul.msk.f32.gmra.mxu1 %vm372_vm1, %v3662_v59  ;;  %4883 = vst [vmem:[#allocation38_spill] sm:$0xff] %v3843_v43 }
  0x87   : > { %2805 = vmatmul.msk.f32.gmra.mxu0 %vm372_vm1, %v3618_v41  ;;  %4886 = vst [vmem:[#allocation41_spill] sm:$0xff] %v3855_v7 }
  0x88   : > { %2928 = vmatmul.msk.f32.gmra.mxu3 %vm372_vm1, %v3643_v47  ;;  %v3861_v58 = vld [vmem:[#allocation3 + $0x80] sm:$0xff] }
  0x89   : > { %4887 = vst [vmem:[#allocation42_spill] sm:$0xff] %v3861_v58 }
  0x8e   : > { %2864 = vmatmul.msk.f32.gmra.mxu2 %vm372_vm1, %v3673_v4  ;;  %2831 = vmatmul.msk.f32.gmra.mxu1 %vm372_vm1, %v3683_v2 }
  0x8f   : > { %2806 = vmatmul.msk.f32.gmra.mxu0 %vm372_vm1, %v3635_v46 }
  0x90   : > { %2929 = vmatmul.msk.f32.gmra.mxu3 %vm372_vm1, %v3662_v59 }
  0x94   : > { %v3712_v14 = vpop.f32.mrf.mxu0  ;;  %v3714_v15 = vpop.f32.mrf.mxu1 }
  0x95   : > { %4860 = vst [vmem:[#allocation15_spill] sm:$0xff] %v3714_v15  ;;  %v3797_v15 = vld [vmem:[#allocation2 + $0x68] sm:$0xff] }
  0x96   : > { %2865 = vmatmul.msk.f32.gmra.mxu2 %vm372_vm1, %v3691_v6  ;;  %2832 = vmatmul.msk.f32.gmra.mxu1 %vm372_vm1, %v3697_v10  ;;  %4873 = vst [vmem:[#allocation28_spill] sm:$0xff] %v3797_v15 }
  0x97   : > { %2807 = vmatmul.msk.f32.gmra.mxu0 %vm372_vm1, %v3656_v56 }
  0x98   : > { %2930 = vmatmul.msk.f32.gmra.mxu3 %vm372_vm1, %v3683_v2 }
  0x9b   : > { %v3729_v22 = vpop.f32.mrf.mxu2  ;;  %v3731_v26 = vpop.f32.mrf.mxu3 }
  0x9c   : > { %4861 = vst [vmem:[#allocation16_spill] sm:$0xff] %v3729_v22  ;;  %v3733_v34 = vpop.f32.mrf.mxu0  ;;  %v3735_v38 = vpop.f32.mrf.mxu1 }
  0x9d   : > { %4862 = vst [vmem:[#allocation17_spill] sm:$0xff] %v3731_v26 }
  0x9e   : > { %2866 = vmatmul.msk.f32.gmra.mxu2 %vm372_vm1, %v3703_v11  ;;  %2833 = vmatmul.msk.f32.gmra.mxu1 %vm372_vm1, %v3716_v18  ;;  %4863 = vst [vmem:[#allocation18_spill] sm:$0xff] %v3735_v38 }
  0x9f   : > { %2808 = vmatmul.msk.f32.gmra.mxu0 %vm372_vm1, %v3677_v8 }
  0xa0   : > { %2931 = vmatmul.msk.f32.gmra.mxu3 %vm372_vm1, %v3697_v10 }
  0xa3   : > { %v3749_v50 = vpop.f32.mrf.mxu2  ;;  %v3751_v52 = vpop.f32.mrf.mxu3 }
  0xa4   : > { %4864 = vst [vmem:[#allocation19_spill] sm:$0xff] %v3749_v50  ;;  %v3753_v62 = vpop.f32.mrf.mxu0  ;;  %v3755_v0 = vpop.f32.mrf.mxu1 }
  0xa5   : > { %4865 = vst [vmem:[#allocation20_spill] sm:$0xff] %v3751_v52 }
  0xa6   : > { %2867 = vmatmul.msk.f32.gmra.mxu2 %vm372_vm1, %v3723_v19  ;;  %2834 = vmatmul.msk.f32.gmra.mxu1 %vm372_vm1, %v3737_v42  ;;  %4866 = vst [vmem:[#allocation21_spill] sm:$0xff] %v3755_v0  ;;  %v3777_v0 = vld [vmem:[#allocation2 + $0x60] sm:$0xff] }
  0xa7   : > { %2892 = vmatmul.msk.f32.vlgmr.msrb.gmra.mxu0 %vm372_vm1, %v3209_v27  ;;  %v3783_v27 = vld [vmem:[#allocation3 + $0x60] sm:$0xff] }
  0xa8   : > { %2932 = vmatmul.msk.f32.gmra.mxu3 %vm372_vm1, %v3716_v18 }
  0xab   : > { %v3769_v50 = vpop.f32.mrf.mxu2  ;;  %v3771_v22 = vpop.f32.mrf.mxu3 }
  0xac   : > { %4867 = vst [vmem:[#allocation22_spill] sm:$0xff] %v3769_v50  ;;  %v3773_v52 = vpop.f32.mrf.mxu0  ;;  %v3775_v26 = vpop.f32.mrf.mxu1 }
  0xad   : > { %4868 = vst [vmem:[#allocation23_spill] sm:$0xff] %v3771_v22 }
  0xae   : > { %2868 = vmatmul.msk.f32.gmra.mxu2 %vm372_vm1, %v3743_v49  ;;  %2835 = vmatmul.msk.f32.gmra.mxu1 %vm372_vm1, %v3757_v1  ;;  %4869 = vst [vmem:[#allocation24_spill] sm:$0xff] %v3775_v26 }
  0xaf   : > { %2893 = vmatmul.msk.f32.gmra.mxu0 %vm372_vm1, %v3243_v39  ;;  %v3803_v39 = vld [vmem:[#allocation3 + $0x68] sm:$0xff] }
  0xb0   : > { %2933 = vmatmul.msk.f32.gmra.mxu3 %vm372_vm1, %v3737_v42 }
  0xb3   : > { %v3789_v50 = vpop.f32.mrf.mxu2  ;;  %v3791_v22 = vpop.f32.mrf.mxu3 }
  0xb4   : > { %4870 = vst [vmem:[#allocation25_spill] sm:$0xff] %v3789_v50  ;;  %v3793_v26 = vpop.f32.mrf.mxu0  ;;  %v3795_v38 = vpop.f32.mrf.mxu1 }
  0xb5   : > { %4871 = vst [vmem:[#allocation26_spill] sm:$0xff] %v3791_v22 }
  0xb6   : > { %2869 = vmatmul.msk.f32.gmra.mxu2 %vm372_vm1, %v3763_v13  ;;  %2836 = vmatmul.msk.f32.gmra.mxu1 %vm372_vm1, %v3777_v0  ;;  %4872 = vst [vmem:[#allocation27_spill] sm:$0xff] %v3795_v38 }
  0xb7   : > { %2894 = vmatmul.msk.f32.gmra.mxu0 %vm372_vm1, %v3286_v54 }
  0xb8   : > { %2934 = vmatmul.msk.f32.gmra.mxu3 %vm372_vm1, %v3757_v1 }
  0xbb   : > { %v3809_v50 = vpop.f32.mrf.mxu2  ;;  %v3811_v22 = vpop.f32.mrf.mxu3 }
  0xbc   : > { %4874 = vst [vmem:[#allocation29_spill] sm:$0xff] %v3809_v50  ;;  %v3813_v38 = vpop.f32.mrf.mxu0  ;;  %v3815_v35 = vpop.f32.mrf.mxu1 }
  0xbd   : > { %4875 = vst [vmem:[#allocation30_spill] sm:$0xff] %v3811_v22 }
  0xbe   : > { %2870 = vmatmul.msk.f32.gmra.mxu2 %vm372_vm1, %v3783_v27  ;;  %2837 = vmatmul.msk.f32.gmra.mxu1 %vm372_vm1, %v3797_v15  ;;  %4876 = vst [vmem:[#allocation31_spill] sm:$0xff] %v3815_v35 }
  0xbf   : > { %2895 = vmatmul.msk.f32.gmra.mxu0 %vm372_vm1, %v3326_v3 }
  0xc0   : > { %2935 = vmatmul.msk.f32.gmra.mxu3 %vm372_vm1, %v3777_v0 }
  0xc3   : > { %v3829_v50 = vpop.f32.mrf.mxu2  ;;  %v3831_v22 = vpop.f32.mrf.mxu3 }
  0xc4   : > { %4879 = vst [vmem:[#allocation34_spill] sm:$0xff] %v3829_v50  ;;  %v3833_v35 = vpop.f32.mrf.mxu0  ;;  %v3835_v5 = vpop.f32.mrf.mxu1 }
  0xc5   : > { %4880 = vst [vmem:[#allocation35_spill] sm:$0xff] %v3831_v22 }
  0xc6   : > { %2871 = vmatmul.msk.f32.gmra.mxu2 %vm372_vm1, %v3803_v39  ;;  %2838 = vmatmul.msk.f32.gmra.mxu1 %vm372_vm1, %v3817_v31  ;;  %4881 = vst [vmem:[#allocation36_spill] sm:$0xff] %v3835_v5 }
  0xc7   : > { %2896 = vmatmul.msk.f32.gmra.mxu0 %vm372_vm1, %v3366_v17 }
  0xc8   : > { %2936 = vmatmul.msk.f32.gmra.mxu3 %vm372_vm1, %v3797_v15  ;;  %v3874_v15 = vld [vmem:[#allocation2 + $0x88] sm:$0xff] }
  0xc9   : > { %4890 = vst [vmem:[#allocation45_spill] sm:$0xff] %v3874_v15 }
  0xcb   : > { %v3849_v50 = vpop.f32.mrf.mxu2  ;;  %v3851_v22 = vpop.f32.mrf.mxu3 }
  0xcc   : > { %4884 = vst [vmem:[#allocation39_spill] sm:$0xff] %v3849_v50  ;;  %v3853_v5 = vpop.f32.mrf.mxu0 }
  0xcd   : > { %4885 = vst [vmem:[#allocation40_spill] sm:$0xff] %v3851_v22 }
  0xce   : > { %2872 = vmatmul.msk.f32.gmra.mxu2 %vm372_vm1, %v3823_v20  ;;  %2839 = vmatmul.msk.f32.gmra.mxu1 %vm372_vm1, %v3837_v57 }
  0xcf   : > { %2897 = vmatmul.msk.f32.gmra.mxu0 %vm372_vm1, %v3387_v24 }
  0xd0   : > { %2937 = vmatmul.msk.f32.gmra.mxu3 %vm372_vm1, %v3817_v31 }
  0xd3   : > { %v869_v29 = vpop.f32.mrf.mxu1  ;;  %v1083_v22 = vpop.f32.mrf.mxu2 }
  0xd4   : > { %v870_v50 = vadd.f32 %v869_v29, %v3712_v14  ;;  %v3868_v44 = vpop.f32.mrf.mxu3  ;;  %v3880_v29 = vld [vmem:[#allocation3 + $0x88] sm:$0xff] }
  0xd5   : > { %4888 = vst [vmem:[#allocation43_spill] sm:$0xff] %v3868_v44  ;;  %v3890_v44 = vld [vmem:[#allocation2 + $0x90] sm:$0xff] }
  0xd6   : > { %2873 = vmatmul.msk.f32.gmra.mxu2 %vm372_vm1, %v3843_v43  ;;  %2840 = vmatmul.msk.f32.gmra.mxu1 %vm372_vm1, %v3855_v7  ;;  %v3870_v30 = vadd.f32 %v1083_v22, %v870_v50  ;;  %v3872_v43 = vpop.f32.mrf.mxu0  ;;  %4891 = vst [vmem:[#allocation46_spill] sm:$0xff] %v3880_v29 }
  0xd7   : > { %2898 = vmatmul.msk.f32.gmra.mxu0 %vm372_vm1, %v3406_v33  ;;  %4893 = vst [vmem:[#allocation48_spill] sm:$0xff] %v3890_v44 }
  0xd8   : > { %4889 = vst [vmem:[#allocation44_spill] sm:$0xff] %v3870_v30  ;;  %2938 = vmatmul.msk.f32.gmra.mxu3 %vm372_vm1, %v3837_v57  ;;  %v3899_v57 = vld [vmem:[#allocation3 + $0x90] sm:$0xff] }
  0xd9   : > { %4895 = vst [vmem:[#allocation50_spill] sm:$0xff] %v3899_v57 }
  0xdb   : > { %v872_v20 = vpop.f32.mrf.mxu1 }
  0xdc   : > { %v3886_v14 = vpop.f32.mrf.mxu3  ;;  %v873_v30 = vadd.f32 %v872_v20, %v3733_v34 }
  0xdd   : > { %4892 = vst [vmem:[#allocation47_spill] sm:$0xff] %v3886_v14 }
  0xde   : > { %2874 = vmatmul.msk.f32.gmra.mxu2 %vm372_vm1, %v3861_v58  ;;  %2841 = vmatmul.msk.f32.gmra.mxu1 %vm372_vm1, %v3874_v15  ;;  %v3888_v22 = vpop.f32.mrf.mxu0 }
  0xdf   : > { %2899 = vmatmul.msk.f32.gmra.mxu0 %vm372_vm1, %v3423_v36 }
  0xe0   : > { %2939 = vmatmul.msk.f32.gmra.mxu3 %vm372_vm1, %v3855_v7  ;;  %v3918_v7 = vld [vmem:[#allocation3 + $0x98] sm:$0xff] }
  0xe1   : > { %4899 = vst [vmem:[#allocation54_spill] sm:$0xff] %v3918_v7 }
  0xe3   : > { %v875_v50 = vpop.f32.mrf.mxu1 }
  0xe4   : > { %v3905_v14 = vpop.f32.mrf.mxu3  ;;  %v876_v34 = vadd.f32 %v875_v50, %v3753_v62  ;;  %v3928_v50 = vld [vmem:[#allocation2 + $0xa0] sm:$0xff] }
  0xe5   : > { %4896 = vst [vmem:[#allocation51_spill] sm:$0xff] %v3905_v14 }
  0xe6   : > { %2875 = vmatmul.msk.f32.gmra.mxu2 %vm372_vm1, %v3880_v29  ;;  %2842 = vmatmul.msk.f32.gmra.mxu1 %vm372_vm1, %v3890_v44  ;;  %v3907_v20 = vpop.f32.mrf.mxu0  ;;  %4901 = vst [vmem:[#allocation56_spill] sm:$0xff] %v3928_v50 }
  0xe7   : > { %2900 = vmatmul.msk.f32.gmra.mxu0 %vm372_vm1, %v3502_v51 }
  0xe8   : > { %2940 = vmatmul.msk.f32.gmra.mxu3 %vm372_vm1, %v3874_v15  ;;  %v3937_v15 = vld [vmem:[#allocation3 + $0xa0] sm:$0xff] }
  0xe9   : > { %v1086_v58 = vpop.f32.mrf.mxu2  ;;  %4903 = vst [vmem:[#allocation58_spill] sm:$0xff] %v3937_v15 }
  0xea   : > { %v3893_v31 = vadd.f32 %v1086_v58, %v873_v30  ;;  %v3909_v58 = vld [vmem:[#allocation2 + $0x98] sm:$0xff] }
  0xeb   : > { %v878_v30 = vpop.f32.mrf.mxu1  ;;  %4897 = vst [vmem:[#allocation52_spill] sm:$0xff] %v3909_v58 }
  0xec   : > { %4894 = vst [vmem:[#allocation49_spill] sm:$0xff] %v3893_v31 }
  0xee   : > { %2876 = vmatmul.msk.f32.gmra.mxu2 %vm372_vm1, %v3899_v57  ;;  %2843 = vmatmul.msk.f32.gmra.mxu1 %vm372_vm1, %v3909_v58  ;;  %v3924_v57 = vpop.f32.mrf.mxu3  ;;  %v3926_v62 = vpop.f32.mrf.mxu0 }
  0xef   : > { %4900 = vst [vmem:[#allocation55_spill] sm:$0xff] %v3924_v57  ;;  %2901 = vmatmul.msk.f32.gmra.mxu0 %vm372_vm1, %v3532_v61 }
  0xf0   : > { %2941 = vmatmul.msk.f32.gmra.mxu3 %vm372_vm1, %v3890_v44  ;;  %v3956_v44 = vld [vmem:[#allocation3 + $0xa8] sm:$0xff] }
  0xf1   : > { %v1089_v31 = vpop.f32.mrf.mxu2  ;;  %4907 = vst [vmem:[#allocation62_spill] sm:$0xff] %v3956_v44 }
  0xf2   : > { %v3912_v29 = vadd.f32 %v1089_v31, %v876_v34  ;;  %v879_v34 = vadd.f32 %v878_v30, %v3773_v52  ;;  %v3947_v30 = vld [vmem:[#allocation2 + $0xa8] sm:$0xff] }
  0xf3   : > { %v881_v31 = vpop.f32.mrf.mxu1  ;;  %4905 = vst [vmem:[#allocation60_spill] sm:$0xff] %v3947_v30 }
  0xf4   : > { %4898 = vst [vmem:[#allocation53_spill] sm:$0xff] %v3912_v29 }
  0xf6   : > { %2877 = vmatmul.msk.f32.gmra.mxu2 %vm372_vm1, %v3918_v7  ;;  %2844 = vmatmul.msk.f32.gmra.mxu1 %vm372_vm1, %v3928_v50  ;;  %v3943_v7 = vpop.f32.mrf.mxu3  ;;  %v3945_v52 = vpop.f32.mrf.mxu0 }
  0xf7   : > { %4904 = vst [vmem:[#allocation59_spill] sm:$0xff] %v3943_v7  ;;  %2902 = vmatmul.msk.f32.gmra.mxu0 %vm372_vm1, %v3568_v12 }
  0xf8   : > { %2942 = vmatmul.msk.f32.gmra.mxu3 %vm372_vm1, %v3909_v58  ;;  %v3975_v58 = vld [vmem:[#allocation3 + $0xb0] sm:$0xff] }
  0xf9   : > { %v1092_v29 = vpop.f32.mrf.mxu2  ;;  %4911 = vst [vmem:[#allocation66_spill] sm:$0xff] %v3975_v58 }
  0xfa   : > { %v3931_v14 = vadd.f32 %v1092_v29, %v879_v34  ;;  %v882_v34 = vadd.f32 %v881_v31, %v3793_v26  ;;  %v3966_v31 = vld [vmem:[#allocation2 + $0xb0] sm:$0xff] }
  0xfb   : > { %v884_v29 = vpop.f32.mrf.mxu1  ;;  %4909 = vst [vmem:[#allocation64_spill] sm:$0xff] %v3966_v31 }
  0xfc   : > { %4902 = vst [vmem:[#allocation57_spill] sm:$0xff] %v3931_v14 }
  0xfe   : > { %2878 = vmatmul.msk.f32.gmra.mxu2 %vm372_vm1, %v3937_v15  ;;  %2845 = vmatmul.msk.f32.gmra.mxu1 %vm372_vm1, %v3947_v30  ;;  %v3962_v15 = vpop.f32.mrf.mxu3  ;;  %v3964_v26 = vpop.f32.mrf.mxu0 }
  0xff   : > { %4908 = vst [vmem:[#allocation63_spill] sm:$0xff] %v3962_v15  ;;  %2903 = vmatmul.msk.f32.gmra.mxu0 %vm372_vm1, %v3589_v21 }
 0x100   : > { %2943 = vmatmul.msk.f32.gmra.mxu3 %vm372_vm1, %v3928_v50  ;;  %v3994_v50 = vld [vmem:[#allocation3 + $0xb8] sm:$0xff] }
 0x101   : > { %v1095_v14 = vpop.f32.mrf.mxu2  ;;  %4915 = vst [vmem:[#allocation70_spill] sm:$0xff] %v3994_v50 }
 0x102   : > { %v3950_v57 = vadd.f32 %v1095_v14, %v882_v34  ;;  %v885_v34 = vadd.f32 %v884_v29, %v3813_v38  ;;  %v3985_v29 = vld [vmem:[#allocation2 + $0xb8] sm:$0xff] }
 0x103   : > { %v887_v14 = vpop.f32.mrf.mxu1  ;;  %4913 = vst [vmem:[#allocation68_spill] sm:$0xff] %v3985_v29 }
 0x104   : > { %4906 = vst [vmem:[#allocation61_spill] sm:$0xff] %v3950_v57 }
 0x106   : > { %2879 = vmatmul.msk.f32.gmra.mxu2 %vm372_vm1, %v3956_v44  ;;  %2846 = vmatmul.msk.f32.gmra.mxu1 %vm372_vm1, %v3966_v31  ;;  %v3981_v44 = vpop.f32.mrf.mxu3  ;;  %v3983_v38 = vpop.f32.mrf.mxu0 }
 0x107   : > { %4912 = vst [vmem:[#allocation67_spill] sm:$0xff] %v3981_v44  ;;  %2904 = vmatmul.msk.f32.gmra.mxu0 %vm372_vm1, %v3599_v25 }
 0x108   : > { %2944 = vmatmul.msk.f32.gmra.mxu3 %vm372_vm1, %v3947_v30  ;;  %v4013_v30 = vld [vmem:[#allocation3 + $0xc0] sm:$0xff] }
 0x109   : > { %v1098_v57 = vpop.f32.mrf.mxu2  ;;  %4919 = vst [vmem:[#allocation74_spill] sm:$0xff] %v4013_v30 }
 0x10a   : > { %v3969_v7 = vadd.f32 %v1098_v57, %v885_v34  ;;  %v888_v34 = vadd.f32 %v887_v14, %v3833_v35  ;;  %v4004_v14 = vld [vmem:[#allocation2 + $0xc0] sm:$0xff] }
 0x10b   : > { %v890_v57 = vpop.f32.mrf.mxu1  ;;  %4917 = vst [vmem:[#allocation72_spill] sm:$0xff] %v4004_v14 }
 0x10c   : > { %4910 = vst [vmem:[#allocation65_spill] sm:$0xff] %v3969_v7 }
 0x10e   : > { %2880 = vmatmul.msk.f32.gmra.mxu2 %vm372_vm1, %v3975_v58  ;;  %2847 = vmatmul.msk.f32.gmra.mxu1 %vm372_vm1, %v3985_v29  ;;  %v4000_v58 = vpop.f32.mrf.mxu3  ;;  %v4002_v35 = vpop.f32.mrf.mxu0 }
 0x10f   : > { %4916 = vst [vmem:[#allocation71_spill] sm:$0xff] %v4000_v58  ;;  %2905 = vmatmul.msk.f32.gmra.mxu0 %vm372_vm1, %v3608_v32 }
 0x110   : > { %2945 = vmatmul.msk.f32.gmra.mxu3 %vm372_vm1, %v3966_v31  ;;  %v4032_v31 = vld [vmem:[#allocation3 + $0xc8] sm:$0xff] }
 0x111   : > { %v1101_v7 = vpop.f32.mrf.mxu2  ;;  %4923 = vst [vmem:[#allocation78_spill] sm:$0xff] %v4032_v31 }
 0x112   : > { %v3988_v15 = vadd.f32 %v1101_v7, %v888_v34  ;;  %v891_v34 = vadd.f32 %v890_v57, %v3853_v5  ;;  %v4023_v57 = vld [vmem:[#allocation2 + $0xc8] sm:$0xff] }
 0x113   : > { %v893_v7 = vpop.f32.mrf.mxu1  ;;  %4921 = vst [vmem:[#allocation76_spill] sm:$0xff] %v4023_v57 }
 0x114   : > { %4914 = vst [vmem:[#allocation69_spill] sm:$0xff] %v3988_v15 }
 0x116   : > { %2881 = vmatmul.msk.f32.gmra.mxu2 %vm372_vm1, %v3994_v50  ;;  %2848 = vmatmul.msk.f32.gmra.mxu1 %vm372_vm1, %v4004_v14  ;;  %v4019_v50 = vpop.f32.mrf.mxu3  ;;  %v4021_v5 = vpop.f32.mrf.mxu0 }
 0x117   : > { %4920 = vst [vmem:[#allocation75_spill] sm:$0xff] %v4019_v50  ;;  %2906 = vmatmul.msk.f32.gmra.mxu0 %vm372_vm1, %v3618_v41 }
 0x118   : > { %2946 = vmatmul.msk.f32.gmra.mxu3 %vm372_vm1, %v3985_v29  ;;  %v4051_v29 = vld [vmem:[#allocation3 + $0xd0] sm:$0xff] }
 0x119   : > { %v1104_v15 = vpop.f32.mrf.mxu2  ;;  %4927 = vst [vmem:[#allocation82_spill] sm:$0xff] %v4051_v29 }
 0x11a   : > { %v4007_v44 = vadd.f32 %v1104_v15, %v891_v34  ;;  %v894_v34 = vadd.f32 %v893_v7, %v3872_v43  ;;  %v4042_v7 = vld [vmem:[#allocation2 + $0xd0] sm:$0xff] }
 0x11b   : > { %v896_v15 = vpop.f32.mrf.mxu1  ;;  %4925 = vst [vmem:[#allocation80_spill] sm:$0xff] %v4042_v7 }
 0x11c   : > { %4918 = vst [vmem:[#allocation73_spill] sm:$0xff] %v4007_v44 }
 0x11e   : > { %2882 = vmatmul.msk.f32.gmra.mxu2 %vm372_vm1, %v4013_v30  ;;  %2849 = vmatmul.msk.f32.gmra.mxu1 %vm372_vm1, %v4023_v57  ;;  %v4038_v30 = vpop.f32.mrf.mxu3  ;;  %v4040_v43 = vpop.f32.mrf.mxu0 }
 0x11f   : > { %4924 = vst [vmem:[#allocation79_spill] sm:$0xff] %v4038_v30  ;;  %2907 = vmatmul.msk.f32.gmra.mxu0 %vm372_vm1, %v3635_v46 }
 0x120   : > { %2947 = vmatmul.msk.f32.gmra.mxu3 %vm372_vm1, %v4004_v14  ;;  %v4070_v14 = vld [vmem:[#allocation3 + $0xd8] sm:$0xff] }
 0x121   : > { %v1107_v44 = vpop.f32.mrf.mxu2  ;;  %4931 = vst [vmem:[#allocation86_spill] sm:$0xff] %v4070_v14 }
 0x122   : > { %v4026_v58 = vadd.f32 %v1107_v44, %v894_v34  ;;  %v897_v34 = vadd.f32 %v896_v15, %v3888_v22 }
 0x123   : > { %v899_v44 = vpop.f32.mrf.mxu1 }
 0x124   : > { %4922 = vst [vmem:[#allocation77_spill] sm:$0xff] %v4026_v58 }
 0x126   : > { %2883 = vmatmul.msk.f32.gmra.mxu2 %vm372_vm1, %v4032_v31  ;;  %2850 = vmatmul.msk.f32.gmra.mxu1 %vm372_vm1, %v4042_v7  ;;  %v4057_v31 = vpop.f32.mrf.mxu3  ;;  %v4059_v15 = vpop.f32.mrf.mxu0 }
 0x127   : > { %4928 = vst [vmem:[#allocation83_spill] sm:$0xff] %v4057_v31  ;;  %2908 = vmatmul.msk.f32.gmra.mxu0 %vm372_vm1, %v3656_v56 }
 0x128   : > { %2948 = vmatmul.msk.f32.gmra.mxu3 %vm372_vm1, %v4023_v57  ;;  %v4089_v57 = vld [vmem:[#allocation3 + $0xe0] sm:$0xff] }
 0x129   : > { %v1110_v58 = vpop.f32.mrf.mxu2  ;;  %4934 = vst [vmem:[#allocation89_spill] sm:$0xff] %v4089_v57 }
 0x12a   : > { %v4045_v50 = vadd.f32 %v1110_v58, %v897_v34  ;;  %v4061_v58 = vld [vmem:[#allocation2 + $0xd8] sm:$0xff]  ;;  %v900_v34 = vadd.f32 %v899_v44, %v3907_v20 }
 0x12b   : > { %v902_v22 = vpop.f32.mrf.mxu1  ;;  %4929 = vst [vmem:[#allocation84_spill] sm:$0xff] %v4061_v58 }
 0x12c   : > { %4926 = vst [vmem:[#allocation81_spill] sm:$0xff] %v4045_v50 }
 0x12e   : > { %2884 = vmatmul.msk.f32.gmra.mxu2 %vm372_vm1, %v4051_v29  ;;  %2851 = vmatmul.msk.f32.gmra.mxu1 %vm372_vm1, %v4061_v58  ;;  %v4076_v29 = vpop.f32.mrf.mxu3  ;;  %v4078_v44 = vpop.f32.mrf.mxu0 }
 0x12f   : > { %4932 = vst [vmem:[#allocation87_spill] sm:$0xff] %v4076_v29  ;;  %2909 = vmatmul.msk.f32.gmra.mxu0 %vm372_vm1, %v3677_v8 }
 0x130   : > { %2949 = vmatmul.msk.f32.gmra.mxu3 %vm372_vm1, %v4042_v7  ;;  %v533_v7 = vld [vmem:[#allocation3 + $0xe8] sm:$0xff] }
 0x131   : > { %v1113_v50 = vpop.f32.mrf.mxu2 }
 0x132   : > { %v4064_v30 = vadd.f32 %v1113_v50, %v900_v34  ;;  %v4080_v50 = vld [vmem:[#allocation2 + $0xe0] sm:$0xff]  ;;  %v903_v34 = vadd.f32 %v902_v22, %v3926_v62 }
 0x133   : > { %v905_v20 = vpop.f32.mrf.mxu1 }
 0x134   : > { %4930 = vst [vmem:[#allocation85_spill] sm:$0xff] %v4064_v30 }
 0x136   : > { %2885 = vmatmul.msk.f32.gmra.mxu2 %vm372_vm1, %v4070_v14  ;;  %2852 = vmatmul.msk.f32.gmra.mxu1 %vm372_vm1, %v4080_v50  ;;  %v4095_v14 = vpop.f32.mrf.mxu3  ;;  %v4097_v22 = vpop.f32.mrf.mxu0 }
 0x137   : > { %4935 = vst [vmem:[#allocation90_spill] sm:$0xff] %v4095_v14  ;;  %2910 = vmatmul.msk.f32.gmra.mxu0 %vm372_vm1, %v3211_v28 }
 0x138   : > { %4936 = vst [vmem:[#allocation91_spill] sm:$0xff] %v4097_v22  ;;  %2950 = vmatmul.msk.f32.gmra.mxu3 %vm372_vm1, %v4061_v58 }
 0x139   : > { %v1116_v30 = vpop.f32.mrf.mxu2 }
 0x13a   : > { %v4083_v31 = vadd.f32 %v1116_v30, %v903_v34  ;;  %v501_v30 = vld [vmem:[#allocation2 + $0xe8] sm:$0xff]  ;;  %v906_v34 = vadd.f32 %v905_v20, %v3945_v52  ;;  %v502_v52 = vld [vmem:[#allocation2 + $0xf0] sm:$0xff] }
 0x13b   : > { %v908_v62 = vpop.f32.mrf.mxu1 }
 0x13c   : > { %4933 = vst [vmem:[#allocation88_spill] sm:$0xff] %v4083_v31 }
 0x13e   : > { %2886 = vmatmul.msk.f32.gmra.mxu2 %vm372_vm1, %v4089_v57  ;;  %2853 = vmatmul.msk.f32.gmra.mxu1 %vm372_vm1, %v501_v30  ;;  %v4108_v57 = vpop.f32.mrf.mxu3  ;;  %v4110_v22 = vpop.f32.mrf.mxu0 }
 0x13f   : > { %4938 = vst [vmem:[#allocation93_spill] sm:$0xff] %v4108_v57  ;;  %2911 = vmatmul.msk.f32.gmra.mxu0 %vm372_vm1, %v3245_v40 }
 0x140   : > { %2951 = vmatmul.msk.f32.gmra.mxu3 %vm372_vm1, %v4080_v50 }
 0x141   : > { %v1119_v31 = vpop.f32.mrf.mxu2 }
 0x142   : > { %v4100_v29 = vadd.f32 %v1119_v31, %v906_v34  ;;  %v909_v31 = vadd.f32 %v908_v62, %v3964_v26  ;;  %v503_v26 = vld [vmem:[#allocation2 + $0xf8] sm:$0xff] }
 0x143   : > { %v911_v14 = vpop.f32.mrf.mxu1 }
 0x144   : > { %4937 = vst [vmem:[#allocation92_spill] sm:$0xff] %v4100_v29  ;;  %v534_v29 = vld [vmem:[#allocation3 + $0xf0] sm:$0xff]  ;;  %v912_v62 = vadd.f32 %v911_v14, %v3983_v38 }
 0x146   : > { %2887 = vmatmul.msk.f32.gmra.mxu2 %vm372_vm1, %v533_v7  ;;  %2854 = vmatmul.msk.f32.gmra.mxu1 %vm372_vm1, %v502_v52  ;;  %v4121_v7 = vpop.f32.mrf.mxu3  ;;  %v4123_v58 = vpop.f32.mrf.mxu0  ;;  %v535_v52 = vld [vmem:[#allocation3 + $0xf8] sm:$0xff] }
 0x147   : > { %4940 = vst [vmem:[#allocation95_spill] sm:$0xff] %v4121_v7  ;;  %2912 = vmatmul.msk.f32.gmra.mxu0 %vm372_vm1, %v3288_v55 }
 0x148   : > { %2952 = vmatmul.msk.f32.gmra.mxu3 %vm372_vm1, %v501_v30 }
 0x149   : > { %v1122_v20 = vpop.f32.mrf.mxu2 }
 0x14a   : > { %v4113_v34 = vadd.f32 %v1122_v20, %v909_v31 }
 0x14b   : > { %v914_v57 = vpop.f32.mrf.mxu1 }
 0x14c   : > { %4939 = vst [vmem:[#allocation94_spill] sm:$0xff] %v4113_v34  ;;  %v915_v38 = vadd.f32 %v914_v57, %v4002_v35 }
 0x14e   : > { %2888 = vmatmul.msk.f32.gmra.mxu2 %vm372_vm1, %v534_v29  ;;  %2855 = vmatmul.msk.f32.gmra.mxu1 %vm372_vm1, %v503_v26  ;;  %v4133_v29 = vpop.f32.mrf.mxu3  ;;  %v4135_v34 = vpop.f32.mrf.mxu0 }
 0x14f   : > { %2955 = vmatmul.msk.f32.vlgmr.msra.gmra.mxu0 %vm372_vm1, %v3479_v48 }
 0x150   : > { %3051 = vmatmul.msk.f32.vlgmr.msra.gmra.mxu3 %vm372_vm1, %v3555_v9 }
 0x151   : > { %v1125_v31 = vpop.f32.mrf.mxu2 }
 0x152   : > { %v4126_v20 = vadd.f32 %v1125_v31, %v912_v62 }
 0x153   : > { %v917_v7 = vpop.f32.mrf.mxu1 }
 0x154   : > { %v918_v35 = vadd.f32 %v917_v7, %v4021_v5 }
 0x156   : > { %2889 = vmatmul.msk.f32.gmra.mxu2 %vm372_vm1, %v535_v52  ;;  %2988 = vmatmul.msk.f32.vlgmr.msra.gmra.mxu1 %vm372_vm1, %v3286_v54  ;;  %v4148_v30 = vpop.f32.mrf.mxu3  ;;  %v4150_v31 = vpop.f32.mrf.mxu0 }
 0x157   : > { %2956 = vmatmul.msk.f32.gmra.mxu0 %vm372_vm1, %v3526_v60 }
 0x158   : > { %3052 = vmatmul.msk.f32.gmra.mxu3 %vm372_vm1, %v3594_v23 }
 0x159   : > { %v1128_v14 = vpop.f32.mrf.mxu2 }
 0x15a   : > { %v4138_v62 = vadd.f32 %v1128_v14, %v915_v38 }
 0x15b   : > { %v920_v26 = vpop.f32.mrf.mxu1 }
 0x15c   : > { %v921_v5 = vadd.f32 %v920_v26, %v4040_v43 }
 0x15e   : > { %3019 = vmatmul.msk.f32.vlgmr.msra.gmra.mxu2 %vm372_vm1, %v3537_v63  ;;  %2989 = vmatmul.msk.f32.gmra.mxu1 %vm372_vm1, %v3326_v3  ;;  %v4163_v54 = vpop.f32.mrf.mxu3  ;;  %v4167_v63 = vpop.f32.mrf.mxu0 }
 0x15f   : > { %2957 = vmatmul.msk.f32.gmra.mxu0 %vm372_vm1, %v3555_v9 }
 0x160   : > { %3053 = vmatmul.msk.f32.gmra.mxu3 %vm372_vm1, %v3629_v45 }
 0x161   : > { %v1131_v57 = vpop.f32.mrf.mxu2 }
 0x162   : > { %v4153_v52 = vadd.f32 %v1131_v57, %v918_v35 }
 0x163   : > { %v4165_v48 = vpop.f32.mrf.mxu1 }
 0x166   : > { %3020 = vmatmul.msk.f32.gmra.mxu2 %vm372_vm1, %v3575_v16  ;;  %2990 = vmatmul.msk.f32.gmra.mxu1 %vm372_vm1, %v3366_v17  ;;  %v4180_v3 = vpop.f32.mrf.mxu3  ;;  %v4184_v16 = vpop.f32.mrf.mxu0 }
 0x167   : > { %2958 = vmatmul.msk.f32.gmra.mxu0 %vm372_vm1, %v3594_v23 }
 0x168   : > { %3054 = vmatmul.msk.f32.gmra.mxu3 %vm372_vm1, %v3652_v53 }
 0x169   : > { %v1134_v7 = vpop.f32.mrf.mxu2 }
 0x16a   : > { %v4170_v38 = vadd.f32 %v1134_v7, %v921_v5 }
 0x16b   : > { %v4182_v60 = vpop.f32.mrf.mxu1 }
 0x16e   : > { %3021 = vmatmul.msk.f32.gmra.mxu2 %vm372_vm1, %v3611_v37  ;;  %2991 = vmatmul.msk.f32.gmra.mxu1 %vm372_vm1, %v3387_v24  ;;  %v4196_v17 = vpop.f32.mrf.mxu3  ;;  %v4200_v37 = vpop.f32.mrf.mxu0 }
 0x16f   : > { %2959 = vmatmul.msk.f32.gmra.mxu0 %vm372_vm1, %v3629_v45 }
 0x170   : > { %3055 = vmatmul.msk.f32.gmra.mxu3 %vm372_vm1, %v3673_v4 }
 0x171   : > { %v4186_v43 = vpop.f32.mrf.mxu2 }
 0x173   : > { %v4198_v9 = vpop.f32.mrf.mxu1 }
 0x176   : > { %3022 = vmatmul.msk.f32.gmra.mxu2 %vm372_vm1, %v3643_v47  ;;  %2992 = vmatmul.msk.f32.gmra.mxu1 %vm372_vm1, %v3406_v33  ;;  %v4212_v24 = vpop.f32.mrf.mxu3  ;;  %v4216_v47 = vpop.f32.mrf.mxu0 }
 0x177   : > { %2960 = vmatmul.msk.f32.gmra.mxu0 %vm372_vm1, %v3652_v53 }
 0x178   : > { %3056 = vmatmul.msk.f32.gmra.mxu3 %vm372_vm1, %v3691_v6 }
 0x179   : > { %v4202_v14 = vpop.f32.mrf.mxu2 }
 0x17b   : > { %v4214_v23 = vpop.f32.mrf.mxu1 }
 0x17e   : > { %3023 = vmatmul.msk.f32.gmra.mxu2 %vm372_vm1, %v3662_v59  ;;  %2993 = vmatmul.msk.f32.gmra.mxu1 %vm372_vm1, %v3423_v36  ;;  %v4228_v33 = vpop.f32.mrf.mxu3  ;;  %v4232_v59 = vpop.f32.mrf.mxu0 }
 0x17f   : > { %2961 = vmatmul.msk.f32.gmra.mxu0 %vm372_vm1, %v3673_v4 }
 0x180   : > { %3057 = vmatmul.msk.f32.gmra.mxu3 %vm372_vm1, %v3703_v11 }
 0x181   : > { %v4218_v26 = vpop.f32.mrf.mxu2 }
 0x183   : > { %v4230_v45 = vpop.f32.mrf.mxu1 }
 0x186   : > { %3024 = vmatmul.msk.f32.gmra.mxu2 %vm372_vm1, %v3683_v2  ;;  %2994 = vmatmul.msk.f32.gmra.mxu1 %vm372_vm1, %v3502_v51  ;;  %v4244_v36 = vpop.f32.mrf.mxu3  ;;  %v4248_v2 = vpop.f32.mrf.mxu0 }
 0x187   : > { %2962 = vmatmul.msk.f32.gmra.mxu0 %vm372_vm1, %v3691_v6 }
 0x188   : > { %3058 = vmatmul.msk.f32.gmra.mxu3 %vm372_vm1, %v3723_v19 }
 0x189   : > { %v4234_v35 = vpop.f32.mrf.mxu2 }
 0x18b   : > { %v4246_v53 = vpop.f32.mrf.mxu1 }
 0x18c   : > { %4941 = vst [vmem:[#allocation96_spill] sm:$0xff] %v4246_v53 }
 0x18e   : > { %3025 = vmatmul.msk.f32.gmra.mxu2 %vm372_vm1, %v3697_v10  ;;  %2995 = vmatmul.msk.f32.gmra.mxu1 %vm372_vm1, %v3532_v61  ;;  %v4260_v51 = vpop.f32.mrf.mxu3  ;;  %v4264_v10 = vpop.f32.mrf.mxu0 }
 0x18f   : > { %4943 = vst [vmem:[#allocation98_spill] sm:$0xff] %v4260_v51  ;;  %2963 = vmatmul.msk.f32.gmra.mxu0 %vm372_vm1, %v3703_v11 }
 0x190   : > { %3059 = vmatmul.msk.f32.gmra.mxu3 %vm372_vm1, %v3743_v49 }
 0x191   : > { %v4250_v57 = vpop.f32.mrf.mxu2 }
 0x192   : > { %4942 = vst [vmem:[#allocation97_spill] sm:$0xff] %v4250_v57 }
 0x193   : > { %v4262_v4 = vpop.f32.mrf.mxu1 }
 0x194   : > { %4944 = vst [vmem:[#allocation99_spill] sm:$0xff] %v4262_v4  ;;  %v4989_v4 = vld [vmem:[#allocation61_spill] sm:$0xff] }
 0x196   : > { %3026 = vmatmul.msk.f32.gmra.mxu2 %vm372_vm1, %v3716_v18  ;;  %2996 = vmatmul.msk.f32.gmra.mxu1 %vm372_vm1, %v3568_v12  ;;  %v4276_v61 = vpop.f32.mrf.mxu3  ;;  %v4280_v18 = vpop.f32.mrf.mxu0 }
 0x197   : > { %4946 = vst [vmem:[#allocation101_spill] sm:$0xff] %v4276_v61  ;;  %2964 = vmatmul.msk.f32.gmra.mxu0 %vm372_vm1, %v3723_v19 }
 0x198   : > { %3060 = vmatmul.msk.f32.gmra.mxu3 %vm372_vm1, %v3763_v13 }
 0x199   : > { %v4266_v5 = vpop.f32.mrf.mxu2 }
 0x19a   : > { %4945 = vst [vmem:[#allocation100_spill] sm:$0xff] %v4266_v5 }
 0x19b   : > { %v4278_v6 = vpop.f32.mrf.mxu1 }
 0x19c   : > { %4947 = vst [vmem:[#allocation102_spill] sm:$0xff] %v4278_v6 }
 0x19e   : > { %3027 = vmatmul.msk.f32.gmra.mxu2 %vm372_vm1, %v3737_v42  ;;  %2997 = vmatmul.msk.f32.gmra.mxu1 %vm372_vm1, %v3589_v21  ;;  %v4292_v12 = vpop.f32.mrf.mxu3  ;;  %v4296_v42 = vpop.f32.mrf.mxu0 }
 0x19f   : > { %4949 = vst [vmem:[#allocation104_spill] sm:$0xff] %v4292_v12  ;;  %2965 = vmatmul.msk.f32.gmra.mxu0 %vm372_vm1, %v3743_v49 }
 0x1a0   : > { %3061 = vmatmul.msk.f32.gmra.mxu3 %vm372_vm1, %v3783_v27 }
 0x1a1   : > { %v4282_v7 = vpop.f32.mrf.mxu2 }
 0x1a2   : > { %4948 = vst [vmem:[#allocation103_spill] sm:$0xff] %v4282_v7 }
 0x1a3   : > { %v4294_v11 = vpop.f32.mrf.mxu1 }
 0x1a4   : > { %4950 = vst [vmem:[#allocation105_spill] sm:$0xff] %v4294_v11 }
 0x1a6   : > { %3028 = vmatmul.msk.f32.gmra.mxu2 %vm372_vm1, %v3757_v1  ;;  %2998 = vmatmul.msk.f32.gmra.mxu1 %vm372_vm1, %v3599_v25  ;;  %v4308_v21 = vpop.f32.mrf.mxu3  ;;  %v4312_v1 = vpop.f32.mrf.mxu0  ;;  %v4955_v25 = vld [vmem:[#allocation28_spill] sm:$0xff] }
 0x1a7   : > { %4952 = vst [vmem:[#allocation107_spill] sm:$0xff] %v4308_v21  ;;  %2966 = vmatmul.msk.f32.gmra.mxu0 %vm372_vm1, %v3763_v13  ;;  %v4960_v13 = vld [vmem:[#allocation32_spill] sm:$0xff] }
 0x1a8   : > { %3062 = vmatmul.msk.f32.gmra.mxu3 %vm372_vm1, %v3803_v39 }
 0x1a9   : > { %v4298_v6 = vpop.f32.mrf.mxu2 }
 0x1aa   : > { %4951 = vst [vmem:[#allocation106_spill] sm:$0xff] %v4298_v6 }
 0x1ab   : > { %v4310_v19 = vpop.f32.mrf.mxu1 }
 0x1ac   : > { %4953 = vst [vmem:[#allocation108_spill] sm:$0xff] %v4310_v19 }
 0x1ae   : > { %3029 = vmatmul.msk.f32.gmra.mxu2 %vm372_vm1, %v3777_v0  ;;  %2999 = vmatmul.msk.f32.gmra.mxu1 %vm372_vm1, %v3608_v32  ;;  %v4324_v49 = vpop.f32.mrf.mxu3  ;;  %v4328_v19 = vpop.f32.mrf.mxu0  ;;  %v4959_v32 = vld [vmem:[#allocation33_spill] sm:$0xff] }
 0x1af   : > { %4956 = vst [vmem:[#allocation28_spill] sm:$0xff] %v4324_v49  ;;  %2967 = vmatmul.msk.f32.gmra.mxu0 %vm372_vm1, %v3783_v27  ;;  %v4965_v27 = vld [vmem:[#allocation37_spill] sm:$0xff] }
 0x1b0   : > { %3063 = vmatmul.msk.f32.gmra.mxu3 %vm372_vm1, %v4959_v32 }
 0x1b1   : > { %v4314_v11 = vpop.f32.mrf.mxu2 }
 0x1b2   : > { %4954 = vst [vmem:[#allocation109_spill] sm:$0xff] %v4314_v11 }
 0x1b3   : > { %v4326_v0 = vpop.f32.mrf.mxu1 }
 0x1b4   : > { %4957 = vst [vmem:[#allocation110_spill] sm:$0xff] %v4326_v0 }
 0x1b6   : > { %3030 = vmatmul.msk.f32.gmra.mxu2 %vm372_vm1, %v4955_v25  ;;  %3000 = vmatmul.msk.f32.gmra.mxu1 %vm372_vm1, %v3618_v41  ;;  %v4340_v25 = vpop.f32.mrf.mxu3  ;;  %v4344_v0 = vpop.f32.mrf.mxu0  ;;  %v4964_v41 = vld [vmem:[#allocation38_spill] sm:$0xff] }
 0x1b7   : > { %4961 = vst [vmem:[#allocation33_spill] sm:$0xff] %v4340_v25  ;;  %2968 = vmatmul.msk.f32.gmra.mxu0 %vm372_vm1, %v3803_v39  ;;  %v4970_v39 = vld [vmem:[#allocation41_spill] sm:$0xff] }
 0x1b8   : > { %3064 = vmatmul.msk.f32.gmra.mxu3 %vm372_vm1, %v4964_v41 }
 0x1b9   : > { %v4330_v21 = vpop.f32.mrf.mxu2 }
 0x1ba   : > { %4958 = vst [vmem:[#allocation111_spill] sm:$0xff] %v4330_v21 }
 0x1bb   : > { %v4342_v49 = vpop.f32.mrf.mxu1 }
 0x1bc   : > { %4962 = vst [vmem:[#allocation32_spill] sm:$0xff] %v4342_v49 }
 0x1be   : > { %3031 = vmatmul.msk.f32.gmra.mxu2 %vm372_vm1, %v4960_v13  ;;  %3001 = vmatmul.msk.f32.gmra.mxu1 %vm372_vm1, %v3635_v46  ;;  %v4356_v13 = vpop.f32.mrf.mxu3  ;;  %v4360_v49 = vpop.f32.mrf.mxu0  ;;  %v4969_v46 = vld [vmem:[#allocation42_spill] sm:$0xff] }
 0x1bf   : > { %4966 = vst [vmem:[#allocation38_spill] sm:$0xff] %v4356_v13  ;;  %2969 = vmatmul.msk.f32.gmra.mxu0 %vm372_vm1, %v4959_v32  ;;  %v4975_v32 = vld [vmem:[#allocation51_spill] sm:$0xff] }
 0x1c0   : > { %3065 = vmatmul.msk.f32.gmra.mxu3 %vm372_vm1, %v4969_v46 }
 0x1c1   : > { %v4346_v11 = vpop.f32.mrf.mxu2 }
 0x1c2   : > { %4963 = vst [vmem:[#allocation112_spill] sm:$0xff] %v4346_v11 }
 0x1c3   : > { %v4358_v25 = vpop.f32.mrf.mxu1 }
 0x1c4   : > { %4967 = vst [vmem:[#allocation37_spill] sm:$0xff] %v4358_v25 }
 0x1c6   : > { %3032 = vmatmul.msk.f32.gmra.mxu2 %vm372_vm1, %v4965_v27  ;;  %3002 = vmatmul.msk.f32.gmra.mxu1 %vm372_vm1, %v3656_v56  ;;  %v4372_v27 = vpop.f32.mrf.mxu3  ;;  %v4376_v25 = vpop.f32.mrf.mxu0  ;;  %v4974_v56 = vld [vmem:[#allocation46_spill] sm:$0xff] }
 0x1c7   : > { %4971 = vst [vmem:[#allocation42_spill] sm:$0xff] %v4372_v27  ;;  %2970 = vmatmul.msk.f32.gmra.mxu0 %vm372_vm1, %v4964_v41  ;;  %v4979_v41 = vld [vmem:[#allocation53_spill] sm:$0xff] }
 0x1c8   : > { %3066 = vmatmul.msk.f32.gmra.mxu3 %vm372_vm1, %v4974_v56 }
 0x1c9   : > { %v4362_v21 = vpop.f32.mrf.mxu2 }
 0x1ca   : > { %4968 = vst [vmem:[#allocation113_spill] sm:$0xff] %v4362_v21  ;;  %v4976_v21 = vld [vmem:[#allocation45_spill] sm:$0xff] }
 0x1cb   : > { %v4374_v13 = vpop.f32.mrf.mxu1 }
 0x1cc   : > { %4972 = vst [vmem:[#allocation41_spill] sm:$0xff] %v4374_v13 }
 0x1ce   : > { %3033 = vmatmul.msk.f32.gmra.mxu2 %vm372_vm1, %v4970_v39  ;;  %3003 = vmatmul.msk.f32.gmra.mxu1 %vm372_vm1, %v3677_v8  ;;  %v1495_v39 = vadd.f32 %v4975_v32, %v4059_v15  ;;  %v4390_v13 = vpop.f32.mrf.mxu3  ;;  %v1696_v27 = vpop.f32.mrf.mxu0  ;;  %v4980_v8 = vld [vmem:[#allocation50_spill] sm:$0xff]  ;;  %v4981_v15 = vld [vmem:[#allocation55_spill] sm:$0xff]  ;;  %v4982_v32 = vld [vmem:[#allocation48_spill] sm:$0xff] }
 0x1cf   : > { %4977 = vst [vmem:[#allocation46_spill] sm:$0xff] %v4390_v13  ;;  %2971 = vmatmul.msk.f32.gmra.mxu0 %vm372_vm1, %v4969_v46  ;;  %v4983_v46 = vld [vmem:[#allocation57_spill] sm:$0xff] }
 0x1d0   : > { %3067 = vmatmul.msk.f32.gmra.mxu3 %vm372_vm1, %v4980_v8 }
 0x1d1   : > { %v4378_v11 = vpop.f32.mrf.mxu2 }
 0x1d2   : > { %4973 = vst [vmem:[#allocation114_spill] sm:$0xff] %v4378_v11  ;;  %v1786_v11 = vadd.f32 %v1696_v27, %v1495_v39 }
 0x1d3   : > { %v1934_v6 = vpop.f32.mrf.mxu1 }
 0x1d4   : > { %v1818_v7 = vadd.f32 %v1786_v11, %v4979_v41 }
 0x1d6   : > { %3034 = vmatmul.msk.f32.gmra.mxu2 %vm372_vm1, %v4976_v21  ;;  %3004 = vmatmul.msk.f32.gmra.mxu1 %vm372_vm1, %v3211_v28  ;;  %v1498_v21 = vadd.f32 %v4981_v15, %v4078_v44  ;;  %v2336_v27 = vpop.f32.mrf.mxu3  ;;  %v1699_v39 = vpop.f32.mrf.mxu0  ;;  %v4984_v28 = vld [vmem:[#allocation54_spill] sm:$0xff]  ;;  %v4986_v15 = vld [vmem:[#allocation59_spill] sm:$0xff] }
 0x1d7   : > { %2972 = vmatmul.msk.f32.gmra.mxu0 %vm372_vm1, %v4974_v56  ;;  %v4988_v56 = vld [vmem:[#allocation52_spill] sm:$0xff] }
 0x1d8   : > { %v1787_v11 = vadd.f32 %v1699_v39, %v1498_v21  ;;  %3068 = vmatmul.msk.f32.gmra.mxu3 %vm372_vm1, %v4984_v28 }
 0x1d9   : > { %v4392_v12 = vpop.f32.mrf.mxu2 }
 0x1da   : > { %4978 = vst [vmem:[#allocation51_spill] sm:$0xff] %v4392_v12  ;;  %v4406_v61 = vadd.f32 %v1787_v11, %v4983_v46 }
 0x1db   : > { %v1937_v12 = vpop.f32.mrf.mxu1 }
 0x1de   : > { %3035 = vmatmul.msk.f32.gmra.mxu2 %vm372_vm1, %v4982_v32  ;;  %3005 = vmatmul.msk.f32.gmra.mxu1 %vm372_vm1, %v3245_v40  ;;  %v4987_v32 = vld [vmem:[#allocation44_spill] sm:$0xff]  ;;  %v2339_v40 = vpop.f32.mrf.mxu3  ;;  %v1702_v11 = vpop.f32.mrf.mxu0 }
 0x1df   : > { %2973 = vmatmul.msk.f32.gmra.mxu0 %vm372_vm1, %v4980_v8 }
 0x1e1   : > { %v2134_v41 = vpop.f32.mrf.mxu2 }
 0x1e2   : > { %v2135_v13 = vadd.f32 %v2134_v41, %v1934_v6  ;;  %v4985_v6 = vld [vmem:[#allocation91_spill] sm:$0xff] }
 0x1e3   : > { %v1501_v21 = vadd.f32 %v4986_v15, %v4985_v6  ;;  %v1940_v41 = vpop.f32.mrf.mxu1  ;;  %v4991_v15 = vld [vmem:[#allocation63_spill] sm:$0xff] }
 0x1e4   : > { %v2426_v44 = vadd.f32 %v2336_v27, %v2135_v13 }
 0x1e5   : > { %v1788_v13 = vadd.f32 %v1702_v11, %v1501_v21  ;;  %v4993_v11 = vld [vmem:[#allocation56_spill] sm:$0xff] }
 0x1e6   : > { %v2456_v39 = vadd.f32 %v2426_v44, %v4987_v32  ;;  %3036 = vmatmul.msk.f32.gmra.mxu2 %vm372_vm1, %v4988_v56  ;;  %3006 = vmatmul.msk.f32.gmra.mxu1 %vm372_vm1, %v3288_v55  ;;  %v4990_v44 = vld [vmem:[#allocation58_spill] sm:$0xff]  ;;  %v1504_v32 = vadd.f32 %v4991_v15, %v4110_v22  ;;  %v4992_v56 = vld [vmem:[#allocation49_spill] sm:$0xff] }
 0x1e7   : > { %v4429_v5 = vadd.f32 %v1788_v13, %v4989_v4  ;;  %3069 = vmatmul.msk.f32.gmra.mxu3 %vm372_vm1, %v4990_v44  ;;  %v2342_v4 = vpop.f32.mrf.mxu3  ;;  %v1705_v13 = vpop.f32.mrf.mxu0  ;;  %2974 = vmatmul.msk.f32.gmra.mxu0 %vm372_vm1, %v4984_v28 }
 0x1e8   : > { %2660 = vst.msk [vmem:[%s4419_s25] sm:$0xff] %vm372_vm1, %v2456_v39  ;;  %v2558_v21 = vmul.f32 %v2456_v39, %v2456_v39  ;;  %v2488_v8 = vsel %vm372_vm1, %v2456_v39, 0.0  ;;  %v4995_v39 = vld [vmem:[#allocation5_spill] sm:$0xff] }
 0x1e9   : > { %v2137_v27 = vpop.f32.mrf.mxu2 }
 0x1ea   : > { %v2138_v46 = vadd.f32 %v2137_v27, %v1937_v12  ;;  %v2590_v22 = vsel %vm372_vm1, %v2558_v21, 0.0  ;;  %v4997_v21 = vld [vmem:[#allocation67_spill] sm:$0xff] }
 0x1eb   : > { %v1943_v27 = vpop.f32.mrf.mxu1 }
 0x1ec   : > { %v2427_v6 = vadd.f32 %v2339_v40, %v2138_v46  ;;  %v1789_v40 = vadd.f32 %v1705_v13, %v1504_v32  ;;  %v1507_v13 = vadd.f32 %v4997_v21, %v4123_v58  ;;  %v4999_v58 = vld [vmem:[#allocation69_spill] sm:$0xff]  ;;  %v5001_v21 = vld [vmem:[#allocation66_spill] sm:$0xff] }
 0x1ee   : > { %v2457_v12 = vadd.f32 %v2427_v6, %v4992_v56  ;;  %3037 = vmatmul.msk.f32.gmra.mxu2 %vm372_vm1, %v4993_v11  ;;  %v4994_v56 = vld [vmem:[#allocation65_spill] sm:$0xff]  ;;  %3007 = vmatmul.msk.f32.gmra.mxu1 %vm372_vm1, %v4995_v39  ;;  %v5000_v39 = vld [vmem:[#allocation7_spill] sm:$0xff] }
 0x1ef   : > { %v4449_v11 = vadd.f32 %v1789_v40, %v4994_v56  ;;  %2975 = vmatmul.msk.f32.gmra.mxu0 %vm372_vm1, %v4990_v44 }
 0x1f0   : > { %v2489_v55 = vsel %vm372_vm1, %v2457_v12, 0.0  ;;  %v2559_v51 = vmul.f32 %v2457_v12, %v2457_v12  ;;  %2661 = vst.msk [vmem:[%s4419_s25 + $0x8] sm:$0xff] %vm372_vm1, %v2457_v12  ;;  %v4996_v12 = vld [vmem:[#allocation62_spill] sm:$0xff] }
 0x1f1   : > { %v2490_v46 = vadd.f32 %v2489_v55, %v2488_v8  ;;  %v2140_v53 = vpop.f32.mrf.mxu2  ;;  %3070 = vmatmul.msk.f32.gmra.mxu3 %vm372_vm1, %v4996_v12  ;;  %v4998_v8 = vld [vmem:[#allocation60_spill] sm:$0xff] }
 0x1f2   : > { %v2591_v6 = vsel %vm372_vm1, %v2559_v51, 0.0  ;;  %v2141_v15 = vadd.f32 %v2140_v53, %v1940_v41  ;;  %v2345_v53 = vpop.f32.mrf.mxu3  ;;  %v1708_v41 = vpop.f32.mrf.mxu0 }
 0x1f3   : > { %v2592_v57 = vadd.f32 %v2591_v6, %v2590_v22  ;;  %v1946_v55 = vpop.f32.mrf.mxu1  ;;  %v1790_v22 = vadd.f32 %v1708_v41, %v1507_v13 }
 0x1f4   : > { %v2428_v32 = vadd.f32 %v2342_v4, %v2141_v15 }
 0x1f6   : > { %v2458_v51 = vadd.f32 %v2428_v32, %v1818_v7  ;;  %3038 = vmatmul.msk.f32.gmra.mxu2 %vm372_vm1, %v4998_v8  ;;  %v4466_v7 = vadd.f32 %v1790_v22, %v4999_v58  ;;  %3008 = vmatmul.msk.f32.gmra.mxu1 %vm372_vm1, %v5000_v39  ;;  %v5005_v58 = vld [vmem:[#allocation9_spill] sm:$0xff] }
 0x1f7   : > { %2976 = vmatmul.msk.f32.gmra.mxu0 %vm372_vm1, %v4996_v12 }
 0x1f8   : > { %v2491_v28 = vsel %vm372_vm1, %v2458_v51, 0.0  ;;  %v2560_v40 = vmul.f32 %v2458_v51, %v2458_v51  ;;  %2662 = vst.msk [vmem:[%s4419_s25 + $0x10] sm:$0xff] %vm372_vm1, %v2458_v51 }
 0x1f9   : > { %v2492_v6 = vadd.f32 %v2491_v28, %v2490_v46  ;;  %v2143_v56 = vpop.f32.mrf.mxu2  ;;  %3071 = vmatmul.msk.f32.gmra.mxu3 %vm372_vm1, %v5001_v21  ;;  %v5002_v46 = vld [vmem:[#allocation71_spill] sm:$0xff] }
 0x1fa   : > { %v2593_v4 = vsel %vm372_vm1, %v2560_v40, 0.0  ;;  %v2144_v15 = vadd.f32 %v2143_v56, %v1943_v27  ;;  %v1510_v51 = vadd.f32 %v5002_v46, %v4135_v34  ;;  %v5003_v27 = vld [vmem:[#allocation64_spill] sm:$0xff]  ;;  %v2348_v41 = vpop.f32.mrf.mxu3  ;;  %v1711_v28 = vpop.f32.mrf.mxu0 }
 0x1fb   : > { %v2594_v32 = vadd.f32 %v2593_v4, %v2592_v57  ;;  %v1949_v40 = vpop.f32.mrf.mxu1 }
 0x1fc   : > { %v2429_v13 = vadd.f32 %v2345_v53, %v2144_v15  ;;  %v1791_v57 = vadd.f32 %v1711_v28, %v1510_v51  ;;  %v5004_v15 = vld [vmem:[#allocation73_spill] sm:$0xff] }
 0x1fe   : > { %v2459_v8 = vadd.f32 %v2429_v13, %v4406_v61  ;;  %3039 = vmatmul.msk.f32.gmra.mxu2 %vm372_vm1, %v5003_v27  ;;  %v4484_v61 = vadd.f32 %v1791_v57, %v5004_v15  ;;  %3009 = vmatmul.msk.f32.gmra.mxu1 %vm372_vm1, %v5005_v58  ;;  %v5006_v13 = vld [vmem:[#allocation70_spill] sm:$0xff] }
 0x1ff   : > { %2977 = vmatmul.msk.f32.gmra.mxu0 %vm372_vm1, %v5001_v21  ;;  %v5011_v58 = vld [vmem:[#allocation74_spill] sm:$0xff] }
 0x200   : > { %v2493_v44 = vsel %vm372_vm1, %v2459_v8, 0.0  ;;  %v2561_v22 = vmul.f32 %v2459_v8, %v2459_v8  ;;  %2663 = vst.msk [vmem:[%s4419_s25 + $0x18] sm:$0xff] %vm372_vm1, %v2459_v8 }
 0x201   : > { %v2494_v56 = vadd.f32 %v2493_v44, %v2492_v6  ;;  %v2146_v4 = vpop.f32.mrf.mxu2  ;;  %3072 = vmatmul.msk.f32.gmra.mxu3 %vm372_vm1, %v5006_v13  ;;  %v5007_v6 = vld [vmem:[#allocation75_spill] sm:$0xff] }
 0x202   : > { %v2595_v53 = vsel %vm372_vm1, %v2561_v22, 0.0  ;;  %v2147_v34 = vadd.f32 %v2146_v4, %v1946_v55  ;;  %v1513_v51 = vadd.f32 %v5007_v6, %v4150_v31  ;;  %v5008_v55 = vld [vmem:[#allocation68_spill] sm:$0xff]  ;;  %v2351_v27 = vpop.f32.mrf.mxu3  ;;  %v1714_v28 = vpop.f32.mrf.mxu0 }
 0x203   : > { %v2596_v39 = vadd.f32 %v2595_v53, %v2594_v32  ;;  %v1952_v44 = vpop.f32.mrf.mxu1  ;;  %v5009_v53 = vld [vmem:[#allocation77_spill] sm:$0xff] }
 0x204   : > { %v2430_v46 = vadd.f32 %v2348_v41, %v2147_v34  ;;  %v1792_v32 = vadd.f32 %v1714_v28, %v1513_v51  ;;  %v5010_v34 = vld [vmem:[#allocation11_spill] sm:$0xff] }
 0x206   : > { %v2460_v8 = vadd.f32 %v2430_v46, %v4429_v5  ;;  %3040 = vmatmul.msk.f32.gmra.mxu2 %vm372_vm1, %v5008_v55  ;;  %v4502_v5 = vadd.f32 %v1792_v32, %v5009_v53  ;;  %3010 = vmatmul.msk.f32.gmra.mxu1 %vm372_vm1, %v5010_v34  ;;  %v5016_v53 = vld [vmem:[#allocation78_spill] sm:$0xff] }
 0x207   : > { %2978 = vmatmul.msk.f32.gmra.mxu0 %vm372_vm1, %v5006_v13 }
 0x208   : > { %v2495_v12 = vsel %vm372_vm1, %v2460_v8, 0.0  ;;  %v2562_v22 = vmul.f32 %v2460_v8, %v2460_v8  ;;  %2664 = vst.msk [vmem:[%s4419_s25 + $0x20] sm:$0xff] %vm372_vm1, %v2460_v8 }
 0x209   : > { %v2496_v57 = vadd.f32 %v2495_v12, %v2494_v56  ;;  %v2149_v4 = vpop.f32.mrf.mxu2  ;;  %3073 = vmatmul.msk.f32.gmra.mxu3 %vm372_vm1, %v5011_v58  ;;  %v5012_v56 = vld [vmem:[#allocation79_spill] sm:$0xff] }
 0x20a   : > { %v2597_v41 = vsel %vm372_vm1, %v2562_v22, 0.0  ;;  %v2150_v31 = vadd.f32 %v2149_v4, %v1949_v40  ;;  %v1516_v6 = vadd.f32 %v5012_v56, %v4167_v63  ;;  %v5013_v40 = vld [vmem:[#allocation72_spill] sm:$0xff]  ;;  %v2354_v8 = vpop.f32.mrf.mxu3  ;;  %v1717_v55 = vpop.f32.mrf.mxu0  ;;  %v5014_v63 = vld [vmem:[#allocation81_spill] sm:$0xff] }
 0x20b   : > { %v2598_v15 = vadd.f32 %v2597_v41, %v2596_v39  ;;  %v1955_v28 = vpop.f32.mrf.mxu1  ;;  %v5015_v41 = vld [vmem:[#allocation4_spill] sm:$0xff] }
 0x20c   : > { %v2431_v46 = vadd.f32 %v2351_v27, %v2150_v31  ;;  %v1793_v39 = vadd.f32 %v1717_v55, %v1516_v6 }
 0x20e   : > { %v2461_v51 = vadd.f32 %v2431_v46, %v4449_v11  ;;  %3041 = vmatmul.msk.f32.gmra.mxu2 %vm372_vm1, %v5013_v40  ;;  %v4520_v11 = vadd.f32 %v1793_v39, %v5014_v63  ;;  %3011 = vmatmul.msk.f32.gmra.mxu1 %vm372_vm1, %v5015_v41  ;;  %v5018_v46 = vld [vmem:[#allocation76_spill] sm:$0xff]  ;;  %v5019_v39 = vld [vmem:[#allocation85_spill] sm:$0xff] }
 0x210   : > { %v2497_v21 = vsel %vm372_vm1, %v2461_v51, 0.0  ;;  %v2563_v12 = vmul.f32 %v2461_v51, %v2461_v51  ;;  %2665 = vst.msk [vmem:[%s4419_s25 + $0x28] sm:$0xff] %vm372_vm1, %v2461_v51  ;;  %v1265_v51 = vld [vmem:[#allocation3 + $0xc0] sm:$0xff] }
 0x211   : > { %v2498_v22 = vadd.f32 %v2497_v21, %v2496_v57  ;;  %v2152_v32 = vpop.f32.mrf.mxu2  ;;  %3074 = vmatmul.msk.f32.gmra.mxu3 %vm372_vm1, %v5016_v53  ;;  %v5017_v57 = vld [vmem:[#allocation83_spill] sm:$0xff]  ;;  %2979 = vmatmul.msk.f32.gmra.mxu0 %vm372_vm1, %v1265_v51 }
 0x212   : > { %v2599_v27 = vsel %vm372_vm1, %v2563_v12, 0.0  ;;  %v2153_v4 = vadd.f32 %v2152_v32, %v1952_v44  ;;  %v1519_v58 = vadd.f32 %v5017_v57, %v4184_v16  ;;  %v2357_v56 = vpop.f32.mrf.mxu3  ;;  %v1720_v6 = vpop.f32.mrf.mxu0  ;;  %v5020_v32 = vld [vmem:[#allocation6_spill] sm:$0xff] }
 0x213   : > { %v2600_v31 = vadd.f32 %v2599_v27, %v2598_v15  ;;  %v1958_v13 = vpop.f32.mrf.mxu1 }
 0x214   : > { %v2432_v34 = vadd.f32 %v2354_v8, %v2153_v4  ;;  %v1794_v15 = vadd.f32 %v1720_v6, %v1519_v58  ;;  %v5021_v4 = vld [vmem:[#allocation82_spill] sm:$0xff]  ;;  %v1266_v58 = vld [vmem:[#allocation3 + $0xc8] sm:$0xff] }
 0x216   : > { %v2462_v44 = vadd.f32 %v2432_v34, %v4466_v7  ;;  %3042 = vmatmul.msk.f32.gmra.mxu2 %vm372_vm1, %v5018_v46  ;;  %v4538_v7 = vadd.f32 %v1794_v15, %v5019_v39  ;;  %3012 = vmatmul.msk.f32.gmra.mxu1 %vm372_vm1, %v5020_v32  ;;  %v5025_v15 = vld [vmem:[#allocation8_spill] sm:$0xff] }
 0x218   : > { %v2499_v40 = vsel %vm372_vm1, %v2462_v44, 0.0  ;;  %v2564_v55 = vmul.f32 %v2462_v44, %v2462_v44  ;;  %2666 = vst.msk [vmem:[%s4419_s25 + $0x30] sm:$0xff] %vm372_vm1, %v2462_v44 }
 0x219   : > { %v2500_v21 = vadd.f32 %v2499_v40, %v2498_v22  ;;  %v2155_v8 = vpop.f32.mrf.mxu2  ;;  %3075 = vmatmul.msk.f32.gmra.mxu3 %vm372_vm1, %v5021_v4  ;;  %v5022_v22 = vld [vmem:[#allocation87_spill] sm:$0xff]  ;;  %2980 = vmatmul.msk.f32.gmra.mxu0 %vm372_vm1, %v1266_v58 }
 0x21a   : > { %v2601_v12 = vsel %vm372_vm1, %v2564_v55, 0.0  ;;  %v2156_v16 = vadd.f32 %v2155_v8, %v1955_v28  ;;  %v1522_v41 = vadd.f32 %v5022_v22, %v4200_v37  ;;  %v5023_v28 = vld [vmem:[#allocation80_spill] sm:$0xff]  ;;  %v2360_v34 = vpop.f32.mrf.mxu3  ;;  %v1723_v57 = vpop.f32.mrf.mxu0  ;;  %v1267_v22 = vld [vmem:[#allocation3 + $0xd0] sm:$0xff] }
 0x21b   : > { %v2602_v27 = vadd.f32 %v2601_v12, %v2600_v31  ;;  %v1961_v44 = vpop.f32.mrf.mxu1  ;;  %v5024_v55 = vld [vmem:[#allocation88_spill] sm:$0xff]  ;;  %v5026_v12 = vld [vmem:[#allocation86_spill] sm:$0xff] }
 0x21c   : > { %v2433_v63 = vadd.f32 %v2357_v56, %v2156_v16  ;;  %v1795_v31 = vadd.f32 %v1723_v57, %v1522_v41 }
 0x21e   : > { %v2463_v53 = vadd.f32 %v2433_v63, %v4484_v61  ;;  %3043 = vmatmul.msk.f32.gmra.mxu2 %vm372_vm1, %v5023_v28  ;;  %v4555_v61 = vadd.f32 %v1795_v31, %v5024_v55  ;;  %3013 = vmatmul.msk.f32.gmra.mxu1 %vm372_vm1, %v5025_v15 }
 0x220   : > { %v2501_v46 = vsel %vm372_vm1, %v2463_v53, 0.0  ;;  %v2565_v6 = vmul.f32 %v2463_v53, %v2463_v53  ;;  %2667 = vst.msk [vmem:[%s4419_s25 + $0x38] sm:$0xff] %vm372_vm1, %v2463_v53 }
 0x221   : > { %v2502_v51 = vadd.f32 %v2501_v46, %v2500_v21  ;;  %v2158_v56 = vpop.f32.mrf.mxu2  ;;  %3076 = vmatmul.msk.f32.gmra.mxu3 %vm372_vm1, %v5026_v12  ;;  %v5027_v21 = vld [vmem:[#allocation90_spill] sm:$0xff]  ;;  %v5029_v46 = vld [vmem:[#allocation92_spill] sm:$0xff]  ;;  %2981 = vmatmul.msk.f32.gmra.mxu0 %vm372_vm1, %v1267_v22  ;;  %v1268_v12 = vld [vmem:[#allocation3 + $0xd8] sm:$0xff] }
 0x222   : > { %v2603_v40 = vsel %vm372_vm1, %v2565_v6, 0.0  ;;  %v2159_v37 = vadd.f32 %v2158_v56, %v1958_v13  ;;  %v1525_v39 = vadd.f32 %v5027_v21, %v4216_v47  ;;  %v5028_v13 = vld [vmem:[#allocation84_spill] sm:$0xff]  ;;  %v2363_v4 = vpop.f32.mrf.mxu3  ;;  %v1726_v63 = vpop.f32.mrf.mxu0  ;;  %v5030_v6 = vld [vmem:[#allocation10_spill] sm:$0xff]  ;;  %v5031_v56 = vld [vmem:[#allocation89_spill] sm:$0xff] }
 0x223   : > { %v2604_v8 = vadd.f32 %v2603_v40, %v2602_v27  ;;  %v1964_v41 = vpop.f32.mrf.mxu1 }
 0x224   : > { %v2434_v16 = vadd.f32 %v2360_v34, %v2159_v37  ;;  %v1796_v27 = vadd.f32 %v1726_v63, %v1525_v39 }
 0x226   : > { %v2464_v32 = vadd.f32 %v2434_v16, %v4502_v5  ;;  %3044 = vmatmul.msk.f32.gmra.mxu2 %vm372_vm1, %v5028_v13  ;;  %v4572_v5 = vadd.f32 %v1796_v27, %v5029_v46  ;;  %3014 = vmatmul.msk.f32.gmra.mxu1 %vm372_vm1, %v5030_v6  ;;  %v1269_v46 = vld [vmem:[#allocation3 + $0xe0] sm:$0xff] }
 0x228   : > { %v2503_v53 = vsel %vm372_vm1, %v2464_v32, 0.0  ;;  %v2566_v28 = vmul.f32 %v2464_v32, %v2464_v32  ;;  %2668 = vst.msk [vmem:[%s4419_s25 + $0x40] sm:$0xff] %vm372_vm1, %v2464_v32  ;;  %v1907_v32 = vld [vmem:[#allocation3 + $0xe8] sm:$0xff] }
 0x229   : > { %v2504_v57 = vadd.f32 %v2503_v53, %v2502_v51  ;;  %v2161_v34 = vpop.f32.mrf.mxu2  ;;  %3077 = vmatmul.msk.f32.gmra.mxu3 %vm372_vm1, %v5031_v56  ;;  %v5032_v51 = vld [vmem:[#allocation93_spill] sm:$0xff]  ;;  %2982 = vmatmul.msk.f32.gmra.mxu0 %vm372_vm1, %v1268_v12 }
 0x22a   : > { %v2605_v58 = vsel %vm372_vm1, %v2566_v28, 0.0  ;;  %v2162_v47 = vadd.f32 %v2161_v34, %v1961_v44  ;;  %v1528_v37 = vadd.f32 %v5032_v51, %v4232_v59  ;;  %v2366_v44 = vpop.f32.mrf.mxu3  ;;  %v1729_v15 = vpop.f32.mrf.mxu0  ;;  %v1876_v28 = vld [vmem:[#allocation2 + $0xe8] sm:$0xff]  ;;  %v1908_v51 = vld [vmem:[#allocation3 + $0xf0] sm:$0xff] }
 0x22b   : > { %v2606_v31 = vadd.f32 %v2605_v58, %v2604_v8  ;;  %v1967_v16 = vpop.f32.mrf.mxu1 }
 0x22c   : > { %v2435_v40 = vadd.f32 %v2363_v4, %v2162_v47  ;;  %v1797_v8 = vadd.f32 %v1729_v15, %v1528_v37  ;;  %v5036_v15 = vld [vmem:[#allocation13_spill] sm:$0xff] }
 0x22e   : > { %v2465_v55 = vadd.f32 %v2435_v40, %v4520_v11  ;;  %3045 = vmatmul.msk.f32.gmra.mxu2 %vm372_vm1, %v4080_v50  ;;  %v5033_v11 = vld [vmem:[#allocation94_spill] sm:$0xff]  ;;  %v5034_v50 = vld [vmem:[#allocation12_spill] sm:$0xff] }
 0x22f   : > { %v4589_v22 = vadd.f32 %v1797_v8, %v5033_v11  ;;  %3015 = vmatmul.msk.f32.gmra.mxu1 %vm372_vm1, %v5034_v50  ;;  %v1534_v8 = vadd.f32 %v4133_v29, %v4264_v10  ;;  %v1909_v50 = vld [vmem:[#allocation3 + $0xf8] sm:$0xff]  ;;  %v5037_v10 = vld [vmem:[#allocation14_spill] sm:$0xff] }
 0x230   : > { %v2505_v21 = vsel %vm372_vm1, %v2465_v55, 0.0  ;;  %v2567_v39 = vmul.f32 %v2465_v55, %v2465_v55  ;;  %2669 = vst.msk [vmem:[%s4419_s25 + $0x48] sm:$0xff] %vm372_vm1, %v2465_v55 }
 0x231   : > { %v2506_v13 = vadd.f32 %v2505_v21, %v2504_v57  ;;  %v2164_v4 = vpop.f32.mrf.mxu2  ;;  %3078 = vmatmul.msk.f32.gmra.mxu3 %vm372_vm1, %v1907_v32  ;;  %v5035_v57 = vld [vmem:[#allocation95_spill] sm:$0xff]  ;;  %2983 = vmatmul.msk.f32.gmra.mxu0 %vm372_vm1, %v1269_v46  ;;  %v1877_v21 = vld [vmem:[#allocation2 + $0xf0] sm:$0xff] }
 0x232   : > { %v2607_v59 = vsel %vm372_vm1, %v2567_v39, 0.0  ;;  %v2165_v63 = vadd.f32 %v2164_v4, %v1964_v41  ;;  %v1531_v34 = vadd.f32 %v5035_v57, %v4248_v2  ;;  %v2369_v41 = vpop.f32.mrf.mxu3  ;;  %v1732_v47 = vpop.f32.mrf.mxu0 }
 0x233   : > { %v2608_v53 = vadd.f32 %v2607_v59, %v2606_v31  ;;  %v1970_v6 = vpop.f32.mrf.mxu1 }
 0x234   : > { %v2436_v27 = vadd.f32 %v2366_v44, %v2165_v63  ;;  %v1798_v31 = vadd.f32 %v1732_v47, %v1531_v34  ;;  %v1878_v34 = vld [vmem:[#allocation2 + $0xf8] sm:$0xff] }
 0x236   : > { %v2466_v58 = vadd.f32 %v2436_v27, %v4538_v7  ;;  %3046 = vmatmul.msk.f32.gmra.mxu2 %vm372_vm1, %v1876_v28  ;;  %v4604_v7 = vadd.f32 %v1798_v31, %v4126_v20 }
 0x237   : > { %3016 = vmatmul.msk.f32.gmra.mxu1 %vm372_vm1, %v5036_v15 }
 0x238   : > { %v2507_v56 = vsel %vm372_vm1, %v2466_v58, 0.0  ;;  %v2568_v40 = vmul.f32 %v2466_v58, %v2466_v58  ;;  %2670 = vst.msk [vmem:[%s4419_s25 + $0x50] sm:$0xff] %vm372_vm1, %v2466_v58 }
 0x239   : > { %v2508_v37 = vadd.f32 %v2507_v56, %v2506_v13  ;;  %v2167_v55 = vpop.f32.mrf.mxu2  ;;  %3079 = vmatmul.msk.f32.gmra.mxu3 %vm372_vm1, %v1908_v51  ;;  %2984 = vmatmul.msk.f32.gmra.mxu0 %vm372_vm1, %v1907_v32 }
 0x23a   : > { %v2609_v44 = vsel %vm372_vm1, %v2568_v40, 0.0  ;;  %v2168_v2 = vadd.f32 %v2167_v55, %v1967_v16  ;;  %v2372_v16 = vpop.f32.mrf.mxu3  ;;  %v1735_v20 = vpop.f32.mrf.mxu0 }
 0x23b   : > { %v2610_v12 = vadd.f32 %v2609_v44, %v2608_v53  ;;  %v1973_v4 = vpop.f32.mrf.mxu1  ;;  %v1799_v11 = vadd.f32 %v1735_v20, %v1534_v8  ;;  %v1540_v44 = vadd.f32 %v4163_v54, %v4296_v42 }
 0x23c   : > { %v2437_v39 = vadd.f32 %v2369_v41, %v2168_v2  ;;  %v1537_v41 = vadd.f32 %v4148_v30, %v4280_v18 }
 0x23d   : > { %v1831_v29 = vadd.f32 %v1799_v11, %v4138_v62  ;;  %v1543_v11 = vadd.f32 %v4180_v3, %v4312_v1 }
 0x23e   : > { %v2467_v13 = vadd.f32 %v2437_v39, %v4555_v61  ;;  %3047 = vmatmul.msk.f32.gmra.mxu2 %vm372_vm1, %v1877_v21 }
 0x23f   : > { %3017 = vmatmul.msk.f32.gmra.mxu1 %vm372_vm1, %v5037_v10 }
 0x240   : > { %v2509_v59 = vsel %vm372_vm1, %v2467_v13, 0.0  ;;  %v2569_v63 = vmul.f32 %v2467_v13, %v2467_v13  ;;  %2671 = vst.msk [vmem:[%s4419_s25 + $0x58] sm:$0xff] %vm372_vm1, %v2467_v13 }
 0x241   : > { %v2510_v53 = vadd.f32 %v2509_v59, %v2508_v37  ;;  %v2170_v28 = vpop.f32.mrf.mxu2  ;;  %3080 = vmatmul.msk.f32.gmra.mxu3 %vm372_vm1, %v1909_v50 }
 0x242   : > { %v2611_v27 = vsel %vm372_vm1, %v2569_v63, 0.0  ;;  %v2171_v57 = vadd.f32 %v2170_v28, %v1970_v6  ;;  %v2375_v46 = vpop.f32.mrf.mxu3  ;;  %v1738_v6 = vpop.f32.mrf.mxu0 }
 0x243   : > { %v2612_v61 = vadd.f32 %v2611_v27, %v2610_v12  ;;  %v1976_v62 = vpop.f32.mrf.mxu1  ;;  %v1800_v40 = vadd.f32 %v1738_v6, %v1537_v41 }
 0x244   : > { %v2438_v58 = vadd.f32 %v2372_v16, %v2171_v57 }
 0x245   : > { %v1832_v30 = vadd.f32 %v1800_v40, %v4153_v52 }
 0x246   : > { %v2468_v47 = vadd.f32 %v2438_v58, %v4572_v5  ;;  %3048 = vmatmul.msk.f32.gmra.mxu2 %vm372_vm1, %v1878_v34 }
 0x248   : > { %v2511_v32 = vsel %vm372_vm1, %v2468_v47, 0.0  ;;  %v2570_v56 = vmul.f32 %v2468_v47, %v2468_v47  ;;  %2672 = vst.msk [vmem:[%s4419_s25 + $0x60] sm:$0xff] %vm372_vm1, %v2468_v47  ;;  %v5039_v47 = vld [vmem:[#allocation18_spill] sm:$0xff] }
 0x249   : > { %v2512_v31 = vadd.f32 %v2511_v32, %v2510_v53  ;;  %v2173_v51 = vpop.f32.mrf.mxu2 }
 0x24a   : > { %v2613_v37 = vsel %vm372_vm1, %v2570_v56, 0.0  ;;  %v2174_v55 = vadd.f32 %v2173_v51, %v1973_v4  ;;  %v2378_v15 = vpop.f32.mrf.mxu3  ;;  %v1741_v12 = vpop.f32.mrf.mxu0 }
 0x24b   : > { %v2614_v18 = vadd.f32 %v2613_v37, %v2612_v61  ;;  %v1979_v21 = vpop.f32.mrf.mxu1  ;;  %v1801_v13 = vadd.f32 %v1741_v12, %v1540_v44 }
 0x24c   : > { %v2439_v5 = vadd.f32 %v2375_v46, %v2174_v55  ;;  %v927_v46 = vadd.f32 %v4182_v60, %v5039_v47 }
 0x24d   : > { %v1833_v59 = vadd.f32 %v1801_v13, %v4170_v38 }
 0x24e   : > { %v2469_v2 = vadd.f32 %v2439_v5, %v4589_v22  ;;  %v5038_v22 = vld [vmem:[#allocation15_spill] sm:$0xff]  ;;  %v1198_v40 = vadd.f32 %v4202_v14, %v927_v46  ;;  %v1549_v14 = vadd.f32 %v4212_v24, %v4344_v0  ;;  %v5043_v46 = vld [vmem:[#allocation97_spill] sm:$0xff] }
 0x24f   : > { %v924_v63 = vadd.f32 %v4165_v48, %v5038_v22 }
 0x250   : > { %v2513_v39 = vsel %vm372_vm1, %v2469_v2, 0.0  ;;  %v2571_v8 = vmul.f32 %v2469_v2, %v2469_v2  ;;  %2673 = vst.msk [vmem:[%s4419_s25 + $0x68] sm:$0xff] %vm372_vm1, %v2469_v2 }
 0x251   : > { %v2514_v16 = vadd.f32 %v2513_v39, %v2512_v31  ;;  %v2176_v20 = vpop.f32.mrf.mxu2  ;;  %v1197_v57 = vadd.f32 %v4186_v43, %v924_v63  ;;  %v1546_v43 = vadd.f32 %v4196_v17, %v4328_v19 }
 0x252   : > { %v2615_v52 = vsel %vm372_vm1, %v2571_v8, 0.0  ;;  %v2177_v4 = vadd.f32 %v2176_v20, %v1976_v62  ;;  %v2381_v53 = vpop.f32.mrf.mxu3  ;;  %v1744_v28 = vpop.f32.mrf.mxu0 }
 0x253   : > { %v2616_v54 = vadd.f32 %v2615_v52, %v2614_v18  ;;  %v1982_v27 = vpop.f32.mrf.mxu1  ;;  %v1802_v38 = vadd.f32 %v1744_v28, %v1543_v11 }
 0x254   : > { %v2440_v42 = vadd.f32 %v2378_v15, %v2177_v4 }
 0x255   : > { %v1834_v3 = vadd.f32 %v1802_v38, %v1197_v57 }
 0x256   : > { %v2470_v50 = vadd.f32 %v2440_v42, %v4604_v7 }
 0x258   : > { %v2515_v10 = vsel %vm372_vm1, %v2470_v50, 0.0  ;;  %v2572_v61 = vmul.f32 %v2470_v50, %v2470_v50  ;;  %2674 = vst.msk [vmem:[%s4419_s25 + $0x70] sm:$0xff] %vm372_vm1, %v2470_v50 }
 0x259   : > { %v2516_v34 = vadd.f32 %v2515_v10, %v2514_v16  ;;  %v2179_v58 = vpop.f32.mrf.mxu2 }
 0x25a   : > { %v2617_v48 = vsel %vm372_vm1, %v2572_v61, 0.0  ;;  %v2180_v41 = vadd.f32 %v2179_v58, %v1979_v21  ;;  %v2384_v62 = vpop.f32.mrf.mxu3  ;;  %v1747_v32 = vpop.f32.mrf.mxu0 }
 0x25b   : > { %v2618_v1 = vadd.f32 %v2617_v48, %v2616_v54  ;;  %v1985_v56 = vpop.f32.mrf.mxu1  ;;  %v1803_v37 = vadd.f32 %v1747_v32, %v1546_v43 }
 0x25c   : > { %v2441_v7 = vadd.f32 %v2381_v53, %v2180_v41 }
 0x25d   : > { %v1835_v44 = vadd.f32 %v1803_v37, %v1198_v40  ;;  %v5045_v37 = vld [vmem:[#allocation96_spill] sm:$0xff] }
 0x25e   : > { %v2471_v6 = vadd.f32 %v2441_v7, %v1831_v29  ;;  %v5040_v29 = vld [vmem:[#allocation21_spill] sm:$0xff] }
 0x25f   : > { %v930_v2 = vadd.f32 %v4198_v9, %v5040_v29 }
 0x260   : > { %v2517_v31 = vsel %vm372_vm1, %v2471_v6, 0.0  ;;  %v2573_v51 = vmul.f32 %v2471_v6, %v2471_v6  ;;  %2675 = vst.msk [vmem:[%s4419_s25 + $0x78] sm:$0xff] %vm372_vm1, %v2471_v6 }
 0x261   : > { %v2518_v55 = vadd.f32 %v2517_v31, %v2516_v34  ;;  %v2182_v18 = vpop.f32.mrf.mxu2  ;;  %v1199_v8 = vadd.f32 %v4218_v26, %v930_v2  ;;  %v1552_v26 = vadd.f32 %v4228_v33, %v4360_v49 }
 0x262   : > { %v2619_v60 = vsel %vm372_vm1, %v2573_v51, 0.0  ;;  %v2183_v5 = vadd.f32 %v2182_v18, %v1982_v27  ;;  %v2387_v12 = vpop.f32.mrf.mxu3  ;;  %v1750_v21 = vpop.f32.mrf.mxu0  ;;  %v5046_v18 = vld [vmem:[#allocation17_spill] sm:$0xff] }
 0x263   : > { %v2620_v17 = vadd.f32 %v2619_v60, %v2618_v1  ;;  %v1988_v39 = vpop.f32.mrf.mxu1  ;;  %v1804_v20 = vadd.f32 %v1750_v21, %v1549_v14  ;;  %v5047_v60 = vld [vmem:[#allocation98_spill] sm:$0xff]  ;;  %v5048_v14 = vld [vmem:[#allocation100_spill] sm:$0xff] }
 0x264   : > { %v2442_v19 = vadd.f32 %v2384_v62, %v2183_v5  ;;  %v1558_v5 = vadd.f32 %v5047_v60, %v5046_v18  ;;  %v5059_v18 = vld [vmem:[#allocation19_spill] sm:$0xff]  ;;  %v5060_v60 = vld [vmem:[#allocation105_spill] sm:$0xff] }
 0x265   : > { %v1836_v42 = vadd.f32 %v1804_v20, %v1199_v8 }
 0x266   : > { %v2472_v15 = vadd.f32 %v2442_v19, %v1832_v30  ;;  %v5041_v30 = vld [vmem:[#allocation24_spill] sm:$0xff] }
 0x267   : > { %v933_v22 = vadd.f32 %v4214_v23, %v5041_v30  ;;  %v5052_v30 = vld [vmem:[#allocation101_spill] sm:$0xff] }
 0x268   : > { %v2519_v13 = vsel %vm372_vm1, %v2472_v15, 0.0  ;;  %v2574_v16 = vmul.f32 %v2472_v15, %v2472_v15  ;;  %2676 = vst.msk [vmem:[%s4419_s25 + $0x80] sm:$0xff] %vm372_vm1, %v2472_v15 }
 0x269   : > { %v2520_v52 = vadd.f32 %v2519_v13, %v2518_v55  ;;  %v2185_v4 = vpop.f32.mrf.mxu2  ;;  %v1200_v28 = vadd.f32 %v4234_v35, %v933_v22  ;;  %v1555_v35 = vadd.f32 %v4244_v36, %v4376_v25 }
 0x26a   : > { %v2621_v9 = vsel %vm372_vm1, %v2574_v16, 0.0  ;;  %v2186_v54 = vadd.f32 %v2185_v4, %v1985_v56  ;;  %v2390_v11 = vpop.f32.mrf.mxu3  ;;  %v1753_v50 = vpop.f32.mrf.mxu0 }
 0x26b   : > { %v2622_v24 = vadd.f32 %v2621_v9, %v2620_v17  ;;  %v1991_v53 = vpop.f32.mrf.mxu1  ;;  %v1805_v10 = vadd.f32 %v1753_v50, %v1552_v26  ;;  %v5049_v9 = vld [vmem:[#allocation36_spill] sm:$0xff] }
 0x26c   : > { %v2443_v0 = vadd.f32 %v2387_v12, %v2186_v54  ;;  %v5050_v54 = vld [vmem:[#allocation99_spill] sm:$0xff] }
 0x26d   : > { %v1837_v58 = vadd.f32 %v1805_v10, %v1200_v28 }
 0x26e   : > { %v2473_v63 = vadd.f32 %v2443_v0, %v1833_v59  ;;  %v5042_v59 = vld [vmem:[#allocation27_spill] sm:$0xff]  ;;  %v5051_v0 = vld [vmem:[#allocation20_spill] sm:$0xff] }
 0x26f   : > { %v936_v48 = vadd.f32 %v4230_v45, %v5042_v59  ;;  %v1561_v22 = vadd.f32 %v5052_v30, %v5051_v0  ;;  %v5054_v59 = vld [vmem:[#allocation16_spill] sm:$0xff]  ;;  %v5064_v0 = vld [vmem:[#allocation22_spill] sm:$0xff] }
 0x270   : > { %v2521_v27 = vsel %vm372_vm1, %v2473_v63, 0.0  ;;  %v2575_v57 = vmul.f32 %v2473_v63, %v2473_v63  ;;  %2677 = vst.msk [vmem:[%s4419_s25 + $0x88] sm:$0xff] %vm372_vm1, %v2473_v63  ;;  %v5065_v30 = vld [vmem:[#allocation108_spill] sm:$0xff] }
 0x271   : > { %v2522_v61 = vadd.f32 %v2521_v27, %v2520_v52  ;;  %v2188_v38 = vpop.f32.mrf.mxu2  ;;  %v1201_v43 = vadd.f32 %v5043_v46, %v936_v48  ;;  %v5055_v48 = vld [vmem:[#allocation102_spill] sm:$0xff] }
 0x272   : > { %v2623_v23 = vsel %vm372_vm1, %v2575_v57, 0.0  ;;  %v2189_v34 = vadd.f32 %v2188_v38, %v1988_v39  ;;  %v1756_v7 = vpop.f32.mrf.mxu0 }
 0x273   : > { %v2624_v33 = vadd.f32 %v2623_v23, %v2622_v24  ;;  %v1994_v47 = vpop.f32.mrf.mxu1  ;;  %v1806_v32 = vadd.f32 %v1756_v7, %v1555_v35  ;;  %v942_v24 = vadd.f32 %v5050_v54, %v5049_v9  ;;  %v945_v35 = vadd.f32 %v5055_v48, %v5054_v59 }
 0x274   : > { %v2444_v49 = vadd.f32 %v2390_v11, %v2189_v34  ;;  %v2393_v1 = vpop.f32.mrf.mxu3 }
 0x275   : > { %v1838_v51 = vadd.f32 %v1806_v32, %v1201_v43 }
 0x276   : > { %v2474_v41 = vadd.f32 %v2444_v49, %v1834_v3  ;;  %v5044_v3 = vld [vmem:[#allocation31_spill] sm:$0xff] }
 0x277   : > { %v939_v55 = vadd.f32 %v5045_v37, %v5044_v3 }
 0x278   : > { %v2523_v6 = vsel %vm372_vm1, %v2474_v41, 0.0  ;;  %v2576_v62 = vmul.f32 %v2474_v41, %v2474_v41  ;;  %2678 = vst.msk [vmem:[%s4419_s25 + $0x90] sm:$0xff] %vm372_vm1, %v2474_v41  ;;  %v5056_v41 = vld [vmem:[#allocation23_spill] sm:$0xff] }
 0x279   : > { %v2524_v56 = vadd.f32 %v2523_v6, %v2522_v61  ;;  %v2191_v40 = vpop.f32.mrf.mxu2  ;;  %v1202_v15 = vadd.f32 %v5048_v14, %v939_v55 }
 0x27a   : > { %v2625_v45 = vsel %vm372_vm1, %v2576_v62, 0.0  ;;  %v2192_v31 = vadd.f32 %v2191_v40, %v1991_v53  ;;  %v1759_v29 = vpop.f32.mrf.mxu0  ;;  %v5053_v53 = vld [vmem:[#allocation103_spill] sm:$0xff]  ;;  %v5058_v62 = vld [vmem:[#allocation106_spill] sm:$0xff] }
 0x27b   : > { %v2626_v36 = vadd.f32 %v2625_v45, %v2624_v33  ;;  %v1997_v2 = vpop.f32.mrf.mxu1  ;;  %v1807_v39 = vadd.f32 %v1759_v29, %v1558_v5  ;;  %v1203_v28 = vadd.f32 %v5053_v53, %v942_v24  ;;  %v1204_v32 = vadd.f32 %v5058_v62, %v945_v35 }
 0x27c   : > { %v2445_v25 = vadd.f32 %v2393_v1, %v2192_v31  ;;  %v2396_v19 = vpop.f32.mrf.mxu3  ;;  %v5057_v1 = vld [vmem:[#allocation104_spill] sm:$0xff]  ;;  %v948_v5 = vadd.f32 %v5060_v60, %v5059_v18 }
 0x27d   : > { %v1839_v52 = vadd.f32 %v1807_v39, %v1202_v15  ;;  %v1564_v7 = vadd.f32 %v5057_v1, %v5056_v41  ;;  %v5069_v41 = vld [vmem:[#allocation25_spill] sm:$0xff]  ;;  %v5070_v1 = vld [vmem:[#allocation110_spill] sm:$0xff] }
 0x27e   : > { %v2475_v17 = vadd.f32 %v2445_v25, %v1835_v44 }
 0x280   : > { %v2525_v12 = vsel %vm372_vm1, %v2475_v17, 0.0  ;;  %v2577_v21 = vmul.f32 %v2475_v17, %v2475_v17  ;;  %2679 = vst.msk [vmem:[%s4419_s25 + $0x98] sm:$0xff] %vm372_vm1, %v2475_v17  ;;  %v5061_v17 = vld [vmem:[#allocation26_spill] sm:$0xff] }
 0x281   : > { %v2526_v8 = vadd.f32 %v2525_v12, %v2524_v56  ;;  %v2194_v13 = vpop.f32.mrf.mxu2 }
 0x282   : > { %v2627_v16 = vsel %vm372_vm1, %v2577_v21, 0.0  ;;  %v2195_v20 = vadd.f32 %v2194_v13, %v1994_v47  ;;  %v1762_v11 = vpop.f32.mrf.mxu0  ;;  %v5063_v21 = vld [vmem:[#allocation109_spill] sm:$0xff] }
 0x283   : > { %v2628_v4 = vadd.f32 %v2627_v16, %v2626_v36  ;;  %v2000_v50 = vpop.f32.mrf.mxu1  ;;  %v1808_v10 = vadd.f32 %v1762_v11, %v1561_v22  ;;  %v1205_v39 = vadd.f32 %v5063_v21, %v948_v5  ;;  %v951_v22 = vadd.f32 %v5065_v30, %v5064_v0 }
 0x284   : > { %v2446_v44 = vadd.f32 %v2396_v19, %v2195_v20  ;;  %v2399_v63 = vpop.f32.mrf.mxu3  ;;  %v5062_v19 = vld [vmem:[#allocation107_spill] sm:$0xff] }
 0x285   : > { %v1840_v33 = vadd.f32 %v1808_v10, %v1203_v28  ;;  %v1567_v29 = vadd.f32 %v5062_v19, %v5061_v17  ;;  %v5074_v17 = vld [vmem:[#allocation29_spill] sm:$0xff]  ;;  %v5075_v19 = vld [vmem:[#allocation32_spill] sm:$0xff] }
 0x286   : > { %v2476_v26 = vadd.f32 %v2446_v44, %v1836_v42 }
 0x288   : > { %v2527_v27 = vsel %vm372_vm1, %v2476_v26, 0.0  ;;  %v2578_v57 = vmul.f32 %v2476_v26, %v2476_v26  ;;  %2680 = vst.msk [vmem:[%s4419_s25 + $0xa0] sm:$0xff] %vm372_vm1, %v2476_v26  ;;  %v5066_v26 = vld [vmem:[#allocation30_spill] sm:$0xff] }
 0x289   : > { %v2528_v61 = vadd.f32 %v2527_v27, %v2526_v8  ;;  %v2197_v38 = vpop.f32.mrf.mxu2 }
 0x28a   : > { %v2629_v23 = vsel %vm372_vm1, %v2578_v57, 0.0  ;;  %v2198_v34 = vadd.f32 %v2197_v38, %v1997_v2  ;;  %v1765_v43 = vpop.f32.mrf.mxu0  ;;  %v5068_v57 = vld [vmem:[#allocation111_spill] sm:$0xff] }
 0x28b   : > { %v2630_v49 = vadd.f32 %v2629_v23, %v2628_v4  ;;  %v2003_v6 = vpop.f32.mrf.mxu1  ;;  %v1809_v45 = vadd.f32 %v1765_v43, %v1564_v7  ;;  %v1206_v10 = vadd.f32 %v5068_v57, %v951_v22  ;;  %v954_v7 = vadd.f32 %v5070_v1, %v5069_v41 }
 0x28c   : > { %v2447_v42 = vadd.f32 %v2399_v63, %v2198_v34  ;;  %v2402_v46 = vpop.f32.mrf.mxu3  ;;  %v5067_v63 = vld [vmem:[#allocation28_spill] sm:$0xff] }
 0x28d   : > { %v1841_v37 = vadd.f32 %v1809_v45, %v1204_v32  ;;  %v1570_v11 = vadd.f32 %v5067_v63, %v5066_v26  ;;  %v5079_v26 = vld [vmem:[#allocation34_spill] sm:$0xff]  ;;  %v5080_v63 = vld [vmem:[#allocation37_spill] sm:$0xff] }
 0x28e   : > { %v2477_v47 = vadd.f32 %v2447_v42, %v1837_v58 }
 0x290   : > { %v2529_v56 = vsel %vm372_vm1, %v2477_v47, 0.0  ;;  %v2579_v40 = vmul.f32 %v2477_v47, %v2477_v47  ;;  %2681 = vst.msk [vmem:[%s4419_s25 + $0xa8] sm:$0xff] %vm372_vm1, %v2477_v47  ;;  %v5071_v47 = vld [vmem:[#allocation35_spill] sm:$0xff] }
 0x291   : > { %v2530_v31 = vadd.f32 %v2529_v56, %v2528_v61  ;;  %v2200_v36 = vpop.f32.mrf.mxu2  ;;  %v5073_v56 = vld [vmem:[#allocation112_spill] sm:$0xff] }
 0x292   : > { %v2631_v25 = vsel %vm372_vm1, %v2579_v40, 0.0  ;;  %v2201_v3 = vadd.f32 %v2200_v36, %v2000_v50  ;;  %v1768_v15 = vpop.f32.mrf.mxu0  ;;  %v1207_v40 = vadd.f32 %v5073_v56, %v954_v7 }
 0x293   : > { %v2632_v55 = vadd.f32 %v2631_v25, %v2630_v49  ;;  %v2006_v12 = vpop.f32.mrf.mxu1  ;;  %v1810_v16 = vadd.f32 %v1768_v15, %v1567_v29  ;;  %v957_v29 = vadd.f32 %v5075_v19, %v5074_v17 }
 0x294   : > { %v2448_v58 = vadd.f32 %v2402_v46, %v2201_v3  ;;  %v2405_v14 = vpop.f32.mrf.mxu3  ;;  %v5072_v46 = vld [vmem:[#allocation33_spill] sm:$0xff] }
 0x295   : > { %v1842_v54 = vadd.f32 %v1810_v16, %v1205_v39  ;;  %v1573_v43 = vadd.f32 %v5072_v46, %v5071_v47  ;;  %v5084_v47 = vld [vmem:[#allocation39_spill] sm:$0xff]  ;;  %v5085_v46 = vld [vmem:[#allocation41_spill] sm:$0xff] }
 0x296   : > { %v2478_v2 = vadd.f32 %v2448_v58, %v1838_v51 }
 0x298   : > { %v2531_v8 = vsel %vm372_vm1, %v2478_v2, 0.0  ;;  %v2580_v13 = vmul.f32 %v2478_v2, %v2478_v2  ;;  %2682 = vst.msk [vmem:[%s4419_s25 + $0xb0] sm:$0xff] %vm372_vm1, %v2478_v2  ;;  %v5076_v2 = vld [vmem:[#allocation40_spill] sm:$0xff] }
 0x299   : > { %v2532_v20 = vadd.f32 %v2531_v8, %v2530_v31  ;;  %v2203_v4 = vpop.f32.mrf.mxu2  ;;  %v5078_v8 = vld [vmem:[#allocation113_spill] sm:$0xff] }
 0x29a   : > { %v2633_v44 = vsel %vm372_vm1, %v2580_v13, 0.0  ;;  %v2204_v9 = vadd.f32 %v2203_v4, %v2003_v6  ;;  %v1771_v28 = vpop.f32.mrf.mxu0  ;;  %v1208_v13 = vadd.f32 %v5078_v8, %v957_v29 }
 0x29b   : > { %v2634_v24 = vadd.f32 %v2633_v44, %v2632_v55  ;;  %v2009_v27 = vpop.f32.mrf.mxu1  ;;  %v1811_v23 = vadd.f32 %v1771_v28, %v1570_v11  ;;  %v960_v11 = vadd.f32 %v5080_v63, %v5079_v26 }
 0x29c   : > { %v2449_v51 = vadd.f32 %v2405_v14, %v2204_v9  ;;  %v2408_v53 = vpop.f32.mrf.mxu3  ;;  %v5077_v14 = vld [vmem:[#allocation38_spill] sm:$0xff] }
 0x29d   : > { %v1843_v48 = vadd.f32 %v1811_v23, %v1206_v10  ;;  %v1576_v15 = vadd.f32 %v5077_v14, %v5076_v2 }
 0x29e   : > { %v2479_v50 = vadd.f32 %v2449_v51, %v1839_v52 }
 0x2a0   : > { %v2533_v61 = vsel %vm372_vm1, %v2479_v50, 0.0  ;;  %v2581_v38 = vmul.f32 %v2479_v50, %v2479_v50  ;;  %2683 = vst.msk [vmem:[%s4419_s25 + $0xb8] sm:$0xff] %vm372_vm1, %v2479_v50  ;;  %v5081_v50 = vld [vmem:[#allocation43_spill] sm:$0xff] }
 0x2a1   : > { %v2534_v34 = vadd.f32 %v2533_v61, %v2532_v20  ;;  %v2206_v49 = vpop.f32.mrf.mxu2  ;;  %v5083_v61 = vld [vmem:[#allocation114_spill] sm:$0xff] }
 0x2a2   : > { %v2635_v42 = vsel %vm372_vm1, %v2581_v38, 0.0  ;;  %v2207_v59 = vadd.f32 %v2206_v49, %v2006_v12  ;;  %v1774_v32 = vpop.f32.mrf.mxu0  ;;  %v1209_v38 = vadd.f32 %v5083_v61, %v960_v11 }
 0x2a3   : > { %v2636_v35 = vadd.f32 %v2635_v42, %v2634_v24  ;;  %v1812_v36 = vadd.f32 %v1774_v32, %v1573_v43  ;;  %v2012_v55 = vpop.f32.mrf.mxu1  ;;  %v963_v43 = vadd.f32 %v5085_v46, %v5084_v47 }
 0x2a4   : > { %v2450_v52 = vadd.f32 %v2408_v53, %v2207_v59  ;;  %v2411_v62 = vpop.f32.mrf.mxu3  ;;  %v5082_v53 = vld [vmem:[#allocation42_spill] sm:$0xff] }
 0x2a5   : > { %v1844_v60 = vadd.f32 %v1812_v36, %v1207_v40  ;;  %v1579_v28 = vadd.f32 %v5082_v53, %v5081_v50 }
 0x2a6   : > { %v2480_v6 = vadd.f32 %v2450_v52, %v1840_v33 }
 0x2a8   : > { %v2535_v45 = vsel %vm372_vm1, %v2480_v6, 0.0  ;;  %v2582_v31 = vmul.f32 %v2480_v6, %v2480_v6  ;;  %2684 = vst.msk [vmem:[%s4419_s25 + $0xc0] sm:$0xff] %vm372_vm1, %v2480_v6  ;;  %v5086_v6 = vld [vmem:[#allocation47_spill] sm:$0xff] }
 0x2a9   : > { %v2536_v25 = vadd.f32 %v2535_v45, %v2534_v34  ;;  %v2209_v3 = vpop.f32.mrf.mxu2 }
 0x2aa   : > { %v2637_v58 = vsel %vm372_vm1, %v2582_v31, 0.0  ;;  %v2210_v18 = vadd.f32 %v2209_v3, %v2009_v27  ;;  %v1777_v39 = vpop.f32.mrf.mxu0  ;;  %v5088_v31 = vld [vmem:[#allocation51_spill] sm:$0xff] }
 0x2ab   : > { %v2638_v5 = vadd.f32 %v2637_v58, %v2636_v35  ;;  %v1813_v4 = vadd.f32 %v1777_v39, %v1576_v15  ;;  %v1210_v36 = vadd.f32 %v5088_v31, %v963_v43 }
 0x2ac   : > { %v2451_v33 = vadd.f32 %v2411_v62, %v2210_v18  ;;  %v2414_v21 = vpop.f32.mrf.mxu3  ;;  %v2015_v22 = vpop.f32.mrf.mxu1  ;;  %v5087_v62 = vld [vmem:[#allocation46_spill] sm:$0xff] }
 0x2ad   : > { %v1845_v0 = vadd.f32 %v1813_v4, %v1208_v13  ;;  %v1582_v32 = vadd.f32 %v5087_v62, %v5086_v6 }
 0x2ae   : > { %v2481_v12 = vadd.f32 %v2451_v33, %v1841_v37 }
 0x2b0   : > { %v2537_v16 = vsel %vm372_vm1, %v2481_v12, 0.0  ;;  %v2583_v20 = vmul.f32 %v2481_v12, %v2481_v12  ;;  %2685 = vst.msk [vmem:[%s4419_s25 + $0xc8] sm:$0xff] %vm372_vm1, %v2481_v12 }
 0x2b1   : > { %v2538_v44 = vadd.f32 %v2537_v16, %v2536_v25  ;;  %v2212_v9 = vpop.f32.mrf.mxu2 }
 0x2b2   : > { %v2639_v24 = vsel %vm372_vm1, %v2583_v20, 0.0  ;;  %v2213_v51 = vadd.f32 %v2212_v9, %v2012_v55  ;;  %v1780_v10 = vpop.f32.mrf.mxu0 }
 0x2b3   : > { %v2640_v30 = vadd.f32 %v2639_v24, %v2638_v5  ;;  %v1814_v49 = vadd.f32 %v1780_v10, %v1579_v28 }
 0x2b4   : > { %v2452_v37 = vadd.f32 %v2414_v21, %v2213_v51  ;;  %v2417_v57 = vpop.f32.mrf.mxu3  ;;  %v2018_v7 = vpop.f32.mrf.mxu1 }
 0x2b5   : > { %v1846_v41 = vadd.f32 %v1814_v49, %v1209_v38 }
 0x2b6   : > { %v2482_v27 = vadd.f32 %v2452_v37, %v1842_v54 }
 0x2b7   : > { %2690 = vst.msk [vmem:[%s4419_s25 + $0xf0] sm:$0xff] %vm372_vm1, %v1846_v41  ;;  %v2547_v51 = vsel %vm372_vm1, %v1846_v41, 0.0 }
 0x2b8   : > { %v2539_v23 = vsel %vm372_vm1, %v2482_v27, 0.0  ;;  %v2584_v34 = vmul.f32 %v2482_v27, %v2482_v27  ;;  %2686 = vst.msk [vmem:[%s4419_s25 + $0xd0] sm:$0xff] %vm372_vm1, %v2482_v27 }
 0x2b9   : > { %v2540_v42 = vadd.f32 %v2539_v23, %v2538_v44  ;;  %v2215_v59 = vpop.f32.mrf.mxu2  ;;  %v2588_v44 = vmul.f32 %v1846_v41, %v1846_v41 }
 0x2ba   : > { %v2641_v35 = vsel %vm372_vm1, %v2584_v34, 0.0  ;;  %v2216_v52 = vadd.f32 %v2215_v59, %v2015_v22  ;;  %v1783_v40 = vpop.f32.mrf.mxu0 }
 0x2bb   : > { %v2642_v1 = vadd.f32 %v2641_v35, %v2640_v30  ;;  %v1815_v55 = vadd.f32 %v1783_v40, %v1582_v32  ;;  %v2649_v63 = vsel %vm372_vm1, %v2588_v44, 0.0 }
 0x2bc   : > { %v2453_v54 = vadd.f32 %v2417_v57, %v2216_v52  ;;  %v2420_v45 = vpop.f32.mrf.mxu3  ;;  %v2021_v2 = vpop.f32.mrf.mxu1 }
 0x2bd   : > { %v1847_v17 = vadd.f32 %v1815_v55, %v1210_v36 }
 0x2be   : > { %v2483_v56 = vadd.f32 %v2453_v54, %v1843_v48 }
 0x2bf   : > { %2691 = vst.msk [vmem:[%s4419_s25 + $0xf8] sm:$0xff] %vm372_vm1, %v1847_v17  ;;  %v2589_v30 = vmul.f32 %v1847_v17, %v1847_v17  ;;  %v2549_v11 = vsel %vm372_vm1, %v1847_v17, 0.0 }
 0x2c0   : > { %v2541_v25 = vsel %vm372_vm1, %v2483_v56, 0.0  ;;  %v2585_v3 = vmul.f32 %v2483_v56, %v2483_v56  ;;  %2687 = vst.msk [vmem:[%s4419_s25 + $0xd8] sm:$0xff] %vm372_vm1, %v2483_v56 }
 0x2c1   : > { %v2542_v58 = vadd.f32 %v2541_v25, %v2540_v42  ;;  %v2218_v18 = vpop.f32.mrf.mxu2  ;;  %v2651_v53 = vsel %vm372_vm1, %v2589_v30, 0.0 }
 0x2c2   : > { %v2643_v5 = vsel %vm372_vm1, %v2585_v3, 0.0  ;;  %v2219_v33 = vadd.f32 %v2218_v18, %v2018_v7 }
 0x2c3   : > { %v2644_v19 = vadd.f32 %v2643_v5, %v2642_v1 }
 0x2c4   : > { %v2454_v48 = vadd.f32 %v2420_v45, %v2219_v33  ;;  %v2423_v39 = vpop.f32.mrf.mxu3 }
 0x2c6   : > { %v2484_v29 = vadd.f32 %v2454_v48, %v1844_v60 }
 0x2c8   : > { %v2543_v14 = vsel %vm372_vm1, %v2484_v29, 0.0  ;;  %v2586_v15 = vmul.f32 %v2484_v29, %v2484_v29  ;;  %2688 = vst.msk [vmem:[%s4419_s25 + $0xe0] sm:$0xff] %vm372_vm1, %v2484_v29 }
 0x2c9   : > { %v2544_v12 = vadd.f32 %v2543_v14, %v2542_v58  ;;  %v2221_v21 = vpop.f32.mrf.mxu2 }
 0x2ca   : > { %v2645_v8 = vsel %vm372_vm1, %v2586_v15, 0.0  ;;  %v2222_v13 = vadd.f32 %v2221_v21, %v2021_v2 }
 0x2cb   : > { %v2646_v16 = vadd.f32 %v2645_v8, %v2644_v19 }
 0x2cc   : > { %v2455_v20 = vadd.f32 %v2423_v39, %v2222_v13 }
 0x2ce   : > { %v2485_v4 = vadd.f32 %v2455_v20, %v1845_v0 }
 0x2d0   : > { %v2545_v9 = vsel %vm372_vm1, %v2485_v4, 0.0  ;;  %v2587_v60 = vmul.f32 %v2485_v4, %v2485_v4  ;;  %2689 = vst.msk [vmem:[%s4419_s25 + $0xe8] sm:$0xff] %vm372_vm1, %v2485_v4 }
 0x2d1   : > { %v2546_v24 = vadd.f32 %v2545_v9, %v2544_v12 }
 0x2d2   : > { %v2647_v22 = vsel %vm372_vm1, %v2587_v60, 0.0 }
 0x2d3   : > { %v2548_v37 = vadd.f32 %v2547_v51, %v2546_v24  ;;  %v2648_v26 = vadd.f32 %v2647_v22, %v2646_v16 }
 0x2d5   : > { %v2550_v0 = vadd.f32 %v2549_v11, %v2548_v37  ;;  %v2650_v50 = vadd.f32 %v2649_v63, %v2648_v26 }
 0x2d7   : > { %v2551_v28 = vrot.slane %v2550_v0, 4  ;;  %v2652_v27 = vadd.f32 %v2651_v53, %v2650_v50 }
 0x2d9   : > { %v2552_v57 = vadd.f32 %v2551_v28, %v2550_v0  ;;  %v2653_v10 = vrot.slane %v2652_v27, 4 }
 0x2db   : > { %v2553_v61 = vrot.slane %v2552_v57, 2  ;;  %v2654_v38 = vadd.f32 %v2653_v10, %v2652_v27 }
 0x2dd   : > { %v2554_v23 = vadd.f32 %v2553_v61, %v2552_v57  ;;  %v2655_v34 = vrot.slane %v2654_v38, 2 }
 0x2df   : > { %v2555_v49 = vrot.slane %v2554_v23, 1  ;;  %v2656_v42 = vadd.f32 %v2655_v34, %v2654_v38 }
 0x2e1   : > { %v2556_v59 = vadd.f32 %v2555_v49, %v2554_v23  ;;  %v2657_v35 = vrot.slane %v2656_v42, 1 }
 0x2e3   : > { %2557 = vst.msk [vmem:[%s235_s29] sm:$0x1] %vm406_vm4, %v2556_v59  ;;  %v2658_v52 = vadd.f32 %v2657_v35, %v2656_v42 }
 0x2e5   : > { %2659 = vst.msk [vmem:[%s235_s29 + $0x1] sm:$0x1] %vm406_vm4, %v2658_v52 }
 0x2e6 PF: > { %s16_s18 = sadd.s32 1, %s3105_s18  }
 0x2e7   : > { %p13_p4 = scmp.ge.s32.totalorder %s16_s18, 4  }
 0x2e9   :  { %15 = sbr.rel (!%p13_p4) target bundleno = 1 (0x1), region = 88 }

</bundles_post_ra>
